<compile_context>
chip_gen: v6e
topology: v6e:2x2x1
jax: 0.10.0
libtpu: 0.0.40
codegen_flags: <defaults>
</compile_context>

<pallas_src>
import math

import numpy as np
import jax
import jax.numpy as jnp
from jax.experimental import pallas as pl
from jax.experimental.pallas import tpu as pltpu

Y_NUM = 4          # y_num of the instantiated ode_fn
LANE = 128         # TPU lane width
SUB_UNROLL = 4     # inner Euler-substep unroll factor (power of two)
_SHIFT = SUB_UNROLL.bit_length() - 1
assert SUB_UNROLL & (SUB_UNROLL - 1) == 0
_MAX_STATIC_INTERVALS = 64   # Python-unroll the interval loop up to this size


def _make_kernel(n_int):
    """One kernel per trajectory length: n_int intervals, schedule in SMEM."""
    unroll_intervals = n_int <= _MAX_STATIC_INTERVALS

    def kernel(t0_ref, h_ref, n_ref, A_ref, b_ref, y0_ref, out_ref):
        f32 = jnp.float32
        # ---- hoisted loop invariants (stay resident in vregs) --------------
        A = [[jnp.full((1, LANE), A_ref[Y_NUM * j + k], f32)
              for k in range(Y_NUM)] for j in range(Y_NUM)]
        b = [jnp.full((1, LANE), b_ref[j], f32) for j in range(Y_NUM)]
        zeros = jnp.zeros((1, LANE), f32)
        lane = jax.lax.broadcasted_iota(jnp.int32, (1, LANE), 1)
        lane_mask = [lane == j for j in range(Y_NUM)]

        def pack(ys):
            # components -> lanes 0..Y_NUM-1 of one lane-dense (1, LANE) row
            row = zeros
            for j in range(Y_NUM):
                row = jnp.where(lane_mask[j], ys[j], row)
            return row

        def substep(carry, h_step):
            y0v, y1v, y2v, y3v, t_vec = carry
            ys = (y0v, y1v, y2v, y3v)
            new = []
            for j in range(Y_NUM):
                # ode_fn: dy_j = sum_k A[j,k]*y_k + b_j*t  (4 independent chains)
                dy = A[j][0] * ys[0]
                for k in range(1, Y_NUM):
                    dy = dy + A[j][k] * ys[k]
                dy = dy + b[j] * t_vec
                # torch.clamp(dy, -1e5, 1e5); ode_next_euler: y <- y + h*dy
                dy = jnp.clip(dy, -100000.0, 100000.0)
                new.append(ys[j] + h_step * dy)
            return (new[0], new[1], new[2], new[3], t_vec + h_step)

        y_init = tuple(jnp.full((1, LANE), y0_ref[j], f32) for j in range(Y_NUM))
        out_ref[pl.ds(0, 1), :] = pack(y_init)            # row 0 = y0

        def interval_body(i, ys):
            n_i = jnp.maximum(n_ref[i], 0)
            h_i = h_ref[i]
            h_vec = jnp.full((1, LANE), h_i, f32)          # hoisted per interval
            t_vec = jnp.full((1, LANE), t0_ref[i], f32)    # scalar-exact t carry
            carry = (ys[0], ys[1], ys[2], ys[3], t_vec)

            # Hot loop: groups of SUB_UNROLL maskless substeps.
            n_full = jax.lax.shift_right_logical(n_i, _SHIFT)

            def group(_, c):
                for _u in range(SUB_UNROLL):
                    c = substep(c, h_vec)
                return c

            carry = jax.lax.fori_loop(0, n_full, group, carry)

            # Tail: at most SUB_UNROLL-1 substeps; h=0 makes a step an exact no-op.
            n_tail = n_i - n_full * SUB_UNROLL
            for u in range(SUB_UNROLL - 1):
                h_u = jnp.full((1, LANE),
                               jnp.where(n_tail > u, h_i, f32(0.0)), f32)
                carry = substep(carry, h_u)

            ys_new = (carry[0], carry[1], carry[2], carry[3])
            out_ref[pl.ds(i + 1, 1), :] = pack(ys_new)     # sublane-dense row store
            return ys_new

        if unroll_intervals:
            # Static row indices / SMEM indices (n_int is small).
            ys = y_init
            for i in range(n_int):
                ys = interval_body(i, ys)
        else:
            # Large trajectories: scf.for over intervals, dynamic row stores.
            jax.lax.fori_loop(0, n_int, interval_body, y_init)

    return kernel


def _concrete(x):
    try:
        return np.asarray(x)
    except Exception:       # traced value (e.g. under jit)
        return None


def neuroode_forward(t, y0, A_eff, b_eff, max_step):
    """t: (sample_num,) f32, y0: (Y_NUM,) f32 -> (sample_num, Y_NUM) f32."""
    n_samples = int(t.shape[0])
    y0 = jnp.asarray(y0, jnp.float32)
    if n_samples < 2:
        return y0[None, :]
    n_int = n_samples - 1

    # ---- per-interval schedule (t0, h, n_sub), passed through SMEM ---------
    t_np = _concrete(t)
    ms_np = _concrete(max_step)
    if t_np is not None and ms_np is not None:
        # Concrete t: math.ceil on the float64 quotient -- bit-exact with the
        # PyTorch control flow for the substep counts.
        t_f32 = t_np.astype(np.float32)
        diffs = np.diff(t_f32)
        max_step_f = float(ms_np)
        n_sub = np.array([math.ceil(float(d) / max_step_f) for d in diffs],
                         np.int32)
        h = (diffs / np.maximum(n_sub, 1).astype(np.float32)).astype(np.float32)
        t_start = t_f32[:-1]
    else:
        # Traced t.
        # TODO(synk): float32 ceil here can differ by one substep from the
        # reference's float64 math.ceil when dt/max_step is (nearly) integral.
        t_f = jnp.asarray(t, jnp.float32)
        diffs = jnp.diff(t_f)
        n_sub = jnp.ceil(diffs / max_step).astype(jnp.int32)
        h = diffs / jnp.maximum(n_sub, 1).astype(jnp.float32)
        t_start = t_f[:-1]

    A_flat = jnp.asarray(A_eff, jnp.float32).reshape(Y_NUM * Y_NUM)
    b_vec = jnp.asarray(b_eff, jnp.float32).reshape(Y_NUM)

    n_rows_pad = max(8, -(-n_samples // 8) * 8)          # sublane-aligned rows
    out_bytes = n_rows_pad * LANE * 4
    # TODO(synk): for trajectories whose output slab approaches v7x's 64 MiB
    # VMEM, chunk the interval axis over a grid with a carried-y VMEM scratch.
    vmem_limit = int(min(max(out_bytes + (2 << 20), 16 << 20), 64 << 20))

    smem = pl.BlockSpec(memory_space=pltpu.MemorySpace.SMEM)
    vmem = pl.BlockSpec(memory_space=pltpu.MemorySpace.VMEM)

    out = pl.pallas_call(
        _make_kernel(n_int),
        out_shape=jax.ShapeDtypeStruct((n_rows_pad, LANE), jnp.float32),
        in_specs=[smem, smem, smem, smem, smem, smem],
        out_specs=vmem,
        compiler_params=pltpu.CompilerParams(vmem_limit_bytes=vmem_limit),
    )(jnp.asarray(t_start, jnp.float32),
      jnp.asarray(h, jnp.float32),
      jnp.asarray(n_sub, jnp.int32),
      A_flat, b_vec, y0)
    # Row 0 already holds y0; single cheap slice, no concatenate / pad glue.
    return out[:n_samples, :Y_NUM]


def _reference_forward(t, y0, A, b, max_step):
    """Pure numpy mirror of the PyTorch forward() control flow."""
    t = np.asarray(t, np.float32)
    A = np.asarray(A, np.float32)
    b = np.asarray(b, np.float32)
    steps = np.diff(t)
    ts = t[:-1]
    yi = np.asarray(y0, np.float32)
    out = [yi.copy()]
    for no in range(ts.shape[0]):
        ti = np.float32(ts[no])
        step = np.float32(steps[no])
        step_n = math.ceil(float(step) / max_step)
        hh = np.float32(step / step_n)
        for _ in range(step_n):
            dy = (A @ yi + b * ti).astype(np.float32)
            dy = np.clip(dy, -100000.0, 100000.0).astype(np.float32)
            yi = (yi + hh * dy).astype(np.float32)
            ti = np.float32(ti + hh)
        out.append(yi.copy())
    return np.stack(out, axis=0)


if __name__ == "__main__":
    key = jax.random.PRNGKey(0)
    ka, kb, kw, ky = jax.random.split(key, 4)

    # `params` dict values -> weights_ratios (A entries + b entries).
    A_ratio = jax.random.uniform(ka, (Y_NUM, Y_NUM), minval=-0.2, maxval=0.2)
    b_ratio = jax.random.uniform(kb, (Y_NUM,), minval=-0.1, maxval=0.1)

    n_params = Y_NUM * Y_NUM + Y_NUM
    # TODO(synk): WeightsDistribution(a=0.1, b=10).rvs() scipy rejection
    # sampling replaced by a deterministic uniform draw in the same support.
    weights = 0.5 + jax.random.uniform(kw, (n_params,))  # in [0.5, 1.5]

    # get_params_tensors(): effective param = weight * ratio  (plain-JAX glue)
    A_eff = A_ratio * weights[:Y_NUM * Y_NUM].reshape(Y_NUM, Y_NUM)
    b_eff = b_ratio * weights[Y_NUM * Y_NUM:]

    y0 = jax.random.uniform(ky, (Y_NUM,), minval=0.5, maxval=1.5)
    t = jnp.linspace(0.0, 1.0, 8).astype(jnp.float32)   # sample_num = 8
    max_step = 0.05

    ref = _reference_forward(np.asarray(t), np.asarray(y0),
                             np.asarray(A_eff), np.asarray(b_eff), max_step)

    # Concrete-t path (host-computed schedule, SMEM-scheduled kernel).
    out = jax.block_until_ready(neuroode_forward(t, y0, A_eff, b_eff, max_step))
    assert out.shape == (t.shape[0], Y_NUM), out.shape
    np.testing.assert_allclose(np.asarray(out), ref, rtol=1e-4, atol=1e-4)

    # Traced-t path (schedule computed in-graph, same kernel).
    fwd_jit = jax.jit(neuroode_forward, static_argnums=(4,))
    out_dyn = jax.block_until_ready(fwd_jit(t, y0, A_eff, b_eff, max_step))
    np.testing.assert_allclose(np.asarray(out_dyn), ref, rtol=1e-4, atol=1e-4)

    print("KERNEL_OK")
</pallas_src>

<mosaic_0001>
module attributes {stable_mosaic.version = 11 : i64} {
  func.func @kernel(%arg0: memref<7xf32, #tpu.memory_space<smem>>, %arg1: memref<7xf32, #tpu.memory_space<smem>>, %arg2: memref<7xi32, #tpu.memory_space<smem>>, %arg3: memref<16xf32, #tpu.memory_space<smem>>, %arg4: memref<4xf32, #tpu.memory_space<smem>>, %arg5: memref<4xf32, #tpu.memory_space<smem>>, %arg6: memref<8x128xf32, #tpu.memory_space<vmem>>) attributes {dimension_semantics = [], scalar_prefetch = 0 : i64, scratch_operands = 0 : i64, tpu.core_type = #tpu.core_type<tc>} {
    %c0 = arith.constant 0 : index
    %0 = memref.load %arg3[%c0] : memref<16xf32, #tpu.memory_space<smem>>
    %1 = vector.broadcast %0 : f32 to vector<1x128xf32>
    %c1 = arith.constant 1 : index
    %2 = memref.load %arg3[%c1] : memref<16xf32, #tpu.memory_space<smem>>
    %3 = vector.broadcast %2 : f32 to vector<1x128xf32>
    %c2 = arith.constant 2 : index
    %4 = memref.load %arg3[%c2] : memref<16xf32, #tpu.memory_space<smem>>
    %5 = vector.broadcast %4 : f32 to vector<1x128xf32>
    %c3 = arith.constant 3 : index
    %6 = memref.load %arg3[%c3] : memref<16xf32, #tpu.memory_space<smem>>
    %7 = vector.broadcast %6 : f32 to vector<1x128xf32>
    %c4 = arith.constant 4 : index
    %8 = memref.load %arg3[%c4] : memref<16xf32, #tpu.memory_space<smem>>
    %9 = vector.broadcast %8 : f32 to vector<1x128xf32>
    %c5 = arith.constant 5 : index
    %10 = memref.load %arg3[%c5] : memref<16xf32, #tpu.memory_space<smem>>
    %11 = vector.broadcast %10 : f32 to vector<1x128xf32>
    %c6 = arith.constant 6 : index
    %12 = memref.load %arg3[%c6] : memref<16xf32, #tpu.memory_space<smem>>
    %13 = vector.broadcast %12 : f32 to vector<1x128xf32>
    %c7 = arith.constant 7 : index
    %14 = memref.load %arg3[%c7] : memref<16xf32, #tpu.memory_space<smem>>
    %15 = vector.broadcast %14 : f32 to vector<1x128xf32>
    %c8 = arith.constant 8 : index
    %16 = memref.load %arg3[%c8] : memref<16xf32, #tpu.memory_space<smem>>
    %17 = vector.broadcast %16 : f32 to vector<1x128xf32>
    %c9 = arith.constant 9 : index
    %18 = memref.load %arg3[%c9] : memref<16xf32, #tpu.memory_space<smem>>
    %19 = vector.broadcast %18 : f32 to vector<1x128xf32>
    %c10 = arith.constant 10 : index
    %20 = memref.load %arg3[%c10] : memref<16xf32, #tpu.memory_space<smem>>
    %21 = vector.broadcast %20 : f32 to vector<1x128xf32>
    %c11 = arith.constant 11 : index
    %22 = memref.load %arg3[%c11] : memref<16xf32, #tpu.memory_space<smem>>
    %23 = vector.broadcast %22 : f32 to vector<1x128xf32>
    %c12 = arith.constant 12 : index
    %24 = memref.load %arg3[%c12] : memref<16xf32, #tpu.memory_space<smem>>
    %25 = vector.broadcast %24 : f32 to vector<1x128xf32>
    %c13 = arith.constant 13 : index
    %26 = memref.load %arg3[%c13] : memref<16xf32, #tpu.memory_space<smem>>
    %27 = vector.broadcast %26 : f32 to vector<1x128xf32>
    %c14 = arith.constant 14 : index
    %28 = memref.load %arg3[%c14] : memref<16xf32, #tpu.memory_space<smem>>
    %29 = vector.broadcast %28 : f32 to vector<1x128xf32>
    %c15 = arith.constant 15 : index
    %30 = memref.load %arg3[%c15] : memref<16xf32, #tpu.memory_space<smem>>
    %31 = vector.broadcast %30 : f32 to vector<1x128xf32>
    %c0_0 = arith.constant 0 : index
    %32 = memref.load %arg4[%c0_0] : memref<4xf32, #tpu.memory_space<smem>>
    %33 = vector.broadcast %32 : f32 to vector<1x128xf32>
    %c1_1 = arith.constant 1 : index
    %34 = memref.load %arg4[%c1_1] : memref<4xf32, #tpu.memory_space<smem>>
    %35 = vector.broadcast %34 : f32 to vector<1x128xf32>
    %c2_2 = arith.constant 2 : index
    %36 = memref.load %arg4[%c2_2] : memref<4xf32, #tpu.memory_space<smem>>
    %37 = vector.broadcast %36 : f32 to vector<1x128xf32>
    %c3_3 = arith.constant 3 : index
    %38 = memref.load %arg4[%c3_3] : memref<4xf32, #tpu.memory_space<smem>>
    %39 = vector.broadcast %38 : f32 to vector<1x128xf32>
    %cst = arith.constant 0.000000e+00 : f32
    %40 = vector.broadcast %cst : f32 to vector<1x128xf32>
    %41 = tpu.iota {dimensions = array<i32: 1>} : vector<1x128xi32>
    %c0_i32 = arith.constant 0 : i32
    %42 = vector.broadcast %c0_i32 : i32 to vector<1x128xi32>
    %43 = arith.cmpi eq, %41, %42 : vector<1x128xi32>
    %c1_i32 = arith.constant 1 : i32
    %44 = vector.broadcast %c1_i32 : i32 to vector<1x128xi32>
    %45 = arith.cmpi eq, %41, %44 : vector<1x128xi32>
    %c2_i32 = arith.constant 2 : i32
    %46 = vector.broadcast %c2_i32 : i32 to vector<1x128xi32>
    %47 = arith.cmpi eq, %41, %46 : vector<1x128xi32>
    %c3_i32 = arith.constant 3 : i32
    %48 = vector.broadcast %c3_i32 : i32 to vector<1x128xi32>
    %49 = arith.cmpi eq, %41, %48 : vector<1x128xi32>
    %c0_4 = arith.constant 0 : index
    %50 = memref.load %arg5[%c0_4] : memref<4xf32, #tpu.memory_space<smem>>
    %51 = vector.broadcast %50 : f32 to vector<1x128xf32>
    %c1_5 = arith.constant 1 : index
    %52 = memref.load %arg5[%c1_5] : memref<4xf32, #tpu.memory_space<smem>>
    %53 = vector.broadcast %52 : f32 to vector<1x128xf32>
    %c2_6 = arith.constant 2 : index
    %54 = memref.load %arg5[%c2_6] : memref<4xf32, #tpu.memory_space<smem>>
    %55 = vector.broadcast %54 : f32 to vector<1x128xf32>
    %c3_7 = arith.constant 3 : index
    %56 = memref.load %arg5[%c3_7] : memref<4xf32, #tpu.memory_space<smem>>
    %57 = vector.broadcast %56 : f32 to vector<1x128xf32>
    %58 = arith.select %43, %51, %40 : vector<1x128xi1>, vector<1x128xf32>
    %59 = arith.select %45, %53, %58 : vector<1x128xi1>, vector<1x128xf32>
    %60 = arith.select %47, %55, %59 : vector<1x128xi1>, vector<1x128xf32>
    %61 = arith.select %49, %57, %60 : vector<1x128xi1>, vector<1x128xf32>
    %c0_8 = arith.constant 0 : index
    %c0_9 = arith.constant 0 : index
    %62 = vector.load %arg6[%c0_8, %c0_9] : memref<8x128xf32, #tpu.memory_space<vmem>>, vector<1x128xf32>
    tpu.vector_store %arg6[%c0_8, %c0_9], %61 {strides = array<i32>} : memref<8x128xf32, #tpu.memory_space<vmem>>, vector<1x128xf32>,
    %c0_10 = arith.constant 0 : index
    %63 = memref.load %arg2[%c0_10] : memref<7xi32, #tpu.memory_space<smem>>
    %c0_i32_11 = arith.constant 0 : i32
    %64 = arith.maxsi %63, %c0_i32_11 : i32
    %c0_12 = arith.constant 0 : index
    %65 = memref.load %arg1[%c0_12] : memref<7xf32, #tpu.memory_space<smem>>
    %66 = vector.broadcast %65 : f32 to vector<1x128xf32>
    %c0_13 = arith.constant 0 : index
    %67 = memref.load %arg0[%c0_13] : memref<7xf32, #tpu.memory_space<smem>>
    %68 = vector.broadcast %67 : f32 to vector<1x128xf32>
    %c2_i32_14 = arith.constant 2 : i32
    %69 = arith.shrui %64, %c2_i32_14 : i32
    %c0_i32_15 = arith.constant 0 : i32
    %70 = arith.subi %69, %c0_i32_15 : i32
    %71 = arith.addi %c0_i32_15, %70 : i32
    %c1_i32_16 = arith.constant 1 : i32
    %72:5 = scf.for %arg7 = %c0_i32_15 to %71 step %c1_i32_16 iter_args(%arg8 = %51, %arg9 = %53, %arg10 = %55, %arg11 = %57, %arg12 = %68) -> (vector<1x128xf32>, vector<1x128xf32>, vector<1x128xf32>, vector<1x128xf32>, vector<1x128xf32>)  : i32 {
      %1519 = arith.mulf %1, %arg8 : vector<1x128xf32>
      %1520 = arith.mulf %3, %arg9 : vector<1x128xf32>
      %1521 = arith.addf %1519, %1520 : vector<1x128xf32>
      %1522 = arith.mulf %5, %arg10 : vector<1x128xf32>
      %1523 = arith.addf %1521, %1522 : vector<1x128xf32>
      %1524 = arith.mulf %7, %arg11 : vector<1x128xf32>
      %1525 = arith.addf %1523, %1524 : vector<1x128xf32>
      %1526 = arith.mulf %33, %arg12 : vector<1x128xf32>
      %1527 = arith.addf %1525, %1526 : vector<1x128xf32>
      %cst_289 = arith.constant -1.000000e+05 : f32
      %cst_290 = arith.constant 1.000000e+05 : f32
      %1528 = vector.broadcast %cst_289 : f32 to vector<1x128xf32>
      %1529 = arith.maximumf %1528, %1527 : vector<1x128xf32>
      %1530 = vector.broadcast %cst_290 : f32 to vector<1x128xf32>
      %1531 = arith.minimumf %1530, %1529 : vector<1x128xf32>
      %1532 = arith.mulf %66, %1531 : vector<1x128xf32>
      %1533 = arith.addf %arg8, %1532 : vector<1x128xf32>
      %1534 = arith.mulf %9, %arg8 : vector<1x128xf32>
      %1535 = arith.mulf %11, %arg9 : vector<1x128xf32>
      %1536 = arith.addf %1534, %1535 : vector<1x128xf32>
      %1537 = arith.mulf %13, %arg10 : vector<1x128xf32>
      %1538 = arith.addf %1536, %1537 : vector<1x128xf32>
      %1539 = arith.mulf %15, %arg11 : vector<1x128xf32>
      %1540 = arith.addf %1538, %1539 : vector<1x128xf32>
      %1541 = arith.mulf %35, %arg12 : vector<1x128xf32>
      %1542 = arith.addf %1540, %1541 : vector<1x128xf32>
      %cst_291 = arith.constant -1.000000e+05 : f32
      %cst_292 = arith.constant 1.000000e+05 : f32
      %1543 = vector.broadcast %cst_291 : f32 to vector<1x128xf32>
      %1544 = arith.maximumf %1543, %1542 : vector<1x128xf32>
      %1545 = vector.broadcast %cst_292 : f32 to vector<1x128xf32>
      %1546 = arith.minimumf %1545, %1544 : vector<1x128xf32>
      %1547 = arith.mulf %66, %1546 : vector<1x128xf32>
      %1548 = arith.addf %arg9, %1547 : vector<1x128xf32>
      %1549 = arith.mulf %17, %arg8 : vector<1x128xf32>
      %1550 = arith.mulf %19, %arg9 : vector<1x128xf32>
      %1551 = arith.addf %1549, %1550 : vector<1x128xf32>
      %1552 = arith.mulf %21, %arg10 : vector<1x128xf32>
      %1553 = arith.addf %1551, %1552 : vector<1x128xf32>
      %1554 = arith.mulf %23, %arg11 : vector<1x128xf32>
      %1555 = arith.addf %1553, %1554 : vector<1x128xf32>
      %1556 = arith.mulf %37, %arg12 : vector<1x128xf32>
      %1557 = arith.addf %1555, %1556 : vector<1x128xf32>
      %cst_293 = arith.constant -1.000000e+05 : f32
      %cst_294 = arith.constant 1.000000e+05 : f32
      %1558 = vector.broadcast %cst_293 : f32 to vector<1x128xf32>
      %1559 = arith.maximumf %1558, %1557 : vector<1x128xf32>
      %1560 = vector.broadcast %cst_294 : f32 to vector<1x128xf32>
      %1561 = arith.minimumf %1560, %1559 : vector<1x128xf32>
      %1562 = arith.mulf %66, %1561 : vector<1x128xf32>
      %1563 = arith.addf %arg10, %1562 : vector<1x128xf32>
      %1564 = arith.mulf %25, %arg8 : vector<1x128xf32>
      %1565 = arith.mulf %27, %arg9 : vector<1x128xf32>
      %1566 = arith.addf %1564, %1565 : vector<1x128xf32>
      %1567 = arith.mulf %29, %arg10 : vector<1x128xf32>
      %1568 = arith.addf %1566, %1567 : vector<1x128xf32>
      %1569 = arith.mulf %31, %arg11 : vector<1x128xf32>
      %1570 = arith.addf %1568, %1569 : vector<1x128xf32>
      %1571 = arith.mulf %39, %arg12 : vector<1x128xf32>
      %1572 = arith.addf %1570, %1571 : vector<1x128xf32>
      %cst_295 = arith.constant -1.000000e+05 : f32
      %cst_296 = arith.constant 1.000000e+05 : f32
      %1573 = vector.broadcast %cst_295 : f32 to vector<1x128xf32>
      %1574 = arith.maximumf %1573, %1572 : vector<1x128xf32>
      %1575 = vector.broadcast %cst_296 : f32 to vector<1x128xf32>
      %1576 = arith.minimumf %1575, %1574 : vector<1x128xf32>
      %1577 = arith.mulf %66, %1576 : vector<1x128xf32>
      %1578 = arith.addf %arg11, %1577 : vector<1x128xf32>
      %1579 = arith.addf %arg12, %66 : vector<1x128xf32>
      %1580 = arith.mulf %1, %1533 : vector<1x128xf32>
      %1581 = arith.mulf %3, %1548 : vector<1x128xf32>
      %1582 = arith.addf %1580, %1581 : vector<1x128xf32>
      %1583 = arith.mulf %5, %1563 : vector<1x128xf32>
      %1584 = arith.addf %1582, %1583 : vector<1x128xf32>
      %1585 = arith.mulf %7, %1578 : vector<1x128xf32>
      %1586 = arith.addf %1584, %1585 : vector<1x128xf32>
      %1587 = arith.mulf %33, %1579 : vector<1x128xf32>
      %1588 = arith.addf %1586, %1587 : vector<1x128xf32>
      %cst_297 = arith.constant -1.000000e+05 : f32
      %cst_298 = arith.constant 1.000000e+05 : f32
      %1589 = vector.broadcast %cst_297 : f32 to vector<1x128xf32>
      %1590 = arith.maximumf %1589, %1588 : vector<1x128xf32>
      %1591 = vector.broadcast %cst_298 : f32 to vector<1x128xf32>
      %1592 = arith.minimumf %1591, %1590 : vector<1x128xf32>
      %1593 = arith.mulf %66, %1592 : vector<1x128xf32>
      %1594 = arith.addf %1533, %1593 : vector<1x128xf32>
      %1595 = arith.mulf %9, %1533 : vector<1x128xf32>
      %1596 = arith.mulf %11, %1548 : vector<1x128xf32>
      %1597 = arith.addf %1595, %1596 : vector<1x128xf32>
      %1598 = arith.mulf %13, %1563 : vector<1x128xf32>
      %1599 = arith.addf %1597, %1598 : vector<1x128xf32>
      %1600 = arith.mulf %15, %1578 : vector<1x128xf32>
      %1601 = arith.addf %1599, %1600 : vector<1x128xf32>
      %1602 = arith.mulf %35, %1579 : vector<1x128xf32>
      %1603 = arith.addf %1601, %1602 : vector<1x128xf32>
      %cst_299 = arith.constant -1.000000e+05 : f32
      %cst_300 = arith.constant 1.000000e+05 : f32
      %1604 = vector.broadcast %cst_299 : f32 to vector<1x128xf32>
      %1605 = arith.maximumf %1604, %1603 : vector<1x128xf32>
      %1606 = vector.broadcast %cst_300 : f32 to vector<1x128xf32>
      %1607 = arith.minimumf %1606, %1605 : vector<1x128xf32>
      %1608 = arith.mulf %66, %1607 : vector<1x128xf32>
      %1609 = arith.addf %1548, %1608 : vector<1x128xf32>
      %1610 = arith.mulf %17, %1533 : vector<1x128xf32>
      %1611 = arith.mulf %19, %1548 : vector<1x128xf32>
      %1612 = arith.addf %1610, %1611 : vector<1x128xf32>
      %1613 = arith.mulf %21, %1563 : vector<1x128xf32>
      %1614 = arith.addf %1612, %1613 : vector<1x128xf32>
      %1615 = arith.mulf %23, %1578 : vector<1x128xf32>
      %1616 = arith.addf %1614, %1615 : vector<1x128xf32>
      %1617 = arith.mulf %37, %1579 : vector<1x128xf32>
      %1618 = arith.addf %1616, %1617 : vector<1x128xf32>
      %cst_301 = arith.constant -1.000000e+05 : f32
      %cst_302 = arith.constant 1.000000e+05 : f32
      %1619 = vector.broadcast %cst_301 : f32 to vector<1x128xf32>
      %1620 = arith.maximumf %1619, %1618 : vector<1x128xf32>
      %1621 = vector.broadcast %cst_302 : f32 to vector<1x128xf32>
      %1622 = arith.minimumf %1621, %1620 : vector<1x128xf32>
      %1623 = arith.mulf %66, %1622 : vector<1x128xf32>
      %1624 = arith.addf %1563, %1623 : vector<1x128xf32>
      %1625 = arith.mulf %25, %1533 : vector<1x128xf32>
      %1626 = arith.mulf %27, %1548 : vector<1x128xf32>
      %1627 = arith.addf %1625, %1626 : vector<1x128xf32>
      %1628 = arith.mulf %29, %1563 : vector<1x128xf32>
      %1629 = arith.addf %1627, %1628 : vector<1x128xf32>
      %1630 = arith.mulf %31, %1578 : vector<1x128xf32>
      %1631 = arith.addf %1629, %1630 : vector<1x128xf32>
      %1632 = arith.mulf %39, %1579 : vector<1x128xf32>
      %1633 = arith.addf %1631, %1632 : vector<1x128xf32>
      %cst_303 = arith.constant -1.000000e+05 : f32
      %cst_304 = arith.constant 1.000000e+05 : f32
      %1634 = vector.broadcast %cst_303 : f32 to vector<1x128xf32>
      %1635 = arith.maximumf %1634, %1633 : vector<1x128xf32>
      %1636 = vector.broadcast %cst_304 : f32 to vector<1x128xf32>
      %1637 = arith.minimumf %1636, %1635 : vector<1x128xf32>
      %1638 = arith.mulf %66, %1637 : vector<1x128xf32>
      %1639 = arith.addf %1578, %1638 : vector<1x128xf32>
      %1640 = arith.addf %1579, %66 : vector<1x128xf32>
      %1641 = arith.mulf %1, %1594 : vector<1x128xf32>
      %1642 = arith.mulf %3, %1609 : vector<1x128xf32>
      %1643 = arith.addf %1641, %1642 : vector<1x128xf32>
      %1644 = arith.mulf %5, %1624 : vector<1x128xf32>
      %1645 = arith.addf %1643, %1644 : vector<1x128xf32>
      %1646 = arith.mulf %7, %1639 : vector<1x128xf32>
      %1647 = arith.addf %1645, %1646 : vector<1x128xf32>
      %1648 = arith.mulf %33, %1640 : vector<1x128xf32>
      %1649 = arith.addf %1647, %1648 : vector<1x128xf32>
      %cst_305 = arith.constant -1.000000e+05 : f32
      %cst_306 = arith.constant 1.000000e+05 : f32
      %1650 = vector.broadcast %cst_305 : f32 to vector<1x128xf32>
      %1651 = arith.maximumf %1650, %1649 : vector<1x128xf32>
      %1652 = vector.broadcast %cst_306 : f32 to vector<1x128xf32>
      %1653 = arith.minimumf %1652, %1651 : vector<1x128xf32>
      %1654 = arith.mulf %66, %1653 : vector<1x128xf32>
      %1655 = arith.addf %1594, %1654 : vector<1x128xf32>
      %1656 = arith.mulf %9, %1594 : vector<1x128xf32>
      %1657 = arith.mulf %11, %1609 : vector<1x128xf32>
      %1658 = arith.addf %1656, %1657 : vector<1x128xf32>
      %1659 = arith.mulf %13, %1624 : vector<1x128xf32>
      %1660 = arith.addf %1658, %1659 : vector<1x128xf32>
      %1661 = arith.mulf %15, %1639 : vector<1x128xf32>
      %1662 = arith.addf %1660, %1661 : vector<1x128xf32>
      %1663 = arith.mulf %35, %1640 : vector<1x128xf32>
      %1664 = arith.addf %1662, %1663 : vector<1x128xf32>
      %cst_307 = arith.constant -1.000000e+05 : f32
      %cst_308 = arith.constant 1.000000e+05 : f32
      %1665 = vector.broadcast %cst_307 : f32 to vector<1x128xf32>
      %1666 = arith.maximumf %1665, %1664 : vector<1x128xf32>
      %1667 = vector.broadcast %cst_308 : f32 to vector<1x128xf32>
      %1668 = arith.minimumf %1667, %1666 : vector<1x128xf32>
      %1669 = arith.mulf %66, %1668 : vector<1x128xf32>
      %1670 = arith.addf %1609, %1669 : vector<1x128xf32>
      %1671 = arith.mulf %17, %1594 : vector<1x128xf32>
      %1672 = arith.mulf %19, %1609 : vector<1x128xf32>
      %1673 = arith.addf %1671, %1672 : vector<1x128xf32>
      %1674 = arith.mulf %21, %1624 : vector<1x128xf32>
      %1675 = arith.addf %1673, %1674 : vector<1x128xf32>
      %1676 = arith.mulf %23, %1639 : vector<1x128xf32>
      %1677 = arith.addf %1675, %1676 : vector<1x128xf32>
      %1678 = arith.mulf %37, %1640 : vector<1x128xf32>
      %1679 = arith.addf %1677, %1678 : vector<1x128xf32>
      %cst_309 = arith.constant -1.000000e+05 : f32
      %cst_310 = arith.constant 1.000000e+05 : f32
      %1680 = vector.broadcast %cst_309 : f32 to vector<1x128xf32>
      %1681 = arith.maximumf %1680, %1679 : vector<1x128xf32>
      %1682 = vector.broadcast %cst_310 : f32 to vector<1x128xf32>
      %1683 = arith.minimumf %1682, %1681 : vector<1x128xf32>
      %1684 = arith.mulf %66, %1683 : vector<1x128xf32>
      %1685 = arith.addf %1624, %1684 : vector<1x128xf32>
      %1686 = arith.mulf %25, %1594 : vector<1x128xf32>
      %1687 = arith.mulf %27, %1609 : vector<1x128xf32>
      %1688 = arith.addf %1686, %1687 : vector<1x128xf32>
      %1689 = arith.mulf %29, %1624 : vector<1x128xf32>
      %1690 = arith.addf %1688, %1689 : vector<1x128xf32>
      %1691 = arith.mulf %31, %1639 : vector<1x128xf32>
      %1692 = arith.addf %1690, %1691 : vector<1x128xf32>
      %1693 = arith.mulf %39, %1640 : vector<1x128xf32>
      %1694 = arith.addf %1692, %1693 : vector<1x128xf32>
      %cst_311 = arith.constant -1.000000e+05 : f32
      %cst_312 = arith.constant 1.000000e+05 : f32
      %1695 = vector.broadcast %cst_311 : f32 to vector<1x128xf32>
      %1696 = arith.maximumf %1695, %1694 : vector<1x128xf32>
      %1697 = vector.broadcast %cst_312 : f32 to vector<1x128xf32>
      %1698 = arith.minimumf %1697, %1696 : vector<1x128xf32>
      %1699 = arith.mulf %66, %1698 : vector<1x128xf32>
      %1700 = arith.addf %1639, %1699 : vector<1x128xf32>
      %1701 = arith.addf %1640, %66 : vector<1x128xf32>
      %1702 = arith.mulf %1, %1655 : vector<1x128xf32>
      %1703 = arith.mulf %3, %1670 : vector<1x128xf32>
      %1704 = arith.addf %1702, %1703 : vector<1x128xf32>
      %1705 = arith.mulf %5, %1685 : vector<1x128xf32>
      %1706 = arith.addf %1704, %1705 : vector<1x128xf32>
      %1707 = arith.mulf %7, %1700 : vector<1x128xf32>
      %1708 = arith.addf %1706, %1707 : vector<1x128xf32>
      %1709 = arith.mulf %33, %1701 : vector<1x128xf32>
      %1710 = arith.addf %1708, %1709 : vector<1x128xf32>
      %cst_313 = arith.constant -1.000000e+05 : f32
      %cst_314 = arith.constant 1.000000e+05 : f32
      %1711 = vector.broadcast %cst_313 : f32 to vector<1x128xf32>
      %1712 = arith.maximumf %1711, %1710 : vector<1x128xf32>
      %1713 = vector.broadcast %cst_314 : f32 to vector<1x128xf32>
      %1714 = arith.minimumf %1713, %1712 : vector<1x128xf32>
      %1715 = arith.mulf %66, %1714 : vector<1x128xf32>
      %1716 = arith.addf %1655, %1715 : vector<1x128xf32>
      %1717 = arith.mulf %9, %1655 : vector<1x128xf32>
      %1718 = arith.mulf %11, %1670 : vector<1x128xf32>
      %1719 = arith.addf %1717, %1718 : vector<1x128xf32>
      %1720 = arith.mulf %13, %1685 : vector<1x128xf32>
      %1721 = arith.addf %1719, %1720 : vector<1x128xf32>
      %1722 = arith.mulf %15, %1700 : vector<1x128xf32>
      %1723 = arith.addf %1721, %1722 : vector<1x128xf32>
      %1724 = arith.mulf %35, %1701 : vector<1x128xf32>
      %1725 = arith.addf %1723, %1724 : vector<1x128xf32>
      %cst_315 = arith.constant -1.000000e+05 : f32
      %cst_316 = arith.constant 1.000000e+05 : f32
      %1726 = vector.broadcast %cst_315 : f32 to vector<1x128xf32>
      %1727 = arith.maximumf %1726, %1725 : vector<1x128xf32>
      %1728 = vector.broadcast %cst_316 : f32 to vector<1x128xf32>
      %1729 = arith.minimumf %1728, %1727 : vector<1x128xf32>
      %1730 = arith.mulf %66, %1729 : vector<1x128xf32>
      %1731 = arith.addf %1670, %1730 : vector<1x128xf32>
      %1732 = arith.mulf %17, %1655 : vector<1x128xf32>
      %1733 = arith.mulf %19, %1670 : vector<1x128xf32>
      %1734 = arith.addf %1732, %1733 : vector<1x128xf32>
      %1735 = arith.mulf %21, %1685 : vector<1x128xf32>
      %1736 = arith.addf %1734, %1735 : vector<1x128xf32>
      %1737 = arith.mulf %23, %1700 : vector<1x128xf32>
      %1738 = arith.addf %1736, %1737 : vector<1x128xf32>
      %1739 = arith.mulf %37, %1701 : vector<1x128xf32>
      %1740 = arith.addf %1738, %1739 : vector<1x128xf32>
      %cst_317 = arith.constant -1.000000e+05 : f32
      %cst_318 = arith.constant 1.000000e+05 : f32
      %1741 = vector.broadcast %cst_317 : f32 to vector<1x128xf32>
      %1742 = arith.maximumf %1741, %1740 : vector<1x128xf32>
      %1743 = vector.broadcast %cst_318 : f32 to vector<1x128xf32>
      %1744 = arith.minimumf %1743, %1742 : vector<1x128xf32>
      %1745 = arith.mulf %66, %1744 : vector<1x128xf32>
      %1746 = arith.addf %1685, %1745 : vector<1x128xf32>
      %1747 = arith.mulf %25, %1655 : vector<1x128xf32>
      %1748 = arith.mulf %27, %1670 : vector<1x128xf32>
      %1749 = arith.addf %1747, %1748 : vector<1x128xf32>
      %1750 = arith.mulf %29, %1685 : vector<1x128xf32>
      %1751 = arith.addf %1749, %1750 : vector<1x128xf32>
      %1752 = arith.mulf %31, %1700 : vector<1x128xf32>
      %1753 = arith.addf %1751, %1752 : vector<1x128xf32>
      %1754 = arith.mulf %39, %1701 : vector<1x128xf32>
      %1755 = arith.addf %1753, %1754 : vector<1x128xf32>
      %cst_319 = arith.constant -1.000000e+05 : f32
      %cst_320 = arith.constant 1.000000e+05 : f32
      %1756 = vector.broadcast %cst_319 : f32 to vector<1x128xf32>
      %1757 = arith.maximumf %1756, %1755 : vector<1x128xf32>
      %1758 = vector.broadcast %cst_320 : f32 to vector<1x128xf32>
      %1759 = arith.minimumf %1758, %1757 : vector<1x128xf32>
      %1760 = arith.mulf %66, %1759 : vector<1x128xf32>
      %1761 = arith.addf %1700, %1760 : vector<1x128xf32>
      %1762 = arith.addf %1701, %66 : vector<1x128xf32>
      scf.yield %1716, %1731, %1746, %1761, %1762 : vector<1x128xf32>, vector<1x128xf32>, vector<1x128xf32>, vector<1x128xf32>, vector<1x128xf32>
    }
    %c4_i32 = arith.constant 4 : i32
    %73 = arith.muli %69, %c4_i32 : i32
    %74 = arith.subi %64, %73 : i32
    %c0_i32_17 = arith.constant 0 : i32
    %75 = arith.cmpi sgt, %74, %c0_i32_17 : i32
    %cst_18 = arith.constant 0.000000e+00 : f32
    %76 = arith.select %75, %65, %cst_18 : f32
    %77 = vector.broadcast %76 : f32 to vector<1x128xf32>
    %78 = arith.mulf %1, %72#0 : vector<1x128xf32>
    %79 = arith.mulf %3, %72#1 : vector<1x128xf32>
    %80 = arith.addf %78, %79 : vector<1x128xf32>
    %81 = arith.mulf %5, %72#2 : vector<1x128xf32>
    %82 = arith.addf %80, %81 : vector<1x128xf32>
    %83 = arith.mulf %7, %72#3 : vector<1x128xf32>
    %84 = arith.addf %82, %83 : vector<1x128xf32>
    %85 = arith.mulf %33, %72#4 : vector<1x128xf32>
    %86 = arith.addf %84, %85 : vector<1x128xf32>
    %cst_19 = arith.constant -1.000000e+05 : f32
    %cst_20 = arith.constant 1.000000e+05 : f32
    %87 = vector.broadcast %cst_19 : f32 to vector<1x128xf32>
    %88 = arith.maximumf %87, %86 : vector<1x128xf32>
    %89 = vector.broadcast %cst_20 : f32 to vector<1x128xf32>
    %90 = arith.minimumf %89, %88 : vector<1x128xf32>
    %91 = arith.mulf %77, %90 : vector<1x128xf32>
    %92 = arith.addf %72#0, %91 : vector<1x128xf32>
    %93 = arith.mulf %9, %72#0 : vector<1x128xf32>
    %94 = arith.mulf %11, %72#1 : vector<1x128xf32>
    %95 = arith.addf %93, %94 : vector<1x128xf32>
    %96 = arith.mulf %13, %72#2 : vector<1x128xf32>
    %97 = arith.addf %95, %96 : vector<1x128xf32>
    %98 = arith.mulf %15, %72#3 : vector<1x128xf32>
    %99 = arith.addf %97, %98 : vector<1x128xf32>
    %100 = arith.mulf %35, %72#4 : vector<1x128xf32>
    %101 = arith.addf %99, %100 : vector<1x128xf32>
    %cst_21 = arith.constant -1.000000e+05 : f32
    %cst_22 = arith.constant 1.000000e+05 : f32
    %102 = vector.broadcast %cst_21 : f32 to vector<1x128xf32>
    %103 = arith.maximumf %102, %101 : vector<1x128xf32>
    %104 = vector.broadcast %cst_22 : f32 to vector<1x128xf32>
    %105 = arith.minimumf %104, %103 : vector<1x128xf32>
    %106 = arith.mulf %77, %105 : vector<1x128xf32>
    %107 = arith.addf %72#1, %106 : vector<1x128xf32>
    %108 = arith.mulf %17, %72#0 : vector<1x128xf32>
    %109 = arith.mulf %19, %72#1 : vector<1x128xf32>
    %110 = arith.addf %108, %109 : vector<1x128xf32>
    %111 = arith.mulf %21, %72#2 : vector<1x128xf32>
    %112 = arith.addf %110, %111 : vector<1x128xf32>
    %113 = arith.mulf %23, %72#3 : vector<1x128xf32>
    %114 = arith.addf %112, %113 : vector<1x128xf32>
    %115 = arith.mulf %37, %72#4 : vector<1x128xf32>
    %116 = arith.addf %114, %115 : vector<1x128xf32>
    %cst_23 = arith.constant -1.000000e+05 : f32
    %cst_24 = arith.constant 1.000000e+05 : f32
    %117 = vector.broadcast %cst_23 : f32 to vector<1x128xf32>
    %118 = arith.maximumf %117, %116 : vector<1x128xf32>
    %119 = vector.broadcast %cst_24 : f32 to vector<1x128xf32>
    %120 = arith.minimumf %119, %118 : vector<1x128xf32>
    %121 = arith.mulf %77, %120 : vector<1x128xf32>
    %122 = arith.addf %72#2, %121 : vector<1x128xf32>
    %123 = arith.mulf %25, %72#0 : vector<1x128xf32>
    %124 = arith.mulf %27, %72#1 : vector<1x128xf32>
    %125 = arith.addf %123, %124 : vector<1x128xf32>
    %126 = arith.mulf %29, %72#2 : vector<1x128xf32>
    %127 = arith.addf %125, %126 : vector<1x128xf32>
    %128 = arith.mulf %31, %72#3 : vector<1x128xf32>
    %129 = arith.addf %127, %128 : vector<1x128xf32>
    %130 = arith.mulf %39, %72#4 : vector<1x128xf32>
    %131 = arith.addf %129, %130 : vector<1x128xf32>
    %cst_25 = arith.constant -1.000000e+05 : f32
    %cst_26 = arith.constant 1.000000e+05 : f32
    %132 = vector.broadcast %cst_25 : f32 to vector<1x128xf32>
    %133 = arith.maximumf %132, %131 : vector<1x128xf32>
    %134 = vector.broadcast %cst_26 : f32 to vector<1x128xf32>
    %135 = arith.minimumf %134, %133 : vector<1x128xf32>
    %136 = arith.mulf %77, %135 : vector<1x128xf32>
    %137 = arith.addf %72#3, %136 : vector<1x128xf32>
    %138 = arith.addf %72#4, %77 : vector<1x128xf32>
    %c1_i32_27 = arith.constant 1 : i32
    %139 = arith.cmpi sgt, %74, %c1_i32_27 : i32
    %cst_28 = arith.constant 0.000000e+00 : f32
    %140 = arith.select %139, %65, %cst_28 : f32
    %141 = vector.broadcast %140 : f32 to vector<1x128xf32>
    %142 = arith.mulf %1, %92 : vector<1x128xf32>
    %143 = arith.mulf %3, %107 : vector<1x128xf32>
    %144 = arith.addf %142, %143 : vector<1x128xf32>
    %145 = arith.mulf %5, %122 : vector<1x128xf32>
    %146 = arith.addf %144, %145 : vector<1x128xf32>
    %147 = arith.mulf %7, %137 : vector<1x128xf32>
    %148 = arith.addf %146, %147 : vector<1x128xf32>
    %149 = arith.mulf %33, %138 : vector<1x128xf32>
    %150 = arith.addf %148, %149 : vector<1x128xf32>
    %cst_29 = arith.constant -1.000000e+05 : f32
    %cst_30 = arith.constant 1.000000e+05 : f32
    %151 = vector.broadcast %cst_29 : f32 to vector<1x128xf32>
    %152 = arith.maximumf %151, %150 : vector<1x128xf32>
    %153 = vector.broadcast %cst_30 : f32 to vector<1x128xf32>
    %154 = arith.minimumf %153, %152 : vector<1x128xf32>
    %155 = arith.mulf %141, %154 : vector<1x128xf32>
    %156 = arith.addf %92, %155 : vector<1x128xf32>
    %157 = arith.mulf %9, %92 : vector<1x128xf32>
    %158 = arith.mulf %11, %107 : vector<1x128xf32>
    %159 = arith.addf %157, %158 : vector<1x128xf32>
    %160 = arith.mulf %13, %122 : vector<1x128xf32>
    %161 = arith.addf %159, %160 : vector<1x128xf32>
    %162 = arith.mulf %15, %137 : vector<1x128xf32>
    %163 = arith.addf %161, %162 : vector<1x128xf32>
    %164 = arith.mulf %35, %138 : vector<1x128xf32>
    %165 = arith.addf %163, %164 : vector<1x128xf32>
    %cst_31 = arith.constant -1.000000e+05 : f32
    %cst_32 = arith.constant 1.000000e+05 : f32
    %166 = vector.broadcast %cst_31 : f32 to vector<1x128xf32>
    %167 = arith.maximumf %166, %165 : vector<1x128xf32>
    %168 = vector.broadcast %cst_32 : f32 to vector<1x128xf32>
    %169 = arith.minimumf %168, %167 : vector<1x128xf32>
    %170 = arith.mulf %141, %169 : vector<1x128xf32>
    %171 = arith.addf %107, %170 : vector<1x128xf32>
    %172 = arith.mulf %17, %92 : vector<1x128xf32>
    %173 = arith.mulf %19, %107 : vector<1x128xf32>
    %174 = arith.addf %172, %173 : vector<1x128xf32>
    %175 = arith.mulf %21, %122 : vector<1x128xf32>
    %176 = arith.addf %174, %175 : vector<1x128xf32>
    %177 = arith.mulf %23, %137 : vector<1x128xf32>
    %178 = arith.addf %176, %177 : vector<1x128xf32>
    %179 = arith.mulf %37, %138 : vector<1x128xf32>
    %180 = arith.addf %178, %179 : vector<1x128xf32>
    %cst_33 = arith.constant -1.000000e+05 : f32
    %cst_34 = arith.constant 1.000000e+05 : f32
    %181 = vector.broadcast %cst_33 : f32 to vector<1x128xf32>
    %182 = arith.maximumf %181, %180 : vector<1x128xf32>
    %183 = vector.broadcast %cst_34 : f32 to vector<1x128xf32>
    %184 = arith.minimumf %183, %182 : vector<1x128xf32>
    %185 = arith.mulf %141, %184 : vector<1x128xf32>
    %186 = arith.addf %122, %185 : vector<1x128xf32>
    %187 = arith.mulf %25, %92 : vector<1x128xf32>
    %188 = arith.mulf %27, %107 : vector<1x128xf32>
    %189 = arith.addf %187, %188 : vector<1x128xf32>
    %190 = arith.mulf %29, %122 : vector<1x128xf32>
    %191 = arith.addf %189, %190 : vector<1x128xf32>
    %192 = arith.mulf %31, %137 : vector<1x128xf32>
    %193 = arith.addf %191, %192 : vector<1x128xf32>
    %194 = arith.mulf %39, %138 : vector<1x128xf32>
    %195 = arith.addf %193, %194 : vector<1x128xf32>
    %cst_35 = arith.constant -1.000000e+05 : f32
    %cst_36 = arith.constant 1.000000e+05 : f32
    %196 = vector.broadcast %cst_35 : f32 to vector<1x128xf32>
    %197 = arith.maximumf %196, %195 : vector<1x128xf32>
    %198 = vector.broadcast %cst_36 : f32 to vector<1x128xf32>
    %199 = arith.minimumf %198, %197 : vector<1x128xf32>
    %200 = arith.mulf %141, %199 : vector<1x128xf32>
    %201 = arith.addf %137, %200 : vector<1x128xf32>
    %202 = arith.addf %138, %141 : vector<1x128xf32>
    %c2_i32_37 = arith.constant 2 : i32
    %203 = arith.cmpi sgt, %74, %c2_i32_37 : i32
    %cst_38 = arith.constant 0.000000e+00 : f32
    %204 = arith.select %203, %65, %cst_38 : f32
    %205 = vector.broadcast %204 : f32 to vector<1x128xf32>
    %206 = arith.mulf %1, %156 : vector<1x128xf32>
    %207 = arith.mulf %3, %171 : vector<1x128xf32>
    %208 = arith.addf %206, %207 : vector<1x128xf32>
    %209 = arith.mulf %5, %186 : vector<1x128xf32>
    %210 = arith.addf %208, %209 : vector<1x128xf32>
    %211 = arith.mulf %7, %201 : vector<1x128xf32>
    %212 = arith.addf %210, %211 : vector<1x128xf32>
    %213 = arith.mulf %33, %202 : vector<1x128xf32>
    %214 = arith.addf %212, %213 : vector<1x128xf32>
    %cst_39 = arith.constant -1.000000e+05 : f32
    %cst_40 = arith.constant 1.000000e+05 : f32
    %215 = vector.broadcast %cst_39 : f32 to vector<1x128xf32>
    %216 = arith.maximumf %215, %214 : vector<1x128xf32>
    %217 = vector.broadcast %cst_40 : f32 to vector<1x128xf32>
    %218 = arith.minimumf %217, %216 : vector<1x128xf32>
    %219 = arith.mulf %205, %218 : vector<1x128xf32>
    %220 = arith.addf %156, %219 : vector<1x128xf32>
    %221 = arith.mulf %9, %156 : vector<1x128xf32>
    %222 = arith.mulf %11, %171 : vector<1x128xf32>
    %223 = arith.addf %221, %222 : vector<1x128xf32>
    %224 = arith.mulf %13, %186 : vector<1x128xf32>
    %225 = arith.addf %223, %224 : vector<1x128xf32>
    %226 = arith.mulf %15, %201 : vector<1x128xf32>
    %227 = arith.addf %225, %226 : vector<1x128xf32>
    %228 = arith.mulf %35, %202 : vector<1x128xf32>
    %229 = arith.addf %227, %228 : vector<1x128xf32>
    %cst_41 = arith.constant -1.000000e+05 : f32
    %cst_42 = arith.constant 1.000000e+05 : f32
    %230 = vector.broadcast %cst_41 : f32 to vector<1x128xf32>
    %231 = arith.maximumf %230, %229 : vector<1x128xf32>
    %232 = vector.broadcast %cst_42 : f32 to vector<1x128xf32>
    %233 = arith.minimumf %232, %231 : vector<1x128xf32>
    %234 = arith.mulf %205, %233 : vector<1x128xf32>
    %235 = arith.addf %171, %234 : vector<1x128xf32>
    %236 = arith.mulf %17, %156 : vector<1x128xf32>
    %237 = arith.mulf %19, %171 : vector<1x128xf32>
    %238 = arith.addf %236, %237 : vector<1x128xf32>
    %239 = arith.mulf %21, %186 : vector<1x128xf32>
    %240 = arith.addf %238, %239 : vector<1x128xf32>
    %241 = arith.mulf %23, %201 : vector<1x128xf32>
    %242 = arith.addf %240, %241 : vector<1x128xf32>
    %243 = arith.mulf %37, %202 : vector<1x128xf32>
    %244 = arith.addf %242, %243 : vector<1x128xf32>
    %cst_43 = arith.constant -1.000000e+05 : f32
    %cst_44 = arith.constant 1.000000e+05 : f32
    %245 = vector.broadcast %cst_43 : f32 to vector<1x128xf32>
    %246 = arith.maximumf %245, %244 : vector<1x128xf32>
    %247 = vector.broadcast %cst_44 : f32 to vector<1x128xf32>
    %248 = arith.minimumf %247, %246 : vector<1x128xf32>
    %249 = arith.mulf %205, %248 : vector<1x128xf32>
    %250 = arith.addf %186, %249 : vector<1x128xf32>
    %251 = arith.mulf %25, %156 : vector<1x128xf32>
    %252 = arith.mulf %27, %171 : vector<1x128xf32>
    %253 = arith.addf %251, %252 : vector<1x128xf32>
    %254 = arith.mulf %29, %186 : vector<1x128xf32>
    %255 = arith.addf %253, %254 : vector<1x128xf32>
    %256 = arith.mulf %31, %201 : vector<1x128xf32>
    %257 = arith.addf %255, %256 : vector<1x128xf32>
    %258 = arith.mulf %39, %202 : vector<1x128xf32>
    %259 = arith.addf %257, %258 : vector<1x128xf32>
    %cst_45 = arith.constant -1.000000e+05 : f32
    %cst_46 = arith.constant 1.000000e+05 : f32
    %260 = vector.broadcast %cst_45 : f32 to vector<1x128xf32>
    %261 = arith.maximumf %260, %259 : vector<1x128xf32>
    %262 = vector.broadcast %cst_46 : f32 to vector<1x128xf32>
    %263 = arith.minimumf %262, %261 : vector<1x128xf32>
    %264 = arith.mulf %205, %263 : vector<1x128xf32>
    %265 = arith.addf %201, %264 : vector<1x128xf32>
    %266 = arith.select %43, %220, %40 : vector<1x128xi1>, vector<1x128xf32>
    %267 = arith.select %45, %235, %266 : vector<1x128xi1>, vector<1x128xf32>
    %268 = arith.select %47, %250, %267 : vector<1x128xi1>, vector<1x128xf32>
    %269 = arith.select %49, %265, %268 : vector<1x128xi1>, vector<1x128xf32>
    %c1_47 = arith.constant 1 : index
    %c0_48 = arith.constant 0 : index
    %270 = vector.load %arg6[%c1_47, %c0_48] : memref<8x128xf32, #tpu.memory_space<vmem>>, vector<1x128xf32>
    tpu.vector_store %arg6[%c1_47, %c0_48], %269 {strides = array<i32>} : memref<8x128xf32, #tpu.memory_space<vmem>>, vector<1x128xf32>,
    %c1_49 = arith.constant 1 : index
    %271 = memref.load %arg2[%c1_49] : memref<7xi32, #tpu.memory_space<smem>>
    %c0_i32_50 = arith.constant 0 : i32
    %272 = arith.maxsi %271, %c0_i32_50 : i32
    %c1_51 = arith.constant 1 : index
    %273 = memref.load %arg1[%c1_51] : memref<7xf32, #tpu.memory_space<smem>>
    %274 = vector.broadcast %273 : f32 to vector<1x128xf32>
    %c1_52 = arith.constant 1 : index
    %275 = memref.load %arg0[%c1_52] : memref<7xf32, #tpu.memory_space<smem>>
    %276 = vector.broadcast %275 : f32 to vector<1x128xf32>
    %c2_i32_53 = arith.constant 2 : i32
    %277 = arith.shrui %272, %c2_i32_53 : i32
    %c0_i32_54 = arith.constant 0 : i32
    %278 = arith.subi %277, %c0_i32_54 : i32
    %279 = arith.addi %c0_i32_54, %278 : i32
    %c1_i32_55 = arith.constant 1 : i32
    %280:5 = scf.for %arg7 = %c0_i32_54 to %279 step %c1_i32_55 iter_args(%arg8 = %220, %arg9 = %235, %arg10 = %250, %arg11 = %265, %arg12 = %276) -> (vector<1x128xf32>, vector<1x128xf32>, vector<1x128xf32>, vector<1x128xf32>, vector<1x128xf32>)  : i32 {
      %1519 = arith.mulf %1, %arg8 : vector<1x128xf32>
      %1520 = arith.mulf %3, %arg9 : vector<1x128xf32>
      %1521 = arith.addf %1519, %1520 : vector<1x128xf32>
      %1522 = arith.mulf %5, %arg10 : vector<1x128xf32>
      %1523 = arith.addf %1521, %1522 : vector<1x128xf32>
      %1524 = arith.mulf %7, %arg11 : vector<1x128xf32>
      %1525 = arith.addf %1523, %1524 : vector<1x128xf32>
      %1526 = arith.mulf %33, %arg12 : vector<1x128xf32>
      %1527 = arith.addf %1525, %1526 : vector<1x128xf32>
      %cst_289 = arith.constant -1.000000e+05 : f32
      %cst_290 = arith.constant 1.000000e+05 : f32
      %1528 = vector.broadcast %cst_289 : f32 to vector<1x128xf32>
      %1529 = arith.maximumf %1528, %1527 : vector<1x128xf32>
      %1530 = vector.broadcast %cst_290 : f32 to vector<1x128xf32>
      %1531 = arith.minimumf %1530, %1529 : vector<1x128xf32>
      %1532 = arith.mulf %274, %1531 : vector<1x128xf32>
      %1533 = arith.addf %arg8, %1532 : vector<1x128xf32>
      %1534 = arith.mulf %9, %arg8 : vector<1x128xf32>
      %1535 = arith.mulf %11, %arg9 : vector<1x128xf32>
      %1536 = arith.addf %1534, %1535 : vector<1x128xf32>
      %1537 = arith.mulf %13, %arg10 : vector<1x128xf32>
      %1538 = arith.addf %1536, %1537 : vector<1x128xf32>
      %1539 = arith.mulf %15, %arg11 : vector<1x128xf32>
      %1540 = arith.addf %1538, %1539 : vector<1x128xf32>
      %1541 = arith.mulf %35, %arg12 : vector<1x128xf32>
      %1542 = arith.addf %1540, %1541 : vector<1x128xf32>
      %cst_291 = arith.constant -1.000000e+05 : f32
      %cst_292 = arith.constant 1.000000e+05 : f32
      %1543 = vector.broadcast %cst_291 : f32 to vector<1x128xf32>
      %1544 = arith.maximumf %1543, %1542 : vector<1x128xf32>
      %1545 = vector.broadcast %cst_292 : f32 to vector<1x128xf32>
      %1546 = arith.minimumf %1545, %1544 : vector<1x128xf32>
      %1547 = arith.mulf %274, %1546 : vector<1x128xf32>
      %1548 = arith.addf %arg9, %1547 : vector<1x128xf32>
      %1549 = arith.mulf %17, %arg8 : vector<1x128xf32>
      %1550 = arith.mulf %19, %arg9 : vector<1x128xf32>
      %1551 = arith.addf %1549, %1550 : vector<1x128xf32>
      %1552 = arith.mulf %21, %arg10 : vector<1x128xf32>
      %1553 = arith.addf %1551, %1552 : vector<1x128xf32>
      %1554 = arith.mulf %23, %arg11 : vector<1x128xf32>
      %1555 = arith.addf %1553, %1554 : vector<1x128xf32>
      %1556 = arith.mulf %37, %arg12 : vector<1x128xf32>
      %1557 = arith.addf %1555, %1556 : vector<1x128xf32>
      %cst_293 = arith.constant -1.000000e+05 : f32
      %cst_294 = arith.constant 1.000000e+05 : f32
      %1558 = vector.broadcast %cst_293 : f32 to vector<1x128xf32>
      %1559 = arith.maximumf %1558, %1557 : vector<1x128xf32>
      %1560 = vector.broadcast %cst_294 : f32 to vector<1x128xf32>
      %1561 = arith.minimumf %1560, %1559 : vector<1x128xf32>
      %1562 = arith.mulf %274, %1561 : vector<1x128xf32>
      %1563 = arith.addf %arg10, %1562 : vector<1x128xf32>
      %1564 = arith.mulf %25, %arg8 : vector<1x128xf32>
      %1565 = arith.mulf %27, %arg9 : vector<1x128xf32>
      %1566 = arith.addf %1564, %1565 : vector<1x128xf32>
      %1567 = arith.mulf %29, %arg10 : vector<1x128xf32>
      %1568 = arith.addf %1566, %1567 : vector<1x128xf32>
      %1569 = arith.mulf %31, %arg11 : vector<1x128xf32>
      %1570 = arith.addf %1568, %1569 : vector<1x128xf32>
      %1571 = arith.mulf %39, %arg12 : vector<1x128xf32>
      %1572 = arith.addf %1570, %1571 : vector<1x128xf32>
      %cst_295 = arith.constant -1.000000e+05 : f32
      %cst_296 = arith.constant 1.000000e+05 : f32
      %1573 = vector.broadcast %cst_295 : f32 to vector<1x128xf32>
      %1574 = arith.maximumf %1573, %1572 : vector<1x128xf32>
      %1575 = vector.broadcast %cst_296 : f32 to vector<1x128xf32>
      %1576 = arith.minimumf %1575, %1574 : vector<1x128xf32>
      %1577 = arith.mulf %274, %1576 : vector<1x128xf32>
      %1578 = arith.addf %arg11, %1577 : vector<1x128xf32>
      %1579 = arith.addf %arg12, %274 : vector<1x128xf32>
      %1580 = arith.mulf %1, %1533 : vector<1x128xf32>
      %1581 = arith.mulf %3, %1548 : vector<1x128xf32>
      %1582 = arith.addf %1580, %1581 : vector<1x128xf32>
      %1583 = arith.mulf %5, %1563 : vector<1x128xf32>
      %1584 = arith.addf %1582, %1583 : vector<1x128xf32>
      %1585 = arith.mulf %7, %1578 : vector<1x128xf32>
      %1586 = arith.addf %1584, %1585 : vector<1x128xf32>
      %1587 = arith.mulf %33, %1579 : vector<1x128xf32>
      %1588 = arith.addf %1586, %1587 : vector<1x128xf32>
      %cst_297 = arith.constant -1.000000e+05 : f32
      %cst_298 = arith.constant 1.000000e+05 : f32
      %1589 = vector.broadcast %cst_297 : f32 to vector<1x128xf32>
      %1590 = arith.maximumf %1589, %1588 : vector<1x128xf32>
      %1591 = vector.broadcast %cst_298 : f32 to vector<1x128xf32>
      %1592 = arith.minimumf %1591, %1590 : vector<1x128xf32>
      %1593 = arith.mulf %274, %1592 : vector<1x128xf32>
      %1594 = arith.addf %1533, %1593 : vector<1x128xf32>
      %1595 = arith.mulf %9, %1533 : vector<1x128xf32>
      %1596 = arith.mulf %11, %1548 : vector<1x128xf32>
      %1597 = arith.addf %1595, %1596 : vector<1x128xf32>
      %1598 = arith.mulf %13, %1563 : vector<1x128xf32>
      %1599 = arith.addf %1597, %1598 : vector<1x128xf32>
      %1600 = arith.mulf %15, %1578 : vector<1x128xf32>
      %1601 = arith.addf %1599, %1600 : vector<1x128xf32>
      %1602 = arith.mulf %35, %1579 : vector<1x128xf32>
      %1603 = arith.addf %1601, %1602 : vector<1x128xf32>
      %cst_299 = arith.constant -1.000000e+05 : f32
      %cst_300 = arith.constant 1.000000e+05 : f32
      %1604 = vector.broadcast %cst_299 : f32 to vector<1x128xf32>
      %1605 = arith.maximumf %1604, %1603 : vector<1x128xf32>
      %1606 = vector.broadcast %cst_300 : f32 to vector<1x128xf32>
      %1607 = arith.minimumf %1606, %1605 : vector<1x128xf32>
      %1608 = arith.mulf %274, %1607 : vector<1x128xf32>
      %1609 = arith.addf %1548, %1608 : vector<1x128xf32>
      %1610 = arith.mulf %17, %1533 : vector<1x128xf32>
      %1611 = arith.mulf %19, %1548 : vector<1x128xf32>
      %1612 = arith.addf %1610, %1611 : vector<1x128xf32>
      %1613 = arith.mulf %21, %1563 : vector<1x128xf32>
      %1614 = arith.addf %1612, %1613 : vector<1x128xf32>
      %1615 = arith.mulf %23, %1578 : vector<1x128xf32>
      %1616 = arith.addf %1614, %1615 : vector<1x128xf32>
      %1617 = arith.mulf %37, %1579 : vector<1x128xf32>
      %1618 = arith.addf %1616, %1617 : vector<1x128xf32>
      %cst_301 = arith.constant -1.000000e+05 : f32
      %cst_302 = arith.constant 1.000000e+05 : f32
      %1619 = vector.broadcast %cst_301 : f32 to vector<1x128xf32>
      %1620 = arith.maximumf %1619, %1618 : vector<1x128xf32>
      %1621 = vector.broadcast %cst_302 : f32 to vector<1x128xf32>
      %1622 = arith.minimumf %1621, %1620 : vector<1x128xf32>
      %1623 = arith.mulf %274, %1622 : vector<1x128xf32>
      %1624 = arith.addf %1563, %1623 : vector<1x128xf32>
      %1625 = arith.mulf %25, %1533 : vector<1x128xf32>
      %1626 = arith.mulf %27, %1548 : vector<1x128xf32>
      %1627 = arith.addf %1625, %1626 : vector<1x128xf32>
      %1628 = arith.mulf %29, %1563 : vector<1x128xf32>
      %1629 = arith.addf %1627, %1628 : vector<1x128xf32>
      %1630 = arith.mulf %31, %1578 : vector<1x128xf32>
      %1631 = arith.addf %1629, %1630 : vector<1x128xf32>
      %1632 = arith.mulf %39, %1579 : vector<1x128xf32>
      %1633 = arith.addf %1631, %1632 : vector<1x128xf32>
      %cst_303 = arith.constant -1.000000e+05 : f32
      %cst_304 = arith.constant 1.000000e+05 : f32
      %1634 = vector.broadcast %cst_303 : f32 to vector<1x128xf32>
      %1635 = arith.maximumf %1634, %1633 : vector<1x128xf32>
      %1636 = vector.broadcast %cst_304 : f32 to vector<1x128xf32>
      %1637 = arith.minimumf %1636, %1635 : vector<1x128xf32>
      %1638 = arith.mulf %274, %1637 : vector<1x128xf32>
      %1639 = arith.addf %1578, %1638 : vector<1x128xf32>
      %1640 = arith.addf %1579, %274 : vector<1x128xf32>
      %1641 = arith.mulf %1, %1594 : vector<1x128xf32>
      %1642 = arith.mulf %3, %1609 : vector<1x128xf32>
      %1643 = arith.addf %1641, %1642 : vector<1x128xf32>
      %1644 = arith.mulf %5, %1624 : vector<1x128xf32>
      %1645 = arith.addf %1643, %1644 : vector<1x128xf32>
      %1646 = arith.mulf %7, %1639 : vector<1x128xf32>
      %1647 = arith.addf %1645, %1646 : vector<1x128xf32>
      %1648 = arith.mulf %33, %1640 : vector<1x128xf32>
      %1649 = arith.addf %1647, %1648 : vector<1x128xf32>
      %cst_305 = arith.constant -1.000000e+05 : f32
      %cst_306 = arith.constant 1.000000e+05 : f32
      %1650 = vector.broadcast %cst_305 : f32 to vector<1x128xf32>
      %1651 = arith.maximumf %1650, %1649 : vector<1x128xf32>
      %1652 = vector.broadcast %cst_306 : f32 to vector<1x128xf32>
      %1653 = arith.minimumf %1652, %1651 : vector<1x128xf32>
      %1654 = arith.mulf %274, %1653 : vector<1x128xf32>
      %1655 = arith.addf %1594, %1654 : vector<1x128xf32>
      %1656 = arith.mulf %9, %1594 : vector<1x128xf32>
      %1657 = arith.mulf %11, %1609 : vector<1x128xf32>
      %1658 = arith.addf %1656, %1657 : vector<1x128xf32>
      %1659 = arith.mulf %13, %1624 : vector<1x128xf32>
      %1660 = arith.addf %1658, %1659 : vector<1x128xf32>
      %1661 = arith.mulf %15, %1639 : vector<1x128xf32>
      %1662 = arith.addf %1660, %1661 : vector<1x128xf32>
      %1663 = arith.mulf %35, %1640 : vector<1x128xf32>
      %1664 = arith.addf %1662, %1663 : vector<1x128xf32>
      %cst_307 = arith.constant -1.000000e+05 : f32
      %cst_308 = arith.constant 1.000000e+05 : f32
      %1665 = vector.broadcast %cst_307 : f32 to vector<1x128xf32>
      %1666 = arith.maximumf %1665, %1664 : vector<1x128xf32>
      %1667 = vector.broadcast %cst_308 : f32 to vector<1x128xf32>
      %1668 = arith.minimumf %1667, %1666 : vector<1x128xf32>
      %1669 = arith.mulf %274, %1668 : vector<1x128xf32>
      %1670 = arith.addf %1609, %1669 : vector<1x128xf32>
      %1671 = arith.mulf %17, %1594 : vector<1x128xf32>
      %1672 = arith.mulf %19, %1609 : vector<1x128xf32>
      %1673 = arith.addf %1671, %1672 : vector<1x128xf32>
      %1674 = arith.mulf %21, %1624 : vector<1x128xf32>
      %1675 = arith.addf %1673, %1674 : vector<1x128xf32>
      %1676 = arith.mulf %23, %1639 : vector<1x128xf32>
      %1677 = arith.addf %1675, %1676 : vector<1x128xf32>
      %1678 = arith.mulf %37, %1640 : vector<1x128xf32>
      %1679 = arith.addf %1677, %1678 : vector<1x128xf32>
      %cst_309 = arith.constant -1.000000e+05 : f32
      %cst_310 = arith.constant 1.000000e+05 : f32
      %1680 = vector.broadcast %cst_309 : f32 to vector<1x128xf32>
      %1681 = arith.maximumf %1680, %1679 : vector<1x128xf32>
      %1682 = vector.broadcast %cst_310 : f32 to vector<1x128xf32>
      %1683 = arith.minimumf %1682, %1681 : vector<1x128xf32>
      %1684 = arith.mulf %274, %1683 : vector<1x128xf32>
      %1685 = arith.addf %1624, %1684 : vector<1x128xf32>
      %1686 = arith.mulf %25, %1594 : vector<1x128xf32>
      %1687 = arith.mulf %27, %1609 : vector<1x128xf32>
      %1688 = arith.addf %1686, %1687 : vector<1x128xf32>
      %1689 = arith.mulf %29, %1624 : vector<1x128xf32>
      %1690 = arith.addf %1688, %1689 : vector<1x128xf32>
      %1691 = arith.mulf %31, %1639 : vector<1x128xf32>
      %1692 = arith.addf %1690, %1691 : vector<1x128xf32>
      %1693 = arith.mulf %39, %1640 : vector<1x128xf32>
      %1694 = arith.addf %1692, %1693 : vector<1x128xf32>
      %cst_311 = arith.constant -1.000000e+05 : f32
      %cst_312 = arith.constant 1.000000e+05 : f32
      %1695 = vector.broadcast %cst_311 : f32 to vector<1x128xf32>
      %1696 = arith.maximumf %1695, %1694 : vector<1x128xf32>
      %1697 = vector.broadcast %cst_312 : f32 to vector<1x128xf32>
      %1698 = arith.minimumf %1697, %1696 : vector<1x128xf32>
      %1699 = arith.mulf %274, %1698 : vector<1x128xf32>
      %1700 = arith.addf %1639, %1699 : vector<1x128xf32>
      %1701 = arith.addf %1640, %274 : vector<1x128xf32>
      %1702 = arith.mulf %1, %1655 : vector<1x128xf32>
      %1703 = arith.mulf %3, %1670 : vector<1x128xf32>
      %1704 = arith.addf %1702, %1703 : vector<1x128xf32>
      %1705 = arith.mulf %5, %1685 : vector<1x128xf32>
      %1706 = arith.addf %1704, %1705 : vector<1x128xf32>
      %1707 = arith.mulf %7, %1700 : vector<1x128xf32>
      %1708 = arith.addf %1706, %1707 : vector<1x128xf32>
      %1709 = arith.mulf %33, %1701 : vector<1x128xf32>
      %1710 = arith.addf %1708, %1709 : vector<1x128xf32>
      %cst_313 = arith.constant -1.000000e+05 : f32
      %cst_314 = arith.constant 1.000000e+05 : f32
      %1711 = vector.broadcast %cst_313 : f32 to vector<1x128xf32>
      %1712 = arith.maximumf %1711, %1710 : vector<1x128xf32>
      %1713 = vector.broadcast %cst_314 : f32 to vector<1x128xf32>
      %1714 = arith.minimumf %1713, %1712 : vector<1x128xf32>
      %1715 = arith.mulf %274, %1714 : vector<1x128xf32>
      %1716 = arith.addf %1655, %1715 : vector<1x128xf32>
      %1717 = arith.mulf %9, %1655 : vector<1x128xf32>
      %1718 = arith.mulf %11, %1670 : vector<1x128xf32>
      %1719 = arith.addf %1717, %1718 : vector<1x128xf32>
      %1720 = arith.mulf %13, %1685 : vector<1x128xf32>
      %1721 = arith.addf %1719, %1720 : vector<1x128xf32>
      %1722 = arith.mulf %15, %1700 : vector<1x128xf32>
      %1723 = arith.addf %1721, %1722 : vector<1x128xf32>
      %1724 = arith.mulf %35, %1701 : vector<1x128xf32>
      %1725 = arith.addf %1723, %1724 : vector<1x128xf32>
      %cst_315 = arith.constant -1.000000e+05 : f32
      %cst_316 = arith.constant 1.000000e+05 : f32
      %1726 = vector.broadcast %cst_315 : f32 to vector<1x128xf32>
      %1727 = arith.maximumf %1726, %1725 : vector<1x128xf32>
      %1728 = vector.broadcast %cst_316 : f32 to vector<1x128xf32>
      %1729 = arith.minimumf %1728, %1727 : vector<1x128xf32>
      %1730 = arith.mulf %274, %1729 : vector<1x128xf32>
      %1731 = arith.addf %1670, %1730 : vector<1x128xf32>
      %1732 = arith.mulf %17, %1655 : vector<1x128xf32>
      %1733 = arith.mulf %19, %1670 : vector<1x128xf32>
      %1734 = arith.addf %1732, %1733 : vector<1x128xf32>
      %1735 = arith.mulf %21, %1685 : vector<1x128xf32>
      %1736 = arith.addf %1734, %1735 : vector<1x128xf32>
      %1737 = arith.mulf %23, %1700 : vector<1x128xf32>
      %1738 = arith.addf %1736, %1737 : vector<1x128xf32>
      %1739 = arith.mulf %37, %1701 : vector<1x128xf32>
      %1740 = arith.addf %1738, %1739 : vector<1x128xf32>
      %cst_317 = arith.constant -1.000000e+05 : f32
      %cst_318 = arith.constant 1.000000e+05 : f32
      %1741 = vector.broadcast %cst_317 : f32 to vector<1x128xf32>
      %1742 = arith.maximumf %1741, %1740 : vector<1x128xf32>
      %1743 = vector.broadcast %cst_318 : f32 to vector<1x128xf32>
      %1744 = arith.minimumf %1743, %1742 : vector<1x128xf32>
      %1745 = arith.mulf %274, %1744 : vector<1x128xf32>
      %1746 = arith.addf %1685, %1745 : vector<1x128xf32>
      %1747 = arith.mulf %25, %1655 : vector<1x128xf32>
      %1748 = arith.mulf %27, %1670 : vector<1x128xf32>
      %1749 = arith.addf %1747, %1748 : vector<1x128xf32>
      %1750 = arith.mulf %29, %1685 : vector<1x128xf32>
      %1751 = arith.addf %1749, %1750 : vector<1x128xf32>
      %1752 = arith.mulf %31, %1700 : vector<1x128xf32>
      %1753 = arith.addf %1751, %1752 : vector<1x128xf32>
      %1754 = arith.mulf %39, %1701 : vector<1x128xf32>
      %1755 = arith.addf %1753, %1754 : vector<1x128xf32>
      %cst_319 = arith.constant -1.000000e+05 : f32
      %cst_320 = arith.constant 1.000000e+05 : f32
      %1756 = vector.broadcast %cst_319 : f32 to vector<1x128xf32>
      %1757 = arith.maximumf %1756, %1755 : vector<1x128xf32>
      %1758 = vector.broadcast %cst_320 : f32 to vector<1x128xf32>
      %1759 = arith.minimumf %1758, %1757 : vector<1x128xf32>
      %1760 = arith.mulf %274, %1759 : vector<1x128xf32>
      %1761 = arith.addf %1700, %1760 : vector<1x128xf32>
      %1762 = arith.addf %1701, %274 : vector<1x128xf32>
      scf.yield %1716, %1731, %1746, %1761, %1762 : vector<1x128xf32>, vector<1x128xf32>, vector<1x128xf32>, vector<1x128xf32>, vector<1x128xf32>
    }
    %c4_i32_56 = arith.constant 4 : i32
    %281 = arith.muli %277, %c4_i32_56 : i32
    %282 = arith.subi %272, %281 : i32
    %c0_i32_57 = arith.constant 0 : i32
    %283 = arith.cmpi sgt, %282, %c0_i32_57 : i32
    %cst_58 = arith.constant 0.000000e+00 : f32
    %284 = arith.select %283, %273, %cst_58 : f32
    %285 = vector.broadcast %284 : f32 to vector<1x128xf32>
    %286 = arith.mulf %1, %280#0 : vector<1x128xf32>
    %287 = arith.mulf %3, %280#1 : vector<1x128xf32>
    %288 = arith.addf %286, %287 : vector<1x128xf32>
    %289 = arith.mulf %5, %280#2 : vector<1x128xf32>
    %290 = arith.addf %288, %289 : vector<1x128xf32>
    %291 = arith.mulf %7, %280#3 : vector<1x128xf32>
    %292 = arith.addf %290, %291 : vector<1x128xf32>
    %293 = arith.mulf %33, %280#4 : vector<1x128xf32>
    %294 = arith.addf %292, %293 : vector<1x128xf32>
    %cst_59 = arith.constant -1.000000e+05 : f32
    %cst_60 = arith.constant 1.000000e+05 : f32
    %295 = vector.broadcast %cst_59 : f32 to vector<1x128xf32>
    %296 = arith.maximumf %295, %294 : vector<1x128xf32>
    %297 = vector.broadcast %cst_60 : f32 to vector<1x128xf32>
    %298 = arith.minimumf %297, %296 : vector<1x128xf32>
    %299 = arith.mulf %285, %298 : vector<1x128xf32>
    %300 = arith.addf %280#0, %299 : vector<1x128xf32>
    %301 = arith.mulf %9, %280#0 : vector<1x128xf32>
    %302 = arith.mulf %11, %280#1 : vector<1x128xf32>
    %303 = arith.addf %301, %302 : vector<1x128xf32>
    %304 = arith.mulf %13, %280#2 : vector<1x128xf32>
    %305 = arith.addf %303, %304 : vector<1x128xf32>
    %306 = arith.mulf %15, %280#3 : vector<1x128xf32>
    %307 = arith.addf %305, %306 : vector<1x128xf32>
    %308 = arith.mulf %35, %280#4 : vector<1x128xf32>
    %309 = arith.addf %307, %308 : vector<1x128xf32>
    %cst_61 = arith.constant -1.000000e+05 : f32
    %cst_62 = arith.constant 1.000000e+05 : f32
    %310 = vector.broadcast %cst_61 : f32 to vector<1x128xf32>
    %311 = arith.maximumf %310, %309 : vector<1x128xf32>
    %312 = vector.broadcast %cst_62 : f32 to vector<1x128xf32>
    %313 = arith.minimumf %312, %311 : vector<1x128xf32>
    %314 = arith.mulf %285, %313 : vector<1x128xf32>
    %315 = arith.addf %280#1, %314 : vector<1x128xf32>
    %316 = arith.mulf %17, %280#0 : vector<1x128xf32>
    %317 = arith.mulf %19, %280#1 : vector<1x128xf32>
    %318 = arith.addf %316, %317 : vector<1x128xf32>
    %319 = arith.mulf %21, %280#2 : vector<1x128xf32>
    %320 = arith.addf %318, %319 : vector<1x128xf32>
    %321 = arith.mulf %23, %280#3 : vector<1x128xf32>
    %322 = arith.addf %320, %321 : vector<1x128xf32>
    %323 = arith.mulf %37, %280#4 : vector<1x128xf32>
    %324 = arith.addf %322, %323 : vector<1x128xf32>
    %cst_63 = arith.constant -1.000000e+05 : f32
    %cst_64 = arith.constant 1.000000e+05 : f32
    %325 = vector.broadcast %cst_63 : f32 to vector<1x128xf32>
    %326 = arith.maximumf %325, %324 : vector<1x128xf32>
    %327 = vector.broadcast %cst_64 : f32 to vector<1x128xf32>
    %328 = arith.minimumf %327, %326 : vector<1x128xf32>
    %329 = arith.mulf %285, %328 : vector<1x128xf32>
    %330 = arith.addf %280#2, %329 : vector<1x128xf32>
    %331 = arith.mulf %25, %280#0 : vector<1x128xf32>
    %332 = arith.mulf %27, %280#1 : vector<1x128xf32>
    %333 = arith.addf %331, %332 : vector<1x128xf32>
    %334 = arith.mulf %29, %280#2 : vector<1x128xf32>
    %335 = arith.addf %333, %334 : vector<1x128xf32>
    %336 = arith.mulf %31, %280#3 : vector<1x128xf32>
    %337 = arith.addf %335, %336 : vector<1x128xf32>
    %338 = arith.mulf %39, %280#4 : vector<1x128xf32>
    %339 = arith.addf %337, %338 : vector<1x128xf32>
    %cst_65 = arith.constant -1.000000e+05 : f32
    %cst_66 = arith.constant 1.000000e+05 : f32
    %340 = vector.broadcast %cst_65 : f32 to vector<1x128xf32>
    %341 = arith.maximumf %340, %339 : vector<1x128xf32>
    %342 = vector.broadcast %cst_66 : f32 to vector<1x128xf32>
    %343 = arith.minimumf %342, %341 : vector<1x128xf32>
    %344 = arith.mulf %285, %343 : vector<1x128xf32>
    %345 = arith.addf %280#3, %344 : vector<1x128xf32>
    %346 = arith.addf %280#4, %285 : vector<1x128xf32>
    %c1_i32_67 = arith.constant 1 : i32
    %347 = arith.cmpi sgt, %282, %c1_i32_67 : i32
    %cst_68 = arith.constant 0.000000e+00 : f32
    %348 = arith.select %347, %273, %cst_68 : f32
    %349 = vector.broadcast %348 : f32 to vector<1x128xf32>
    %350 = arith.mulf %1, %300 : vector<1x128xf32>
    %351 = arith.mulf %3, %315 : vector<1x128xf32>
    %352 = arith.addf %350, %351 : vector<1x128xf32>
    %353 = arith.mulf %5, %330 : vector<1x128xf32>
    %354 = arith.addf %352, %353 : vector<1x128xf32>
    %355 = arith.mulf %7, %345 : vector<1x128xf32>
    %356 = arith.addf %354, %355 : vector<1x128xf32>
    %357 = arith.mulf %33, %346 : vector<1x128xf32>
    %358 = arith.addf %356, %357 : vector<1x128xf32>
    %cst_69 = arith.constant -1.000000e+05 : f32
    %cst_70 = arith.constant 1.000000e+05 : f32
    %359 = vector.broadcast %cst_69 : f32 to vector<1x128xf32>
    %360 = arith.maximumf %359, %358 : vector<1x128xf32>
    %361 = vector.broadcast %cst_70 : f32 to vector<1x128xf32>
    %362 = arith.minimumf %361, %360 : vector<1x128xf32>
    %363 = arith.mulf %349, %362 : vector<1x128xf32>
    %364 = arith.addf %300, %363 : vector<1x128xf32>
    %365 = arith.mulf %9, %300 : vector<1x128xf32>
    %366 = arith.mulf %11, %315 : vector<1x128xf32>
    %367 = arith.addf %365, %366 : vector<1x128xf32>
    %368 = arith.mulf %13, %330 : vector<1x128xf32>
    %369 = arith.addf %367, %368 : vector<1x128xf32>
    %370 = arith.mulf %15, %345 : vector<1x128xf32>
    %371 = arith.addf %369, %370 : vector<1x128xf32>
    %372 = arith.mulf %35, %346 : vector<1x128xf32>
    %373 = arith.addf %371, %372 : vector<1x128xf32>
    %cst_71 = arith.constant -1.000000e+05 : f32
    %cst_72 = arith.constant 1.000000e+05 : f32
    %374 = vector.broadcast %cst_71 : f32 to vector<1x128xf32>
    %375 = arith.maximumf %374, %373 : vector<1x128xf32>
    %376 = vector.broadcast %cst_72 : f32 to vector<1x128xf32>
    %377 = arith.minimumf %376, %375 : vector<1x128xf32>
    %378 = arith.mulf %349, %377 : vector<1x128xf32>
    %379 = arith.addf %315, %378 : vector<1x128xf32>
    %380 = arith.mulf %17, %300 : vector<1x128xf32>
    %381 = arith.mulf %19, %315 : vector<1x128xf32>
    %382 = arith.addf %380, %381 : vector<1x128xf32>
    %383 = arith.mulf %21, %330 : vector<1x128xf32>
    %384 = arith.addf %382, %383 : vector<1x128xf32>
    %385 = arith.mulf %23, %345 : vector<1x128xf32>
    %386 = arith.addf %384, %385 : vector<1x128xf32>
    %387 = arith.mulf %37, %346 : vector<1x128xf32>
    %388 = arith.addf %386, %387 : vector<1x128xf32>
    %cst_73 = arith.constant -1.000000e+05 : f32
    %cst_74 = arith.constant 1.000000e+05 : f32
    %389 = vector.broadcast %cst_73 : f32 to vector<1x128xf32>
    %390 = arith.maximumf %389, %388 : vector<1x128xf32>
    %391 = vector.broadcast %cst_74 : f32 to vector<1x128xf32>
    %392 = arith.minimumf %391, %390 : vector<1x128xf32>
    %393 = arith.mulf %349, %392 : vector<1x128xf32>
    %394 = arith.addf %330, %393 : vector<1x128xf32>
    %395 = arith.mulf %25, %300 : vector<1x128xf32>
    %396 = arith.mulf %27, %315 : vector<1x128xf32>
    %397 = arith.addf %395, %396 : vector<1x128xf32>
    %398 = arith.mulf %29, %330 : vector<1x128xf32>
    %399 = arith.addf %397, %398 : vector<1x128xf32>
    %400 = arith.mulf %31, %345 : vector<1x128xf32>
    %401 = arith.addf %399, %400 : vector<1x128xf32>
    %402 = arith.mulf %39, %346 : vector<1x128xf32>
    %403 = arith.addf %401, %402 : vector<1x128xf32>
    %cst_75 = arith.constant -1.000000e+05 : f32
    %cst_76 = arith.constant 1.000000e+05 : f32
    %404 = vector.broadcast %cst_75 : f32 to vector<1x128xf32>
    %405 = arith.maximumf %404, %403 : vector<1x128xf32>
    %406 = vector.broadcast %cst_76 : f32 to vector<1x128xf32>
    %407 = arith.minimumf %406, %405 : vector<1x128xf32>
    %408 = arith.mulf %349, %407 : vector<1x128xf32>
    %409 = arith.addf %345, %408 : vector<1x128xf32>
    %410 = arith.addf %346, %349 : vector<1x128xf32>
    %c2_i32_77 = arith.constant 2 : i32
    %411 = arith.cmpi sgt, %282, %c2_i32_77 : i32
    %cst_78 = arith.constant 0.000000e+00 : f32
    %412 = arith.select %411, %273, %cst_78 : f32
    %413 = vector.broadcast %412 : f32 to vector<1x128xf32>
    %414 = arith.mulf %1, %364 : vector<1x128xf32>
    %415 = arith.mulf %3, %379 : vector<1x128xf32>
    %416 = arith.addf %414, %415 : vector<1x128xf32>
    %417 = arith.mulf %5, %394 : vector<1x128xf32>
    %418 = arith.addf %416, %417 : vector<1x128xf32>
    %419 = arith.mulf %7, %409 : vector<1x128xf32>
    %420 = arith.addf %418, %419 : vector<1x128xf32>
    %421 = arith.mulf %33, %410 : vector<1x128xf32>
    %422 = arith.addf %420, %421 : vector<1x128xf32>
    %cst_79 = arith.constant -1.000000e+05 : f32
    %cst_80 = arith.constant 1.000000e+05 : f32
    %423 = vector.broadcast %cst_79 : f32 to vector<1x128xf32>
    %424 = arith.maximumf %423, %422 : vector<1x128xf32>
    %425 = vector.broadcast %cst_80 : f32 to vector<1x128xf32>
    %426 = arith.minimumf %425, %424 : vector<1x128xf32>
    %427 = arith.mulf %413, %426 : vector<1x128xf32>
    %428 = arith.addf %364, %427 : vector<1x128xf32>
    %429 = arith.mulf %9, %364 : vector<1x128xf32>
    %430 = arith.mulf %11, %379 : vector<1x128xf32>
    %431 = arith.addf %429, %430 : vector<1x128xf32>
    %432 = arith.mulf %13, %394 : vector<1x128xf32>
    %433 = arith.addf %431, %432 : vector<1x128xf32>
    %434 = arith.mulf %15, %409 : vector<1x128xf32>
    %435 = arith.addf %433, %434 : vector<1x128xf32>
    %436 = arith.mulf %35, %410 : vector<1x128xf32>
    %437 = arith.addf %435, %436 : vector<1x128xf32>
    %cst_81 = arith.constant -1.000000e+05 : f32
    %cst_82 = arith.constant 1.000000e+05 : f32
    %438 = vector.broadcast %cst_81 : f32 to vector<1x128xf32>
    %439 = arith.maximumf %438, %437 : vector<1x128xf32>
    %440 = vector.broadcast %cst_82 : f32 to vector<1x128xf32>
    %441 = arith.minimumf %440, %439 : vector<1x128xf32>
    %442 = arith.mulf %413, %441 : vector<1x128xf32>
    %443 = arith.addf %379, %442 : vector<1x128xf32>
    %444 = arith.mulf %17, %364 : vector<1x128xf32>
    %445 = arith.mulf %19, %379 : vector<1x128xf32>
    %446 = arith.addf %444, %445 : vector<1x128xf32>
    %447 = arith.mulf %21, %394 : vector<1x128xf32>
    %448 = arith.addf %446, %447 : vector<1x128xf32>
    %449 = arith.mulf %23, %409 : vector<1x128xf32>
    %450 = arith.addf %448, %449 : vector<1x128xf32>
    %451 = arith.mulf %37, %410 : vector<1x128xf32>
    %452 = arith.addf %450, %451 : vector<1x128xf32>
    %cst_83 = arith.constant -1.000000e+05 : f32
    %cst_84 = arith.constant 1.000000e+05 : f32
    %453 = vector.broadcast %cst_83 : f32 to vector<1x128xf32>
    %454 = arith.maximumf %453, %452 : vector<1x128xf32>
    %455 = vector.broadcast %cst_84 : f32 to vector<1x128xf32>
    %456 = arith.minimumf %455, %454 : vector<1x128xf32>
    %457 = arith.mulf %413, %456 : vector<1x128xf32>
    %458 = arith.addf %394, %457 : vector<1x128xf32>
    %459 = arith.mulf %25, %364 : vector<1x128xf32>
    %460 = arith.mulf %27, %379 : vector<1x128xf32>
    %461 = arith.addf %459, %460 : vector<1x128xf32>
    %462 = arith.mulf %29, %394 : vector<1x128xf32>
    %463 = arith.addf %461, %462 : vector<1x128xf32>
    %464 = arith.mulf %31, %409 : vector<1x128xf32>
    %465 = arith.addf %463, %464 : vector<1x128xf32>
    %466 = arith.mulf %39, %410 : vector<1x128xf32>
    %467 = arith.addf %465, %466 : vector<1x128xf32>
    %cst_85 = arith.constant -1.000000e+05 : f32
    %cst_86 = arith.constant 1.000000e+05 : f32
    %468 = vector.broadcast %cst_85 : f32 to vector<1x128xf32>
    %469 = arith.maximumf %468, %467 : vector<1x128xf32>
    %470 = vector.broadcast %cst_86 : f32 to vector<1x128xf32>
    %471 = arith.minimumf %470, %469 : vector<1x128xf32>
    %472 = arith.mulf %413, %471 : vector<1x128xf32>
    %473 = arith.addf %409, %472 : vector<1x128xf32>
    %474 = arith.select %43, %428, %40 : vector<1x128xi1>, vector<1x128xf32>
    %475 = arith.select %45, %443, %474 : vector<1x128xi1>, vector<1x128xf32>
    %476 = arith.select %47, %458, %475 : vector<1x128xi1>, vector<1x128xf32>
    %477 = arith.select %49, %473, %476 : vector<1x128xi1>, vector<1x128xf32>
    %c2_87 = arith.constant 2 : index
    %c0_88 = arith.constant 0 : index
    %478 = vector.load %arg6[%c2_87, %c0_88] : memref<8x128xf32, #tpu.memory_space<vmem>>, vector<1x128xf32>
    tpu.vector_store %arg6[%c2_87, %c0_88], %477 {strides = array<i32>} : memref<8x128xf32, #tpu.memory_space<vmem>>, vector<1x128xf32>,
    %c2_89 = arith.constant 2 : index
    %479 = memref.load %arg2[%c2_89] : memref<7xi32, #tpu.memory_space<smem>>
    %c0_i32_90 = arith.constant 0 : i32
    %480 = arith.maxsi %479, %c0_i32_90 : i32
    %c2_91 = arith.constant 2 : index
    %481 = memref.load %arg1[%c2_91] : memref<7xf32, #tpu.memory_space<smem>>
    %482 = vector.broadcast %481 : f32 to vector<1x128xf32>
    %c2_92 = arith.constant 2 : index
    %483 = memref.load %arg0[%c2_92] : memref<7xf32, #tpu.memory_space<smem>>
    %484 = vector.broadcast %483 : f32 to vector<1x128xf32>
    %c2_i32_93 = arith.constant 2 : i32
    %485 = arith.shrui %480, %c2_i32_93 : i32
    %c0_i32_94 = arith.constant 0 : i32
    %486 = arith.subi %485, %c0_i32_94 : i32
    %487 = arith.addi %c0_i32_94, %486 : i32
    %c1_i32_95 = arith.constant 1 : i32
    %488:5 = scf.for %arg7 = %c0_i32_94 to %487 step %c1_i32_95 iter_args(%arg8 = %428, %arg9 = %443, %arg10 = %458, %arg11 = %473, %arg12 = %484) -> (vector<1x128xf32>, vector<1x128xf32>, vector<1x128xf32>, vector<1x128xf32>, vector<1x128xf32>)  : i32 {
      %1519 = arith.mulf %1, %arg8 : vector<1x128xf32>
      %1520 = arith.mulf %3, %arg9 : vector<1x128xf32>
      %1521 = arith.addf %1519, %1520 : vector<1x128xf32>
      %1522 = arith.mulf %5, %arg10 : vector<1x128xf32>
      %1523 = arith.addf %1521, %1522 : vector<1x128xf32>
      %1524 = arith.mulf %7, %arg11 : vector<1x128xf32>
      %1525 = arith.addf %1523, %1524 : vector<1x128xf32>
      %1526 = arith.mulf %33, %arg12 : vector<1x128xf32>
      %1527 = arith.addf %1525, %1526 : vector<1x128xf32>
      %cst_289 = arith.constant -1.000000e+05 : f32
      %cst_290 = arith.constant 1.000000e+05 : f32
      %1528 = vector.broadcast %cst_289 : f32 to vector<1x128xf32>
      %1529 = arith.maximumf %1528, %1527 : vector<1x128xf32>
      %1530 = vector.broadcast %cst_290 : f32 to vector<1x128xf32>
      %1531 = arith.minimumf %1530, %1529 : vector<1x128xf32>
      %1532 = arith.mulf %482, %1531 : vector<1x128xf32>
      %1533 = arith.addf %arg8, %1532 : vector<1x128xf32>
      %1534 = arith.mulf %9, %arg8 : vector<1x128xf32>
      %1535 = arith.mulf %11, %arg9 : vector<1x128xf32>
      %1536 = arith.addf %1534, %1535 : vector<1x128xf32>
      %1537 = arith.mulf %13, %arg10 : vector<1x128xf32>
      %1538 = arith.addf %1536, %1537 : vector<1x128xf32>
      %1539 = arith.mulf %15, %arg11 : vector<1x128xf32>
      %1540 = arith.addf %1538, %1539 : vector<1x128xf32>
      %1541 = arith.mulf %35, %arg12 : vector<1x128xf32>
      %1542 = arith.addf %1540, %1541 : vector<1x128xf32>
      %cst_291 = arith.constant -1.000000e+05 : f32
      %cst_292 = arith.constant 1.000000e+05 : f32
      %1543 = vector.broadcast %cst_291 : f32 to vector<1x128xf32>
      %1544 = arith.maximumf %1543, %1542 : vector<1x128xf32>
      %1545 = vector.broadcast %cst_292 : f32 to vector<1x128xf32>
      %1546 = arith.minimumf %1545, %1544 : vector<1x128xf32>
      %1547 = arith.mulf %482, %1546 : vector<1x128xf32>
      %1548 = arith.addf %arg9, %1547 : vector<1x128xf32>
      %1549 = arith.mulf %17, %arg8 : vector<1x128xf32>
      %1550 = arith.mulf %19, %arg9 : vector<1x128xf32>
      %1551 = arith.addf %1549, %1550 : vector<1x128xf32>
      %1552 = arith.mulf %21, %arg10 : vector<1x128xf32>
      %1553 = arith.addf %1551, %1552 : vector<1x128xf32>
      %1554 = arith.mulf %23, %arg11 : vector<1x128xf32>
      %1555 = arith.addf %1553, %1554 : vector<1x128xf32>
      %1556 = arith.mulf %37, %arg12 : vector<1x128xf32>
      %1557 = arith.addf %1555, %1556 : vector<1x128xf32>
      %cst_293 = arith.constant -1.000000e+05 : f32
      %cst_294 = arith.constant 1.000000e+05 : f32
      %1558 = vector.broadcast %cst_293 : f32 to vector<1x128xf32>
      %1559 = arith.maximumf %1558, %1557 : vector<1x128xf32>
      %1560 = vector.broadcast %cst_294 : f32 to vector<1x128xf32>
      %1561 = arith.minimumf %1560, %1559 : vector<1x128xf32>
      %1562 = arith.mulf %482, %1561 : vector<1x128xf32>
      %1563 = arith.addf %arg10, %1562 : vector<1x128xf32>
      %1564 = arith.mulf %25, %arg8 : vector<1x128xf32>
      %1565 = arith.mulf %27, %arg9 : vector<1x128xf32>
      %1566 = arith.addf %1564, %1565 : vector<1x128xf32>
      %1567 = arith.mulf %29, %arg10 : vector<1x128xf32>
      %1568 = arith.addf %1566, %1567 : vector<1x128xf32>
      %1569 = arith.mulf %31, %arg11 : vector<1x128xf32>
      %1570 = arith.addf %1568, %1569 : vector<1x128xf32>
      %1571 = arith.mulf %39, %arg12 : vector<1x128xf32>
      %1572 = arith.addf %1570, %1571 : vector<1x128xf32>
      %cst_295 = arith.constant -1.000000e+05 : f32
      %cst_296 = arith.constant 1.000000e+05 : f32
      %1573 = vector.broadcast %cst_295 : f32 to vector<1x128xf32>
      %1574 = arith.maximumf %1573, %1572 : vector<1x128xf32>
      %1575 = vector.broadcast %cst_296 : f32 to vector<1x128xf32>
      %1576 = arith.minimumf %1575, %1574 : vector<1x128xf32>
      %1577 = arith.mulf %482, %1576 : vector<1x128xf32>
      %1578 = arith.addf %arg11, %1577 : vector<1x128xf32>
      %1579 = arith.addf %arg12, %482 : vector<1x128xf32>
      %1580 = arith.mulf %1, %1533 : vector<1x128xf32>
      %1581 = arith.mulf %3, %1548 : vector<1x128xf32>
      %1582 = arith.addf %1580, %1581 : vector<1x128xf32>
      %1583 = arith.mulf %5, %1563 : vector<1x128xf32>
      %1584 = arith.addf %1582, %1583 : vector<1x128xf32>
      %1585 = arith.mulf %7, %1578 : vector<1x128xf32>
      %1586 = arith.addf %1584, %1585 : vector<1x128xf32>
      %1587 = arith.mulf %33, %1579 : vector<1x128xf32>
      %1588 = arith.addf %1586, %1587 : vector<1x128xf32>
      %cst_297 = arith.constant -1.000000e+05 : f32
      %cst_298 = arith.constant 1.000000e+05 : f32
      %1589 = vector.broadcast %cst_297 : f32 to vector<1x128xf32>
      %1590 = arith.maximumf %1589, %1588 : vector<1x128xf32>
      %1591 = vector.broadcast %cst_298 : f32 to vector<1x128xf32>
      %1592 = arith.minimumf %1591, %1590 : vector<1x128xf32>
      %1593 = arith.mulf %482, %1592 : vector<1x128xf32>
      %1594 = arith.addf %1533, %1593 : vector<1x128xf32>
      %1595 = arith.mulf %9, %1533 : vector<1x128xf32>
      %1596 = arith.mulf %11, %1548 : vector<1x128xf32>
      %1597 = arith.addf %1595, %1596 : vector<1x128xf32>
      %1598 = arith.mulf %13, %1563 : vector<1x128xf32>
      %1599 = arith.addf %1597, %1598 : vector<1x128xf32>
      %1600 = arith.mulf %15, %1578 : vector<1x128xf32>
      %1601 = arith.addf %1599, %1600 : vector<1x128xf32>
      %1602 = arith.mulf %35, %1579 : vector<1x128xf32>
      %1603 = arith.addf %1601, %1602 : vector<1x128xf32>
      %cst_299 = arith.constant -1.000000e+05 : f32
      %cst_300 = arith.constant 1.000000e+05 : f32
      %1604 = vector.broadcast %cst_299 : f32 to vector<1x128xf32>
      %1605 = arith.maximumf %1604, %1603 : vector<1x128xf32>
      %1606 = vector.broadcast %cst_300 : f32 to vector<1x128xf32>
      %1607 = arith.minimumf %1606, %1605 : vector<1x128xf32>
      %1608 = arith.mulf %482, %1607 : vector<1x128xf32>
      %1609 = arith.addf %1548, %1608 : vector<1x128xf32>
      %1610 = arith.mulf %17, %1533 : vector<1x128xf32>
      %1611 = arith.mulf %19, %1548 : vector<1x128xf32>
      %1612 = arith.addf %1610, %1611 : vector<1x128xf32>
      %1613 = arith.mulf %21, %1563 : vector<1x128xf32>
      %1614 = arith.addf %1612, %1613 : vector<1x128xf32>
      %1615 = arith.mulf %23, %1578 : vector<1x128xf32>
      %1616 = arith.addf %1614, %1615 : vector<1x128xf32>
      %1617 = arith.mulf %37, %1579 : vector<1x128xf32>
      %1618 = arith.addf %1616, %1617 : vector<1x128xf32>
      %cst_301 = arith.constant -1.000000e+05 : f32
      %cst_302 = arith.constant 1.000000e+05 : f32
      %1619 = vector.broadcast %cst_301 : f32 to vector<1x128xf32>
      %1620 = arith.maximumf %1619, %1618 : vector<1x128xf32>
      %1621 = vector.broadcast %cst_302 : f32 to vector<1x128xf32>
      %1622 = arith.minimumf %1621, %1620 : vector<1x128xf32>
      %1623 = arith.mulf %482, %1622 : vector<1x128xf32>
      %1624 = arith.addf %1563, %1623 : vector<1x128xf32>
      %1625 = arith.mulf %25, %1533 : vector<1x128xf32>
      %1626 = arith.mulf %27, %1548 : vector<1x128xf32>
      %1627 = arith.addf %1625, %1626 : vector<1x128xf32>
      %1628 = arith.mulf %29, %1563 : vector<1x128xf32>
      %1629 = arith.addf %1627, %1628 : vector<1x128xf32>
      %1630 = arith.mulf %31, %1578 : vector<1x128xf32>
      %1631 = arith.addf %1629, %1630 : vector<1x128xf32>
      %1632 = arith.mulf %39, %1579 : vector<1x128xf32>
      %1633 = arith.addf %1631, %1632 : vector<1x128xf32>
      %cst_303 = arith.constant -1.000000e+05 : f32
      %cst_304 = arith.constant 1.000000e+05 : f32
      %1634 = vector.broadcast %cst_303 : f32 to vector<1x128xf32>
      %1635 = arith.maximumf %1634, %1633 : vector<1x128xf32>
      %1636 = vector.broadcast %cst_304 : f32 to vector<1x128xf32>
      %1637 = arith.minimumf %1636, %1635 : vector<1x128xf32>
      %1638 = arith.mulf %482, %1637 : vector<1x128xf32>
      %1639 = arith.addf %1578, %1638 : vector<1x128xf32>
      %1640 = arith.addf %1579, %482 : vector<1x128xf32>
      %1641 = arith.mulf %1, %1594 : vector<1x128xf32>
      %1642 = arith.mulf %3, %1609 : vector<1x128xf32>
      %1643 = arith.addf %1641, %1642 : vector<1x128xf32>
      %1644 = arith.mulf %5, %1624 : vector<1x128xf32>
      %1645 = arith.addf %1643, %1644 : vector<1x128xf32>
      %1646 = arith.mulf %7, %1639 : vector<1x128xf32>
      %1647 = arith.addf %1645, %1646 : vector<1x128xf32>
      %1648 = arith.mulf %33, %1640 : vector<1x128xf32>
      %1649 = arith.addf %1647, %1648 : vector<1x128xf32>
      %cst_305 = arith.constant -1.000000e+05 : f32
      %cst_306 = arith.constant 1.000000e+05 : f32
      %1650 = vector.broadcast %cst_305 : f32 to vector<1x128xf32>
      %1651 = arith.maximumf %1650, %1649 : vector<1x128xf32>
      %1652 = vector.broadcast %cst_306 : f32 to vector<1x128xf32>
      %1653 = arith.minimumf %1652, %1651 : vector<1x128xf32>
      %1654 = arith.mulf %482, %1653 : vector<1x128xf32>
      %1655 = arith.addf %1594, %1654 : vector<1x128xf32>
      %1656 = arith.mulf %9, %1594 : vector<1x128xf32>
      %1657 = arith.mulf %11, %1609 : vector<1x128xf32>
      %1658 = arith.addf %1656, %1657 : vector<1x128xf32>
      %1659 = arith.mulf %13, %1624 : vector<1x128xf32>
      %1660 = arith.addf %1658, %1659 : vector<1x128xf32>
      %1661 = arith.mulf %15, %1639 : vector<1x128xf32>
      %1662 = arith.addf %1660, %1661 : vector<1x128xf32>
      %1663 = arith.mulf %35, %1640 : vector<1x128xf32>
      %1664 = arith.addf %1662, %1663 : vector<1x128xf32>
      %cst_307 = arith.constant -1.000000e+05 : f32
      %cst_308 = arith.constant 1.000000e+05 : f32
      %1665 = vector.broadcast %cst_307 : f32 to vector<1x128xf32>
      %1666 = arith.maximumf %1665, %1664 : vector<1x128xf32>
      %1667 = vector.broadcast %cst_308 : f32 to vector<1x128xf32>
      %1668 = arith.minimumf %1667, %1666 : vector<1x128xf32>
      %1669 = arith.mulf %482, %1668 : vector<1x128xf32>
      %1670 = arith.addf %1609, %1669 : vector<1x128xf32>
      %1671 = arith.mulf %17, %1594 : vector<1x128xf32>
      %1672 = arith.mulf %19, %1609 : vector<1x128xf32>
      %1673 = arith.addf %1671, %1672 : vector<1x128xf32>
      %1674 = arith.mulf %21, %1624 : vector<1x128xf32>
      %1675 = arith.addf %1673, %1674 : vector<1x128xf32>
      %1676 = arith.mulf %23, %1639 : vector<1x128xf32>
      %1677 = arith.addf %1675, %1676 : vector<1x128xf32>
      %1678 = arith.mulf %37, %1640 : vector<1x128xf32>
      %1679 = arith.addf %1677, %1678 : vector<1x128xf32>
      %cst_309 = arith.constant -1.000000e+05 : f32
      %cst_310 = arith.constant 1.000000e+05 : f32
      %1680 = vector.broadcast %cst_309 : f32 to vector<1x128xf32>
      %1681 = arith.maximumf %1680, %1679 : vector<1x128xf32>
      %1682 = vector.broadcast %cst_310 : f32 to vector<1x128xf32>
      %1683 = arith.minimumf %1682, %1681 : vector<1x128xf32>
      %1684 = arith.mulf %482, %1683 : vector<1x128xf32>
      %1685 = arith.addf %1624, %1684 : vector<1x128xf32>
      %1686 = arith.mulf %25, %1594 : vector<1x128xf32>
      %1687 = arith.mulf %27, %1609 : vector<1x128xf32>
      %1688 = arith.addf %1686, %1687 : vector<1x128xf32>
      %1689 = arith.mulf %29, %1624 : vector<1x128xf32>
      %1690 = arith.addf %1688, %1689 : vector<1x128xf32>
      %1691 = arith.mulf %31, %1639 : vector<1x128xf32>
      %1692 = arith.addf %1690, %1691 : vector<1x128xf32>
      %1693 = arith.mulf %39, %1640 : vector<1x128xf32>
      %1694 = arith.addf %1692, %1693 : vector<1x128xf32>
      %cst_311 = arith.constant -1.000000e+05 : f32
      %cst_312 = arith.constant 1.000000e+05 : f32
      %1695 = vector.broadcast %cst_311 : f32 to vector<1x128xf32>
      %1696 = arith.maximumf %1695, %1694 : vector<1x128xf32>
      %1697 = vector.broadcast %cst_312 : f32 to vector<1x128xf32>
      %1698 = arith.minimumf %1697, %1696 : vector<1x128xf32>
      %1699 = arith.mulf %482, %1698 : vector<1x128xf32>
      %1700 = arith.addf %1639, %1699 : vector<1x128xf32>
      %1701 = arith.addf %1640, %482 : vector<1x128xf32>
      %1702 = arith.mulf %1, %1655 : vector<1x128xf32>
      %1703 = arith.mulf %3, %1670 : vector<1x128xf32>
      %1704 = arith.addf %1702, %1703 : vector<1x128xf32>
      %1705 = arith.mulf %5, %1685 : vector<1x128xf32>
      %1706 = arith.addf %1704, %1705 : vector<1x128xf32>
      %1707 = arith.mulf %7, %1700 : vector<1x128xf32>
      %1708 = arith.addf %1706, %1707 : vector<1x128xf32>
      %1709 = arith.mulf %33, %1701 : vector<1x128xf32>
      %1710 = arith.addf %1708, %1709 : vector<1x128xf32>
      %cst_313 = arith.constant -1.000000e+05 : f32
      %cst_314 = arith.constant 1.000000e+05 : f32
      %1711 = vector.broadcast %cst_313 : f32 to vector<1x128xf32>
      %1712 = arith.maximumf %1711, %1710 : vector<1x128xf32>
      %1713 = vector.broadcast %cst_314 : f32 to vector<1x128xf32>
      %1714 = arith.minimumf %1713, %1712 : vector<1x128xf32>
      %1715 = arith.mulf %482, %1714 : vector<1x128xf32>
      %1716 = arith.addf %1655, %1715 : vector<1x128xf32>
      %1717 = arith.mulf %9, %1655 : vector<1x128xf32>
      %1718 = arith.mulf %11, %1670 : vector<1x128xf32>
      %1719 = arith.addf %1717, %1718 : vector<1x128xf32>
      %1720 = arith.mulf %13, %1685 : vector<1x128xf32>
      %1721 = arith.addf %1719, %1720 : vector<1x128xf32>
      %1722 = arith.mulf %15, %1700 : vector<1x128xf32>
      %1723 = arith.addf %1721, %1722 : vector<1x128xf32>
      %1724 = arith.mulf %35, %1701 : vector<1x128xf32>
      %1725 = arith.addf %1723, %1724 : vector<1x128xf32>
      %cst_315 = arith.constant -1.000000e+05 : f32
      %cst_316 = arith.constant 1.000000e+05 : f32
      %1726 = vector.broadcast %cst_315 : f32 to vector<1x128xf32>
      %1727 = arith.maximumf %1726, %1725 : vector<1x128xf32>
      %1728 = vector.broadcast %cst_316 : f32 to vector<1x128xf32>
      %1729 = arith.minimumf %1728, %1727 : vector<1x128xf32>
      %1730 = arith.mulf %482, %1729 : vector<1x128xf32>
      %1731 = arith.addf %1670, %1730 : vector<1x128xf32>
      %1732 = arith.mulf %17, %1655 : vector<1x128xf32>
      %1733 = arith.mulf %19, %1670 : vector<1x128xf32>
      %1734 = arith.addf %1732, %1733 : vector<1x128xf32>
      %1735 = arith.mulf %21, %1685 : vector<1x128xf32>
      %1736 = arith.addf %1734, %1735 : vector<1x128xf32>
      %1737 = arith.mulf %23, %1700 : vector<1x128xf32>
      %1738 = arith.addf %1736, %1737 : vector<1x128xf32>
      %1739 = arith.mulf %37, %1701 : vector<1x128xf32>
      %1740 = arith.addf %1738, %1739 : vector<1x128xf32>
      %cst_317 = arith.constant -1.000000e+05 : f32
      %cst_318 = arith.constant 1.000000e+05 : f32
      %1741 = vector.broadcast %cst_317 : f32 to vector<1x128xf32>
      %1742 = arith.maximumf %1741, %1740 : vector<1x128xf32>
      %1743 = vector.broadcast %cst_318 : f32 to vector<1x128xf32>
      %1744 = arith.minimumf %1743, %1742 : vector<1x128xf32>
      %1745 = arith.mulf %482, %1744 : vector<1x128xf32>
      %1746 = arith.addf %1685, %1745 : vector<1x128xf32>
      %1747 = arith.mulf %25, %1655 : vector<1x128xf32>
      %1748 = arith.mulf %27, %1670 : vector<1x128xf32>
      %1749 = arith.addf %1747, %1748 : vector<1x128xf32>
      %1750 = arith.mulf %29, %1685 : vector<1x128xf32>
      %1751 = arith.addf %1749, %1750 : vector<1x128xf32>
      %1752 = arith.mulf %31, %1700 : vector<1x128xf32>
      %1753 = arith.addf %1751, %1752 : vector<1x128xf32>
      %1754 = arith.mulf %39, %1701 : vector<1x128xf32>
      %1755 = arith.addf %1753, %1754 : vector<1x128xf32>
      %cst_319 = arith.constant -1.000000e+05 : f32
      %cst_320 = arith.constant 1.000000e+05 : f32
      %1756 = vector.broadcast %cst_319 : f32 to vector<1x128xf32>
      %1757 = arith.maximumf %1756, %1755 : vector<1x128xf32>
      %1758 = vector.broadcast %cst_320 : f32 to vector<1x128xf32>
      %1759 = arith.minimumf %1758, %1757 : vector<1x128xf32>
      %1760 = arith.mulf %482, %1759 : vector<1x128xf32>
      %1761 = arith.addf %1700, %1760 : vector<1x128xf32>
      %1762 = arith.addf %1701, %482 : vector<1x128xf32>
      scf.yield %1716, %1731, %1746, %1761, %1762 : vector<1x128xf32>, vector<1x128xf32>, vector<1x128xf32>, vector<1x128xf32>, vector<1x128xf32>
    }
    %c4_i32_96 = arith.constant 4 : i32
    %489 = arith.muli %485, %c4_i32_96 : i32
    %490 = arith.subi %480, %489 : i32
    %c0_i32_97 = arith.constant 0 : i32
    %491 = arith.cmpi sgt, %490, %c0_i32_97 : i32
    %cst_98 = arith.constant 0.000000e+00 : f32
    %492 = arith.select %491, %481, %cst_98 : f32
    %493 = vector.broadcast %492 : f32 to vector<1x128xf32>
    %494 = arith.mulf %1, %488#0 : vector<1x128xf32>
    %495 = arith.mulf %3, %488#1 : vector<1x128xf32>
    %496 = arith.addf %494, %495 : vector<1x128xf32>
    %497 = arith.mulf %5, %488#2 : vector<1x128xf32>
    %498 = arith.addf %496, %497 : vector<1x128xf32>
    %499 = arith.mulf %7, %488#3 : vector<1x128xf32>
    %500 = arith.addf %498, %499 : vector<1x128xf32>
    %501 = arith.mulf %33, %488#4 : vector<1x128xf32>
    %502 = arith.addf %500, %501 : vector<1x128xf32>
    %cst_99 = arith.constant -1.000000e+05 : f32
    %cst_100 = arith.constant 1.000000e+05 : f32
    %503 = vector.broadcast %cst_99 : f32 to vector<1x128xf32>
    %504 = arith.maximumf %503, %502 : vector<1x128xf32>
    %505 = vector.broadcast %cst_100 : f32 to vector<1x128xf32>
    %506 = arith.minimumf %505, %504 : vector<1x128xf32>
    %507 = arith.mulf %493, %506 : vector<1x128xf32>
    %508 = arith.addf %488#0, %507 : vector<1x128xf32>
    %509 = arith.mulf %9, %488#0 : vector<1x128xf32>
    %510 = arith.mulf %11, %488#1 : vector<1x128xf32>
    %511 = arith.addf %509, %510 : vector<1x128xf32>
    %512 = arith.mulf %13, %488#2 : vector<1x128xf32>
    %513 = arith.addf %511, %512 : vector<1x128xf32>
    %514 = arith.mulf %15, %488#3 : vector<1x128xf32>
    %515 = arith.addf %513, %514 : vector<1x128xf32>
    %516 = arith.mulf %35, %488#4 : vector<1x128xf32>
    %517 = arith.addf %515, %516 : vector<1x128xf32>
    %cst_101 = arith.constant -1.000000e+05 : f32
    %cst_102 = arith.constant 1.000000e+05 : f32
    %518 = vector.broadcast %cst_101 : f32 to vector<1x128xf32>
    %519 = arith.maximumf %518, %517 : vector<1x128xf32>
    %520 = vector.broadcast %cst_102 : f32 to vector<1x128xf32>
    %521 = arith.minimumf %520, %519 : vector<1x128xf32>
    %522 = arith.mulf %493, %521 : vector<1x128xf32>
    %523 = arith.addf %488#1, %522 : vector<1x128xf32>
    %524 = arith.mulf %17, %488#0 : vector<1x128xf32>
    %525 = arith.mulf %19, %488#1 : vector<1x128xf32>
    %526 = arith.addf %524, %525 : vector<1x128xf32>
    %527 = arith.mulf %21, %488#2 : vector<1x128xf32>
    %528 = arith.addf %526, %527 : vector<1x128xf32>
    %529 = arith.mulf %23, %488#3 : vector<1x128xf32>
    %530 = arith.addf %528, %529 : vector<1x128xf32>
    %531 = arith.mulf %37, %488#4 : vector<1x128xf32>
    %532 = arith.addf %530, %531 : vector<1x128xf32>
    %cst_103 = arith.constant -1.000000e+05 : f32
    %cst_104 = arith.constant 1.000000e+05 : f32
    %533 = vector.broadcast %cst_103 : f32 to vector<1x128xf32>
    %534 = arith.maximumf %533, %532 : vector<1x128xf32>
    %535 = vector.broadcast %cst_104 : f32 to vector<1x128xf32>
    %536 = arith.minimumf %535, %534 : vector<1x128xf32>
    %537 = arith.mulf %493, %536 : vector<1x128xf32>
    %538 = arith.addf %488#2, %537 : vector<1x128xf32>
    %539 = arith.mulf %25, %488#0 : vector<1x128xf32>
    %540 = arith.mulf %27, %488#1 : vector<1x128xf32>
    %541 = arith.addf %539, %540 : vector<1x128xf32>
    %542 = arith.mulf %29, %488#2 : vector<1x128xf32>
    %543 = arith.addf %541, %542 : vector<1x128xf32>
    %544 = arith.mulf %31, %488#3 : vector<1x128xf32>
    %545 = arith.addf %543, %544 : vector<1x128xf32>
    %546 = arith.mulf %39, %488#4 : vector<1x128xf32>
    %547 = arith.addf %545, %546 : vector<1x128xf32>
    %cst_105 = arith.constant -1.000000e+05 : f32
    %cst_106 = arith.constant 1.000000e+05 : f32
    %548 = vector.broadcast %cst_105 : f32 to vector<1x128xf32>
    %549 = arith.maximumf %548, %547 : vector<1x128xf32>
    %550 = vector.broadcast %cst_106 : f32 to vector<1x128xf32>
    %551 = arith.minimumf %550, %549 : vector<1x128xf32>
    %552 = arith.mulf %493, %551 : vector<1x128xf32>
    %553 = arith.addf %488#3, %552 : vector<1x128xf32>
    %554 = arith.addf %488#4, %493 : vector<1x128xf32>
    %c1_i32_107 = arith.constant 1 : i32
    %555 = arith.cmpi sgt, %490, %c1_i32_107 : i32
    %cst_108 = arith.constant 0.000000e+00 : f32
    %556 = arith.select %555, %481, %cst_108 : f32
    %557 = vector.broadcast %556 : f32 to vector<1x128xf32>
    %558 = arith.mulf %1, %508 : vector<1x128xf32>
    %559 = arith.mulf %3, %523 : vector<1x128xf32>
    %560 = arith.addf %558, %559 : vector<1x128xf32>
    %561 = arith.mulf %5, %538 : vector<1x128xf32>
    %562 = arith.addf %560, %561 : vector<1x128xf32>
    %563 = arith.mulf %7, %553 : vector<1x128xf32>
    %564 = arith.addf %562, %563 : vector<1x128xf32>
    %565 = arith.mulf %33, %554 : vector<1x128xf32>
    %566 = arith.addf %564, %565 : vector<1x128xf32>
    %cst_109 = arith.constant -1.000000e+05 : f32
    %cst_110 = arith.constant 1.000000e+05 : f32
    %567 = vector.broadcast %cst_109 : f32 to vector<1x128xf32>
    %568 = arith.maximumf %567, %566 : vector<1x128xf32>
    %569 = vector.broadcast %cst_110 : f32 to vector<1x128xf32>
    %570 = arith.minimumf %569, %568 : vector<1x128xf32>
    %571 = arith.mulf %557, %570 : vector<1x128xf32>
    %572 = arith.addf %508, %571 : vector<1x128xf32>
    %573 = arith.mulf %9, %508 : vector<1x128xf32>
    %574 = arith.mulf %11, %523 : vector<1x128xf32>
    %575 = arith.addf %573, %574 : vector<1x128xf32>
    %576 = arith.mulf %13, %538 : vector<1x128xf32>
    %577 = arith.addf %575, %576 : vector<1x128xf32>
    %578 = arith.mulf %15, %553 : vector<1x128xf32>
    %579 = arith.addf %577, %578 : vector<1x128xf32>
    %580 = arith.mulf %35, %554 : vector<1x128xf32>
    %581 = arith.addf %579, %580 : vector<1x128xf32>
    %cst_111 = arith.constant -1.000000e+05 : f32
    %cst_112 = arith.constant 1.000000e+05 : f32
    %582 = vector.broadcast %cst_111 : f32 to vector<1x128xf32>
    %583 = arith.maximumf %582, %581 : vector<1x128xf32>
    %584 = vector.broadcast %cst_112 : f32 to vector<1x128xf32>
    %585 = arith.minimumf %584, %583 : vector<1x128xf32>
    %586 = arith.mulf %557, %585 : vector<1x128xf32>
    %587 = arith.addf %523, %586 : vector<1x128xf32>
    %588 = arith.mulf %17, %508 : vector<1x128xf32>
    %589 = arith.mulf %19, %523 : vector<1x128xf32>
    %590 = arith.addf %588, %589 : vector<1x128xf32>
    %591 = arith.mulf %21, %538 : vector<1x128xf32>
    %592 = arith.addf %590, %591 : vector<1x128xf32>
    %593 = arith.mulf %23, %553 : vector<1x128xf32>
    %594 = arith.addf %592, %593 : vector<1x128xf32>
    %595 = arith.mulf %37, %554 : vector<1x128xf32>
    %596 = arith.addf %594, %595 : vector<1x128xf32>
    %cst_113 = arith.constant -1.000000e+05 : f32
    %cst_114 = arith.constant 1.000000e+05 : f32
    %597 = vector.broadcast %cst_113 : f32 to vector<1x128xf32>
    %598 = arith.maximumf %597, %596 : vector<1x128xf32>
    %599 = vector.broadcast %cst_114 : f32 to vector<1x128xf32>
    %600 = arith.minimumf %599, %598 : vector<1x128xf32>
    %601 = arith.mulf %557, %600 : vector<1x128xf32>
    %602 = arith.addf %538, %601 : vector<1x128xf32>
    %603 = arith.mulf %25, %508 : vector<1x128xf32>
    %604 = arith.mulf %27, %523 : vector<1x128xf32>
    %605 = arith.addf %603, %604 : vector<1x128xf32>
    %606 = arith.mulf %29, %538 : vector<1x128xf32>
    %607 = arith.addf %605, %606 : vector<1x128xf32>
    %608 = arith.mulf %31, %553 : vector<1x128xf32>
    %609 = arith.addf %607, %608 : vector<1x128xf32>
    %610 = arith.mulf %39, %554 : vector<1x128xf32>
    %611 = arith.addf %609, %610 : vector<1x128xf32>
    %cst_115 = arith.constant -1.000000e+05 : f32
    %cst_116 = arith.constant 1.000000e+05 : f32
    %612 = vector.broadcast %cst_115 : f32 to vector<1x128xf32>
    %613 = arith.maximumf %612, %611 : vector<1x128xf32>
    %614 = vector.broadcast %cst_116 : f32 to vector<1x128xf32>
    %615 = arith.minimumf %614, %613 : vector<1x128xf32>
    %616 = arith.mulf %557, %615 : vector<1x128xf32>
    %617 = arith.addf %553, %616 : vector<1x128xf32>
    %618 = arith.addf %554, %557 : vector<1x128xf32>
    %c2_i32_117 = arith.constant 2 : i32
    %619 = arith.cmpi sgt, %490, %c2_i32_117 : i32
    %cst_118 = arith.constant 0.000000e+00 : f32
    %620 = arith.select %619, %481, %cst_118 : f32
    %621 = vector.broadcast %620 : f32 to vector<1x128xf32>
    %622 = arith.mulf %1, %572 : vector<1x128xf32>
    %623 = arith.mulf %3, %587 : vector<1x128xf32>
    %624 = arith.addf %622, %623 : vector<1x128xf32>
    %625 = arith.mulf %5, %602 : vector<1x128xf32>
    %626 = arith.addf %624, %625 : vector<1x128xf32>
    %627 = arith.mulf %7, %617 : vector<1x128xf32>
    %628 = arith.addf %626, %627 : vector<1x128xf32>
    %629 = arith.mulf %33, %618 : vector<1x128xf32>
    %630 = arith.addf %628, %629 : vector<1x128xf32>
    %cst_119 = arith.constant -1.000000e+05 : f32
    %cst_120 = arith.constant 1.000000e+05 : f32
    %631 = vector.broadcast %cst_119 : f32 to vector<1x128xf32>
    %632 = arith.maximumf %631, %630 : vector<1x128xf32>
    %633 = vector.broadcast %cst_120 : f32 to vector<1x128xf32>
    %634 = arith.minimumf %633, %632 : vector<1x128xf32>
    %635 = arith.mulf %621, %634 : vector<1x128xf32>
    %636 = arith.addf %572, %635 : vector<1x128xf32>
    %637 = arith.mulf %9, %572 : vector<1x128xf32>
    %638 = arith.mulf %11, %587 : vector<1x128xf32>
    %639 = arith.addf %637, %638 : vector<1x128xf32>
    %640 = arith.mulf %13, %602 : vector<1x128xf32>
    %641 = arith.addf %639, %640 : vector<1x128xf32>
    %642 = arith.mulf %15, %617 : vector<1x128xf32>
    %643 = arith.addf %641, %642 : vector<1x128xf32>
    %644 = arith.mulf %35, %618 : vector<1x128xf32>
    %645 = arith.addf %643, %644 : vector<1x128xf32>
    %cst_121 = arith.constant -1.000000e+05 : f32
    %cst_122 = arith.constant 1.000000e+05 : f32
    %646 = vector.broadcast %cst_121 : f32 to vector<1x128xf32>
    %647 = arith.maximumf %646, %645 : vector<1x128xf32>
    %648 = vector.broadcast %cst_122 : f32 to vector<1x128xf32>
    %649 = arith.minimumf %648, %647 : vector<1x128xf32>
    %650 = arith.mulf %621, %649 : vector<1x128xf32>
    %651 = arith.addf %587, %650 : vector<1x128xf32>
    %652 = arith.mulf %17, %572 : vector<1x128xf32>
    %653 = arith.mulf %19, %587 : vector<1x128xf32>
    %654 = arith.addf %652, %653 : vector<1x128xf32>
    %655 = arith.mulf %21, %602 : vector<1x128xf32>
    %656 = arith.addf %654, %655 : vector<1x128xf32>
    %657 = arith.mulf %23, %617 : vector<1x128xf32>
    %658 = arith.addf %656, %657 : vector<1x128xf32>
    %659 = arith.mulf %37, %618 : vector<1x128xf32>
    %660 = arith.addf %658, %659 : vector<1x128xf32>
    %cst_123 = arith.constant -1.000000e+05 : f32
    %cst_124 = arith.constant 1.000000e+05 : f32
    %661 = vector.broadcast %cst_123 : f32 to vector<1x128xf32>
    %662 = arith.maximumf %661, %660 : vector<1x128xf32>
    %663 = vector.broadcast %cst_124 : f32 to vector<1x128xf32>
    %664 = arith.minimumf %663, %662 : vector<1x128xf32>
    %665 = arith.mulf %621, %664 : vector<1x128xf32>
    %666 = arith.addf %602, %665 : vector<1x128xf32>
    %667 = arith.mulf %25, %572 : vector<1x128xf32>
    %668 = arith.mulf %27, %587 : vector<1x128xf32>
    %669 = arith.addf %667, %668 : vector<1x128xf32>
    %670 = arith.mulf %29, %602 : vector<1x128xf32>
    %671 = arith.addf %669, %670 : vector<1x128xf32>
    %672 = arith.mulf %31, %617 : vector<1x128xf32>
    %673 = arith.addf %671, %672 : vector<1x128xf32>
    %674 = arith.mulf %39, %618 : vector<1x128xf32>
    %675 = arith.addf %673, %674 : vector<1x128xf32>
    %cst_125 = arith.constant -1.000000e+05 : f32
    %cst_126 = arith.constant 1.000000e+05 : f32
    %676 = vector.broadcast %cst_125 : f32 to vector<1x128xf32>
    %677 = arith.maximumf %676, %675 : vector<1x128xf32>
    %678 = vector.broadcast %cst_126 : f32 to vector<1x128xf32>
    %679 = arith.minimumf %678, %677 : vector<1x128xf32>
    %680 = arith.mulf %621, %679 : vector<1x128xf32>
    %681 = arith.addf %617, %680 : vector<1x128xf32>
    %682 = arith.select %43, %636, %40 : vector<1x128xi1>, vector<1x128xf32>
    %683 = arith.select %45, %651, %682 : vector<1x128xi1>, vector<1x128xf32>
    %684 = arith.select %47, %666, %683 : vector<1x128xi1>, vector<1x128xf32>
    %685 = arith.select %49, %681, %684 : vector<1x128xi1>, vector<1x128xf32>
    %c3_127 = arith.constant 3 : index
    %c0_128 = arith.constant 0 : index
    %686 = vector.load %arg6[%c3_127, %c0_128] : memref<8x128xf32, #tpu.memory_space<vmem>>, vector<1x128xf32>
    tpu.vector_store %arg6[%c3_127, %c0_128], %685 {strides = array<i32>} : memref<8x128xf32, #tpu.memory_space<vmem>>, vector<1x128xf32>,
    %c3_129 = arith.constant 3 : index
    %687 = memref.load %arg2[%c3_129] : memref<7xi32, #tpu.memory_space<smem>>
    %c0_i32_130 = arith.constant 0 : i32
    %688 = arith.maxsi %687, %c0_i32_130 : i32
    %c3_131 = arith.constant 3 : index
    %689 = memref.load %arg1[%c3_131] : memref<7xf32, #tpu.memory_space<smem>>
    %690 = vector.broadcast %689 : f32 to vector<1x128xf32>
    %c3_132 = arith.constant 3 : index
    %691 = memref.load %arg0[%c3_132] : memref<7xf32, #tpu.memory_space<smem>>
    %692 = vector.broadcast %691 : f32 to vector<1x128xf32>
    %c2_i32_133 = arith.constant 2 : i32
    %693 = arith.shrui %688, %c2_i32_133 : i32
    %c0_i32_134 = arith.constant 0 : i32
    %694 = arith.subi %693, %c0_i32_134 : i32
    %695 = arith.addi %c0_i32_134, %694 : i32
    %c1_i32_135 = arith.constant 1 : i32
    %696:5 = scf.for %arg7 = %c0_i32_134 to %695 step %c1_i32_135 iter_args(%arg8 = %636, %arg9 = %651, %arg10 = %666, %arg11 = %681, %arg12 = %692) -> (vector<1x128xf32>, vector<1x128xf32>, vector<1x128xf32>, vector<1x128xf32>, vector<1x128xf32>)  : i32 {
      %1519 = arith.mulf %1, %arg8 : vector<1x128xf32>
      %1520 = arith.mulf %3, %arg9 : vector<1x128xf32>
      %1521 = arith.addf %1519, %1520 : vector<1x128xf32>
      %1522 = arith.mulf %5, %arg10 : vector<1x128xf32>
      %1523 = arith.addf %1521, %1522 : vector<1x128xf32>
      %1524 = arith.mulf %7, %arg11 : vector<1x128xf32>
      %1525 = arith.addf %1523, %1524 : vector<1x128xf32>
      %1526 = arith.mulf %33, %arg12 : vector<1x128xf32>
      %1527 = arith.addf %1525, %1526 : vector<1x128xf32>
      %cst_289 = arith.constant -1.000000e+05 : f32
      %cst_290 = arith.constant 1.000000e+05 : f32
      %1528 = vector.broadcast %cst_289 : f32 to vector<1x128xf32>
      %1529 = arith.maximumf %1528, %1527 : vector<1x128xf32>
      %1530 = vector.broadcast %cst_290 : f32 to vector<1x128xf32>
      %1531 = arith.minimumf %1530, %1529 : vector<1x128xf32>
      %1532 = arith.mulf %690, %1531 : vector<1x128xf32>
      %1533 = arith.addf %arg8, %1532 : vector<1x128xf32>
      %1534 = arith.mulf %9, %arg8 : vector<1x128xf32>
      %1535 = arith.mulf %11, %arg9 : vector<1x128xf32>
      %1536 = arith.addf %1534, %1535 : vector<1x128xf32>
      %1537 = arith.mulf %13, %arg10 : vector<1x128xf32>
      %1538 = arith.addf %1536, %1537 : vector<1x128xf32>
      %1539 = arith.mulf %15, %arg11 : vector<1x128xf32>
      %1540 = arith.addf %1538, %1539 : vector<1x128xf32>
      %1541 = arith.mulf %35, %arg12 : vector<1x128xf32>
      %1542 = arith.addf %1540, %1541 : vector<1x128xf32>
      %cst_291 = arith.constant -1.000000e+05 : f32
      %cst_292 = arith.constant 1.000000e+05 : f32
      %1543 = vector.broadcast %cst_291 : f32 to vector<1x128xf32>
      %1544 = arith.maximumf %1543, %1542 : vector<1x128xf32>
      %1545 = vector.broadcast %cst_292 : f32 to vector<1x128xf32>
      %1546 = arith.minimumf %1545, %1544 : vector<1x128xf32>
      %1547 = arith.mulf %690, %1546 : vector<1x128xf32>
      %1548 = arith.addf %arg9, %1547 : vector<1x128xf32>
      %1549 = arith.mulf %17, %arg8 : vector<1x128xf32>
      %1550 = arith.mulf %19, %arg9 : vector<1x128xf32>
      %1551 = arith.addf %1549, %1550 : vector<1x128xf32>
      %1552 = arith.mulf %21, %arg10 : vector<1x128xf32>
      %1553 = arith.addf %1551, %1552 : vector<1x128xf32>
      %1554 = arith.mulf %23, %arg11 : vector<1x128xf32>
      %1555 = arith.addf %1553, %1554 : vector<1x128xf32>
      %1556 = arith.mulf %37, %arg12 : vector<1x128xf32>
      %1557 = arith.addf %1555, %1556 : vector<1x128xf32>
      %cst_293 = arith.constant -1.000000e+05 : f32
      %cst_294 = arith.constant 1.000000e+05 : f32
      %1558 = vector.broadcast %cst_293 : f32 to vector<1x128xf32>
      %1559 = arith.maximumf %1558, %1557 : vector<1x128xf32>
      %1560 = vector.broadcast %cst_294 : f32 to vector<1x128xf32>
      %1561 = arith.minimumf %1560, %1559 : vector<1x128xf32>
      %1562 = arith.mulf %690, %1561 : vector<1x128xf32>
      %1563 = arith.addf %arg10, %1562 : vector<1x128xf32>
      %1564 = arith.mulf %25, %arg8 : vector<1x128xf32>
      %1565 = arith.mulf %27, %arg9 : vector<1x128xf32>
      %1566 = arith.addf %1564, %1565 : vector<1x128xf32>
      %1567 = arith.mulf %29, %arg10 : vector<1x128xf32>
      %1568 = arith.addf %1566, %1567 : vector<1x128xf32>
      %1569 = arith.mulf %31, %arg11 : vector<1x128xf32>
      %1570 = arith.addf %1568, %1569 : vector<1x128xf32>
      %1571 = arith.mulf %39, %arg12 : vector<1x128xf32>
      %1572 = arith.addf %1570, %1571 : vector<1x128xf32>
      %cst_295 = arith.constant -1.000000e+05 : f32
      %cst_296 = arith.constant 1.000000e+05 : f32
      %1573 = vector.broadcast %cst_295 : f32 to vector<1x128xf32>
      %1574 = arith.maximumf %1573, %1572 : vector<1x128xf32>
      %1575 = vector.broadcast %cst_296 : f32 to vector<1x128xf32>
      %1576 = arith.minimumf %1575, %1574 : vector<1x128xf32>
      %1577 = arith.mulf %690, %1576 : vector<1x128xf32>
      %1578 = arith.addf %arg11, %1577 : vector<1x128xf32>
      %1579 = arith.addf %arg12, %690 : vector<1x128xf32>
      %1580 = arith.mulf %1, %1533 : vector<1x128xf32>
      %1581 = arith.mulf %3, %1548 : vector<1x128xf32>
      %1582 = arith.addf %1580, %1581 : vector<1x128xf32>
      %1583 = arith.mulf %5, %1563 : vector<1x128xf32>
      %1584 = arith.addf %1582, %1583 : vector<1x128xf32>
      %1585 = arith.mulf %7, %1578 : vector<1x128xf32>
      %1586 = arith.addf %1584, %1585 : vector<1x128xf32>
      %1587 = arith.mulf %33, %1579 : vector<1x128xf32>
      %1588 = arith.addf %1586, %1587 : vector<1x128xf32>
      %cst_297 = arith.constant -1.000000e+05 : f32
      %cst_298 = arith.constant 1.000000e+05 : f32
      %1589 = vector.broadcast %cst_297 : f32 to vector<1x128xf32>
      %1590 = arith.maximumf %1589, %1588 : vector<1x128xf32>
      %1591 = vector.broadcast %cst_298 : f32 to vector<1x128xf32>
      %1592 = arith.minimumf %1591, %1590 : vector<1x128xf32>
      %1593 = arith.mulf %690, %1592 : vector<1x128xf32>
      %1594 = arith.addf %1533, %1593 : vector<1x128xf32>
      %1595 = arith.mulf %9, %1533 : vector<1x128xf32>
      %1596 = arith.mulf %11, %1548 : vector<1x128xf32>
      %1597 = arith.addf %1595, %1596 : vector<1x128xf32>
      %1598 = arith.mulf %13, %1563 : vector<1x128xf32>
      %1599 = arith.addf %1597, %1598 : vector<1x128xf32>
      %1600 = arith.mulf %15, %1578 : vector<1x128xf32>
      %1601 = arith.addf %1599, %1600 : vector<1x128xf32>
      %1602 = arith.mulf %35, %1579 : vector<1x128xf32>
      %1603 = arith.addf %1601, %1602 : vector<1x128xf32>
      %cst_299 = arith.constant -1.000000e+05 : f32
      %cst_300 = arith.constant 1.000000e+05 : f32
      %1604 = vector.broadcast %cst_299 : f32 to vector<1x128xf32>
      %1605 = arith.maximumf %1604, %1603 : vector<1x128xf32>
      %1606 = vector.broadcast %cst_300 : f32 to vector<1x128xf32>
      %1607 = arith.minimumf %1606, %1605 : vector<1x128xf32>
      %1608 = arith.mulf %690, %1607 : vector<1x128xf32>
      %1609 = arith.addf %1548, %1608 : vector<1x128xf32>
      %1610 = arith.mulf %17, %1533 : vector<1x128xf32>
      %1611 = arith.mulf %19, %1548 : vector<1x128xf32>
      %1612 = arith.addf %1610, %1611 : vector<1x128xf32>
      %1613 = arith.mulf %21, %1563 : vector<1x128xf32>
      %1614 = arith.addf %1612, %1613 : vector<1x128xf32>
      %1615 = arith.mulf %23, %1578 : vector<1x128xf32>
      %1616 = arith.addf %1614, %1615 : vector<1x128xf32>
      %1617 = arith.mulf %37, %1579 : vector<1x128xf32>
      %1618 = arith.addf %1616, %1617 : vector<1x128xf32>
      %cst_301 = arith.constant -1.000000e+05 : f32
      %cst_302 = arith.constant 1.000000e+05 : f32
      %1619 = vector.broadcast %cst_301 : f32 to vector<1x128xf32>
      %1620 = arith.maximumf %1619, %1618 : vector<1x128xf32>
      %1621 = vector.broadcast %cst_302 : f32 to vector<1x128xf32>
      %1622 = arith.minimumf %1621, %1620 : vector<1x128xf32>
      %1623 = arith.mulf %690, %1622 : vector<1x128xf32>
      %1624 = arith.addf %1563, %1623 : vector<1x128xf32>
      %1625 = arith.mulf %25, %1533 : vector<1x128xf32>
      %1626 = arith.mulf %27, %1548 : vector<1x128xf32>
      %1627 = arith.addf %1625, %1626 : vector<1x128xf32>
      %1628 = arith.mulf %29, %1563 : vector<1x128xf32>
      %1629 = arith.addf %1627, %1628 : vector<1x128xf32>
      %1630 = arith.mulf %31, %1578 : vector<1x128xf32>
      %1631 = arith.addf %1629, %1630 : vector<1x128xf32>
      %1632 = arith.mulf %39, %1579 : vector<1x128xf32>
      %1633 = arith.addf %1631, %1632 : vector<1x128xf32>
      %cst_303 = arith.constant -1.000000e+05 : f32
      %cst_304 = arith.constant 1.000000e+05 : f32
      %1634 = vector.broadcast %cst_303 : f32 to vector<1x128xf32>
      %1635 = arith.maximumf %1634, %1633 : vector<1x128xf32>
      %1636 = vector.broadcast %cst_304 : f32 to vector<1x128xf32>
      %1637 = arith.minimumf %1636, %1635 : vector<1x128xf32>
      %1638 = arith.mulf %690, %1637 : vector<1x128xf32>
      %1639 = arith.addf %1578, %1638 : vector<1x128xf32>
      %1640 = arith.addf %1579, %690 : vector<1x128xf32>
      %1641 = arith.mulf %1, %1594 : vector<1x128xf32>
      %1642 = arith.mulf %3, %1609 : vector<1x128xf32>
      %1643 = arith.addf %1641, %1642 : vector<1x128xf32>
      %1644 = arith.mulf %5, %1624 : vector<1x128xf32>
      %1645 = arith.addf %1643, %1644 : vector<1x128xf32>
      %1646 = arith.mulf %7, %1639 : vector<1x128xf32>
      %1647 = arith.addf %1645, %1646 : vector<1x128xf32>
      %1648 = arith.mulf %33, %1640 : vector<1x128xf32>
      %1649 = arith.addf %1647, %1648 : vector<1x128xf32>
      %cst_305 = arith.constant -1.000000e+05 : f32
      %cst_306 = arith.constant 1.000000e+05 : f32
      %1650 = vector.broadcast %cst_305 : f32 to vector<1x128xf32>
      %1651 = arith.maximumf %1650, %1649 : vector<1x128xf32>
      %1652 = vector.broadcast %cst_306 : f32 to vector<1x128xf32>
      %1653 = arith.minimumf %1652, %1651 : vector<1x128xf32>
      %1654 = arith.mulf %690, %1653 : vector<1x128xf32>
      %1655 = arith.addf %1594, %1654 : vector<1x128xf32>
      %1656 = arith.mulf %9, %1594 : vector<1x128xf32>
      %1657 = arith.mulf %11, %1609 : vector<1x128xf32>
      %1658 = arith.addf %1656, %1657 : vector<1x128xf32>
      %1659 = arith.mulf %13, %1624 : vector<1x128xf32>
      %1660 = arith.addf %1658, %1659 : vector<1x128xf32>
      %1661 = arith.mulf %15, %1639 : vector<1x128xf32>
      %1662 = arith.addf %1660, %1661 : vector<1x128xf32>
      %1663 = arith.mulf %35, %1640 : vector<1x128xf32>
      %1664 = arith.addf %1662, %1663 : vector<1x128xf32>
      %cst_307 = arith.constant -1.000000e+05 : f32
      %cst_308 = arith.constant 1.000000e+05 : f32
      %1665 = vector.broadcast %cst_307 : f32 to vector<1x128xf32>
      %1666 = arith.maximumf %1665, %1664 : vector<1x128xf32>
      %1667 = vector.broadcast %cst_308 : f32 to vector<1x128xf32>
      %1668 = arith.minimumf %1667, %1666 : vector<1x128xf32>
      %1669 = arith.mulf %690, %1668 : vector<1x128xf32>
      %1670 = arith.addf %1609, %1669 : vector<1x128xf32>
      %1671 = arith.mulf %17, %1594 : vector<1x128xf32>
      %1672 = arith.mulf %19, %1609 : vector<1x128xf32>
      %1673 = arith.addf %1671, %1672 : vector<1x128xf32>
      %1674 = arith.mulf %21, %1624 : vector<1x128xf32>
      %1675 = arith.addf %1673, %1674 : vector<1x128xf32>
      %1676 = arith.mulf %23, %1639 : vector<1x128xf32>
      %1677 = arith.addf %1675, %1676 : vector<1x128xf32>
      %1678 = arith.mulf %37, %1640 : vector<1x128xf32>
      %1679 = arith.addf %1677, %1678 : vector<1x128xf32>
      %cst_309 = arith.constant -1.000000e+05 : f32
      %cst_310 = arith.constant 1.000000e+05 : f32
      %1680 = vector.broadcast %cst_309 : f32 to vector<1x128xf32>
      %1681 = arith.maximumf %1680, %1679 : vector<1x128xf32>
      %1682 = vector.broadcast %cst_310 : f32 to vector<1x128xf32>
      %1683 = arith.minimumf %1682, %1681 : vector<1x128xf32>
      %1684 = arith.mulf %690, %1683 : vector<1x128xf32>
      %1685 = arith.addf %1624, %1684 : vector<1x128xf32>
      %1686 = arith.mulf %25, %1594 : vector<1x128xf32>
      %1687 = arith.mulf %27, %1609 : vector<1x128xf32>
      %1688 = arith.addf %1686, %1687 : vector<1x128xf32>
      %1689 = arith.mulf %29, %1624 : vector<1x128xf32>
      %1690 = arith.addf %1688, %1689 : vector<1x128xf32>
      %1691 = arith.mulf %31, %1639 : vector<1x128xf32>
      %1692 = arith.addf %1690, %1691 : vector<1x128xf32>
      %1693 = arith.mulf %39, %1640 : vector<1x128xf32>
      %1694 = arith.addf %1692, %1693 : vector<1x128xf32>
      %cst_311 = arith.constant -1.000000e+05 : f32
      %cst_312 = arith.constant 1.000000e+05 : f32
      %1695 = vector.broadcast %cst_311 : f32 to vector<1x128xf32>
      %1696 = arith.maximumf %1695, %1694 : vector<1x128xf32>
      %1697 = vector.broadcast %cst_312 : f32 to vector<1x128xf32>
      %1698 = arith.minimumf %1697, %1696 : vector<1x128xf32>
      %1699 = arith.mulf %690, %1698 : vector<1x128xf32>
      %1700 = arith.addf %1639, %1699 : vector<1x128xf32>
      %1701 = arith.addf %1640, %690 : vector<1x128xf32>
      %1702 = arith.mulf %1, %1655 : vector<1x128xf32>
      %1703 = arith.mulf %3, %1670 : vector<1x128xf32>
      %1704 = arith.addf %1702, %1703 : vector<1x128xf32>
      %1705 = arith.mulf %5, %1685 : vector<1x128xf32>
      %1706 = arith.addf %1704, %1705 : vector<1x128xf32>
      %1707 = arith.mulf %7, %1700 : vector<1x128xf32>
      %1708 = arith.addf %1706, %1707 : vector<1x128xf32>
      %1709 = arith.mulf %33, %1701 : vector<1x128xf32>
      %1710 = arith.addf %1708, %1709 : vector<1x128xf32>
      %cst_313 = arith.constant -1.000000e+05 : f32
      %cst_314 = arith.constant 1.000000e+05 : f32
      %1711 = vector.broadcast %cst_313 : f32 to vector<1x128xf32>
      %1712 = arith.maximumf %1711, %1710 : vector<1x128xf32>
      %1713 = vector.broadcast %cst_314 : f32 to vector<1x128xf32>
      %1714 = arith.minimumf %1713, %1712 : vector<1x128xf32>
      %1715 = arith.mulf %690, %1714 : vector<1x128xf32>
      %1716 = arith.addf %1655, %1715 : vector<1x128xf32>
      %1717 = arith.mulf %9, %1655 : vector<1x128xf32>
      %1718 = arith.mulf %11, %1670 : vector<1x128xf32>
      %1719 = arith.addf %1717, %1718 : vector<1x128xf32>
      %1720 = arith.mulf %13, %1685 : vector<1x128xf32>
      %1721 = arith.addf %1719, %1720 : vector<1x128xf32>
      %1722 = arith.mulf %15, %1700 : vector<1x128xf32>
      %1723 = arith.addf %1721, %1722 : vector<1x128xf32>
      %1724 = arith.mulf %35, %1701 : vector<1x128xf32>
      %1725 = arith.addf %1723, %1724 : vector<1x128xf32>
      %cst_315 = arith.constant -1.000000e+05 : f32
      %cst_316 = arith.constant 1.000000e+05 : f32
      %1726 = vector.broadcast %cst_315 : f32 to vector<1x128xf32>
      %1727 = arith.maximumf %1726, %1725 : vector<1x128xf32>
      %1728 = vector.broadcast %cst_316 : f32 to vector<1x128xf32>
      %1729 = arith.minimumf %1728, %1727 : vector<1x128xf32>
      %1730 = arith.mulf %690, %1729 : vector<1x128xf32>
      %1731 = arith.addf %1670, %1730 : vector<1x128xf32>
      %1732 = arith.mulf %17, %1655 : vector<1x128xf32>
      %1733 = arith.mulf %19, %1670 : vector<1x128xf32>
      %1734 = arith.addf %1732, %1733 : vector<1x128xf32>
      %1735 = arith.mulf %21, %1685 : vector<1x128xf32>
      %1736 = arith.addf %1734, %1735 : vector<1x128xf32>
      %1737 = arith.mulf %23, %1700 : vector<1x128xf32>
      %1738 = arith.addf %1736, %1737 : vector<1x128xf32>
      %1739 = arith.mulf %37, %1701 : vector<1x128xf32>
      %1740 = arith.addf %1738, %1739 : vector<1x128xf32>
      %cst_317 = arith.constant -1.000000e+05 : f32
      %cst_318 = arith.constant 1.000000e+05 : f32
      %1741 = vector.broadcast %cst_317 : f32 to vector<1x128xf32>
      %1742 = arith.maximumf %1741, %1740 : vector<1x128xf32>
      %1743 = vector.broadcast %cst_318 : f32 to vector<1x128xf32>
      %1744 = arith.minimumf %1743, %1742 : vector<1x128xf32>
      %1745 = arith.mulf %690, %1744 : vector<1x128xf32>
      %1746 = arith.addf %1685, %1745 : vector<1x128xf32>
      %1747 = arith.mulf %25, %1655 : vector<1x128xf32>
      %1748 = arith.mulf %27, %1670 : vector<1x128xf32>
      %1749 = arith.addf %1747, %1748 : vector<1x128xf32>
      %1750 = arith.mulf %29, %1685 : vector<1x128xf32>
      %1751 = arith.addf %1749, %1750 : vector<1x128xf32>
      %1752 = arith.mulf %31, %1700 : vector<1x128xf32>
      %1753 = arith.addf %1751, %1752 : vector<1x128xf32>
      %1754 = arith.mulf %39, %1701 : vector<1x128xf32>
      %1755 = arith.addf %1753, %1754 : vector<1x128xf32>
      %cst_319 = arith.constant -1.000000e+05 : f32
      %cst_320 = arith.constant 1.000000e+05 : f32
      %1756 = vector.broadcast %cst_319 : f32 to vector<1x128xf32>
      %1757 = arith.maximumf %1756, %1755 : vector<1x128xf32>
      %1758 = vector.broadcast %cst_320 : f32 to vector<1x128xf32>
      %1759 = arith.minimumf %1758, %1757 : vector<1x128xf32>
      %1760 = arith.mulf %690, %1759 : vector<1x128xf32>
      %1761 = arith.addf %1700, %1760 : vector<1x128xf32>
      %1762 = arith.addf %1701, %690 : vector<1x128xf32>
      scf.yield %1716, %1731, %1746, %1761, %1762 : vector<1x128xf32>, vector<1x128xf32>, vector<1x128xf32>, vector<1x128xf32>, vector<1x128xf32>
    }
    %c4_i32_136 = arith.constant 4 : i32
    %697 = arith.muli %693, %c4_i32_136 : i32
    %698 = arith.subi %688, %697 : i32
    %c0_i32_137 = arith.constant 0 : i32
    %699 = arith.cmpi sgt, %698, %c0_i32_137 : i32
    %cst_138 = arith.constant 0.000000e+00 : f32
    %700 = arith.select %699, %689, %cst_138 : f32
    %701 = vector.broadcast %700 : f32 to vector<1x128xf32>
    %702 = arith.mulf %1, %696#0 : vector<1x128xf32>
    %703 = arith.mulf %3, %696#1 : vector<1x128xf32>
    %704 = arith.addf %702, %703 : vector<1x128xf32>
    %705 = arith.mulf %5, %696#2 : vector<1x128xf32>
    %706 = arith.addf %704, %705 : vector<1x128xf32>
    %707 = arith.mulf %7, %696#3 : vector<1x128xf32>
    %708 = arith.addf %706, %707 : vector<1x128xf32>
    %709 = arith.mulf %33, %696#4 : vector<1x128xf32>
    %710 = arith.addf %708, %709 : vector<1x128xf32>
    %cst_139 = arith.constant -1.000000e+05 : f32
    %cst_140 = arith.constant 1.000000e+05 : f32
    %711 = vector.broadcast %cst_139 : f32 to vector<1x128xf32>
    %712 = arith.maximumf %711, %710 : vector<1x128xf32>
    %713 = vector.broadcast %cst_140 : f32 to vector<1x128xf32>
    %714 = arith.minimumf %713, %712 : vector<1x128xf32>
    %715 = arith.mulf %701, %714 : vector<1x128xf32>
    %716 = arith.addf %696#0, %715 : vector<1x128xf32>
    %717 = arith.mulf %9, %696#0 : vector<1x128xf32>
    %718 = arith.mulf %11, %696#1 : vector<1x128xf32>
    %719 = arith.addf %717, %718 : vector<1x128xf32>
    %720 = arith.mulf %13, %696#2 : vector<1x128xf32>
    %721 = arith.addf %719, %720 : vector<1x128xf32>
    %722 = arith.mulf %15, %696#3 : vector<1x128xf32>
    %723 = arith.addf %721, %722 : vector<1x128xf32>
    %724 = arith.mulf %35, %696#4 : vector<1x128xf32>
    %725 = arith.addf %723, %724 : vector<1x128xf32>
    %cst_141 = arith.constant -1.000000e+05 : f32
    %cst_142 = arith.constant 1.000000e+05 : f32
    %726 = vector.broadcast %cst_141 : f32 to vector<1x128xf32>
    %727 = arith.maximumf %726, %725 : vector<1x128xf32>
    %728 = vector.broadcast %cst_142 : f32 to vector<1x128xf32>
    %729 = arith.minimumf %728, %727 : vector<1x128xf32>
    %730 = arith.mulf %701, %729 : vector<1x128xf32>
    %731 = arith.addf %696#1, %730 : vector<1x128xf32>
    %732 = arith.mulf %17, %696#0 : vector<1x128xf32>
    %733 = arith.mulf %19, %696#1 : vector<1x128xf32>
    %734 = arith.addf %732, %733 : vector<1x128xf32>
    %735 = arith.mulf %21, %696#2 : vector<1x128xf32>
    %736 = arith.addf %734, %735 : vector<1x128xf32>
    %737 = arith.mulf %23, %696#3 : vector<1x128xf32>
    %738 = arith.addf %736, %737 : vector<1x128xf32>
    %739 = arith.mulf %37, %696#4 : vector<1x128xf32>
    %740 = arith.addf %738, %739 : vector<1x128xf32>
    %cst_143 = arith.constant -1.000000e+05 : f32
    %cst_144 = arith.constant 1.000000e+05 : f32
    %741 = vector.broadcast %cst_143 : f32 to vector<1x128xf32>
    %742 = arith.maximumf %741, %740 : vector<1x128xf32>
    %743 = vector.broadcast %cst_144 : f32 to vector<1x128xf32>
    %744 = arith.minimumf %743, %742 : vector<1x128xf32>
    %745 = arith.mulf %701, %744 : vector<1x128xf32>
    %746 = arith.addf %696#2, %745 : vector<1x128xf32>
    %747 = arith.mulf %25, %696#0 : vector<1x128xf32>
    %748 = arith.mulf %27, %696#1 : vector<1x128xf32>
    %749 = arith.addf %747, %748 : vector<1x128xf32>
    %750 = arith.mulf %29, %696#2 : vector<1x128xf32>
    %751 = arith.addf %749, %750 : vector<1x128xf32>
    %752 = arith.mulf %31, %696#3 : vector<1x128xf32>
    %753 = arith.addf %751, %752 : vector<1x128xf32>
    %754 = arith.mulf %39, %696#4 : vector<1x128xf32>
    %755 = arith.addf %753, %754 : vector<1x128xf32>
    %cst_145 = arith.constant -1.000000e+05 : f32
    %cst_146 = arith.constant 1.000000e+05 : f32
    %756 = vector.broadcast %cst_145 : f32 to vector<1x128xf32>
    %757 = arith.maximumf %756, %755 : vector<1x128xf32>
    %758 = vector.broadcast %cst_146 : f32 to vector<1x128xf32>
    %759 = arith.minimumf %758, %757 : vector<1x128xf32>
    %760 = arith.mulf %701, %759 : vector<1x128xf32>
    %761 = arith.addf %696#3, %760 : vector<1x128xf32>
    %762 = arith.addf %696#4, %701 : vector<1x128xf32>
    %c1_i32_147 = arith.constant 1 : i32
    %763 = arith.cmpi sgt, %698, %c1_i32_147 : i32
    %cst_148 = arith.constant 0.000000e+00 : f32
    %764 = arith.select %763, %689, %cst_148 : f32
    %765 = vector.broadcast %764 : f32 to vector<1x128xf32>
    %766 = arith.mulf %1, %716 : vector<1x128xf32>
    %767 = arith.mulf %3, %731 : vector<1x128xf32>
    %768 = arith.addf %766, %767 : vector<1x128xf32>
    %769 = arith.mulf %5, %746 : vector<1x128xf32>
    %770 = arith.addf %768, %769 : vector<1x128xf32>
    %771 = arith.mulf %7, %761 : vector<1x128xf32>
    %772 = arith.addf %770, %771 : vector<1x128xf32>
    %773 = arith.mulf %33, %762 : vector<1x128xf32>
    %774 = arith.addf %772, %773 : vector<1x128xf32>
    %cst_149 = arith.constant -1.000000e+05 : f32
    %cst_150 = arith.constant 1.000000e+05 : f32
    %775 = vector.broadcast %cst_149 : f32 to vector<1x128xf32>
    %776 = arith.maximumf %775, %774 : vector<1x128xf32>
    %777 = vector.broadcast %cst_150 : f32 to vector<1x128xf32>
    %778 = arith.minimumf %777, %776 : vector<1x128xf32>
    %779 = arith.mulf %765, %778 : vector<1x128xf32>
    %780 = arith.addf %716, %779 : vector<1x128xf32>
    %781 = arith.mulf %9, %716 : vector<1x128xf32>
    %782 = arith.mulf %11, %731 : vector<1x128xf32>
    %783 = arith.addf %781, %782 : vector<1x128xf32>
    %784 = arith.mulf %13, %746 : vector<1x128xf32>
    %785 = arith.addf %783, %784 : vector<1x128xf32>
    %786 = arith.mulf %15, %761 : vector<1x128xf32>
    %787 = arith.addf %785, %786 : vector<1x128xf32>
    %788 = arith.mulf %35, %762 : vector<1x128xf32>
    %789 = arith.addf %787, %788 : vector<1x128xf32>
    %cst_151 = arith.constant -1.000000e+05 : f32
    %cst_152 = arith.constant 1.000000e+05 : f32
    %790 = vector.broadcast %cst_151 : f32 to vector<1x128xf32>
    %791 = arith.maximumf %790, %789 : vector<1x128xf32>
    %792 = vector.broadcast %cst_152 : f32 to vector<1x128xf32>
    %793 = arith.minimumf %792, %791 : vector<1x128xf32>
    %794 = arith.mulf %765, %793 : vector<1x128xf32>
    %795 = arith.addf %731, %794 : vector<1x128xf32>
    %796 = arith.mulf %17, %716 : vector<1x128xf32>
    %797 = arith.mulf %19, %731 : vector<1x128xf32>
    %798 = arith.addf %796, %797 : vector<1x128xf32>
    %799 = arith.mulf %21, %746 : vector<1x128xf32>
    %800 = arith.addf %798, %799 : vector<1x128xf32>
    %801 = arith.mulf %23, %761 : vector<1x128xf32>
    %802 = arith.addf %800, %801 : vector<1x128xf32>
    %803 = arith.mulf %37, %762 : vector<1x128xf32>
    %804 = arith.addf %802, %803 : vector<1x128xf32>
    %cst_153 = arith.constant -1.000000e+05 : f32
    %cst_154 = arith.constant 1.000000e+05 : f32
    %805 = vector.broadcast %cst_153 : f32 to vector<1x128xf32>
    %806 = arith.maximumf %805, %804 : vector<1x128xf32>
    %807 = vector.broadcast %cst_154 : f32 to vector<1x128xf32>
    %808 = arith.minimumf %807, %806 : vector<1x128xf32>
    %809 = arith.mulf %765, %808 : vector<1x128xf32>
    %810 = arith.addf %746, %809 : vector<1x128xf32>
    %811 = arith.mulf %25, %716 : vector<1x128xf32>
    %812 = arith.mulf %27, %731 : vector<1x128xf32>
    %813 = arith.addf %811, %812 : vector<1x128xf32>
    %814 = arith.mulf %29, %746 : vector<1x128xf32>
    %815 = arith.addf %813, %814 : vector<1x128xf32>
    %816 = arith.mulf %31, %761 : vector<1x128xf32>
    %817 = arith.addf %815, %816 : vector<1x128xf32>
    %818 = arith.mulf %39, %762 : vector<1x128xf32>
    %819 = arith.addf %817, %818 : vector<1x128xf32>
    %cst_155 = arith.constant -1.000000e+05 : f32
    %cst_156 = arith.constant 1.000000e+05 : f32
    %820 = vector.broadcast %cst_155 : f32 to vector<1x128xf32>
    %821 = arith.maximumf %820, %819 : vector<1x128xf32>
    %822 = vector.broadcast %cst_156 : f32 to vector<1x128xf32>
    %823 = arith.minimumf %822, %821 : vector<1x128xf32>
    %824 = arith.mulf %765, %823 : vector<1x128xf32>
    %825 = arith.addf %761, %824 : vector<1x128xf32>
    %826 = arith.addf %762, %765 : vector<1x128xf32>
    %c2_i32_157 = arith.constant 2 : i32
    %827 = arith.cmpi sgt, %698, %c2_i32_157 : i32
    %cst_158 = arith.constant 0.000000e+00 : f32
    %828 = arith.select %827, %689, %cst_158 : f32
    %829 = vector.broadcast %828 : f32 to vector<1x128xf32>
    %830 = arith.mulf %1, %780 : vector<1x128xf32>
    %831 = arith.mulf %3, %795 : vector<1x128xf32>
    %832 = arith.addf %830, %831 : vector<1x128xf32>
    %833 = arith.mulf %5, %810 : vector<1x128xf32>
    %834 = arith.addf %832, %833 : vector<1x128xf32>
    %835 = arith.mulf %7, %825 : vector<1x128xf32>
    %836 = arith.addf %834, %835 : vector<1x128xf32>
    %837 = arith.mulf %33, %826 : vector<1x128xf32>
    %838 = arith.addf %836, %837 : vector<1x128xf32>
    %cst_159 = arith.constant -1.000000e+05 : f32
    %cst_160 = arith.constant 1.000000e+05 : f32
    %839 = vector.broadcast %cst_159 : f32 to vector<1x128xf32>
    %840 = arith.maximumf %839, %838 : vector<1x128xf32>
    %841 = vector.broadcast %cst_160 : f32 to vector<1x128xf32>
    %842 = arith.minimumf %841, %840 : vector<1x128xf32>
    %843 = arith.mulf %829, %842 : vector<1x128xf32>
    %844 = arith.addf %780, %843 : vector<1x128xf32>
    %845 = arith.mulf %9, %780 : vector<1x128xf32>
    %846 = arith.mulf %11, %795 : vector<1x128xf32>
    %847 = arith.addf %845, %846 : vector<1x128xf32>
    %848 = arith.mulf %13, %810 : vector<1x128xf32>
    %849 = arith.addf %847, %848 : vector<1x128xf32>
    %850 = arith.mulf %15, %825 : vector<1x128xf32>
    %851 = arith.addf %849, %850 : vector<1x128xf32>
    %852 = arith.mulf %35, %826 : vector<1x128xf32>
    %853 = arith.addf %851, %852 : vector<1x128xf32>
    %cst_161 = arith.constant -1.000000e+05 : f32
    %cst_162 = arith.constant 1.000000e+05 : f32
    %854 = vector.broadcast %cst_161 : f32 to vector<1x128xf32>
    %855 = arith.maximumf %854, %853 : vector<1x128xf32>
    %856 = vector.broadcast %cst_162 : f32 to vector<1x128xf32>
    %857 = arith.minimumf %856, %855 : vector<1x128xf32>
    %858 = arith.mulf %829, %857 : vector<1x128xf32>
    %859 = arith.addf %795, %858 : vector<1x128xf32>
    %860 = arith.mulf %17, %780 : vector<1x128xf32>
    %861 = arith.mulf %19, %795 : vector<1x128xf32>
    %862 = arith.addf %860, %861 : vector<1x128xf32>
    %863 = arith.mulf %21, %810 : vector<1x128xf32>
    %864 = arith.addf %862, %863 : vector<1x128xf32>
    %865 = arith.mulf %23, %825 : vector<1x128xf32>
    %866 = arith.addf %864, %865 : vector<1x128xf32>
    %867 = arith.mulf %37, %826 : vector<1x128xf32>
    %868 = arith.addf %866, %867 : vector<1x128xf32>
    %cst_163 = arith.constant -1.000000e+05 : f32
    %cst_164 = arith.constant 1.000000e+05 : f32
    %869 = vector.broadcast %cst_163 : f32 to vector<1x128xf32>
    %870 = arith.maximumf %869, %868 : vector<1x128xf32>
    %871 = vector.broadcast %cst_164 : f32 to vector<1x128xf32>
    %872 = arith.minimumf %871, %870 : vector<1x128xf32>
    %873 = arith.mulf %829, %872 : vector<1x128xf32>
    %874 = arith.addf %810, %873 : vector<1x128xf32>
    %875 = arith.mulf %25, %780 : vector<1x128xf32>
    %876 = arith.mulf %27, %795 : vector<1x128xf32>
    %877 = arith.addf %875, %876 : vector<1x128xf32>
    %878 = arith.mulf %29, %810 : vector<1x128xf32>
    %879 = arith.addf %877, %878 : vector<1x128xf32>
    %880 = arith.mulf %31, %825 : vector<1x128xf32>
    %881 = arith.addf %879, %880 : vector<1x128xf32>
    %882 = arith.mulf %39, %826 : vector<1x128xf32>
    %883 = arith.addf %881, %882 : vector<1x128xf32>
    %cst_165 = arith.constant -1.000000e+05 : f32
    %cst_166 = arith.constant 1.000000e+05 : f32
    %884 = vector.broadcast %cst_165 : f32 to vector<1x128xf32>
    %885 = arith.maximumf %884, %883 : vector<1x128xf32>
    %886 = vector.broadcast %cst_166 : f32 to vector<1x128xf32>
    %887 = arith.minimumf %886, %885 : vector<1x128xf32>
    %888 = arith.mulf %829, %887 : vector<1x128xf32>
    %889 = arith.addf %825, %888 : vector<1x128xf32>
    %890 = arith.select %43, %844, %40 : vector<1x128xi1>, vector<1x128xf32>
    %891 = arith.select %45, %859, %890 : vector<1x128xi1>, vector<1x128xf32>
    %892 = arith.select %47, %874, %891 : vector<1x128xi1>, vector<1x128xf32>
    %893 = arith.select %49, %889, %892 : vector<1x128xi1>, vector<1x128xf32>
    %c4_167 = arith.constant 4 : index
    %c0_168 = arith.constant 0 : index
    %894 = vector.load %arg6[%c4_167, %c0_168] : memref<8x128xf32, #tpu.memory_space<vmem>>, vector<1x128xf32>
    tpu.vector_store %arg6[%c4_167, %c0_168], %893 {strides = array<i32>} : memref<8x128xf32, #tpu.memory_space<vmem>>, vector<1x128xf32>,
    %c4_169 = arith.constant 4 : index
    %895 = memref.load %arg2[%c4_169] : memref<7xi32, #tpu.memory_space<smem>>
    %c0_i32_170 = arith.constant 0 : i32
    %896 = arith.maxsi %895, %c0_i32_170 : i32
    %c4_171 = arith.constant 4 : index
    %897 = memref.load %arg1[%c4_171] : memref<7xf32, #tpu.memory_space<smem>>
    %898 = vector.broadcast %897 : f32 to vector<1x128xf32>
    %c4_172 = arith.constant 4 : index
    %899 = memref.load %arg0[%c4_172] : memref<7xf32, #tpu.memory_space<smem>>
    %900 = vector.broadcast %899 : f32 to vector<1x128xf32>
    %c2_i32_173 = arith.constant 2 : i32
    %901 = arith.shrui %896, %c2_i32_173 : i32
    %c0_i32_174 = arith.constant 0 : i32
    %902 = arith.subi %901, %c0_i32_174 : i32
    %903 = arith.addi %c0_i32_174, %902 : i32
    %c1_i32_175 = arith.constant 1 : i32
    %904:5 = scf.for %arg7 = %c0_i32_174 to %903 step %c1_i32_175 iter_args(%arg8 = %844, %arg9 = %859, %arg10 = %874, %arg11 = %889, %arg12 = %900) -> (vector<1x128xf32>, vector<1x128xf32>, vector<1x128xf32>, vector<1x128xf32>, vector<1x128xf32>)  : i32 {
      %1519 = arith.mulf %1, %arg8 : vector<1x128xf32>
      %1520 = arith.mulf %3, %arg9 : vector<1x128xf32>
      %1521 = arith.addf %1519, %1520 : vector<1x128xf32>
      %1522 = arith.mulf %5, %arg10 : vector<1x128xf32>
      %1523 = arith.addf %1521, %1522 : vector<1x128xf32>
      %1524 = arith.mulf %7, %arg11 : vector<1x128xf32>
      %1525 = arith.addf %1523, %1524 : vector<1x128xf32>
      %1526 = arith.mulf %33, %arg12 : vector<1x128xf32>
      %1527 = arith.addf %1525, %1526 : vector<1x128xf32>
      %cst_289 = arith.constant -1.000000e+05 : f32
      %cst_290 = arith.constant 1.000000e+05 : f32
      %1528 = vector.broadcast %cst_289 : f32 to vector<1x128xf32>
      %1529 = arith.maximumf %1528, %1527 : vector<1x128xf32>
      %1530 = vector.broadcast %cst_290 : f32 to vector<1x128xf32>
      %1531 = arith.minimumf %1530, %1529 : vector<1x128xf32>
      %1532 = arith.mulf %898, %1531 : vector<1x128xf32>
      %1533 = arith.addf %arg8, %1532 : vector<1x128xf32>
      %1534 = arith.mulf %9, %arg8 : vector<1x128xf32>
      %1535 = arith.mulf %11, %arg9 : vector<1x128xf32>
      %1536 = arith.addf %1534, %1535 : vector<1x128xf32>
      %1537 = arith.mulf %13, %arg10 : vector<1x128xf32>
      %1538 = arith.addf %1536, %1537 : vector<1x128xf32>
      %1539 = arith.mulf %15, %arg11 : vector<1x128xf32>
      %1540 = arith.addf %1538, %1539 : vector<1x128xf32>
      %1541 = arith.mulf %35, %arg12 : vector<1x128xf32>
      %1542 = arith.addf %1540, %1541 : vector<1x128xf32>
      %cst_291 = arith.constant -1.000000e+05 : f32
      %cst_292 = arith.constant 1.000000e+05 : f32
      %1543 = vector.broadcast %cst_291 : f32 to vector<1x128xf32>
      %1544 = arith.maximumf %1543, %1542 : vector<1x128xf32>
      %1545 = vector.broadcast %cst_292 : f32 to vector<1x128xf32>
      %1546 = arith.minimumf %1545, %1544 : vector<1x128xf32>
      %1547 = arith.mulf %898, %1546 : vector<1x128xf32>
      %1548 = arith.addf %arg9, %1547 : vector<1x128xf32>
      %1549 = arith.mulf %17, %arg8 : vector<1x128xf32>
      %1550 = arith.mulf %19, %arg9 : vector<1x128xf32>
      %1551 = arith.addf %1549, %1550 : vector<1x128xf32>
      %1552 = arith.mulf %21, %arg10 : vector<1x128xf32>
      %1553 = arith.addf %1551, %1552 : vector<1x128xf32>
      %1554 = arith.mulf %23, %arg11 : vector<1x128xf32>
      %1555 = arith.addf %1553, %1554 : vector<1x128xf32>
      %1556 = arith.mulf %37, %arg12 : vector<1x128xf32>
      %1557 = arith.addf %1555, %1556 : vector<1x128xf32>
      %cst_293 = arith.constant -1.000000e+05 : f32
      %cst_294 = arith.constant 1.000000e+05 : f32
      %1558 = vector.broadcast %cst_293 : f32 to vector<1x128xf32>
      %1559 = arith.maximumf %1558, %1557 : vector<1x128xf32>
      %1560 = vector.broadcast %cst_294 : f32 to vector<1x128xf32>
      %1561 = arith.minimumf %1560, %1559 : vector<1x128xf32>
      %1562 = arith.mulf %898, %1561 : vector<1x128xf32>
      %1563 = arith.addf %arg10, %1562 : vector<1x128xf32>
      %1564 = arith.mulf %25, %arg8 : vector<1x128xf32>
      %1565 = arith.mulf %27, %arg9 : vector<1x128xf32>
      %1566 = arith.addf %1564, %1565 : vector<1x128xf32>
      %1567 = arith.mulf %29, %arg10 : vector<1x128xf32>
      %1568 = arith.addf %1566, %1567 : vector<1x128xf32>
      %1569 = arith.mulf %31, %arg11 : vector<1x128xf32>
      %1570 = arith.addf %1568, %1569 : vector<1x128xf32>
      %1571 = arith.mulf %39, %arg12 : vector<1x128xf32>
      %1572 = arith.addf %1570, %1571 : vector<1x128xf32>
      %cst_295 = arith.constant -1.000000e+05 : f32
      %cst_296 = arith.constant 1.000000e+05 : f32
      %1573 = vector.broadcast %cst_295 : f32 to vector<1x128xf32>
      %1574 = arith.maximumf %1573, %1572 : vector<1x128xf32>
      %1575 = vector.broadcast %cst_296 : f32 to vector<1x128xf32>
      %1576 = arith.minimumf %1575, %1574 : vector<1x128xf32>
      %1577 = arith.mulf %898, %1576 : vector<1x128xf32>
      %1578 = arith.addf %arg11, %1577 : vector<1x128xf32>
      %1579 = arith.addf %arg12, %898 : vector<1x128xf32>
      %1580 = arith.mulf %1, %1533 : vector<1x128xf32>
      %1581 = arith.mulf %3, %1548 : vector<1x128xf32>
      %1582 = arith.addf %1580, %1581 : vector<1x128xf32>
      %1583 = arith.mulf %5, %1563 : vector<1x128xf32>
      %1584 = arith.addf %1582, %1583 : vector<1x128xf32>
      %1585 = arith.mulf %7, %1578 : vector<1x128xf32>
      %1586 = arith.addf %1584, %1585 : vector<1x128xf32>
      %1587 = arith.mulf %33, %1579 : vector<1x128xf32>
      %1588 = arith.addf %1586, %1587 : vector<1x128xf32>
      %cst_297 = arith.constant -1.000000e+05 : f32
      %cst_298 = arith.constant 1.000000e+05 : f32
      %1589 = vector.broadcast %cst_297 : f32 to vector<1x128xf32>
      %1590 = arith.maximumf %1589, %1588 : vector<1x128xf32>
      %1591 = vector.broadcast %cst_298 : f32 to vector<1x128xf32>
      %1592 = arith.minimumf %1591, %1590 : vector<1x128xf32>
      %1593 = arith.mulf %898, %1592 : vector<1x128xf32>
      %1594 = arith.addf %1533, %1593 : vector<1x128xf32>
      %1595 = arith.mulf %9, %1533 : vector<1x128xf32>
      %1596 = arith.mulf %11, %1548 : vector<1x128xf32>
      %1597 = arith.addf %1595, %1596 : vector<1x128xf32>
      %1598 = arith.mulf %13, %1563 : vector<1x128xf32>
      %1599 = arith.addf %1597, %1598 : vector<1x128xf32>
      %1600 = arith.mulf %15, %1578 : vector<1x128xf32>
      %1601 = arith.addf %1599, %1600 : vector<1x128xf32>
      %1602 = arith.mulf %35, %1579 : vector<1x128xf32>
      %1603 = arith.addf %1601, %1602 : vector<1x128xf32>
      %cst_299 = arith.constant -1.000000e+05 : f32
      %cst_300 = arith.constant 1.000000e+05 : f32
      %1604 = vector.broadcast %cst_299 : f32 to vector<1x128xf32>
      %1605 = arith.maximumf %1604, %1603 : vector<1x128xf32>
      %1606 = vector.broadcast %cst_300 : f32 to vector<1x128xf32>
      %1607 = arith.minimumf %1606, %1605 : vector<1x128xf32>
      %1608 = arith.mulf %898, %1607 : vector<1x128xf32>
      %1609 = arith.addf %1548, %1608 : vector<1x128xf32>
      %1610 = arith.mulf %17, %1533 : vector<1x128xf32>
      %1611 = arith.mulf %19, %1548 : vector<1x128xf32>
      %1612 = arith.addf %1610, %1611 : vector<1x128xf32>
      %1613 = arith.mulf %21, %1563 : vector<1x128xf32>
      %1614 = arith.addf %1612, %1613 : vector<1x128xf32>
      %1615 = arith.mulf %23, %1578 : vector<1x128xf32>
      %1616 = arith.addf %1614, %1615 : vector<1x128xf32>
      %1617 = arith.mulf %37, %1579 : vector<1x128xf32>
      %1618 = arith.addf %1616, %1617 : vector<1x128xf32>
      %cst_301 = arith.constant -1.000000e+05 : f32
      %cst_302 = arith.constant 1.000000e+05 : f32
      %1619 = vector.broadcast %cst_301 : f32 to vector<1x128xf32>
      %1620 = arith.maximumf %1619, %1618 : vector<1x128xf32>
      %1621 = vector.broadcast %cst_302 : f32 to vector<1x128xf32>
      %1622 = arith.minimumf %1621, %1620 : vector<1x128xf32>
      %1623 = arith.mulf %898, %1622 : vector<1x128xf32>
      %1624 = arith.addf %1563, %1623 : vector<1x128xf32>
      %1625 = arith.mulf %25, %1533 : vector<1x128xf32>
      %1626 = arith.mulf %27, %1548 : vector<1x128xf32>
      %1627 = arith.addf %1625, %1626 : vector<1x128xf32>
      %1628 = arith.mulf %29, %1563 : vector<1x128xf32>
      %1629 = arith.addf %1627, %1628 : vector<1x128xf32>
      %1630 = arith.mulf %31, %1578 : vector<1x128xf32>
      %1631 = arith.addf %1629, %1630 : vector<1x128xf32>
      %1632 = arith.mulf %39, %1579 : vector<1x128xf32>
      %1633 = arith.addf %1631, %1632 : vector<1x128xf32>
      %cst_303 = arith.constant -1.000000e+05 : f32
      %cst_304 = arith.constant 1.000000e+05 : f32
      %1634 = vector.broadcast %cst_303 : f32 to vector<1x128xf32>
      %1635 = arith.maximumf %1634, %1633 : vector<1x128xf32>
      %1636 = vector.broadcast %cst_304 : f32 to vector<1x128xf32>
      %1637 = arith.minimumf %1636, %1635 : vector<1x128xf32>
      %1638 = arith.mulf %898, %1637 : vector<1x128xf32>
      %1639 = arith.addf %1578, %1638 : vector<1x128xf32>
      %1640 = arith.addf %1579, %898 : vector<1x128xf32>
      %1641 = arith.mulf %1, %1594 : vector<1x128xf32>
      %1642 = arith.mulf %3, %1609 : vector<1x128xf32>
      %1643 = arith.addf %1641, %1642 : vector<1x128xf32>
      %1644 = arith.mulf %5, %1624 : vector<1x128xf32>
      %1645 = arith.addf %1643, %1644 : vector<1x128xf32>
      %1646 = arith.mulf %7, %1639 : vector<1x128xf32>
      %1647 = arith.addf %1645, %1646 : vector<1x128xf32>
      %1648 = arith.mulf %33, %1640 : vector<1x128xf32>
      %1649 = arith.addf %1647, %1648 : vector<1x128xf32>
      %cst_305 = arith.constant -1.000000e+05 : f32
      %cst_306 = arith.constant 1.000000e+05 : f32
      %1650 = vector.broadcast %cst_305 : f32 to vector<1x128xf32>
      %1651 = arith.maximumf %1650, %1649 : vector<1x128xf32>
      %1652 = vector.broadcast %cst_306 : f32 to vector<1x128xf32>
      %1653 = arith.minimumf %1652, %1651 : vector<1x128xf32>
      %1654 = arith.mulf %898, %1653 : vector<1x128xf32>
      %1655 = arith.addf %1594, %1654 : vector<1x128xf32>
      %1656 = arith.mulf %9, %1594 : vector<1x128xf32>
      %1657 = arith.mulf %11, %1609 : vector<1x128xf32>
      %1658 = arith.addf %1656, %1657 : vector<1x128xf32>
      %1659 = arith.mulf %13, %1624 : vector<1x128xf32>
      %1660 = arith.addf %1658, %1659 : vector<1x128xf32>
      %1661 = arith.mulf %15, %1639 : vector<1x128xf32>
      %1662 = arith.addf %1660, %1661 : vector<1x128xf32>
      %1663 = arith.mulf %35, %1640 : vector<1x128xf32>
      %1664 = arith.addf %1662, %1663 : vector<1x128xf32>
      %cst_307 = arith.constant -1.000000e+05 : f32
      %cst_308 = arith.constant 1.000000e+05 : f32
      %1665 = vector.broadcast %cst_307 : f32 to vector<1x128xf32>
      %1666 = arith.maximumf %1665, %1664 : vector<1x128xf32>
      %1667 = vector.broadcast %cst_308 : f32 to vector<1x128xf32>
      %1668 = arith.minimumf %1667, %1666 : vector<1x128xf32>
      %1669 = arith.mulf %898, %1668 : vector<1x128xf32>
      %1670 = arith.addf %1609, %1669 : vector<1x128xf32>
      %1671 = arith.mulf %17, %1594 : vector<1x128xf32>
      %1672 = arith.mulf %19, %1609 : vector<1x128xf32>
      %1673 = arith.addf %1671, %1672 : vector<1x128xf32>
      %1674 = arith.mulf %21, %1624 : vector<1x128xf32>
      %1675 = arith.addf %1673, %1674 : vector<1x128xf32>
      %1676 = arith.mulf %23, %1639 : vector<1x128xf32>
      %1677 = arith.addf %1675, %1676 : vector<1x128xf32>
      %1678 = arith.mulf %37, %1640 : vector<1x128xf32>
      %1679 = arith.addf %1677, %1678 : vector<1x128xf32>
      %cst_309 = arith.constant -1.000000e+05 : f32
      %cst_310 = arith.constant 1.000000e+05 : f32
      %1680 = vector.broadcast %cst_309 : f32 to vector<1x128xf32>
      %1681 = arith.maximumf %1680, %1679 : vector<1x128xf32>
      %1682 = vector.broadcast %cst_310 : f32 to vector<1x128xf32>
      %1683 = arith.minimumf %1682, %1681 : vector<1x128xf32>
      %1684 = arith.mulf %898, %1683 : vector<1x128xf32>
      %1685 = arith.addf %1624, %1684 : vector<1x128xf32>
      %1686 = arith.mulf %25, %1594 : vector<1x128xf32>
      %1687 = arith.mulf %27, %1609 : vector<1x128xf32>
      %1688 = arith.addf %1686, %1687 : vector<1x128xf32>
      %1689 = arith.mulf %29, %1624 : vector<1x128xf32>
      %1690 = arith.addf %1688, %1689 : vector<1x128xf32>
      %1691 = arith.mulf %31, %1639 : vector<1x128xf32>
      %1692 = arith.addf %1690, %1691 : vector<1x128xf32>
      %1693 = arith.mulf %39, %1640 : vector<1x128xf32>
      %1694 = arith.addf %1692, %1693 : vector<1x128xf32>
      %cst_311 = arith.constant -1.000000e+05 : f32
      %cst_312 = arith.constant 1.000000e+05 : f32
      %1695 = vector.broadcast %cst_311 : f32 to vector<1x128xf32>
      %1696 = arith.maximumf %1695, %1694 : vector<1x128xf32>
      %1697 = vector.broadcast %cst_312 : f32 to vector<1x128xf32>
      %1698 = arith.minimumf %1697, %1696 : vector<1x128xf32>
      %1699 = arith.mulf %898, %1698 : vector<1x128xf32>
      %1700 = arith.addf %1639, %1699 : vector<1x128xf32>
      %1701 = arith.addf %1640, %898 : vector<1x128xf32>
      %1702 = arith.mulf %1, %1655 : vector<1x128xf32>
      %1703 = arith.mulf %3, %1670 : vector<1x128xf32>
      %1704 = arith.addf %1702, %1703 : vector<1x128xf32>
      %1705 = arith.mulf %5, %1685 : vector<1x128xf32>
      %1706 = arith.addf %1704, %1705 : vector<1x128xf32>
      %1707 = arith.mulf %7, %1700 : vector<1x128xf32>
      %1708 = arith.addf %1706, %1707 : vector<1x128xf32>
      %1709 = arith.mulf %33, %1701 : vector<1x128xf32>
      %1710 = arith.addf %1708, %1709 : vector<1x128xf32>
      %cst_313 = arith.constant -1.000000e+05 : f32
      %cst_314 = arith.constant 1.000000e+05 : f32
      %1711 = vector.broadcast %cst_313 : f32 to vector<1x128xf32>
      %1712 = arith.maximumf %1711, %1710 : vector<1x128xf32>
      %1713 = vector.broadcast %cst_314 : f32 to vector<1x128xf32>
      %1714 = arith.minimumf %1713, %1712 : vector<1x128xf32>
      %1715 = arith.mulf %898, %1714 : vector<1x128xf32>
      %1716 = arith.addf %1655, %1715 : vector<1x128xf32>
      %1717 = arith.mulf %9, %1655 : vector<1x128xf32>
      %1718 = arith.mulf %11, %1670 : vector<1x128xf32>
      %1719 = arith.addf %1717, %1718 : vector<1x128xf32>
      %1720 = arith.mulf %13, %1685 : vector<1x128xf32>
      %1721 = arith.addf %1719, %1720 : vector<1x128xf32>
      %1722 = arith.mulf %15, %1700 : vector<1x128xf32>
      %1723 = arith.addf %1721, %1722 : vector<1x128xf32>
      %1724 = arith.mulf %35, %1701 : vector<1x128xf32>
      %1725 = arith.addf %1723, %1724 : vector<1x128xf32>
      %cst_315 = arith.constant -1.000000e+05 : f32
      %cst_316 = arith.constant 1.000000e+05 : f32
      %1726 = vector.broadcast %cst_315 : f32 to vector<1x128xf32>
      %1727 = arith.maximumf %1726, %1725 : vector<1x128xf32>
      %1728 = vector.broadcast %cst_316 : f32 to vector<1x128xf32>
      %1729 = arith.minimumf %1728, %1727 : vector<1x128xf32>
      %1730 = arith.mulf %898, %1729 : vector<1x128xf32>
      %1731 = arith.addf %1670, %1730 : vector<1x128xf32>
      %1732 = arith.mulf %17, %1655 : vector<1x128xf32>
      %1733 = arith.mulf %19, %1670 : vector<1x128xf32>
      %1734 = arith.addf %1732, %1733 : vector<1x128xf32>
      %1735 = arith.mulf %21, %1685 : vector<1x128xf32>
      %1736 = arith.addf %1734, %1735 : vector<1x128xf32>
      %1737 = arith.mulf %23, %1700 : vector<1x128xf32>
      %1738 = arith.addf %1736, %1737 : vector<1x128xf32>
      %1739 = arith.mulf %37, %1701 : vector<1x128xf32>
      %1740 = arith.addf %1738, %1739 : vector<1x128xf32>
      %cst_317 = arith.constant -1.000000e+05 : f32
      %cst_318 = arith.constant 1.000000e+05 : f32
      %1741 = vector.broadcast %cst_317 : f32 to vector<1x128xf32>
      %1742 = arith.maximumf %1741, %1740 : vector<1x128xf32>
      %1743 = vector.broadcast %cst_318 : f32 to vector<1x128xf32>
      %1744 = arith.minimumf %1743, %1742 : vector<1x128xf32>
      %1745 = arith.mulf %898, %1744 : vector<1x128xf32>
      %1746 = arith.addf %1685, %1745 : vector<1x128xf32>
      %1747 = arith.mulf %25, %1655 : vector<1x128xf32>
      %1748 = arith.mulf %27, %1670 : vector<1x128xf32>
      %1749 = arith.addf %1747, %1748 : vector<1x128xf32>
      %1750 = arith.mulf %29, %1685 : vector<1x128xf32>
      %1751 = arith.addf %1749, %1750 : vector<1x128xf32>
      %1752 = arith.mulf %31, %1700 : vector<1x128xf32>
      %1753 = arith.addf %1751, %1752 : vector<1x128xf32>
      %1754 = arith.mulf %39, %1701 : vector<1x128xf32>
      %1755 = arith.addf %1753, %1754 : vector<1x128xf32>
      %cst_319 = arith.constant -1.000000e+05 : f32
      %cst_320 = arith.constant 1.000000e+05 : f32
      %1756 = vector.broadcast %cst_319 : f32 to vector<1x128xf32>
      %1757 = arith.maximumf %1756, %1755 : vector<1x128xf32>
      %1758 = vector.broadcast %cst_320 : f32 to vector<1x128xf32>
      %1759 = arith.minimumf %1758, %1757 : vector<1x128xf32>
      %1760 = arith.mulf %898, %1759 : vector<1x128xf32>
      %1761 = arith.addf %1700, %1760 : vector<1x128xf32>
      %1762 = arith.addf %1701, %898 : vector<1x128xf32>
      scf.yield %1716, %1731, %1746, %1761, %1762 : vector<1x128xf32>, vector<1x128xf32>, vector<1x128xf32>, vector<1x128xf32>, vector<1x128xf32>
    }
    %c4_i32_176 = arith.constant 4 : i32
    %905 = arith.muli %901, %c4_i32_176 : i32
    %906 = arith.subi %896, %905 : i32
    %c0_i32_177 = arith.constant 0 : i32
    %907 = arith.cmpi sgt, %906, %c0_i32_177 : i32
    %cst_178 = arith.constant 0.000000e+00 : f32
    %908 = arith.select %907, %897, %cst_178 : f32
    %909 = vector.broadcast %908 : f32 to vector<1x128xf32>
    %910 = arith.mulf %1, %904#0 : vector<1x128xf32>
    %911 = arith.mulf %3, %904#1 : vector<1x128xf32>
    %912 = arith.addf %910, %911 : vector<1x128xf32>
    %913 = arith.mulf %5, %904#2 : vector<1x128xf32>
    %914 = arith.addf %912, %913 : vector<1x128xf32>
    %915 = arith.mulf %7, %904#3 : vector<1x128xf32>
    %916 = arith.addf %914, %915 : vector<1x128xf32>
    %917 = arith.mulf %33, %904#4 : vector<1x128xf32>
    %918 = arith.addf %916, %917 : vector<1x128xf32>
    %cst_179 = arith.constant -1.000000e+05 : f32
    %cst_180 = arith.constant 1.000000e+05 : f32
    %919 = vector.broadcast %cst_179 : f32 to vector<1x128xf32>
    %920 = arith.maximumf %919, %918 : vector<1x128xf32>
    %921 = vector.broadcast %cst_180 : f32 to vector<1x128xf32>
    %922 = arith.minimumf %921, %920 : vector<1x128xf32>
    %923 = arith.mulf %909, %922 : vector<1x128xf32>
    %924 = arith.addf %904#0, %923 : vector<1x128xf32>
    %925 = arith.mulf %9, %904#0 : vector<1x128xf32>
    %926 = arith.mulf %11, %904#1 : vector<1x128xf32>
    %927 = arith.addf %925, %926 : vector<1x128xf32>
    %928 = arith.mulf %13, %904#2 : vector<1x128xf32>
    %929 = arith.addf %927, %928 : vector<1x128xf32>
    %930 = arith.mulf %15, %904#3 : vector<1x128xf32>
    %931 = arith.addf %929, %930 : vector<1x128xf32>
    %932 = arith.mulf %35, %904#4 : vector<1x128xf32>
    %933 = arith.addf %931, %932 : vector<1x128xf32>
    %cst_181 = arith.constant -1.000000e+05 : f32
    %cst_182 = arith.constant 1.000000e+05 : f32
    %934 = vector.broadcast %cst_181 : f32 to vector<1x128xf32>
    %935 = arith.maximumf %934, %933 : vector<1x128xf32>
    %936 = vector.broadcast %cst_182 : f32 to vector<1x128xf32>
    %937 = arith.minimumf %936, %935 : vector<1x128xf32>
    %938 = arith.mulf %909, %937 : vector<1x128xf32>
    %939 = arith.addf %904#1, %938 : vector<1x128xf32>
    %940 = arith.mulf %17, %904#0 : vector<1x128xf32>
    %941 = arith.mulf %19, %904#1 : vector<1x128xf32>
    %942 = arith.addf %940, %941 : vector<1x128xf32>
    %943 = arith.mulf %21, %904#2 : vector<1x128xf32>
    %944 = arith.addf %942, %943 : vector<1x128xf32>
    %945 = arith.mulf %23, %904#3 : vector<1x128xf32>
    %946 = arith.addf %944, %945 : vector<1x128xf32>
    %947 = arith.mulf %37, %904#4 : vector<1x128xf32>
    %948 = arith.addf %946, %947 : vector<1x128xf32>
    %cst_183 = arith.constant -1.000000e+05 : f32
    %cst_184 = arith.constant 1.000000e+05 : f32
    %949 = vector.broadcast %cst_183 : f32 to vector<1x128xf32>
    %950 = arith.maximumf %949, %948 : vector<1x128xf32>
    %951 = vector.broadcast %cst_184 : f32 to vector<1x128xf32>
    %952 = arith.minimumf %951, %950 : vector<1x128xf32>
    %953 = arith.mulf %909, %952 : vector<1x128xf32>
    %954 = arith.addf %904#2, %953 : vector<1x128xf32>
    %955 = arith.mulf %25, %904#0 : vector<1x128xf32>
    %956 = arith.mulf %27, %904#1 : vector<1x128xf32>
    %957 = arith.addf %955, %956 : vector<1x128xf32>
    %958 = arith.mulf %29, %904#2 : vector<1x128xf32>
    %959 = arith.addf %957, %958 : vector<1x128xf32>
    %960 = arith.mulf %31, %904#3 : vector<1x128xf32>
    %961 = arith.addf %959, %960 : vector<1x128xf32>
    %962 = arith.mulf %39, %904#4 : vector<1x128xf32>
    %963 = arith.addf %961, %962 : vector<1x128xf32>
    %cst_185 = arith.constant -1.000000e+05 : f32
    %cst_186 = arith.constant 1.000000e+05 : f32
    %964 = vector.broadcast %cst_185 : f32 to vector<1x128xf32>
    %965 = arith.maximumf %964, %963 : vector<1x128xf32>
    %966 = vector.broadcast %cst_186 : f32 to vector<1x128xf32>
    %967 = arith.minimumf %966, %965 : vector<1x128xf32>
    %968 = arith.mulf %909, %967 : vector<1x128xf32>
    %969 = arith.addf %904#3, %968 : vector<1x128xf32>
    %970 = arith.addf %904#4, %909 : vector<1x128xf32>
    %c1_i32_187 = arith.constant 1 : i32
    %971 = arith.cmpi sgt, %906, %c1_i32_187 : i32
    %cst_188 = arith.constant 0.000000e+00 : f32
    %972 = arith.select %971, %897, %cst_188 : f32
    %973 = vector.broadcast %972 : f32 to vector<1x128xf32>
    %974 = arith.mulf %1, %924 : vector<1x128xf32>
    %975 = arith.mulf %3, %939 : vector<1x128xf32>
    %976 = arith.addf %974, %975 : vector<1x128xf32>
    %977 = arith.mulf %5, %954 : vector<1x128xf32>
    %978 = arith.addf %976, %977 : vector<1x128xf32>
    %979 = arith.mulf %7, %969 : vector<1x128xf32>
    %980 = arith.addf %978, %979 : vector<1x128xf32>
    %981 = arith.mulf %33, %970 : vector<1x128xf32>
    %982 = arith.addf %980, %981 : vector<1x128xf32>
    %cst_189 = arith.constant -1.000000e+05 : f32
    %cst_190 = arith.constant 1.000000e+05 : f32
    %983 = vector.broadcast %cst_189 : f32 to vector<1x128xf32>
    %984 = arith.maximumf %983, %982 : vector<1x128xf32>
    %985 = vector.broadcast %cst_190 : f32 to vector<1x128xf32>
    %986 = arith.minimumf %985, %984 : vector<1x128xf32>
    %987 = arith.mulf %973, %986 : vector<1x128xf32>
    %988 = arith.addf %924, %987 : vector<1x128xf32>
    %989 = arith.mulf %9, %924 : vector<1x128xf32>
    %990 = arith.mulf %11, %939 : vector<1x128xf32>
    %991 = arith.addf %989, %990 : vector<1x128xf32>
    %992 = arith.mulf %13, %954 : vector<1x128xf32>
    %993 = arith.addf %991, %992 : vector<1x128xf32>
    %994 = arith.mulf %15, %969 : vector<1x128xf32>
    %995 = arith.addf %993, %994 : vector<1x128xf32>
    %996 = arith.mulf %35, %970 : vector<1x128xf32>
    %997 = arith.addf %995, %996 : vector<1x128xf32>
    %cst_191 = arith.constant -1.000000e+05 : f32
    %cst_192 = arith.constant 1.000000e+05 : f32
    %998 = vector.broadcast %cst_191 : f32 to vector<1x128xf32>
    %999 = arith.maximumf %998, %997 : vector<1x128xf32>
    %1000 = vector.broadcast %cst_192 : f32 to vector<1x128xf32>
    %1001 = arith.minimumf %1000, %999 : vector<1x128xf32>
    %1002 = arith.mulf %973, %1001 : vector<1x128xf32>
    %1003 = arith.addf %939, %1002 : vector<1x128xf32>
    %1004 = arith.mulf %17, %924 : vector<1x128xf32>
    %1005 = arith.mulf %19, %939 : vector<1x128xf32>
    %1006 = arith.addf %1004, %1005 : vector<1x128xf32>
    %1007 = arith.mulf %21, %954 : vector<1x128xf32>
    %1008 = arith.addf %1006, %1007 : vector<1x128xf32>
    %1009 = arith.mulf %23, %969 : vector<1x128xf32>
    %1010 = arith.addf %1008, %1009 : vector<1x128xf32>
    %1011 = arith.mulf %37, %970 : vector<1x128xf32>
    %1012 = arith.addf %1010, %1011 : vector<1x128xf32>
    %cst_193 = arith.constant -1.000000e+05 : f32
    %cst_194 = arith.constant 1.000000e+05 : f32
    %1013 = vector.broadcast %cst_193 : f32 to vector<1x128xf32>
    %1014 = arith.maximumf %1013, %1012 : vector<1x128xf32>
    %1015 = vector.broadcast %cst_194 : f32 to vector<1x128xf32>
    %1016 = arith.minimumf %1015, %1014 : vector<1x128xf32>
    %1017 = arith.mulf %973, %1016 : vector<1x128xf32>
    %1018 = arith.addf %954, %1017 : vector<1x128xf32>
    %1019 = arith.mulf %25, %924 : vector<1x128xf32>
    %1020 = arith.mulf %27, %939 : vector<1x128xf32>
    %1021 = arith.addf %1019, %1020 : vector<1x128xf32>
    %1022 = arith.mulf %29, %954 : vector<1x128xf32>
    %1023 = arith.addf %1021, %1022 : vector<1x128xf32>
    %1024 = arith.mulf %31, %969 : vector<1x128xf32>
    %1025 = arith.addf %1023, %1024 : vector<1x128xf32>
    %1026 = arith.mulf %39, %970 : vector<1x128xf32>
    %1027 = arith.addf %1025, %1026 : vector<1x128xf32>
    %cst_195 = arith.constant -1.000000e+05 : f32
    %cst_196 = arith.constant 1.000000e+05 : f32
    %1028 = vector.broadcast %cst_195 : f32 to vector<1x128xf32>
    %1029 = arith.maximumf %1028, %1027 : vector<1x128xf32>
    %1030 = vector.broadcast %cst_196 : f32 to vector<1x128xf32>
    %1031 = arith.minimumf %1030, %1029 : vector<1x128xf32>
    %1032 = arith.mulf %973, %1031 : vector<1x128xf32>
    %1033 = arith.addf %969, %1032 : vector<1x128xf32>
    %1034 = arith.addf %970, %973 : vector<1x128xf32>
    %c2_i32_197 = arith.constant 2 : i32
    %1035 = arith.cmpi sgt, %906, %c2_i32_197 : i32
    %cst_198 = arith.constant 0.000000e+00 : f32
    %1036 = arith.select %1035, %897, %cst_198 : f32
    %1037 = vector.broadcast %1036 : f32 to vector<1x128xf32>
    %1038 = arith.mulf %1, %988 : vector<1x128xf32>
    %1039 = arith.mulf %3, %1003 : vector<1x128xf32>
    %1040 = arith.addf %1038, %1039 : vector<1x128xf32>
    %1041 = arith.mulf %5, %1018 : vector<1x128xf32>
    %1042 = arith.addf %1040, %1041 : vector<1x128xf32>
    %1043 = arith.mulf %7, %1033 : vector<1x128xf32>
    %1044 = arith.addf %1042, %1043 : vector<1x128xf32>
    %1045 = arith.mulf %33, %1034 : vector<1x128xf32>
    %1046 = arith.addf %1044, %1045 : vector<1x128xf32>
    %cst_199 = arith.constant -1.000000e+05 : f32
    %cst_200 = arith.constant 1.000000e+05 : f32
    %1047 = vector.broadcast %cst_199 : f32 to vector<1x128xf32>
    %1048 = arith.maximumf %1047, %1046 : vector<1x128xf32>
    %1049 = vector.broadcast %cst_200 : f32 to vector<1x128xf32>
    %1050 = arith.minimumf %1049, %1048 : vector<1x128xf32>
    %1051 = arith.mulf %1037, %1050 : vector<1x128xf32>
    %1052 = arith.addf %988, %1051 : vector<1x128xf32>
    %1053 = arith.mulf %9, %988 : vector<1x128xf32>
    %1054 = arith.mulf %11, %1003 : vector<1x128xf32>
    %1055 = arith.addf %1053, %1054 : vector<1x128xf32>
    %1056 = arith.mulf %13, %1018 : vector<1x128xf32>
    %1057 = arith.addf %1055, %1056 : vector<1x128xf32>
    %1058 = arith.mulf %15, %1033 : vector<1x128xf32>
    %1059 = arith.addf %1057, %1058 : vector<1x128xf32>
    %1060 = arith.mulf %35, %1034 : vector<1x128xf32>
    %1061 = arith.addf %1059, %1060 : vector<1x128xf32>
    %cst_201 = arith.constant -1.000000e+05 : f32
    %cst_202 = arith.constant 1.000000e+05 : f32
    %1062 = vector.broadcast %cst_201 : f32 to vector<1x128xf32>
    %1063 = arith.maximumf %1062, %1061 : vector<1x128xf32>
    %1064 = vector.broadcast %cst_202 : f32 to vector<1x128xf32>
    %1065 = arith.minimumf %1064, %1063 : vector<1x128xf32>
    %1066 = arith.mulf %1037, %1065 : vector<1x128xf32>
    %1067 = arith.addf %1003, %1066 : vector<1x128xf32>
    %1068 = arith.mulf %17, %988 : vector<1x128xf32>
    %1069 = arith.mulf %19, %1003 : vector<1x128xf32>
    %1070 = arith.addf %1068, %1069 : vector<1x128xf32>
    %1071 = arith.mulf %21, %1018 : vector<1x128xf32>
    %1072 = arith.addf %1070, %1071 : vector<1x128xf32>
    %1073 = arith.mulf %23, %1033 : vector<1x128xf32>
    %1074 = arith.addf %1072, %1073 : vector<1x128xf32>
    %1075 = arith.mulf %37, %1034 : vector<1x128xf32>
    %1076 = arith.addf %1074, %1075 : vector<1x128xf32>
    %cst_203 = arith.constant -1.000000e+05 : f32
    %cst_204 = arith.constant 1.000000e+05 : f32
    %1077 = vector.broadcast %cst_203 : f32 to vector<1x128xf32>
    %1078 = arith.maximumf %1077, %1076 : vector<1x128xf32>
    %1079 = vector.broadcast %cst_204 : f32 to vector<1x128xf32>
    %1080 = arith.minimumf %1079, %1078 : vector<1x128xf32>
    %1081 = arith.mulf %1037, %1080 : vector<1x128xf32>
    %1082 = arith.addf %1018, %1081 : vector<1x128xf32>
    %1083 = arith.mulf %25, %988 : vector<1x128xf32>
    %1084 = arith.mulf %27, %1003 : vector<1x128xf32>
    %1085 = arith.addf %1083, %1084 : vector<1x128xf32>
    %1086 = arith.mulf %29, %1018 : vector<1x128xf32>
    %1087 = arith.addf %1085, %1086 : vector<1x128xf32>
    %1088 = arith.mulf %31, %1033 : vector<1x128xf32>
    %1089 = arith.addf %1087, %1088 : vector<1x128xf32>
    %1090 = arith.mulf %39, %1034 : vector<1x128xf32>
    %1091 = arith.addf %1089, %1090 : vector<1x128xf32>
    %cst_205 = arith.constant -1.000000e+05 : f32
    %cst_206 = arith.constant 1.000000e+05 : f32
    %1092 = vector.broadcast %cst_205 : f32 to vector<1x128xf32>
    %1093 = arith.maximumf %1092, %1091 : vector<1x128xf32>
    %1094 = vector.broadcast %cst_206 : f32 to vector<1x128xf32>
    %1095 = arith.minimumf %1094, %1093 : vector<1x128xf32>
    %1096 = arith.mulf %1037, %1095 : vector<1x128xf32>
    %1097 = arith.addf %1033, %1096 : vector<1x128xf32>
    %1098 = arith.select %43, %1052, %40 : vector<1x128xi1>, vector<1x128xf32>
    %1099 = arith.select %45, %1067, %1098 : vector<1x128xi1>, vector<1x128xf32>
    %1100 = arith.select %47, %1082, %1099 : vector<1x128xi1>, vector<1x128xf32>
    %1101 = arith.select %49, %1097, %1100 : vector<1x128xi1>, vector<1x128xf32>
    %c5_207 = arith.constant 5 : index
    %c0_208 = arith.constant 0 : index
    %1102 = vector.load %arg6[%c5_207, %c0_208] : memref<8x128xf32, #tpu.memory_space<vmem>>, vector<1x128xf32>
    tpu.vector_store %arg6[%c5_207, %c0_208], %1101 {strides = array<i32>} : memref<8x128xf32, #tpu.memory_space<vmem>>, vector<1x128xf32>,
    %c5_209 = arith.constant 5 : index
    %1103 = memref.load %arg2[%c5_209] : memref<7xi32, #tpu.memory_space<smem>>
    %c0_i32_210 = arith.constant 0 : i32
    %1104 = arith.maxsi %1103, %c0_i32_210 : i32
    %c5_211 = arith.constant 5 : index
    %1105 = memref.load %arg1[%c5_211] : memref<7xf32, #tpu.memory_space<smem>>
    %1106 = vector.broadcast %1105 : f32 to vector<1x128xf32>
    %c5_212 = arith.constant 5 : index
    %1107 = memref.load %arg0[%c5_212] : memref<7xf32, #tpu.memory_space<smem>>
    %1108 = vector.broadcast %1107 : f32 to vector<1x128xf32>
    %c2_i32_213 = arith.constant 2 : i32
    %1109 = arith.shrui %1104, %c2_i32_213 : i32
    %c0_i32_214 = arith.constant 0 : i32
    %1110 = arith.subi %1109, %c0_i32_214 : i32
    %1111 = arith.addi %c0_i32_214, %1110 : i32
    %c1_i32_215 = arith.constant 1 : i32
    %1112:5 = scf.for %arg7 = %c0_i32_214 to %1111 step %c1_i32_215 iter_args(%arg8 = %1052, %arg9 = %1067, %arg10 = %1082, %arg11 = %1097, %arg12 = %1108) -> (vector<1x128xf32>, vector<1x128xf32>, vector<1x128xf32>, vector<1x128xf32>, vector<1x128xf32>)  : i32 {
      %1519 = arith.mulf %1, %arg8 : vector<1x128xf32>
      %1520 = arith.mulf %3, %arg9 : vector<1x128xf32>
      %1521 = arith.addf %1519, %1520 : vector<1x128xf32>
      %1522 = arith.mulf %5, %arg10 : vector<1x128xf32>
      %1523 = arith.addf %1521, %1522 : vector<1x128xf32>
      %1524 = arith.mulf %7, %arg11 : vector<1x128xf32>
      %1525 = arith.addf %1523, %1524 : vector<1x128xf32>
      %1526 = arith.mulf %33, %arg12 : vector<1x128xf32>
      %1527 = arith.addf %1525, %1526 : vector<1x128xf32>
      %cst_289 = arith.constant -1.000000e+05 : f32
      %cst_290 = arith.constant 1.000000e+05 : f32
      %1528 = vector.broadcast %cst_289 : f32 to vector<1x128xf32>
      %1529 = arith.maximumf %1528, %1527 : vector<1x128xf32>
      %1530 = vector.broadcast %cst_290 : f32 to vector<1x128xf32>
      %1531 = arith.minimumf %1530, %1529 : vector<1x128xf32>
      %1532 = arith.mulf %1106, %1531 : vector<1x128xf32>
      %1533 = arith.addf %arg8, %1532 : vector<1x128xf32>
      %1534 = arith.mulf %9, %arg8 : vector<1x128xf32>
      %1535 = arith.mulf %11, %arg9 : vector<1x128xf32>
      %1536 = arith.addf %1534, %1535 : vector<1x128xf32>
      %1537 = arith.mulf %13, %arg10 : vector<1x128xf32>
      %1538 = arith.addf %1536, %1537 : vector<1x128xf32>
      %1539 = arith.mulf %15, %arg11 : vector<1x128xf32>
      %1540 = arith.addf %1538, %1539 : vector<1x128xf32>
      %1541 = arith.mulf %35, %arg12 : vector<1x128xf32>
      %1542 = arith.addf %1540, %1541 : vector<1x128xf32>
      %cst_291 = arith.constant -1.000000e+05 : f32
      %cst_292 = arith.constant 1.000000e+05 : f32
      %1543 = vector.broadcast %cst_291 : f32 to vector<1x128xf32>
      %1544 = arith.maximumf %1543, %1542 : vector<1x128xf32>
      %1545 = vector.broadcast %cst_292 : f32 to vector<1x128xf32>
      %1546 = arith.minimumf %1545, %1544 : vector<1x128xf32>
      %1547 = arith.mulf %1106, %1546 : vector<1x128xf32>
      %1548 = arith.addf %arg9, %1547 : vector<1x128xf32>
      %1549 = arith.mulf %17, %arg8 : vector<1x128xf32>
      %1550 = arith.mulf %19, %arg9 : vector<1x128xf32>
      %1551 = arith.addf %1549, %1550 : vector<1x128xf32>
      %1552 = arith.mulf %21, %arg10 : vector<1x128xf32>
      %1553 = arith.addf %1551, %1552 : vector<1x128xf32>
      %1554 = arith.mulf %23, %arg11 : vector<1x128xf32>
      %1555 = arith.addf %1553, %1554 : vector<1x128xf32>
      %1556 = arith.mulf %37, %arg12 : vector<1x128xf32>
      %1557 = arith.addf %1555, %1556 : vector<1x128xf32>
      %cst_293 = arith.constant -1.000000e+05 : f32
      %cst_294 = arith.constant 1.000000e+05 : f32
      %1558 = vector.broadcast %cst_293 : f32 to vector<1x128xf32>
      %1559 = arith.maximumf %1558, %1557 : vector<1x128xf32>
      %1560 = vector.broadcast %cst_294 : f32 to vector<1x128xf32>
      %1561 = arith.minimumf %1560, %1559 : vector<1x128xf32>
      %1562 = arith.mulf %1106, %1561 : vector<1x128xf32>
      %1563 = arith.addf %arg10, %1562 : vector<1x128xf32>
      %1564 = arith.mulf %25, %arg8 : vector<1x128xf32>
      %1565 = arith.mulf %27, %arg9 : vector<1x128xf32>
      %1566 = arith.addf %1564, %1565 : vector<1x128xf32>
      %1567 = arith.mulf %29, %arg10 : vector<1x128xf32>
      %1568 = arith.addf %1566, %1567 : vector<1x128xf32>
      %1569 = arith.mulf %31, %arg11 : vector<1x128xf32>
      %1570 = arith.addf %1568, %1569 : vector<1x128xf32>
      %1571 = arith.mulf %39, %arg12 : vector<1x128xf32>
      %1572 = arith.addf %1570, %1571 : vector<1x128xf32>
      %cst_295 = arith.constant -1.000000e+05 : f32
      %cst_296 = arith.constant 1.000000e+05 : f32
      %1573 = vector.broadcast %cst_295 : f32 to vector<1x128xf32>
      %1574 = arith.maximumf %1573, %1572 : vector<1x128xf32>
      %1575 = vector.broadcast %cst_296 : f32 to vector<1x128xf32>
      %1576 = arith.minimumf %1575, %1574 : vector<1x128xf32>
      %1577 = arith.mulf %1106, %1576 : vector<1x128xf32>
      %1578 = arith.addf %arg11, %1577 : vector<1x128xf32>
      %1579 = arith.addf %arg12, %1106 : vector<1x128xf32>
      %1580 = arith.mulf %1, %1533 : vector<1x128xf32>
      %1581 = arith.mulf %3, %1548 : vector<1x128xf32>
      %1582 = arith.addf %1580, %1581 : vector<1x128xf32>
      %1583 = arith.mulf %5, %1563 : vector<1x128xf32>
      %1584 = arith.addf %1582, %1583 : vector<1x128xf32>
      %1585 = arith.mulf %7, %1578 : vector<1x128xf32>
      %1586 = arith.addf %1584, %1585 : vector<1x128xf32>
      %1587 = arith.mulf %33, %1579 : vector<1x128xf32>
      %1588 = arith.addf %1586, %1587 : vector<1x128xf32>
      %cst_297 = arith.constant -1.000000e+05 : f32
      %cst_298 = arith.constant 1.000000e+05 : f32
      %1589 = vector.broadcast %cst_297 : f32 to vector<1x128xf32>
      %1590 = arith.maximumf %1589, %1588 : vector<1x128xf32>
      %1591 = vector.broadcast %cst_298 : f32 to vector<1x128xf32>
      %1592 = arith.minimumf %1591, %1590 : vector<1x128xf32>
      %1593 = arith.mulf %1106, %1592 : vector<1x128xf32>
      %1594 = arith.addf %1533, %1593 : vector<1x128xf32>
      %1595 = arith.mulf %9, %1533 : vector<1x128xf32>
      %1596 = arith.mulf %11, %1548 : vector<1x128xf32>
      %1597 = arith.addf %1595, %1596 : vector<1x128xf32>
      %1598 = arith.mulf %13, %1563 : vector<1x128xf32>
      %1599 = arith.addf %1597, %1598 : vector<1x128xf32>
      %1600 = arith.mulf %15, %1578 : vector<1x128xf32>
      %1601 = arith.addf %1599, %1600 : vector<1x128xf32>
      %1602 = arith.mulf %35, %1579 : vector<1x128xf32>
      %1603 = arith.addf %1601, %1602 : vector<1x128xf32>
      %cst_299 = arith.constant -1.000000e+05 : f32
      %cst_300 = arith.constant 1.000000e+05 : f32
      %1604 = vector.broadcast %cst_299 : f32 to vector<1x128xf32>
      %1605 = arith.maximumf %1604, %1603 : vector<1x128xf32>
      %1606 = vector.broadcast %cst_300 : f32 to vector<1x128xf32>
      %1607 = arith.minimumf %1606, %1605 : vector<1x128xf32>
      %1608 = arith.mulf %1106, %1607 : vector<1x128xf32>
      %1609 = arith.addf %1548, %1608 : vector<1x128xf32>
      %1610 = arith.mulf %17, %1533 : vector<1x128xf32>
      %1611 = arith.mulf %19, %1548 : vector<1x128xf32>
      %1612 = arith.addf %1610, %1611 : vector<1x128xf32>
      %1613 = arith.mulf %21, %1563 : vector<1x128xf32>
      %1614 = arith.addf %1612, %1613 : vector<1x128xf32>
      %1615 = arith.mulf %23, %1578 : vector<1x128xf32>
      %1616 = arith.addf %1614, %1615 : vector<1x128xf32>
      %1617 = arith.mulf %37, %1579 : vector<1x128xf32>
      %1618 = arith.addf %1616, %1617 : vector<1x128xf32>
      %cst_301 = arith.constant -1.000000e+05 : f32
      %cst_302 = arith.constant 1.000000e+05 : f32
      %1619 = vector.broadcast %cst_301 : f32 to vector<1x128xf32>
      %1620 = arith.maximumf %1619, %1618 : vector<1x128xf32>
      %1621 = vector.broadcast %cst_302 : f32 to vector<1x128xf32>
      %1622 = arith.minimumf %1621, %1620 : vector<1x128xf32>
      %1623 = arith.mulf %1106, %1622 : vector<1x128xf32>
      %1624 = arith.addf %1563, %1623 : vector<1x128xf32>
      %1625 = arith.mulf %25, %1533 : vector<1x128xf32>
      %1626 = arith.mulf %27, %1548 : vector<1x128xf32>
      %1627 = arith.addf %1625, %1626 : vector<1x128xf32>
      %1628 = arith.mulf %29, %1563 : vector<1x128xf32>
      %1629 = arith.addf %1627, %1628 : vector<1x128xf32>
      %1630 = arith.mulf %31, %1578 : vector<1x128xf32>
      %1631 = arith.addf %1629, %1630 : vector<1x128xf32>
      %1632 = arith.mulf %39, %1579 : vector<1x128xf32>
      %1633 = arith.addf %1631, %1632 : vector<1x128xf32>
      %cst_303 = arith.constant -1.000000e+05 : f32
      %cst_304 = arith.constant 1.000000e+05 : f32
      %1634 = vector.broadcast %cst_303 : f32 to vector<1x128xf32>
      %1635 = arith.maximumf %1634, %1633 : vector<1x128xf32>
      %1636 = vector.broadcast %cst_304 : f32 to vector<1x128xf32>
      %1637 = arith.minimumf %1636, %1635 : vector<1x128xf32>
      %1638 = arith.mulf %1106, %1637 : vector<1x128xf32>
      %1639 = arith.addf %1578, %1638 : vector<1x128xf32>
      %1640 = arith.addf %1579, %1106 : vector<1x128xf32>
      %1641 = arith.mulf %1, %1594 : vector<1x128xf32>
      %1642 = arith.mulf %3, %1609 : vector<1x128xf32>
      %1643 = arith.addf %1641, %1642 : vector<1x128xf32>
      %1644 = arith.mulf %5, %1624 : vector<1x128xf32>
      %1645 = arith.addf %1643, %1644 : vector<1x128xf32>
      %1646 = arith.mulf %7, %1639 : vector<1x128xf32>
      %1647 = arith.addf %1645, %1646 : vector<1x128xf32>
      %1648 = arith.mulf %33, %1640 : vector<1x128xf32>
      %1649 = arith.addf %1647, %1648 : vector<1x128xf32>
      %cst_305 = arith.constant -1.000000e+05 : f32
      %cst_306 = arith.constant 1.000000e+05 : f32
      %1650 = vector.broadcast %cst_305 : f32 to vector<1x128xf32>
      %1651 = arith.maximumf %1650, %1649 : vector<1x128xf32>
      %1652 = vector.broadcast %cst_306 : f32 to vector<1x128xf32>
      %1653 = arith.minimumf %1652, %1651 : vector<1x128xf32>
      %1654 = arith.mulf %1106, %1653 : vector<1x128xf32>
      %1655 = arith.addf %1594, %1654 : vector<1x128xf32>
      %1656 = arith.mulf %9, %1594 : vector<1x128xf32>
      %1657 = arith.mulf %11, %1609 : vector<1x128xf32>
      %1658 = arith.addf %1656, %1657 : vector<1x128xf32>
      %1659 = arith.mulf %13, %1624 : vector<1x128xf32>
      %1660 = arith.addf %1658, %1659 : vector<1x128xf32>
      %1661 = arith.mulf %15, %1639 : vector<1x128xf32>
      %1662 = arith.addf %1660, %1661 : vector<1x128xf32>
      %1663 = arith.mulf %35, %1640 : vector<1x128xf32>
      %1664 = arith.addf %1662, %1663 : vector<1x128xf32>
      %cst_307 = arith.constant -1.000000e+05 : f32
      %cst_308 = arith.constant 1.000000e+05 : f32
      %1665 = vector.broadcast %cst_307 : f32 to vector<1x128xf32>
      %1666 = arith.maximumf %1665, %1664 : vector<1x128xf32>
      %1667 = vector.broadcast %cst_308 : f32 to vector<1x128xf32>
      %1668 = arith.minimumf %1667, %1666 : vector<1x128xf32>
      %1669 = arith.mulf %1106, %1668 : vector<1x128xf32>
      %1670 = arith.addf %1609, %1669 : vector<1x128xf32>
      %1671 = arith.mulf %17, %1594 : vector<1x128xf32>
      %1672 = arith.mulf %19, %1609 : vector<1x128xf32>
      %1673 = arith.addf %1671, %1672 : vector<1x128xf32>
      %1674 = arith.mulf %21, %1624 : vector<1x128xf32>
      %1675 = arith.addf %1673, %1674 : vector<1x128xf32>
      %1676 = arith.mulf %23, %1639 : vector<1x128xf32>
      %1677 = arith.addf %1675, %1676 : vector<1x128xf32>
      %1678 = arith.mulf %37, %1640 : vector<1x128xf32>
      %1679 = arith.addf %1677, %1678 : vector<1x128xf32>
      %cst_309 = arith.constant -1.000000e+05 : f32
      %cst_310 = arith.constant 1.000000e+05 : f32
      %1680 = vector.broadcast %cst_309 : f32 to vector<1x128xf32>
      %1681 = arith.maximumf %1680, %1679 : vector<1x128xf32>
      %1682 = vector.broadcast %cst_310 : f32 to vector<1x128xf32>
      %1683 = arith.minimumf %1682, %1681 : vector<1x128xf32>
      %1684 = arith.mulf %1106, %1683 : vector<1x128xf32>
      %1685 = arith.addf %1624, %1684 : vector<1x128xf32>
      %1686 = arith.mulf %25, %1594 : vector<1x128xf32>
      %1687 = arith.mulf %27, %1609 : vector<1x128xf32>
      %1688 = arith.addf %1686, %1687 : vector<1x128xf32>
      %1689 = arith.mulf %29, %1624 : vector<1x128xf32>
      %1690 = arith.addf %1688, %1689 : vector<1x128xf32>
      %1691 = arith.mulf %31, %1639 : vector<1x128xf32>
      %1692 = arith.addf %1690, %1691 : vector<1x128xf32>
      %1693 = arith.mulf %39, %1640 : vector<1x128xf32>
      %1694 = arith.addf %1692, %1693 : vector<1x128xf32>
      %cst_311 = arith.constant -1.000000e+05 : f32
      %cst_312 = arith.constant 1.000000e+05 : f32
      %1695 = vector.broadcast %cst_311 : f32 to vector<1x128xf32>
      %1696 = arith.maximumf %1695, %1694 : vector<1x128xf32>
      %1697 = vector.broadcast %cst_312 : f32 to vector<1x128xf32>
      %1698 = arith.minimumf %1697, %1696 : vector<1x128xf32>
      %1699 = arith.mulf %1106, %1698 : vector<1x128xf32>
      %1700 = arith.addf %1639, %1699 : vector<1x128xf32>
      %1701 = arith.addf %1640, %1106 : vector<1x128xf32>
      %1702 = arith.mulf %1, %1655 : vector<1x128xf32>
      %1703 = arith.mulf %3, %1670 : vector<1x128xf32>
      %1704 = arith.addf %1702, %1703 : vector<1x128xf32>
      %1705 = arith.mulf %5, %1685 : vector<1x128xf32>
      %1706 = arith.addf %1704, %1705 : vector<1x128xf32>
      %1707 = arith.mulf %7, %1700 : vector<1x128xf32>
      %1708 = arith.addf %1706, %1707 : vector<1x128xf32>
      %1709 = arith.mulf %33, %1701 : vector<1x128xf32>
      %1710 = arith.addf %1708, %1709 : vector<1x128xf32>
      %cst_313 = arith.constant -1.000000e+05 : f32
      %cst_314 = arith.constant 1.000000e+05 : f32
      %1711 = vector.broadcast %cst_313 : f32 to vector<1x128xf32>
      %1712 = arith.maximumf %1711, %1710 : vector<1x128xf32>
      %1713 = vector.broadcast %cst_314 : f32 to vector<1x128xf32>
      %1714 = arith.minimumf %1713, %1712 : vector<1x128xf32>
      %1715 = arith.mulf %1106, %1714 : vector<1x128xf32>
      %1716 = arith.addf %1655, %1715 : vector<1x128xf32>
      %1717 = arith.mulf %9, %1655 : vector<1x128xf32>
      %1718 = arith.mulf %11, %1670 : vector<1x128xf32>
      %1719 = arith.addf %1717, %1718 : vector<1x128xf32>
      %1720 = arith.mulf %13, %1685 : vector<1x128xf32>
      %1721 = arith.addf %1719, %1720 : vector<1x128xf32>
      %1722 = arith.mulf %15, %1700 : vector<1x128xf32>
      %1723 = arith.addf %1721, %1722 : vector<1x128xf32>
      %1724 = arith.mulf %35, %1701 : vector<1x128xf32>
      %1725 = arith.addf %1723, %1724 : vector<1x128xf32>
      %cst_315 = arith.constant -1.000000e+05 : f32
      %cst_316 = arith.constant 1.000000e+05 : f32
      %1726 = vector.broadcast %cst_315 : f32 to vector<1x128xf32>
      %1727 = arith.maximumf %1726, %1725 : vector<1x128xf32>
      %1728 = vector.broadcast %cst_316 : f32 to vector<1x128xf32>
      %1729 = arith.minimumf %1728, %1727 : vector<1x128xf32>
      %1730 = arith.mulf %1106, %1729 : vector<1x128xf32>
      %1731 = arith.addf %1670, %1730 : vector<1x128xf32>
      %1732 = arith.mulf %17, %1655 : vector<1x128xf32>
      %1733 = arith.mulf %19, %1670 : vector<1x128xf32>
      %1734 = arith.addf %1732, %1733 : vector<1x128xf32>
      %1735 = arith.mulf %21, %1685 : vector<1x128xf32>
      %1736 = arith.addf %1734, %1735 : vector<1x128xf32>
      %1737 = arith.mulf %23, %1700 : vector<1x128xf32>
      %1738 = arith.addf %1736, %1737 : vector<1x128xf32>
      %1739 = arith.mulf %37, %1701 : vector<1x128xf32>
      %1740 = arith.addf %1738, %1739 : vector<1x128xf32>
      %cst_317 = arith.constant -1.000000e+05 : f32
      %cst_318 = arith.constant 1.000000e+05 : f32
      %1741 = vector.broadcast %cst_317 : f32 to vector<1x128xf32>
      %1742 = arith.maximumf %1741, %1740 : vector<1x128xf32>
      %1743 = vector.broadcast %cst_318 : f32 to vector<1x128xf32>
      %1744 = arith.minimumf %1743, %1742 : vector<1x128xf32>
      %1745 = arith.mulf %1106, %1744 : vector<1x128xf32>
      %1746 = arith.addf %1685, %1745 : vector<1x128xf32>
      %1747 = arith.mulf %25, %1655 : vector<1x128xf32>
      %1748 = arith.mulf %27, %1670 : vector<1x128xf32>
      %1749 = arith.addf %1747, %1748 : vector<1x128xf32>
      %1750 = arith.mulf %29, %1685 : vector<1x128xf32>
      %1751 = arith.addf %1749, %1750 : vector<1x128xf32>
      %1752 = arith.mulf %31, %1700 : vector<1x128xf32>
      %1753 = arith.addf %1751, %1752 : vector<1x128xf32>
      %1754 = arith.mulf %39, %1701 : vector<1x128xf32>
      %1755 = arith.addf %1753, %1754 : vector<1x128xf32>
      %cst_319 = arith.constant -1.000000e+05 : f32
      %cst_320 = arith.constant 1.000000e+05 : f32
      %1756 = vector.broadcast %cst_319 : f32 to vector<1x128xf32>
      %1757 = arith.maximumf %1756, %1755 : vector<1x128xf32>
      %1758 = vector.broadcast %cst_320 : f32 to vector<1x128xf32>
      %1759 = arith.minimumf %1758, %1757 : vector<1x128xf32>
      %1760 = arith.mulf %1106, %1759 : vector<1x128xf32>
      %1761 = arith.addf %1700, %1760 : vector<1x128xf32>
      %1762 = arith.addf %1701, %1106 : vector<1x128xf32>
      scf.yield %1716, %1731, %1746, %1761, %1762 : vector<1x128xf32>, vector<1x128xf32>, vector<1x128xf32>, vector<1x128xf32>, vector<1x128xf32>
    }
    %c4_i32_216 = arith.constant 4 : i32
    %1113 = arith.muli %1109, %c4_i32_216 : i32
    %1114 = arith.subi %1104, %1113 : i32
    %c0_i32_217 = arith.constant 0 : i32
    %1115 = arith.cmpi sgt, %1114, %c0_i32_217 : i32
    %cst_218 = arith.constant 0.000000e+00 : f32
    %1116 = arith.select %1115, %1105, %cst_218 : f32
    %1117 = vector.broadcast %1116 : f32 to vector<1x128xf32>
    %1118 = arith.mulf %1, %1112#0 : vector<1x128xf32>
    %1119 = arith.mulf %3, %1112#1 : vector<1x128xf32>
    %1120 = arith.addf %1118, %1119 : vector<1x128xf32>
    %1121 = arith.mulf %5, %1112#2 : vector<1x128xf32>
    %1122 = arith.addf %1120, %1121 : vector<1x128xf32>
    %1123 = arith.mulf %7, %1112#3 : vector<1x128xf32>
    %1124 = arith.addf %1122, %1123 : vector<1x128xf32>
    %1125 = arith.mulf %33, %1112#4 : vector<1x128xf32>
    %1126 = arith.addf %1124, %1125 : vector<1x128xf32>
    %cst_219 = arith.constant -1.000000e+05 : f32
    %cst_220 = arith.constant 1.000000e+05 : f32
    %1127 = vector.broadcast %cst_219 : f32 to vector<1x128xf32>
    %1128 = arith.maximumf %1127, %1126 : vector<1x128xf32>
    %1129 = vector.broadcast %cst_220 : f32 to vector<1x128xf32>
    %1130 = arith.minimumf %1129, %1128 : vector<1x128xf32>
    %1131 = arith.mulf %1117, %1130 : vector<1x128xf32>
    %1132 = arith.addf %1112#0, %1131 : vector<1x128xf32>
    %1133 = arith.mulf %9, %1112#0 : vector<1x128xf32>
    %1134 = arith.mulf %11, %1112#1 : vector<1x128xf32>
    %1135 = arith.addf %1133, %1134 : vector<1x128xf32>
    %1136 = arith.mulf %13, %1112#2 : vector<1x128xf32>
    %1137 = arith.addf %1135, %1136 : vector<1x128xf32>
    %1138 = arith.mulf %15, %1112#3 : vector<1x128xf32>
    %1139 = arith.addf %1137, %1138 : vector<1x128xf32>
    %1140 = arith.mulf %35, %1112#4 : vector<1x128xf32>
    %1141 = arith.addf %1139, %1140 : vector<1x128xf32>
    %cst_221 = arith.constant -1.000000e+05 : f32
    %cst_222 = arith.constant 1.000000e+05 : f32
    %1142 = vector.broadcast %cst_221 : f32 to vector<1x128xf32>
    %1143 = arith.maximumf %1142, %1141 : vector<1x128xf32>
    %1144 = vector.broadcast %cst_222 : f32 to vector<1x128xf32>
    %1145 = arith.minimumf %1144, %1143 : vector<1x128xf32>
    %1146 = arith.mulf %1117, %1145 : vector<1x128xf32>
    %1147 = arith.addf %1112#1, %1146 : vector<1x128xf32>
    %1148 = arith.mulf %17, %1112#0 : vector<1x128xf32>
    %1149 = arith.mulf %19, %1112#1 : vector<1x128xf32>
    %1150 = arith.addf %1148, %1149 : vector<1x128xf32>
    %1151 = arith.mulf %21, %1112#2 : vector<1x128xf32>
    %1152 = arith.addf %1150, %1151 : vector<1x128xf32>
    %1153 = arith.mulf %23, %1112#3 : vector<1x128xf32>
    %1154 = arith.addf %1152, %1153 : vector<1x128xf32>
    %1155 = arith.mulf %37, %1112#4 : vector<1x128xf32>
    %1156 = arith.addf %1154, %1155 : vector<1x128xf32>
    %cst_223 = arith.constant -1.000000e+05 : f32
    %cst_224 = arith.constant 1.000000e+05 : f32
    %1157 = vector.broadcast %cst_223 : f32 to vector<1x128xf32>
    %1158 = arith.maximumf %1157, %1156 : vector<1x128xf32>
    %1159 = vector.broadcast %cst_224 : f32 to vector<1x128xf32>
    %1160 = arith.minimumf %1159, %1158 : vector<1x128xf32>
    %1161 = arith.mulf %1117, %1160 : vector<1x128xf32>
    %1162 = arith.addf %1112#2, %1161 : vector<1x128xf32>
    %1163 = arith.mulf %25, %1112#0 : vector<1x128xf32>
    %1164 = arith.mulf %27, %1112#1 : vector<1x128xf32>
    %1165 = arith.addf %1163, %1164 : vector<1x128xf32>
    %1166 = arith.mulf %29, %1112#2 : vector<1x128xf32>
    %1167 = arith.addf %1165, %1166 : vector<1x128xf32>
    %1168 = arith.mulf %31, %1112#3 : vector<1x128xf32>
    %1169 = arith.addf %1167, %1168 : vector<1x128xf32>
    %1170 = arith.mulf %39, %1112#4 : vector<1x128xf32>
    %1171 = arith.addf %1169, %1170 : vector<1x128xf32>
    %cst_225 = arith.constant -1.000000e+05 : f32
    %cst_226 = arith.constant 1.000000e+05 : f32
    %1172 = vector.broadcast %cst_225 : f32 to vector<1x128xf32>
    %1173 = arith.maximumf %1172, %1171 : vector<1x128xf32>
    %1174 = vector.broadcast %cst_226 : f32 to vector<1x128xf32>
    %1175 = arith.minimumf %1174, %1173 : vector<1x128xf32>
    %1176 = arith.mulf %1117, %1175 : vector<1x128xf32>
    %1177 = arith.addf %1112#3, %1176 : vector<1x128xf32>
    %1178 = arith.addf %1112#4, %1117 : vector<1x128xf32>
    %c1_i32_227 = arith.constant 1 : i32
    %1179 = arith.cmpi sgt, %1114, %c1_i32_227 : i32
    %cst_228 = arith.constant 0.000000e+00 : f32
    %1180 = arith.select %1179, %1105, %cst_228 : f32
    %1181 = vector.broadcast %1180 : f32 to vector<1x128xf32>
    %1182 = arith.mulf %1, %1132 : vector<1x128xf32>
    %1183 = arith.mulf %3, %1147 : vector<1x128xf32>
    %1184 = arith.addf %1182, %1183 : vector<1x128xf32>
    %1185 = arith.mulf %5, %1162 : vector<1x128xf32>
    %1186 = arith.addf %1184, %1185 : vector<1x128xf32>
    %1187 = arith.mulf %7, %1177 : vector<1x128xf32>
    %1188 = arith.addf %1186, %1187 : vector<1x128xf32>
    %1189 = arith.mulf %33, %1178 : vector<1x128xf32>
    %1190 = arith.addf %1188, %1189 : vector<1x128xf32>
    %cst_229 = arith.constant -1.000000e+05 : f32
    %cst_230 = arith.constant 1.000000e+05 : f32
    %1191 = vector.broadcast %cst_229 : f32 to vector<1x128xf32>
    %1192 = arith.maximumf %1191, %1190 : vector<1x128xf32>
    %1193 = vector.broadcast %cst_230 : f32 to vector<1x128xf32>
    %1194 = arith.minimumf %1193, %1192 : vector<1x128xf32>
    %1195 = arith.mulf %1181, %1194 : vector<1x128xf32>
    %1196 = arith.addf %1132, %1195 : vector<1x128xf32>
    %1197 = arith.mulf %9, %1132 : vector<1x128xf32>
    %1198 = arith.mulf %11, %1147 : vector<1x128xf32>
    %1199 = arith.addf %1197, %1198 : vector<1x128xf32>
    %1200 = arith.mulf %13, %1162 : vector<1x128xf32>
    %1201 = arith.addf %1199, %1200 : vector<1x128xf32>
    %1202 = arith.mulf %15, %1177 : vector<1x128xf32>
    %1203 = arith.addf %1201, %1202 : vector<1x128xf32>
    %1204 = arith.mulf %35, %1178 : vector<1x128xf32>
    %1205 = arith.addf %1203, %1204 : vector<1x128xf32>
    %cst_231 = arith.constant -1.000000e+05 : f32
    %cst_232 = arith.constant 1.000000e+05 : f32
    %1206 = vector.broadcast %cst_231 : f32 to vector<1x128xf32>
    %1207 = arith.maximumf %1206, %1205 : vector<1x128xf32>
    %1208 = vector.broadcast %cst_232 : f32 to vector<1x128xf32>
    %1209 = arith.minimumf %1208, %1207 : vector<1x128xf32>
    %1210 = arith.mulf %1181, %1209 : vector<1x128xf32>
    %1211 = arith.addf %1147, %1210 : vector<1x128xf32>
    %1212 = arith.mulf %17, %1132 : vector<1x128xf32>
    %1213 = arith.mulf %19, %1147 : vector<1x128xf32>
    %1214 = arith.addf %1212, %1213 : vector<1x128xf32>
    %1215 = arith.mulf %21, %1162 : vector<1x128xf32>
    %1216 = arith.addf %1214, %1215 : vector<1x128xf32>
    %1217 = arith.mulf %23, %1177 : vector<1x128xf32>
    %1218 = arith.addf %1216, %1217 : vector<1x128xf32>
    %1219 = arith.mulf %37, %1178 : vector<1x128xf32>
    %1220 = arith.addf %1218, %1219 : vector<1x128xf32>
    %cst_233 = arith.constant -1.000000e+05 : f32
    %cst_234 = arith.constant 1.000000e+05 : f32
    %1221 = vector.broadcast %cst_233 : f32 to vector<1x128xf32>
    %1222 = arith.maximumf %1221, %1220 : vector<1x128xf32>
    %1223 = vector.broadcast %cst_234 : f32 to vector<1x128xf32>
    %1224 = arith.minimumf %1223, %1222 : vector<1x128xf32>
    %1225 = arith.mulf %1181, %1224 : vector<1x128xf32>
    %1226 = arith.addf %1162, %1225 : vector<1x128xf32>
    %1227 = arith.mulf %25, %1132 : vector<1x128xf32>
    %1228 = arith.mulf %27, %1147 : vector<1x128xf32>
    %1229 = arith.addf %1227, %1228 : vector<1x128xf32>
    %1230 = arith.mulf %29, %1162 : vector<1x128xf32>
    %1231 = arith.addf %1229, %1230 : vector<1x128xf32>
    %1232 = arith.mulf %31, %1177 : vector<1x128xf32>
    %1233 = arith.addf %1231, %1232 : vector<1x128xf32>
    %1234 = arith.mulf %39, %1178 : vector<1x128xf32>
    %1235 = arith.addf %1233, %1234 : vector<1x128xf32>
    %cst_235 = arith.constant -1.000000e+05 : f32
    %cst_236 = arith.constant 1.000000e+05 : f32
    %1236 = vector.broadcast %cst_235 : f32 to vector<1x128xf32>
    %1237 = arith.maximumf %1236, %1235 : vector<1x128xf32>
    %1238 = vector.broadcast %cst_236 : f32 to vector<1x128xf32>
    %1239 = arith.minimumf %1238, %1237 : vector<1x128xf32>
    %1240 = arith.mulf %1181, %1239 : vector<1x128xf32>
    %1241 = arith.addf %1177, %1240 : vector<1x128xf32>
    %1242 = arith.addf %1178, %1181 : vector<1x128xf32>
    %c2_i32_237 = arith.constant 2 : i32
    %1243 = arith.cmpi sgt, %1114, %c2_i32_237 : i32
    %cst_238 = arith.constant 0.000000e+00 : f32
    %1244 = arith.select %1243, %1105, %cst_238 : f32
    %1245 = vector.broadcast %1244 : f32 to vector<1x128xf32>
    %1246 = arith.mulf %1, %1196 : vector<1x128xf32>
    %1247 = arith.mulf %3, %1211 : vector<1x128xf32>
    %1248 = arith.addf %1246, %1247 : vector<1x128xf32>
    %1249 = arith.mulf %5, %1226 : vector<1x128xf32>
    %1250 = arith.addf %1248, %1249 : vector<1x128xf32>
    %1251 = arith.mulf %7, %1241 : vector<1x128xf32>
    %1252 = arith.addf %1250, %1251 : vector<1x128xf32>
    %1253 = arith.mulf %33, %1242 : vector<1x128xf32>
    %1254 = arith.addf %1252, %1253 : vector<1x128xf32>
    %cst_239 = arith.constant -1.000000e+05 : f32
    %cst_240 = arith.constant 1.000000e+05 : f32
    %1255 = vector.broadcast %cst_239 : f32 to vector<1x128xf32>
    %1256 = arith.maximumf %1255, %1254 : vector<1x128xf32>
    %1257 = vector.broadcast %cst_240 : f32 to vector<1x128xf32>
    %1258 = arith.minimumf %1257, %1256 : vector<1x128xf32>
    %1259 = arith.mulf %1245, %1258 : vector<1x128xf32>
    %1260 = arith.addf %1196, %1259 : vector<1x128xf32>
    %1261 = arith.mulf %9, %1196 : vector<1x128xf32>
    %1262 = arith.mulf %11, %1211 : vector<1x128xf32>
    %1263 = arith.addf %1261, %1262 : vector<1x128xf32>
    %1264 = arith.mulf %13, %1226 : vector<1x128xf32>
    %1265 = arith.addf %1263, %1264 : vector<1x128xf32>
    %1266 = arith.mulf %15, %1241 : vector<1x128xf32>
    %1267 = arith.addf %1265, %1266 : vector<1x128xf32>
    %1268 = arith.mulf %35, %1242 : vector<1x128xf32>
    %1269 = arith.addf %1267, %1268 : vector<1x128xf32>
    %cst_241 = arith.constant -1.000000e+05 : f32
    %cst_242 = arith.constant 1.000000e+05 : f32
    %1270 = vector.broadcast %cst_241 : f32 to vector<1x128xf32>
    %1271 = arith.maximumf %1270, %1269 : vector<1x128xf32>
    %1272 = vector.broadcast %cst_242 : f32 to vector<1x128xf32>
    %1273 = arith.minimumf %1272, %1271 : vector<1x128xf32>
    %1274 = arith.mulf %1245, %1273 : vector<1x128xf32>
    %1275 = arith.addf %1211, %1274 : vector<1x128xf32>
    %1276 = arith.mulf %17, %1196 : vector<1x128xf32>
    %1277 = arith.mulf %19, %1211 : vector<1x128xf32>
    %1278 = arith.addf %1276, %1277 : vector<1x128xf32>
    %1279 = arith.mulf %21, %1226 : vector<1x128xf32>
    %1280 = arith.addf %1278, %1279 : vector<1x128xf32>
    %1281 = arith.mulf %23, %1241 : vector<1x128xf32>
    %1282 = arith.addf %1280, %1281 : vector<1x128xf32>
    %1283 = arith.mulf %37, %1242 : vector<1x128xf32>
    %1284 = arith.addf %1282, %1283 : vector<1x128xf32>
    %cst_243 = arith.constant -1.000000e+05 : f32
    %cst_244 = arith.constant 1.000000e+05 : f32
    %1285 = vector.broadcast %cst_243 : f32 to vector<1x128xf32>
    %1286 = arith.maximumf %1285, %1284 : vector<1x128xf32>
    %1287 = vector.broadcast %cst_244 : f32 to vector<1x128xf32>
    %1288 = arith.minimumf %1287, %1286 : vector<1x128xf32>
    %1289 = arith.mulf %1245, %1288 : vector<1x128xf32>
    %1290 = arith.addf %1226, %1289 : vector<1x128xf32>
    %1291 = arith.mulf %25, %1196 : vector<1x128xf32>
    %1292 = arith.mulf %27, %1211 : vector<1x128xf32>
    %1293 = arith.addf %1291, %1292 : vector<1x128xf32>
    %1294 = arith.mulf %29, %1226 : vector<1x128xf32>
    %1295 = arith.addf %1293, %1294 : vector<1x128xf32>
    %1296 = arith.mulf %31, %1241 : vector<1x128xf32>
    %1297 = arith.addf %1295, %1296 : vector<1x128xf32>
    %1298 = arith.mulf %39, %1242 : vector<1x128xf32>
    %1299 = arith.addf %1297, %1298 : vector<1x128xf32>
    %cst_245 = arith.constant -1.000000e+05 : f32
    %cst_246 = arith.constant 1.000000e+05 : f32
    %1300 = vector.broadcast %cst_245 : f32 to vector<1x128xf32>
    %1301 = arith.maximumf %1300, %1299 : vector<1x128xf32>
    %1302 = vector.broadcast %cst_246 : f32 to vector<1x128xf32>
    %1303 = arith.minimumf %1302, %1301 : vector<1x128xf32>
    %1304 = arith.mulf %1245, %1303 : vector<1x128xf32>
    %1305 = arith.addf %1241, %1304 : vector<1x128xf32>
    %1306 = arith.select %43, %1260, %40 : vector<1x128xi1>, vector<1x128xf32>
    %1307 = arith.select %45, %1275, %1306 : vector<1x128xi1>, vector<1x128xf32>
    %1308 = arith.select %47, %1290, %1307 : vector<1x128xi1>, vector<1x128xf32>
    %1309 = arith.select %49, %1305, %1308 : vector<1x128xi1>, vector<1x128xf32>
    %c6_247 = arith.constant 6 : index
    %c0_248 = arith.constant 0 : index
    %1310 = vector.load %arg6[%c6_247, %c0_248] : memref<8x128xf32, #tpu.memory_space<vmem>>, vector<1x128xf32>
    tpu.vector_store %arg6[%c6_247, %c0_248], %1309 {strides = array<i32>} : memref<8x128xf32, #tpu.memory_space<vmem>>, vector<1x128xf32>,
    %c6_249 = arith.constant 6 : index
    %1311 = memref.load %arg2[%c6_249] : memref<7xi32, #tpu.memory_space<smem>>
    %c0_i32_250 = arith.constant 0 : i32
    %1312 = arith.maxsi %1311, %c0_i32_250 : i32
    %c6_251 = arith.constant 6 : index
    %1313 = memref.load %arg1[%c6_251] : memref<7xf32, #tpu.memory_space<smem>>
    %1314 = vector.broadcast %1313 : f32 to vector<1x128xf32>
    %c6_252 = arith.constant 6 : index
    %1315 = memref.load %arg0[%c6_252] : memref<7xf32, #tpu.memory_space<smem>>
    %1316 = vector.broadcast %1315 : f32 to vector<1x128xf32>
    %c2_i32_253 = arith.constant 2 : i32
    %1317 = arith.shrui %1312, %c2_i32_253 : i32
    %c0_i32_254 = arith.constant 0 : i32
    %1318 = arith.subi %1317, %c0_i32_254 : i32
    %1319 = arith.addi %c0_i32_254, %1318 : i32
    %c1_i32_255 = arith.constant 1 : i32
    %1320:5 = scf.for %arg7 = %c0_i32_254 to %1319 step %c1_i32_255 iter_args(%arg8 = %1260, %arg9 = %1275, %arg10 = %1290, %arg11 = %1305, %arg12 = %1316) -> (vector<1x128xf32>, vector<1x128xf32>, vector<1x128xf32>, vector<1x128xf32>, vector<1x128xf32>)  : i32 {
      %1519 = arith.mulf %1, %arg8 : vector<1x128xf32>
      %1520 = arith.mulf %3, %arg9 : vector<1x128xf32>
      %1521 = arith.addf %1519, %1520 : vector<1x128xf32>
      %1522 = arith.mulf %5, %arg10 : vector<1x128xf32>
      %1523 = arith.addf %1521, %1522 : vector<1x128xf32>
      %1524 = arith.mulf %7, %arg11 : vector<1x128xf32>
      %1525 = arith.addf %1523, %1524 : vector<1x128xf32>
      %1526 = arith.mulf %33, %arg12 : vector<1x128xf32>
      %1527 = arith.addf %1525, %1526 : vector<1x128xf32>
      %cst_289 = arith.constant -1.000000e+05 : f32
      %cst_290 = arith.constant 1.000000e+05 : f32
      %1528 = vector.broadcast %cst_289 : f32 to vector<1x128xf32>
      %1529 = arith.maximumf %1528, %1527 : vector<1x128xf32>
      %1530 = vector.broadcast %cst_290 : f32 to vector<1x128xf32>
      %1531 = arith.minimumf %1530, %1529 : vector<1x128xf32>
      %1532 = arith.mulf %1314, %1531 : vector<1x128xf32>
      %1533 = arith.addf %arg8, %1532 : vector<1x128xf32>
      %1534 = arith.mulf %9, %arg8 : vector<1x128xf32>
      %1535 = arith.mulf %11, %arg9 : vector<1x128xf32>
      %1536 = arith.addf %1534, %1535 : vector<1x128xf32>
      %1537 = arith.mulf %13, %arg10 : vector<1x128xf32>
      %1538 = arith.addf %1536, %1537 : vector<1x128xf32>
      %1539 = arith.mulf %15, %arg11 : vector<1x128xf32>
      %1540 = arith.addf %1538, %1539 : vector<1x128xf32>
      %1541 = arith.mulf %35, %arg12 : vector<1x128xf32>
      %1542 = arith.addf %1540, %1541 : vector<1x128xf32>
      %cst_291 = arith.constant -1.000000e+05 : f32
      %cst_292 = arith.constant 1.000000e+05 : f32
      %1543 = vector.broadcast %cst_291 : f32 to vector<1x128xf32>
      %1544 = arith.maximumf %1543, %1542 : vector<1x128xf32>
      %1545 = vector.broadcast %cst_292 : f32 to vector<1x128xf32>
      %1546 = arith.minimumf %1545, %1544 : vector<1x128xf32>
      %1547 = arith.mulf %1314, %1546 : vector<1x128xf32>
      %1548 = arith.addf %arg9, %1547 : vector<1x128xf32>
      %1549 = arith.mulf %17, %arg8 : vector<1x128xf32>
      %1550 = arith.mulf %19, %arg9 : vector<1x128xf32>
      %1551 = arith.addf %1549, %1550 : vector<1x128xf32>
      %1552 = arith.mulf %21, %arg10 : vector<1x128xf32>
      %1553 = arith.addf %1551, %1552 : vector<1x128xf32>
      %1554 = arith.mulf %23, %arg11 : vector<1x128xf32>
      %1555 = arith.addf %1553, %1554 : vector<1x128xf32>
      %1556 = arith.mulf %37, %arg12 : vector<1x128xf32>
      %1557 = arith.addf %1555, %1556 : vector<1x128xf32>
      %cst_293 = arith.constant -1.000000e+05 : f32
      %cst_294 = arith.constant 1.000000e+05 : f32
      %1558 = vector.broadcast %cst_293 : f32 to vector<1x128xf32>
      %1559 = arith.maximumf %1558, %1557 : vector<1x128xf32>
      %1560 = vector.broadcast %cst_294 : f32 to vector<1x128xf32>
      %1561 = arith.minimumf %1560, %1559 : vector<1x128xf32>
      %1562 = arith.mulf %1314, %1561 : vector<1x128xf32>
      %1563 = arith.addf %arg10, %1562 : vector<1x128xf32>
      %1564 = arith.mulf %25, %arg8 : vector<1x128xf32>
      %1565 = arith.mulf %27, %arg9 : vector<1x128xf32>
      %1566 = arith.addf %1564, %1565 : vector<1x128xf32>
      %1567 = arith.mulf %29, %arg10 : vector<1x128xf32>
      %1568 = arith.addf %1566, %1567 : vector<1x128xf32>
      %1569 = arith.mulf %31, %arg11 : vector<1x128xf32>
      %1570 = arith.addf %1568, %1569 : vector<1x128xf32>
      %1571 = arith.mulf %39, %arg12 : vector<1x128xf32>
      %1572 = arith.addf %1570, %1571 : vector<1x128xf32>
      %cst_295 = arith.constant -1.000000e+05 : f32
      %cst_296 = arith.constant 1.000000e+05 : f32
      %1573 = vector.broadcast %cst_295 : f32 to vector<1x128xf32>
      %1574 = arith.maximumf %1573, %1572 : vector<1x128xf32>
      %1575 = vector.broadcast %cst_296 : f32 to vector<1x128xf32>
      %1576 = arith.minimumf %1575, %1574 : vector<1x128xf32>
      %1577 = arith.mulf %1314, %1576 : vector<1x128xf32>
      %1578 = arith.addf %arg11, %1577 : vector<1x128xf32>
      %1579 = arith.addf %arg12, %1314 : vector<1x128xf32>
      %1580 = arith.mulf %1, %1533 : vector<1x128xf32>
      %1581 = arith.mulf %3, %1548 : vector<1x128xf32>
      %1582 = arith.addf %1580, %1581 : vector<1x128xf32>
      %1583 = arith.mulf %5, %1563 : vector<1x128xf32>
      %1584 = arith.addf %1582, %1583 : vector<1x128xf32>
      %1585 = arith.mulf %7, %1578 : vector<1x128xf32>
      %1586 = arith.addf %1584, %1585 : vector<1x128xf32>
      %1587 = arith.mulf %33, %1579 : vector<1x128xf32>
      %1588 = arith.addf %1586, %1587 : vector<1x128xf32>
      %cst_297 = arith.constant -1.000000e+05 : f32
      %cst_298 = arith.constant 1.000000e+05 : f32
      %1589 = vector.broadcast %cst_297 : f32 to vector<1x128xf32>
      %1590 = arith.maximumf %1589, %1588 : vector<1x128xf32>
      %1591 = vector.broadcast %cst_298 : f32 to vector<1x128xf32>
      %1592 = arith.minimumf %1591, %1590 : vector<1x128xf32>
      %1593 = arith.mulf %1314, %1592 : vector<1x128xf32>
      %1594 = arith.addf %1533, %1593 : vector<1x128xf32>
      %1595 = arith.mulf %9, %1533 : vector<1x128xf32>
      %1596 = arith.mulf %11, %1548 : vector<1x128xf32>
      %1597 = arith.addf %1595, %1596 : vector<1x128xf32>
      %1598 = arith.mulf %13, %1563 : vector<1x128xf32>
      %1599 = arith.addf %1597, %1598 : vector<1x128xf32>
      %1600 = arith.mulf %15, %1578 : vector<1x128xf32>
      %1601 = arith.addf %1599, %1600 : vector<1x128xf32>
      %1602 = arith.mulf %35, %1579 : vector<1x128xf32>
      %1603 = arith.addf %1601, %1602 : vector<1x128xf32>
      %cst_299 = arith.constant -1.000000e+05 : f32
      %cst_300 = arith.constant 1.000000e+05 : f32
      %1604 = vector.broadcast %cst_299 : f32 to vector<1x128xf32>
      %1605 = arith.maximumf %1604, %1603 : vector<1x128xf32>
      %1606 = vector.broadcast %cst_300 : f32 to vector<1x128xf32>
      %1607 = arith.minimumf %1606, %1605 : vector<1x128xf32>
      %1608 = arith.mulf %1314, %1607 : vector<1x128xf32>
      %1609 = arith.addf %1548, %1608 : vector<1x128xf32>
      %1610 = arith.mulf %17, %1533 : vector<1x128xf32>
      %1611 = arith.mulf %19, %1548 : vector<1x128xf32>
      %1612 = arith.addf %1610, %1611 : vector<1x128xf32>
      %1613 = arith.mulf %21, %1563 : vector<1x128xf32>
      %1614 = arith.addf %1612, %1613 : vector<1x128xf32>
      %1615 = arith.mulf %23, %1578 : vector<1x128xf32>
      %1616 = arith.addf %1614, %1615 : vector<1x128xf32>
      %1617 = arith.mulf %37, %1579 : vector<1x128xf32>
      %1618 = arith.addf %1616, %1617 : vector<1x128xf32>
      %cst_301 = arith.constant -1.000000e+05 : f32
      %cst_302 = arith.constant 1.000000e+05 : f32
      %1619 = vector.broadcast %cst_301 : f32 to vector<1x128xf32>
      %1620 = arith.maximumf %1619, %1618 : vector<1x128xf32>
      %1621 = vector.broadcast %cst_302 : f32 to vector<1x128xf32>
      %1622 = arith.minimumf %1621, %1620 : vector<1x128xf32>
      %1623 = arith.mulf %1314, %1622 : vector<1x128xf32>
      %1624 = arith.addf %1563, %1623 : vector<1x128xf32>
      %1625 = arith.mulf %25, %1533 : vector<1x128xf32>
      %1626 = arith.mulf %27, %1548 : vector<1x128xf32>
      %1627 = arith.addf %1625, %1626 : vector<1x128xf32>
      %1628 = arith.mulf %29, %1563 : vector<1x128xf32>
      %1629 = arith.addf %1627, %1628 : vector<1x128xf32>
      %1630 = arith.mulf %31, %1578 : vector<1x128xf32>
      %1631 = arith.addf %1629, %1630 : vector<1x128xf32>
      %1632 = arith.mulf %39, %1579 : vector<1x128xf32>
      %1633 = arith.addf %1631, %1632 : vector<1x128xf32>
      %cst_303 = arith.constant -1.000000e+05 : f32
      %cst_304 = arith.constant 1.000000e+05 : f32
      %1634 = vector.broadcast %cst_303 : f32 to vector<1x128xf32>
      %1635 = arith.maximumf %1634, %1633 : vector<1x128xf32>
      %1636 = vector.broadcast %cst_304 : f32 to vector<1x128xf32>
      %1637 = arith.minimumf %1636, %1635 : vector<1x128xf32>
      %1638 = arith.mulf %1314, %1637 : vector<1x128xf32>
      %1639 = arith.addf %1578, %1638 : vector<1x128xf32>
      %1640 = arith.addf %1579, %1314 : vector<1x128xf32>
      %1641 = arith.mulf %1, %1594 : vector<1x128xf32>
      %1642 = arith.mulf %3, %1609 : vector<1x128xf32>
      %1643 = arith.addf %1641, %1642 : vector<1x128xf32>
      %1644 = arith.mulf %5, %1624 : vector<1x128xf32>
      %1645 = arith.addf %1643, %1644 : vector<1x128xf32>
      %1646 = arith.mulf %7, %1639 : vector<1x128xf32>
      %1647 = arith.addf %1645, %1646 : vector<1x128xf32>
      %1648 = arith.mulf %33, %1640 : vector<1x128xf32>
      %1649 = arith.addf %1647, %1648 : vector<1x128xf32>
      %cst_305 = arith.constant -1.000000e+05 : f32
      %cst_306 = arith.constant 1.000000e+05 : f32
      %1650 = vector.broadcast %cst_305 : f32 to vector<1x128xf32>
      %1651 = arith.maximumf %1650, %1649 : vector<1x128xf32>
      %1652 = vector.broadcast %cst_306 : f32 to vector<1x128xf32>
      %1653 = arith.minimumf %1652, %1651 : vector<1x128xf32>
      %1654 = arith.mulf %1314, %1653 : vector<1x128xf32>
      %1655 = arith.addf %1594, %1654 : vector<1x128xf32>
      %1656 = arith.mulf %9, %1594 : vector<1x128xf32>
      %1657 = arith.mulf %11, %1609 : vector<1x128xf32>
      %1658 = arith.addf %1656, %1657 : vector<1x128xf32>
      %1659 = arith.mulf %13, %1624 : vector<1x128xf32>
      %1660 = arith.addf %1658, %1659 : vector<1x128xf32>
      %1661 = arith.mulf %15, %1639 : vector<1x128xf32>
      %1662 = arith.addf %1660, %1661 : vector<1x128xf32>
      %1663 = arith.mulf %35, %1640 : vector<1x128xf32>
      %1664 = arith.addf %1662, %1663 : vector<1x128xf32>
      %cst_307 = arith.constant -1.000000e+05 : f32
      %cst_308 = arith.constant 1.000000e+05 : f32
      %1665 = vector.broadcast %cst_307 : f32 to vector<1x128xf32>
      %1666 = arith.maximumf %1665, %1664 : vector<1x128xf32>
      %1667 = vector.broadcast %cst_308 : f32 to vector<1x128xf32>
      %1668 = arith.minimumf %1667, %1666 : vector<1x128xf32>
      %1669 = arith.mulf %1314, %1668 : vector<1x128xf32>
      %1670 = arith.addf %1609, %1669 : vector<1x128xf32>
      %1671 = arith.mulf %17, %1594 : vector<1x128xf32>
      %1672 = arith.mulf %19, %1609 : vector<1x128xf32>
      %1673 = arith.addf %1671, %1672 : vector<1x128xf32>
      %1674 = arith.mulf %21, %1624 : vector<1x128xf32>
      %1675 = arith.addf %1673, %1674 : vector<1x128xf32>
      %1676 = arith.mulf %23, %1639 : vector<1x128xf32>
      %1677 = arith.addf %1675, %1676 : vector<1x128xf32>
      %1678 = arith.mulf %37, %1640 : vector<1x128xf32>
      %1679 = arith.addf %1677, %1678 : vector<1x128xf32>
      %cst_309 = arith.constant -1.000000e+05 : f32
      %cst_310 = arith.constant 1.000000e+05 : f32
      %1680 = vector.broadcast %cst_309 : f32 to vector<1x128xf32>
      %1681 = arith.maximumf %1680, %1679 : vector<1x128xf32>
      %1682 = vector.broadcast %cst_310 : f32 to vector<1x128xf32>
      %1683 = arith.minimumf %1682, %1681 : vector<1x128xf32>
      %1684 = arith.mulf %1314, %1683 : vector<1x128xf32>
      %1685 = arith.addf %1624, %1684 : vector<1x128xf32>
      %1686 = arith.mulf %25, %1594 : vector<1x128xf32>
      %1687 = arith.mulf %27, %1609 : vector<1x128xf32>
      %1688 = arith.addf %1686, %1687 : vector<1x128xf32>
      %1689 = arith.mulf %29, %1624 : vector<1x128xf32>
      %1690 = arith.addf %1688, %1689 : vector<1x128xf32>
      %1691 = arith.mulf %31, %1639 : vector<1x128xf32>
      %1692 = arith.addf %1690, %1691 : vector<1x128xf32>
      %1693 = arith.mulf %39, %1640 : vector<1x128xf32>
      %1694 = arith.addf %1692, %1693 : vector<1x128xf32>
      %cst_311 = arith.constant -1.000000e+05 : f32
      %cst_312 = arith.constant 1.000000e+05 : f32
      %1695 = vector.broadcast %cst_311 : f32 to vector<1x128xf32>
      %1696 = arith.maximumf %1695, %1694 : vector<1x128xf32>
      %1697 = vector.broadcast %cst_312 : f32 to vector<1x128xf32>
      %1698 = arith.minimumf %1697, %1696 : vector<1x128xf32>
      %1699 = arith.mulf %1314, %1698 : vector<1x128xf32>
      %1700 = arith.addf %1639, %1699 : vector<1x128xf32>
      %1701 = arith.addf %1640, %1314 : vector<1x128xf32>
      %1702 = arith.mulf %1, %1655 : vector<1x128xf32>
      %1703 = arith.mulf %3, %1670 : vector<1x128xf32>
      %1704 = arith.addf %1702, %1703 : vector<1x128xf32>
      %1705 = arith.mulf %5, %1685 : vector<1x128xf32>
      %1706 = arith.addf %1704, %1705 : vector<1x128xf32>
      %1707 = arith.mulf %7, %1700 : vector<1x128xf32>
      %1708 = arith.addf %1706, %1707 : vector<1x128xf32>
      %1709 = arith.mulf %33, %1701 : vector<1x128xf32>
      %1710 = arith.addf %1708, %1709 : vector<1x128xf32>
      %cst_313 = arith.constant -1.000000e+05 : f32
      %cst_314 = arith.constant 1.000000e+05 : f32
      %1711 = vector.broadcast %cst_313 : f32 to vector<1x128xf32>
      %1712 = arith.maximumf %1711, %1710 : vector<1x128xf32>
      %1713 = vector.broadcast %cst_314 : f32 to vector<1x128xf32>
      %1714 = arith.minimumf %1713, %1712 : vector<1x128xf32>
      %1715 = arith.mulf %1314, %1714 : vector<1x128xf32>
      %1716 = arith.addf %1655, %1715 : vector<1x128xf32>
      %1717 = arith.mulf %9, %1655 : vector<1x128xf32>
      %1718 = arith.mulf %11, %1670 : vector<1x128xf32>
      %1719 = arith.addf %1717, %1718 : vector<1x128xf32>
      %1720 = arith.mulf %13, %1685 : vector<1x128xf32>
      %1721 = arith.addf %1719, %1720 : vector<1x128xf32>
      %1722 = arith.mulf %15, %1700 : vector<1x128xf32>
      %1723 = arith.addf %1721, %1722 : vector<1x128xf32>
      %1724 = arith.mulf %35, %1701 : vector<1x128xf32>
      %1725 = arith.addf %1723, %1724 : vector<1x128xf32>
      %cst_315 = arith.constant -1.000000e+05 : f32
      %cst_316 = arith.constant 1.000000e+05 : f32
      %1726 = vector.broadcast %cst_315 : f32 to vector<1x128xf32>
      %1727 = arith.maximumf %1726, %1725 : vector<1x128xf32>
      %1728 = vector.broadcast %cst_316 : f32 to vector<1x128xf32>
      %1729 = arith.minimumf %1728, %1727 : vector<1x128xf32>
      %1730 = arith.mulf %1314, %1729 : vector<1x128xf32>
      %1731 = arith.addf %1670, %1730 : vector<1x128xf32>
      %1732 = arith.mulf %17, %1655 : vector<1x128xf32>
      %1733 = arith.mulf %19, %1670 : vector<1x128xf32>
      %1734 = arith.addf %1732, %1733 : vector<1x128xf32>
      %1735 = arith.mulf %21, %1685 : vector<1x128xf32>
      %1736 = arith.addf %1734, %1735 : vector<1x128xf32>
      %1737 = arith.mulf %23, %1700 : vector<1x128xf32>
      %1738 = arith.addf %1736, %1737 : vector<1x128xf32>
      %1739 = arith.mulf %37, %1701 : vector<1x128xf32>
      %1740 = arith.addf %1738, %1739 : vector<1x128xf32>
      %cst_317 = arith.constant -1.000000e+05 : f32
      %cst_318 = arith.constant 1.000000e+05 : f32
      %1741 = vector.broadcast %cst_317 : f32 to vector<1x128xf32>
      %1742 = arith.maximumf %1741, %1740 : vector<1x128xf32>
      %1743 = vector.broadcast %cst_318 : f32 to vector<1x128xf32>
      %1744 = arith.minimumf %1743, %1742 : vector<1x128xf32>
      %1745 = arith.mulf %1314, %1744 : vector<1x128xf32>
      %1746 = arith.addf %1685, %1745 : vector<1x128xf32>
      %1747 = arith.mulf %25, %1655 : vector<1x128xf32>
      %1748 = arith.mulf %27, %1670 : vector<1x128xf32>
      %1749 = arith.addf %1747, %1748 : vector<1x128xf32>
      %1750 = arith.mulf %29, %1685 : vector<1x128xf32>
      %1751 = arith.addf %1749, %1750 : vector<1x128xf32>
      %1752 = arith.mulf %31, %1700 : vector<1x128xf32>
      %1753 = arith.addf %1751, %1752 : vector<1x128xf32>
      %1754 = arith.mulf %39, %1701 : vector<1x128xf32>
      %1755 = arith.addf %1753, %1754 : vector<1x128xf32>
      %cst_319 = arith.constant -1.000000e+05 : f32
      %cst_320 = arith.constant 1.000000e+05 : f32
      %1756 = vector.broadcast %cst_319 : f32 to vector<1x128xf32>
      %1757 = arith.maximumf %1756, %1755 : vector<1x128xf32>
      %1758 = vector.broadcast %cst_320 : f32 to vector<1x128xf32>
      %1759 = arith.minimumf %1758, %1757 : vector<1x128xf32>
      %1760 = arith.mulf %1314, %1759 : vector<1x128xf32>
      %1761 = arith.addf %1700, %1760 : vector<1x128xf32>
      %1762 = arith.addf %1701, %1314 : vector<1x128xf32>
      scf.yield %1716, %1731, %1746, %1761, %1762 : vector<1x128xf32>, vector<1x128xf32>, vector<1x128xf32>, vector<1x128xf32>, vector<1x128xf32>
    }
    %c4_i32_256 = arith.constant 4 : i32
    %1321 = arith.muli %1317, %c4_i32_256 : i32
    %1322 = arith.subi %1312, %1321 : i32
    %c0_i32_257 = arith.constant 0 : i32
    %1323 = arith.cmpi sgt, %1322, %c0_i32_257 : i32
    %cst_258 = arith.constant 0.000000e+00 : f32
    %1324 = arith.select %1323, %1313, %cst_258 : f32
    %1325 = vector.broadcast %1324 : f32 to vector<1x128xf32>
    %1326 = arith.mulf %1, %1320#0 : vector<1x128xf32>
    %1327 = arith.mulf %3, %1320#1 : vector<1x128xf32>
    %1328 = arith.addf %1326, %1327 : vector<1x128xf32>
    %1329 = arith.mulf %5, %1320#2 : vector<1x128xf32>
    %1330 = arith.addf %1328, %1329 : vector<1x128xf32>
    %1331 = arith.mulf %7, %1320#3 : vector<1x128xf32>
    %1332 = arith.addf %1330, %1331 : vector<1x128xf32>
    %1333 = arith.mulf %33, %1320#4 : vector<1x128xf32>
    %1334 = arith.addf %1332, %1333 : vector<1x128xf32>
    %cst_259 = arith.constant -1.000000e+05 : f32
    %cst_260 = arith.constant 1.000000e+05 : f32
    %1335 = vector.broadcast %cst_259 : f32 to vector<1x128xf32>
    %1336 = arith.maximumf %1335, %1334 : vector<1x128xf32>
    %1337 = vector.broadcast %cst_260 : f32 to vector<1x128xf32>
    %1338 = arith.minimumf %1337, %1336 : vector<1x128xf32>
    %1339 = arith.mulf %1325, %1338 : vector<1x128xf32>
    %1340 = arith.addf %1320#0, %1339 : vector<1x128xf32>
    %1341 = arith.mulf %9, %1320#0 : vector<1x128xf32>
    %1342 = arith.mulf %11, %1320#1 : vector<1x128xf32>
    %1343 = arith.addf %1341, %1342 : vector<1x128xf32>
    %1344 = arith.mulf %13, %1320#2 : vector<1x128xf32>
    %1345 = arith.addf %1343, %1344 : vector<1x128xf32>
    %1346 = arith.mulf %15, %1320#3 : vector<1x128xf32>
    %1347 = arith.addf %1345, %1346 : vector<1x128xf32>
    %1348 = arith.mulf %35, %1320#4 : vector<1x128xf32>
    %1349 = arith.addf %1347, %1348 : vector<1x128xf32>
    %cst_261 = arith.constant -1.000000e+05 : f32
    %cst_262 = arith.constant 1.000000e+05 : f32
    %1350 = vector.broadcast %cst_261 : f32 to vector<1x128xf32>
    %1351 = arith.maximumf %1350, %1349 : vector<1x128xf32>
    %1352 = vector.broadcast %cst_262 : f32 to vector<1x128xf32>
    %1353 = arith.minimumf %1352, %1351 : vector<1x128xf32>
    %1354 = arith.mulf %1325, %1353 : vector<1x128xf32>
    %1355 = arith.addf %1320#1, %1354 : vector<1x128xf32>
    %1356 = arith.mulf %17, %1320#0 : vector<1x128xf32>
    %1357 = arith.mulf %19, %1320#1 : vector<1x128xf32>
    %1358 = arith.addf %1356, %1357 : vector<1x128xf32>
    %1359 = arith.mulf %21, %1320#2 : vector<1x128xf32>
    %1360 = arith.addf %1358, %1359 : vector<1x128xf32>
    %1361 = arith.mulf %23, %1320#3 : vector<1x128xf32>
    %1362 = arith.addf %1360, %1361 : vector<1x128xf32>
    %1363 = arith.mulf %37, %1320#4 : vector<1x128xf32>
    %1364 = arith.addf %1362, %1363 : vector<1x128xf32>
    %cst_263 = arith.constant -1.000000e+05 : f32
    %cst_264 = arith.constant 1.000000e+05 : f32
    %1365 = vector.broadcast %cst_263 : f32 to vector<1x128xf32>
    %1366 = arith.maximumf %1365, %1364 : vector<1x128xf32>
    %1367 = vector.broadcast %cst_264 : f32 to vector<1x128xf32>
    %1368 = arith.minimumf %1367, %1366 : vector<1x128xf32>
    %1369 = arith.mulf %1325, %1368 : vector<1x128xf32>
    %1370 = arith.addf %1320#2, %1369 : vector<1x128xf32>
    %1371 = arith.mulf %25, %1320#0 : vector<1x128xf32>
    %1372 = arith.mulf %27, %1320#1 : vector<1x128xf32>
    %1373 = arith.addf %1371, %1372 : vector<1x128xf32>
    %1374 = arith.mulf %29, %1320#2 : vector<1x128xf32>
    %1375 = arith.addf %1373, %1374 : vector<1x128xf32>
    %1376 = arith.mulf %31, %1320#3 : vector<1x128xf32>
    %1377 = arith.addf %1375, %1376 : vector<1x128xf32>
    %1378 = arith.mulf %39, %1320#4 : vector<1x128xf32>
    %1379 = arith.addf %1377, %1378 : vector<1x128xf32>
    %cst_265 = arith.constant -1.000000e+05 : f32
    %cst_266 = arith.constant 1.000000e+05 : f32
    %1380 = vector.broadcast %cst_265 : f32 to vector<1x128xf32>
    %1381 = arith.maximumf %1380, %1379 : vector<1x128xf32>
    %1382 = vector.broadcast %cst_266 : f32 to vector<1x128xf32>
    %1383 = arith.minimumf %1382, %1381 : vector<1x128xf32>
    %1384 = arith.mulf %1325, %1383 : vector<1x128xf32>
    %1385 = arith.addf %1320#3, %1384 : vector<1x128xf32>
    %1386 = arith.addf %1320#4, %1325 : vector<1x128xf32>
    %c1_i32_267 = arith.constant 1 : i32
    %1387 = arith.cmpi sgt, %1322, %c1_i32_267 : i32
    %cst_268 = arith.constant 0.000000e+00 : f32
    %1388 = arith.select %1387, %1313, %cst_268 : f32
    %1389 = vector.broadcast %1388 : f32 to vector<1x128xf32>
    %1390 = arith.mulf %1, %1340 : vector<1x128xf32>
    %1391 = arith.mulf %3, %1355 : vector<1x128xf32>
    %1392 = arith.addf %1390, %1391 : vector<1x128xf32>
    %1393 = arith.mulf %5, %1370 : vector<1x128xf32>
    %1394 = arith.addf %1392, %1393 : vector<1x128xf32>
    %1395 = arith.mulf %7, %1385 : vector<1x128xf32>
    %1396 = arith.addf %1394, %1395 : vector<1x128xf32>
    %1397 = arith.mulf %33, %1386 : vector<1x128xf32>
    %1398 = arith.addf %1396, %1397 : vector<1x128xf32>
    %cst_269 = arith.constant -1.000000e+05 : f32
    %cst_270 = arith.constant 1.000000e+05 : f32
    %1399 = vector.broadcast %cst_269 : f32 to vector<1x128xf32>
    %1400 = arith.maximumf %1399, %1398 : vector<1x128xf32>
    %1401 = vector.broadcast %cst_270 : f32 to vector<1x128xf32>
    %1402 = arith.minimumf %1401, %1400 : vector<1x128xf32>
    %1403 = arith.mulf %1389, %1402 : vector<1x128xf32>
    %1404 = arith.addf %1340, %1403 : vector<1x128xf32>
    %1405 = arith.mulf %9, %1340 : vector<1x128xf32>
    %1406 = arith.mulf %11, %1355 : vector<1x128xf32>
    %1407 = arith.addf %1405, %1406 : vector<1x128xf32>
    %1408 = arith.mulf %13, %1370 : vector<1x128xf32>
    %1409 = arith.addf %1407, %1408 : vector<1x128xf32>
    %1410 = arith.mulf %15, %1385 : vector<1x128xf32>
    %1411 = arith.addf %1409, %1410 : vector<1x128xf32>
    %1412 = arith.mulf %35, %1386 : vector<1x128xf32>
    %1413 = arith.addf %1411, %1412 : vector<1x128xf32>
    %cst_271 = arith.constant -1.000000e+05 : f32
    %cst_272 = arith.constant 1.000000e+05 : f32
    %1414 = vector.broadcast %cst_271 : f32 to vector<1x128xf32>
    %1415 = arith.maximumf %1414, %1413 : vector<1x128xf32>
    %1416 = vector.broadcast %cst_272 : f32 to vector<1x128xf32>
    %1417 = arith.minimumf %1416, %1415 : vector<1x128xf32>
    %1418 = arith.mulf %1389, %1417 : vector<1x128xf32>
    %1419 = arith.addf %1355, %1418 : vector<1x128xf32>
    %1420 = arith.mulf %17, %1340 : vector<1x128xf32>
    %1421 = arith.mulf %19, %1355 : vector<1x128xf32>
    %1422 = arith.addf %1420, %1421 : vector<1x128xf32>
    %1423 = arith.mulf %21, %1370 : vector<1x128xf32>
    %1424 = arith.addf %1422, %1423 : vector<1x128xf32>
    %1425 = arith.mulf %23, %1385 : vector<1x128xf32>
    %1426 = arith.addf %1424, %1425 : vector<1x128xf32>
    %1427 = arith.mulf %37, %1386 : vector<1x128xf32>
    %1428 = arith.addf %1426, %1427 : vector<1x128xf32>
    %cst_273 = arith.constant -1.000000e+05 : f32
    %cst_274 = arith.constant 1.000000e+05 : f32
    %1429 = vector.broadcast %cst_273 : f32 to vector<1x128xf32>
    %1430 = arith.maximumf %1429, %1428 : vector<1x128xf32>
    %1431 = vector.broadcast %cst_274 : f32 to vector<1x128xf32>
    %1432 = arith.minimumf %1431, %1430 : vector<1x128xf32>
    %1433 = arith.mulf %1389, %1432 : vector<1x128xf32>
    %1434 = arith.addf %1370, %1433 : vector<1x128xf32>
    %1435 = arith.mulf %25, %1340 : vector<1x128xf32>
    %1436 = arith.mulf %27, %1355 : vector<1x128xf32>
    %1437 = arith.addf %1435, %1436 : vector<1x128xf32>
    %1438 = arith.mulf %29, %1370 : vector<1x128xf32>
    %1439 = arith.addf %1437, %1438 : vector<1x128xf32>
    %1440 = arith.mulf %31, %1385 : vector<1x128xf32>
    %1441 = arith.addf %1439, %1440 : vector<1x128xf32>
    %1442 = arith.mulf %39, %1386 : vector<1x128xf32>
    %1443 = arith.addf %1441, %1442 : vector<1x128xf32>
    %cst_275 = arith.constant -1.000000e+05 : f32
    %cst_276 = arith.constant 1.000000e+05 : f32
    %1444 = vector.broadcast %cst_275 : f32 to vector<1x128xf32>
    %1445 = arith.maximumf %1444, %1443 : vector<1x128xf32>
    %1446 = vector.broadcast %cst_276 : f32 to vector<1x128xf32>
    %1447 = arith.minimumf %1446, %1445 : vector<1x128xf32>
    %1448 = arith.mulf %1389, %1447 : vector<1x128xf32>
    %1449 = arith.addf %1385, %1448 : vector<1x128xf32>
    %1450 = arith.addf %1386, %1389 : vector<1x128xf32>
    %c2_i32_277 = arith.constant 2 : i32
    %1451 = arith.cmpi sgt, %1322, %c2_i32_277 : i32
    %cst_278 = arith.constant 0.000000e+00 : f32
    %1452 = arith.select %1451, %1313, %cst_278 : f32
    %1453 = vector.broadcast %1452 : f32 to vector<1x128xf32>
    %1454 = arith.mulf %1, %1404 : vector<1x128xf32>
    %1455 = arith.mulf %3, %1419 : vector<1x128xf32>
    %1456 = arith.addf %1454, %1455 : vector<1x128xf32>
    %1457 = arith.mulf %5, %1434 : vector<1x128xf32>
    %1458 = arith.addf %1456, %1457 : vector<1x128xf32>
    %1459 = arith.mulf %7, %1449 : vector<1x128xf32>
    %1460 = arith.addf %1458, %1459 : vector<1x128xf32>
    %1461 = arith.mulf %33, %1450 : vector<1x128xf32>
    %1462 = arith.addf %1460, %1461 : vector<1x128xf32>
    %cst_279 = arith.constant -1.000000e+05 : f32
    %cst_280 = arith.constant 1.000000e+05 : f32
    %1463 = vector.broadcast %cst_279 : f32 to vector<1x128xf32>
    %1464 = arith.maximumf %1463, %1462 : vector<1x128xf32>
    %1465 = vector.broadcast %cst_280 : f32 to vector<1x128xf32>
    %1466 = arith.minimumf %1465, %1464 : vector<1x128xf32>
    %1467 = arith.mulf %1453, %1466 : vector<1x128xf32>
    %1468 = arith.addf %1404, %1467 : vector<1x128xf32>
    %1469 = arith.mulf %9, %1404 : vector<1x128xf32>
    %1470 = arith.mulf %11, %1419 : vector<1x128xf32>
    %1471 = arith.addf %1469, %1470 : vector<1x128xf32>
    %1472 = arith.mulf %13, %1434 : vector<1x128xf32>
    %1473 = arith.addf %1471, %1472 : vector<1x128xf32>
    %1474 = arith.mulf %15, %1449 : vector<1x128xf32>
    %1475 = arith.addf %1473, %1474 : vector<1x128xf32>
    %1476 = arith.mulf %35, %1450 : vector<1x128xf32>
    %1477 = arith.addf %1475, %1476 : vector<1x128xf32>
    %cst_281 = arith.constant -1.000000e+05 : f32
    %cst_282 = arith.constant 1.000000e+05 : f32
    %1478 = vector.broadcast %cst_281 : f32 to vector<1x128xf32>
    %1479 = arith.maximumf %1478, %1477 : vector<1x128xf32>
    %1480 = vector.broadcast %cst_282 : f32 to vector<1x128xf32>
    %1481 = arith.minimumf %1480, %1479 : vector<1x128xf32>
    %1482 = arith.mulf %1453, %1481 : vector<1x128xf32>
    %1483 = arith.addf %1419, %1482 : vector<1x128xf32>
    %1484 = arith.mulf %17, %1404 : vector<1x128xf32>
    %1485 = arith.mulf %19, %1419 : vector<1x128xf32>
    %1486 = arith.addf %1484, %1485 : vector<1x128xf32>
    %1487 = arith.mulf %21, %1434 : vector<1x128xf32>
    %1488 = arith.addf %1486, %1487 : vector<1x128xf32>
    %1489 = arith.mulf %23, %1449 : vector<1x128xf32>
    %1490 = arith.addf %1488, %1489 : vector<1x128xf32>
    %1491 = arith.mulf %37, %1450 : vector<1x128xf32>
    %1492 = arith.addf %1490, %1491 : vector<1x128xf32>
    %cst_283 = arith.constant -1.000000e+05 : f32
    %cst_284 = arith.constant 1.000000e+05 : f32
    %1493 = vector.broadcast %cst_283 : f32 to vector<1x128xf32>
    %1494 = arith.maximumf %1493, %1492 : vector<1x128xf32>
    %1495 = vector.broadcast %cst_284 : f32 to vector<1x128xf32>
    %1496 = arith.minimumf %1495, %1494 : vector<1x128xf32>
    %1497 = arith.mulf %1453, %1496 : vector<1x128xf32>
    %1498 = arith.addf %1434, %1497 : vector<1x128xf32>
    %1499 = arith.mulf %25, %1404 : vector<1x128xf32>
    %1500 = arith.mulf %27, %1419 : vector<1x128xf32>
    %1501 = arith.addf %1499, %1500 : vector<1x128xf32>
    %1502 = arith.mulf %29, %1434 : vector<1x128xf32>
    %1503 = arith.addf %1501, %1502 : vector<1x128xf32>
    %1504 = arith.mulf %31, %1449 : vector<1x128xf32>
    %1505 = arith.addf %1503, %1504 : vector<1x128xf32>
    %1506 = arith.mulf %39, %1450 : vector<1x128xf32>
    %1507 = arith.addf %1505, %1506 : vector<1x128xf32>
    %cst_285 = arith.constant -1.000000e+05 : f32
    %cst_286 = arith.constant 1.000000e+05 : f32
    %1508 = vector.broadcast %cst_285 : f32 to vector<1x128xf32>
    %1509 = arith.maximumf %1508, %1507 : vector<1x128xf32>
    %1510 = vector.broadcast %cst_286 : f32 to vector<1x128xf32>
    %1511 = arith.minimumf %1510, %1509 : vector<1x128xf32>
    %1512 = arith.mulf %1453, %1511 : vector<1x128xf32>
    %1513 = arith.addf %1449, %1512 : vector<1x128xf32>
    %1514 = arith.select %43, %1468, %40 : vector<1x128xi1>, vector<1x128xf32>
    %1515 = arith.select %45, %1483, %1514 : vector<1x128xi1>, vector<1x128xf32>
    %1516 = arith.select %47, %1498, %1515 : vector<1x128xi1>, vector<1x128xf32>
    %1517 = arith.select %49, %1513, %1516 : vector<1x128xi1>, vector<1x128xf32>
    %c7_287 = arith.constant 7 : index
    %c0_288 = arith.constant 0 : index
    %1518 = vector.load %arg6[%c7_287, %c0_288] : memref<8x128xf32, #tpu.memory_space<vmem>>, vector<1x128xf32>
    tpu.vector_store %arg6[%c7_287, %c0_288], %1517 {strides = array<i32>} : memref<8x128xf32, #tpu.memory_space<vmem>>, vector<1x128xf32>,
    return
  }
}

</mosaic_0001>

<bundles_post_ra>
// kernel: tpu_custom_call.1
= control target key start
LH: loop header
LB: loop body
LE: loop exit
PB: predicated region body
PF: predicated region fallthrough
CT: control target
= control target key end

     0   :  { %11 = vsyncpa [#allocation4], 0  ;;  %s6956_s0 = inlined_call_operand.hbm [shape: f32[7], index: 0, kind: input, shape index: {}]   ;;  %s6957_s1 = inlined_call_operand.vmem [shape: f32[7], index: 1, kind: input, shape index: {}]   ;;  %s6958_s2 = inlined_call_operand.vmem [shape: s32[7], index: 2, kind: input, shape index: {}]   ;;  %s6959_s3 = inlined_call_operand.vmem [shape: f32[16], index: 3, kind: input, shape index: {}]   ;;  %s6960_s4 = inlined_call_operand.vmem [shape: f32[4], index: 4, kind: input, shape index: {}]   ;;  %s6961_s5 = inlined_call_operand.vmem [shape: f32[4], index: 5, kind: input, shape index: {}]   ;;  %s6962_s6 = inlined_call_operand.hbm [shape: f32[8,128], index: 6, kind: output, shape index: {}]  }
   0x1   :  { %12 = vsyncpa [#allocation5], 0 }
   0x2   :  { %13 = vsyncpa [#allocation8], 0 }
   0x3   :  { %14 = vsyncpa [#allocation11], 0  ;;  %s40_s23 = sshll.u32 %s6958_s2, 4  ;;  %s41_s23 = int_to_ptr.vmem [resolvable:$true] %s40_s23 }
   0x4   :  { %15 = vsyncpa [#allocation3], 0  ;;  %s60_s26 = sshll.u32 %s6960_s4, 4  ;;  %s4017_s27 = scalar_lea.vmem %s41_s23, 16  ;;  %s61_s26 = int_to_ptr.vmem [resolvable:$true] %s60_s26 }
   0x5   :  { %p4018_p0 = scmp.ne.s32.totalorder %s41_s23, %s4017_s27  ;;  %p4022_p1 = scmp.lt.s32.totalorder %s41_s23, %s41_s23 }
   0x6   :  { %p4023_p2 = scmp.lt.s32.totalorder %s4017_s27, %s4017_s27 }
   0x8   :  { %p4024_p3 = por %p4023_p2, %p4022_p1 }
   0xa   :  { %p4025_p4 = pnand %p4024_p3, %p4018_p0 }
   0xc   :  { %4028 = shalt.err (!%p4025_p4)
}
   0xd   :  { %s4731_s28 = smov [#allocation7]   ;;  %s4029_s29 = scalar_lea.vmem %s61_s26, 16 }
   0xe   :  { %43 = dma.vmem_to_smem %s41_s23, 16, %s4731_s28, [#allocation8]  }
   0xf   :  { %p4030_p5 = scmp.ne.s32.totalorder %s61_s26, %s4029_s29  ;;  %p4034_p6 = scmp.lt.s32.totalorder %s61_s26, %s61_s26 }
  0x10   :  { %p4035_p7 = scmp.lt.s32.totalorder %s4029_s29, %s4029_s29 }
  0x12   :  { %p4036_p8 = por %p4035_p7, %p4034_p6 }
  0x14   :  { %p4037_p9 = pnand %p4036_p8, %p4030_p5 }
  0x16   :  { %4040 = shalt.err (!%p4037_p9)
}
  0x17   :  { %s4732_s2 = smov [#allocation10]   ;;  %s30_s7 = sshll.u32 %s6957_s1, 4  ;;  %s31_s7 = int_to_ptr.vmem [resolvable:$true] %s30_s7 }
  0x18   :  { %63 = dma.vmem_to_smem %s61_s26, 16, %s4732_s2, [#allocation11]  }
  0x19   :  { %s4733_s8 = smov [#allocation2]   ;;  %s4049_s11 = scalar_lea.vmem %s31_s7, 16 }
  0x1a   :  { %23 = dma.hbm_to_smem %s6956_s0, 16, %s4733_s8, [#allocation4]  }
  0x1b   :  { %p4050_p10 = scmp.ne.s32.totalorder %s31_s7, %s4049_s11  ;;  %p4054_p11 = scmp.lt.s32.totalorder %s31_s7, %s31_s7 }
  0x1c   :  { %p4055_p12 = scmp.lt.s32.totalorder %s4049_s11, %s4049_s11 }
  0x1e   :  { %p4056_p13 = por %p4055_p12, %p4054_p11 }
  0x20   :  { %p4057_p0 = pnand %p4056_p13, %p4050_p10 }
  0x22   :  { %4060 = shalt.err (!%p4057_p0)
}
  0x23   :  { %s4734_s12 = smov [#allocation6]   ;;  %s50_s15 = sshll.u32 %s6959_s3, 4  ;;  %s51_s15 = int_to_ptr.vmem [resolvable:$true] %s50_s15 }
  0x24   :  { %33 = dma.vmem_to_smem %s31_s7, 16, %s4734_s12, [#allocation5]  }
  0x25   :  { %s70_s17 = sshll.u32 %s6961_s5, 4  ;;  %s4061_s0 = scalar_lea.vmem %s51_s15, 16  ;;  %s71_s17 = int_to_ptr.vmem [resolvable:$true] %s70_s17 }
  0x26   :  { %p4062_p1 = scmp.ne.s32.totalorder %s51_s15, %s4061_s0  ;;  %p4066_p2 = scmp.lt.s32.totalorder %s51_s15, %s51_s15 }
  0x27   :  { %p4067_p3 = scmp.lt.s32.totalorder %s4061_s0, %s4061_s0 }
  0x29   :  { %p4068_p4 = por %p4067_p3, %p4066_p2 }
  0x2b   :  { %p4069_p5 = pnand %p4068_p4, %p4062_p1 }
  0x2d   :  { %4072 = shalt.err (!%p4069_p5)
}
  0x2e   :  { %s4735_s18 = smov [#allocation9]   ;;  %s4073_s19 = scalar_lea.vmem %s71_s17, 16 }
  0x2f   :  { %53 = dma.vmem_to_smem %s51_s15, 16, %s4735_s18, [#allocation8]  }
  0x30   :  { %p4074_p6 = scmp.ne.s32.totalorder %s71_s17, %s4073_s19  ;;  %p4078_p7 = scmp.lt.s32.totalorder %s71_s17, %s71_s17 }
  0x31   :  { %p4079_p8 = scmp.lt.s32.totalorder %s4073_s19, %s4073_s19 }
  0x33   :  { %p4080_p9 = por %p4079_p8, %p4078_p7 }
  0x35   :  { %p4081_p10 = pnand %p4080_p9, %p4074_p6 }
  0x37   :  { %4084 = shalt.err (!%p4081_p10)
}
  0x38   :  { %s4736_s3 = smov [#allocation12]  }
  0x39   :  { %73 = dma.vmem_to_smem %s71_s17, 16, %s4736_s3, [#allocation11]  }
  0x3a   :  { %4413 = dma.done.wait [#allocation4], 16  }
  0x3b   :  { %4414 = vsyncadd [#allocation4], 4294967280 }
  0x3c   :  { %4415 = dma.done.wait [#allocation5], 16  }
  0x3d   :  { %4416 = vsyncadd [#allocation5], 4294967280 }
  0x3e   :  { %4417 = dma.done.wait [#allocation8], 32  }
  0x3f   :  { %4418 = vsyncadd [#allocation8], 4294967264 }
  0x40   :  { %4419 = dma.done.wait [#allocation11], 32  }
  0x41   :  { %4420 = vsyncadd [#allocation11], 4294967264 }
  0x42   :  { %92 = sfence }
  0x43   :  { %s93_s5 = sld [smem:[#allocation9]]  ;;  %v133_v11 = vlaneseq }
  0x44   :  { %s3145_s20 = sld [smem:[#allocation9 + $0x1]] }
  0x45   :  { %s3146_s21 = sld [smem:[#allocation9 + $0x2]]  ;;  %v4821_v16 = vand.u32 127, %v133_v11 }
  0x46   :  { %s3147_s22 = sld [smem:[#allocation9 + $0x3]] }
  0x47   :  { %s3148_s23 = sld [smem:[#allocation9 + $0x4]]  ;;  %vm135_vm0 = vcmp.eq.s32.totalorder %v4821_v16, 0  ;;  %vm136_vm1 = vcmp.eq.s32.totalorder %v4821_v16, 1  ;;  %vm137_vm2 = vcmp.eq.s32.totalorder %v4821_v16, 2  ;;  %vm138_vm3 = vcmp.eq.s32.totalorder %v4821_v16, 3 }
  0x48   :  { %s3149_s24 = sld [smem:[#allocation9 + $0x5]] }
  0x49   :  { %v4791_v0 = vstv %s93_s5  ;;  %s3150_s25 = sld [smem:[#allocation9 + $0x6]] }
  0x4a   :  { %v4793_v1 = vstv %s3145_s20  ;;  %s3151_s26 = sld [smem:[#allocation9 + $0x7]] }
  0x4b   :  { %v4795_v2 = vstv %s3146_s21  ;;  %s3152_s27 = sld [smem:[#allocation9 + $0x8]] }
  0x4c   :  { %v4797_v3 = vstv %s3147_s22  ;;  %s3153_s28 = sld [smem:[#allocation9 + $0x9]] }
  0x4d   :  { %v4799_v4 = vstv %s3148_s23  ;;  %s3154_s29 = sld [smem:[#allocation9 + $0xa]] }
  0x4e   :  { %v4801_v5 = vstv %s3149_s24  ;;  %s3155_s2 = sld [smem:[#allocation9 + $0xb]] }
  0x4f   :  { %v4803_v6 = vstv %s3150_s25  ;;  %s3156_s4 = sld [smem:[#allocation9 + $0xc]] }
  0x50   :  { %v4805_v7 = vstv %s3151_s26  ;;  %s3157_s30 = sld [smem:[#allocation9 + $0xd]] }
  0x51   :  { %v4807_v8 = vstv %s3152_s27  ;;  %s3158_s7 = sld [smem:[#allocation9 + $0xe]] }
  0x52   :  { %v4809_v9 = vstv %s3153_s28  ;;  %s3159_s8 = sld [smem:[#allocation9 + $0xf]] }
  0x53   :  { %v4811_v10 = vstv %s3154_s29  ;;  %s125_s9 = sld [smem:[#allocation10]] }
  0x54   :  { %v4813_v12 = vstv %s3155_s2  ;;  %s3160_s10 = sld [smem:[#allocation10 + $0x1]] }
  0x55   :  { %v4815_v13 = vstv %s3156_s4  ;;  %s3161_s11 = sld [smem:[#allocation10 + $0x2]] }
  0x56   :  { %v4817_v14 = vstv %s3157_s30  ;;  %s3162_s12 = sld [smem:[#allocation10 + $0x3]] }
  0x57   :  { %v4819_v15 = vstv %s3158_s7  ;;  %s139_s13 = sld [smem:[#allocation12]] }
  0x58   :  { %v4823_v17 = vstv %s3159_s8  ;;  %s3163_s14 = sld [smem:[#allocation12 + $0x1]] }
  0x59   :  { %v4825_v18 = vstv %s125_s9  ;;  %s3164_s15 = sld [smem:[#allocation12 + $0x2]] }
  0x5a   :  { %v4827_v19 = vstv %s3160_s10  ;;  %s3165_s1 = sld [smem:[#allocation12 + $0x3]] }
  0x5b   :  { %v4829_v20 = vstv %s3161_s11  ;;  %s152_s16 = sld [smem:[#allocation7]] }
  0x5c   :  { %v4832_v21 = vstv %s3162_s12  ;;  %s4835_s17 = sld [smem:[#allocation6]] }
  0x5d   :  { %v140_v22 = vstv %s139_s13   ;;  %s157_s0 = sld [smem:[#allocation2]] }
  0x5e   :  { %v142_v23 = vstv %s3163_s14   ;;  %v147_v24 = vsel %vm135_vm0, %v140_v22, 0.0  ;;  %v6967_v36 = vmov %v140_v22 }
  0x5f   :  { %v144_v25 = vstv %s3164_s15   ;;  %v148_v26 = vsel %vm136_vm1, %v142_v23, %v147_v24  ;;  %v6966_v35 = vmov %v142_v23 }
  0x60   :  { %v146_v27 = vstv %s3165_s1   ;;  %v149_v28 = vsel %vm137_vm2, %v144_v25, %v148_v26  ;;  %v6965_v34 = vmov %v144_v25 }
  0x61   :  { %v150_v29 = vsel %vm138_vm3, %v146_v27, %v149_v28  ;;  %p153_p11 = scmp.gt.s32.totalorder %s152_s16, 0  ;;  %v6964_v33 = vmov %v146_v27 }
  0x62   :  { %151 = vst [vmem:[#allocation13] sm:$0x1] %v150_v29  ;;  %v4848_v30 = vstv %s4835_s17 }
  0x63   :  { %s7069_s16 = smov (!%p153_p11, %s152_s16), 0  ;;  %v158_v31 = vstv %s157_s0  }
  0x64   :  { %s4853_s18 = sshrl.u32 %s7069_s16, 2  ;;  %v6963_v32 = vmov %v158_v31 }
  0x65   :  { %p3166_p12 = scmp.le.s32.totalorder %s4853_s18, 0 }
  0x66   :  { %s4876_s19 = smov (!%p3166_p12), 0  }
  0x67   :  { %3012 = sbr.rel (%p3166_p12) target bundleno = 178 (0xb2), region = 111 }
  0x6c LB: > { %v172_v37 = vmul.f32 %v4437_v23, %v4793_v1  ;;  %v171_v38 = vmul.f32 %v4441_v22, %v4791_v0  ;;  %v174_v39 = vmul.f32 %v4433_v25, %v4795_v2  ;;  %v184_v40 = vmul.f32 %v4441_v22, %v4799_v4  ;;  %s163_s19 = sadd.s32 1, %s4445_s19   ;;  %s4445_s19 = sphi %s4876_s19, %s163_s19   ;;  %v4441_v22 = vphi %v140_v22, %v6972_v22   ;;  %v4437_v23 = vphi %v142_v23, %v6971_v23   ;;  %v4433_v25 = vphi %v144_v25, %v6970_v25   ;;  %v4429_v27 = vphi %v146_v27, %v6969_v27   ;;  %v4425_v31 = vphi %v158_v31, %v6968_v31  }
  0x6d   : > { %v176_v41 = vmul.f32 %v4429_v27, %v4797_v3  ;;  %v178_v42 = vmul.f32 %v4425_v31, %v4825_v18  ;;  %v185_v43 = vmul.f32 %v4437_v23, %v4801_v5  ;;  %v187_v44 = vmul.f32 %v4433_v25, %v4803_v6  ;;  %p162_p13 = scmp.ge.s32.totalorder %s163_s19, %s4853_s18 }
  0x6e   : > { %v173_v45 = vadd.f32 %v172_v37, %v171_v38  ;;  %v197_v46 = vmul.f32 %v4441_v22, %v4807_v8  ;;  %v198_v47 = vmul.f32 %v4437_v23, %v4809_v9  ;;  %v200_v48 = vmul.f32 %v4433_v25, %v4811_v10 }
  0x6f   : > { %v186_v49 = vadd.f32 %v185_v43, %v184_v40  ;;  %v189_v50 = vmul.f32 %v4429_v27, %v4805_v7  ;;  %v202_v51 = vmul.f32 %v4429_v27, %v4813_v12  ;;  %v210_v52 = vmul.f32 %v4441_v22, %v4815_v13 }
  0x70   : > { %v175_v53 = vadd.f32 %v174_v39, %v173_v45  ;;  %v199_v54 = vadd.f32 %v198_v47, %v197_v46  ;;  %v211_v55 = vmul.f32 %v4437_v23, %v4817_v14  ;;  %v213_v56 = vmul.f32 %v4433_v25, %v4819_v15 }
  0x71   : > { %v188_v57 = vadd.f32 %v187_v44, %v186_v49  ;;  %v191_v58 = vmul.f32 %v4425_v31, %v4827_v19  ;;  %v204_v59 = vmul.f32 %v4425_v31, %v4829_v20  ;;  %v215_v63 = vmul.f32 %v4429_v27, %v4823_v17 }
  0x72   : > { %v177_v60 = vadd.f32 %v176_v41, %v175_v53  ;;  %v201_v61 = vadd.f32 %v200_v48, %v199_v54  ;;  %v212_v62 = vadd.f32 %v211_v55, %v210_v52  ;;  %v217_v29 = vmul.f32 %v4425_v31, %v4832_v21 }
  0x73   : > { %v190_v11 = vadd.f32 %v189_v50, %v188_v57  ;;  %v223_v36 = vadd.f32 %v4425_v31, %v4848_v30 }
  0x74   : > { %v179_v24 = vadd.f32 %v178_v42, %v177_v60  ;;  %v203_v26 = vadd.f32 %v202_v51, %v201_v61  ;;  %v214_v28 = vadd.f32 %v213_v56, %v212_v62 }
  0x75   : > { %v192_v32 = vadd.f32 %v191_v58, %v190_v11  ;;  %v4916_v43 = vadd.f32 %v223_v36, %v4848_v30  ;;  %v231_v46 = vmul.f32 %v223_v36, %v4825_v18  ;;  %v244_v48 = vmul.f32 %v223_v36, %v4827_v19 }
  0x76   : > { %v3167_v33 = vclamps-f32 %v179_v24, 100000.0  ;;  %v205_v34 = vadd.f32 %v204_v59, %v203_v26  ;;  %v216_v35 = vadd.f32 %v215_v63, %v214_v28  ;;  %v257_v31 = vmul.f32 %v223_v36, %v4829_v20 }
  0x77   : > { %v3168_v37 = vclamps-f32 %v192_v32, 100000.0  ;;  %v4924_v49 = vadd.f32 %v4916_v43, %v4848_v30 }
  0x78   : > { %v182_v38 = vmul.f32 %v3167_v33, %v4848_v30  ;;  %v3169_v39 = vclamps-f32 %v205_v34, 100000.0  ;;  %v218_v40 = vadd.f32 %v217_v29, %v216_v35 }
  0x79   : > { %v195_v41 = vmul.f32 %v3168_v37, %v4848_v30  ;;  %v4946_v35 = vadd.f32 %v4924_v49, %v4848_v30  }
  0x7a   : > { %v183_v42 = vadd.f32 %v4441_v22, %v182_v38  ;;  %v208_v44 = vmul.f32 %v3169_v39, %v4848_v30  ;;  %v3170_v45 = vclamps-f32 %v218_v40, 100000.0 }
  0x7b   : > { %v196_v47 = vadd.f32 %v4437_v23, %v195_v41  ;;  %v270_v41 = vmul.f32 %v223_v36, %v4832_v21 }
  0x7c   : > { %v209_v50 = vadd.f32 %v4433_v25, %v208_v44  ;;  %v221_v51 = vmul.f32 %v3170_v45, %v4848_v30  ;;  %v224_v52 = vmul.f32 %v183_v42, %v4791_v0  ;;  %v237_v22 = vmul.f32 %v183_v42, %v4799_v4 }
  0x7d   : > { %v225_v53 = vmul.f32 %v196_v47, %v4793_v1  ;;  %v238_v54 = vmul.f32 %v196_v47, %v4801_v5  ;;  %v250_v23 = vmul.f32 %v183_v42, %v4807_v8  ;;  %v251_v55 = vmul.f32 %v196_v47, %v4809_v9 }
  0x7e   : > { %v222_v56 = vadd.f32 %v4429_v27, %v221_v51  ;;  %v227_v57 = vmul.f32 %v209_v50, %v4795_v2  ;;  %v240_v25 = vmul.f32 %v209_v50, %v4803_v6  ;;  %v253_v58 = vmul.f32 %v209_v50, %v4811_v10 }
  0x7f   : > { %v226_v59 = vadd.f32 %v225_v53, %v224_v52  ;;  %v239_v60 = vadd.f32 %v238_v54, %v237_v22  ;;  %v252_v61 = vadd.f32 %v251_v55, %v250_v23  ;;  %v263_v62 = vmul.f32 %v183_v42, %v4815_v13 }
  0x80   : > { %v229_v63 = vmul.f32 %v222_v56, %v4797_v3  ;;  %v242_v11 = vmul.f32 %v222_v56, %v4805_v7  ;;  %v255_v24 = vmul.f32 %v222_v56, %v4813_v12  ;;  %v264_v26 = vmul.f32 %v196_v47, %v4817_v14 }
  0x81   : > { %v228_v27 = vadd.f32 %v227_v57, %v226_v59  ;;  %v241_v28 = vadd.f32 %v240_v25, %v239_v60  ;;  %v254_v29 = vadd.f32 %v253_v58, %v252_v61  ;;  %v266_v32 = vmul.f32 %v209_v50, %v4819_v15 }
  0x82   : > { %v265_v33 = vadd.f32 %v264_v26, %v263_v62  ;;  %v268_v34 = vmul.f32 %v222_v56, %v4823_v17 }
  0x83   : > { %v230_v37 = vadd.f32 %v229_v63, %v228_v27  ;;  %v243_v38 = vadd.f32 %v242_v11, %v241_v28  ;;  %v256_v39 = vadd.f32 %v255_v24, %v254_v29 }
  0x84   : > { %v267_v40 = vadd.f32 %v266_v32, %v265_v33 }
  0x85   : > { %v232_v44 = vadd.f32 %v231_v46, %v230_v37  ;;  %v245_v45 = vadd.f32 %v244_v48, %v243_v38  ;;  %v258_v51 = vadd.f32 %v257_v31, %v256_v39  ;;  %v284_v46 = vmul.f32 %v4916_v43, %v4825_v18 }
  0x86   : > { %v269_v52 = vadd.f32 %v268_v34, %v267_v40 }
  0x87   : > { %v3171_v22 = vclamps-f32 %v232_v44, 100000.0  ;;  %v3172_v53 = vclamps-f32 %v245_v45, 100000.0  ;;  %v3173_v54 = vclamps-f32 %v258_v51, 100000.0  ;;  %v310_v44 = vmul.f32 %v4916_v43, %v4829_v20 }
  0x88   : > { %v271_v23 = vadd.f32 %v270_v41, %v269_v52  ;;  %v297_v41 = vmul.f32 %v4916_v43, %v4827_v19 }
  0x89   : > { %v235_v55 = vmul.f32 %v3171_v22, %v4848_v30  ;;  %v248_v57 = vmul.f32 %v3172_v53, %v4848_v30  ;;  %v261_v25 = vmul.f32 %v3173_v54, %v4848_v30 }
  0x8a   : > { %v3174_v58 = vclamps-f32 %v271_v23, 100000.0 }
  0x8b   : > { %v236_v59 = vadd.f32 %v235_v55, %v183_v42  ;;  %v249_v60 = vadd.f32 %v248_v57, %v196_v47  ;;  %v262_v61 = vadd.f32 %v261_v25, %v209_v50  ;;  %v323_v57 = vmul.f32 %v4916_v43, %v4832_v21 }
  0x8c   : > { %v274_v36 = vmul.f32 %v3174_v58, %v4848_v30  ;;  %v350_v43 = vmul.f32 %v4924_v49, %v4827_v19 }
  0x8d   : > { %v277_v48 = vmul.f32 %v236_v59, %v4791_v0  ;;  %v278_v31 = vmul.f32 %v249_v60, %v4793_v1  ;;  %v280_v62 = vmul.f32 %v262_v61, %v4795_v2  ;;  %v290_v63 = vmul.f32 %v236_v59, %v4799_v4 }
  0x8e   : > { %v275_v11 = vadd.f32 %v274_v36, %v222_v56  ;;  %v291_v24 = vmul.f32 %v249_v60, %v4801_v5  ;;  %v293_v42 = vmul.f32 %v262_v61, %v4803_v6  ;;  %v303_v47 = vmul.f32 %v236_v59, %v4807_v8 }
  0x8f   : > { %v279_v50 = vadd.f32 %v278_v31, %v277_v48  ;;  %v304_v26 = vmul.f32 %v249_v60, %v4809_v9  ;;  %v306_v27 = vmul.f32 %v262_v61, %v4811_v10  ;;  %v316_v28 = vmul.f32 %v236_v59, %v4815_v13 }
  0x90   : > { %v282_v29 = vmul.f32 %v275_v11, %v4797_v3  ;;  %v292_v32 = vadd.f32 %v291_v24, %v290_v63  ;;  %v295_v33 = vmul.f32 %v275_v11, %v4805_v7  ;;  %v308_v56 = vmul.f32 %v275_v11, %v4813_v12 }
  0x91   : > { %v281_v34 = vadd.f32 %v280_v62, %v279_v50  ;;  %v305_v37 = vadd.f32 %v304_v26, %v303_v47  ;;  %v317_v38 = vmul.f32 %v249_v60, %v4817_v14  ;;  %v319_v39 = vmul.f32 %v262_v61, %v4819_v15 }
  0x92   : > { %v294_v40 = vadd.f32 %v293_v42, %v292_v32  ;;  %v321_v22 = vmul.f32 %v275_v11, %v4823_v17 }
  0x93   : > { %v283_v45 = vadd.f32 %v282_v29, %v281_v34  ;;  %v307_v51 = vadd.f32 %v306_v27, %v305_v37  ;;  %v318_v52 = vadd.f32 %v317_v38, %v316_v28  ;;  %v337_v27 = vmul.f32 %v4924_v49, %v4825_v18 }
  0x94   : > { %v296_v53 = vadd.f32 %v295_v33, %v294_v40  ;;  %v363_v28 = vmul.f32 %v4924_v49, %v4829_v20 }
  0x95   : > { %v285_v54 = vadd.f32 %v284_v46, %v283_v45  ;;  %v309_v23 = vadd.f32 %v308_v56, %v307_v51  ;;  %v320_v55 = vadd.f32 %v319_v39, %v318_v52 }
  0x96   : > { %v298_v25 = vadd.f32 %v297_v41, %v296_v53 }
  0x97   : > { %v3175_v58 = vclamps-f32 %v285_v54, 100000.0  ;;  %v311_v36 = vadd.f32 %v310_v44, %v309_v23  ;;  %v322_v48 = vadd.f32 %v321_v22, %v320_v55 }
  0x98   : > { %v3176_v31 = vclamps-f32 %v298_v25, 100000.0 }
  0x99   : > { %v288_v62 = vmul.f32 %v3175_v58, %v4848_v30  ;;  %v3177_v63 = vclamps-f32 %v311_v36, 100000.0  ;;  %v324_v24 = vadd.f32 %v323_v57, %v322_v48 }
  0x9a   : > { %v301_v42 = vmul.f32 %v3176_v31, %v4848_v30 }
  0x9b   : > { %v289_v47 = vadd.f32 %v288_v62, %v236_v59  ;;  %v314_v50 = vmul.f32 %v3177_v63, %v4848_v30  ;;  %v3178_v46 = vclamps-f32 %v324_v24, 100000.0  ;;  %v376_v63 = vmul.f32 %v4924_v49, %v4832_v21 }
  0x9c   : > { %v302_v26 = vadd.f32 %v301_v42, %v249_v60 }
  0x9d   : > { %v315_v29 = vadd.f32 %v314_v50, %v262_v61  ;;  %v327_v32 = vmul.f32 %v3178_v46, %v4848_v30  ;;  %v330_v33 = vmul.f32 %v289_v47, %v4791_v0  ;;  %v343_v59 = vmul.f32 %v289_v47, %v4799_v4 }
  0x9e   : > { %v331_v56 = vmul.f32 %v302_v26, %v4793_v1  ;;  %v344_v60 = vmul.f32 %v302_v26, %v4801_v5  ;;  %v356_v34 = vmul.f32 %v289_v47, %v4807_v8  ;;  %v357_v37 = vmul.f32 %v302_v26, %v4809_v9 }
  0x9f   : > { %v328_v38 = vadd.f32 %v327_v32, %v275_v11  ;;  %v333_v39 = vmul.f32 %v315_v29, %v4795_v2  ;;  %v346_v40 = vmul.f32 %v315_v29, %v4803_v6  ;;  %v359_v61 = vmul.f32 %v315_v29, %v4811_v10 }
  0xa0   : > { %v332_v41 = vadd.f32 %v331_v56, %v330_v33  ;;  %v345_v44 = vadd.f32 %v344_v60, %v343_v59  ;;  %v358_v45 = vadd.f32 %v357_v37, %v356_v34  ;;  %v369_v51 = vmul.f32 %v289_v47, %v4815_v13 }
  0xa1   : > { %v335_v52 = vmul.f32 %v328_v38, %v4797_v3  ;;  %v348_v22 = vmul.f32 %v328_v38, %v4805_v7  ;;  %v361_v53 = vmul.f32 %v328_v38, %v4813_v12  ;;  %v370_v54 = vmul.f32 %v302_v26, %v4817_v14 }
  0xa2   : > { %v334_v11 = vadd.f32 %v333_v39, %v332_v41  ;;  %v347_v23 = vadd.f32 %v346_v40, %v345_v44  ;;  %v360_v55 = vadd.f32 %v359_v61, %v358_v45  ;;  %v372_v57 = vmul.f32 %v315_v29, %v4819_v15 }
  0xa3   : > { %v371_v25 = vadd.f32 %v370_v54, %v369_v51  ;;  %v374_v58 = vmul.f32 %v328_v38, %v4823_v17 }
  0xa4   : > { %v336_v36 = vadd.f32 %v335_v52, %v334_v11  ;;  %v349_v48 = vadd.f32 %v348_v22, %v347_v23  ;;  %v362_v31 = vadd.f32 %v361_v53, %v360_v55 }
  0xa5   : > { %v373_v62 = vadd.f32 %v372_v57, %v371_v25 }
  0xa6   : > { %v338_v24 = vadd.f32 %v337_v27, %v336_v36  ;;  %v351_v42 = vadd.f32 %v350_v43, %v349_v48  ;;  %v364_v50 = vadd.f32 %v363_v28, %v362_v31  ;;  %v6968_v31 = vmov %v4946_v35 }
  0xa7   : > { %v375_v46 = vadd.f32 %v374_v58, %v373_v62 }
  0xa8   : > { %v3179_v32 = vclamps-f32 %v338_v24, 100000.0  ;;  %v3180_v33 = vclamps-f32 %v351_v42, 100000.0  ;;  %v3181_v59 = vclamps-f32 %v364_v50, 100000.0 }
  0xa9   : > { %v377_v56 = vadd.f32 %v376_v63, %v375_v46 }
  0xaa   : > { %v341_v60 = vmul.f32 %v3179_v32, %v4848_v30  ;;  %v354_v34 = vmul.f32 %v3180_v33, %v4848_v30  ;;  %v367_v37 = vmul.f32 %v3181_v59, %v4848_v30  ;;  %v6973_v32 = vmov (%p162_p13), %v4946_v35 }
  0xab   : > { %v3182_v39 = vclamps-f32 %v377_v56, 100000.0 }
  0xac   : > { %v342_v40 = vadd.f32 %v341_v60, %v289_v47   ;;  %v355_v61 = vadd.f32 %v354_v34, %v302_v26   ;;  %v368_v41 = vadd.f32 %v367_v37, %v315_v29  }
  0xad   : > { %v380_v49 = vmul.f32 %v3182_v39, %v4848_v30  ;;  %165 = sbr.rel (!%p162_p13) target bundleno = 108 (0x6c), region = 117 }
  0xae   : > { %v6970_v25 = vmov %v368_v41  ;;  %v6971_v23 = vmov %v355_v61  ;;  %v6972_v22 = vmov %v342_v40  ;;  %v6975_v34 = vmov (%p162_p13), %v368_v41 }
  0xaf   : > { %v381_v44 = vadd.f32 %v380_v49, %v328_v38   ;;  %v6976_v35 = vmov (%p162_p13), %v355_v61  ;;  %v6977_v36 = vmov (%p162_p13), %v342_v40 }
  0xb1   : > { %v6969_v27 = vmov %v381_v44  ;;  %v6974_v33 = vmov (%p162_p13), %v381_v44 }
  0xb2 PF:  { %s3183_s3 = sshll.u32 %s4853_s18, 2  ;;  %v388_v30 = vmul.f32 %v4465_v36, %v4791_v0  ;;  %v389_v47 = vmul.f32 %v4461_v35, %v4793_v1  ;;  %v391_v26 = vmul.f32 %v4457_v34, %v4795_v2  ;;  %s5049_s5 = sld [smem:[#allocation7 + $0x1]]  ;;  %v401_v27 = vmul.f32 %v4465_v36, %v4799_v4  ;;  %v4465_v36 = vphi %v6967_v36, %v6977_v36   ;;  %v4461_v35 = vphi %v6966_v35, %v6976_v35   ;;  %v4457_v34 = vphi %v6965_v34, %v6975_v34   ;;  %v4453_v33 = vphi %v6964_v33, %v6974_v33   ;;  %v4449_v32 = vphi %v6963_v32, %v6973_v32  }
  0xb3   :  { %s5052_s20 = ssub.s32 %s7069_s16, %s3183_s3  ;;  %v402_v43 = vmul.f32 %v4461_v35, %v4801_v5  ;;  %v404_v28 = vmul.f32 %v4457_v34, %v4803_v6  ;;  %s5058_s21 = sld [smem:[#allocation6 + $0x1]]  ;;  %v393_v38 = vmul.f32 %v4453_v33, %v4797_v3  ;;  %v395_v45 = vmul.f32 %v4449_v32, %v4825_v18 }
  0xb4   :  { %p385_p0 = scmp.gt.s32.totalorder %s5052_s20, 0  ;;  %v390_v29 = vadd.f32 %v389_v47, %v388_v30  ;;  %v414_v51 = vmul.f32 %v4465_v36, %v4807_v8  ;;  %v406_v22 = vmul.f32 %v4453_v33, %v4805_v7  ;;  %v415_v53 = vmul.f32 %v4461_v35, %v4809_v9  ;;  %s5070_s22 = sld [smem:[#allocation2 + $0x1]] }
  0xb5   :  { %v403_v52 = vadd.f32 %v402_v43, %v401_v27  ;;  %v417_v54 = vmul.f32 %v4457_v34, %v4811_v10  ;;  %v408_v23 = vmul.f32 %v4449_v32, %v4827_v19  ;;  %v427_v55 = vmul.f32 %v4465_v36, %v4815_v13  ;;  %p441_p2 = scmp.gt.s32.totalorder %s5052_s20, 1  ;;  %p497_p3 = scmp.gt.s32.totalorder %s5052_s20, 2 }
  0xb6   :  { %v392_v11 = vadd.f32 %v391_v26, %v390_v29  ;;  %v428_v57 = vmul.f32 %v4461_v35, %v4817_v14  ;;  %s386_s23 = scalar_select %p385_p0, %s4835_s17, 0.0  ;;  %v416_v58 = vadd.f32 %v415_v53, %v414_v51  ;;  %v419_v48 = vmul.f32 %v4453_v33, %v4813_v12 }
  0xb7   :  { %v405_v25 = vadd.f32 %v404_v28, %v403_v52  ;;  %v430_v31 = vmul.f32 %v4457_v34, %v4819_v15  ;;  %v432_v24 = vmul.f32 %v4453_v33, %v4823_v17  ;;  %v421_v46 = vmul.f32 %v4449_v32, %v4829_v20  ;;  %s442_s25 = scalar_select %p441_p2, %s4835_s17, 0.0 }
  0xb8   :  { %v394_v62 = vadd.f32 %v393_v38, %v392_v11  ;;  %v429_v63 = vadd.f32 %v428_v57, %v427_v55  ;;  %v418_v50 = vadd.f32 %v417_v54, %v416_v58  ;;  %p558_p1 = scmp.gt.s32.totalorder %s5049_s5, 0  ;;  %v434_v60 = vmul.f32 %v4449_v32, %v4832_v21  ;;  %s7073_s17 = smov (!%p497_p3, %s4835_s17), 0.0 }
  0xb9   :  { %v407_v42 = vadd.f32 %v406_v22, %v405_v25  ;;  %v5088_v37 = vstv %s5058_s21  ;;  %v387_v39 = vstv %s386_s23 }
  0xba   :  { %v396_v59 = vadd.f32 %v395_v45, %v394_v62  ;;  %v431_v56 = vadd.f32 %v430_v31, %v429_v63  ;;  %v420_v61 = vadd.f32 %v419_v48, %v418_v50  ;;  %s7071_s5 = smov (!%p558_p1, %s5049_s5), 0  ;;  %v440_v47 = vadd.f32 %v4449_v32, %v387_v39 }
  0xbb   :  { %v409_v40 = vadd.f32 %v408_v23, %v407_v42  ;;  %v563_v26 = vstv %s5070_s22   ;;  %s5095_s24 = sshrl.u32 %s7071_s5, 2 }
  0xbc   :  { %v3184_v41 = vclamps-f32 %v396_v59, 100000.0  ;;  %v433_v49 = vadd.f32 %v432_v24, %v431_v56  ;;  %v422_v30 = vadd.f32 %v421_v46, %v420_v61  ;;  %v451_v22 = vmul.f32 %v440_v47, %v4825_v18  ;;  %p3199_p4 = scmp.le.s32.totalorder %s5095_s24, 0 }
  0xbd   :  { %v3185_v44 = vclamps-f32 %v409_v40, 100000.0  ;;  %v464_v25 = vmul.f32 %v440_v47, %v4827_v19  ;;  %v477_v40 = vmul.f32 %v440_v47, %v4829_v20  ;;  %s5180_s26 = smov (!%p3199_p4), 0  }
  0xbe   :  { %v399_v27 = vmul.f32 %v3184_v41, %v387_v39  ;;  %v435_v43 = vadd.f32 %v434_v60, %v433_v49  ;;  %v3186_v29 = vclamps-f32 %v422_v30, 100000.0 }
  0xbf   :  { %v412_v28 = vmul.f32 %v3185_v44, %v387_v39 }
  0xc0   :  { %v400_v38 = vadd.f32 %v4465_v36, %v399_v27  ;;  %v3187_v45 = vclamps-f32 %v435_v43, 100000.0  ;;  %v425_v52 = vmul.f32 %v3186_v29, %v387_v39  ;;  %v490_v43 = vmul.f32 %v440_v47, %v4832_v21 }
  0xc1   :  { %v413_v51 = vadd.f32 %v4461_v35, %v412_v28 }
  0xc2   :  { %v438_v53 = vmul.f32 %v3187_v45, %v387_v39  ;;  %v444_v54 = vmul.f32 %v400_v38, %v4791_v0  ;;  %v457_v11 = vmul.f32 %v400_v38, %v4799_v4  ;;  %v470_v32 = vmul.f32 %v400_v38, %v4807_v8 }
  0xc3   :  { %v426_v23 = vadd.f32 %v4457_v34, %v425_v52  ;;  %v445_v55 = vmul.f32 %v413_v51, %v4793_v1  ;;  %v458_v57 = vmul.f32 %v413_v51, %v4801_v5  ;;  %v471_v36 = vmul.f32 %v413_v51, %v4809_v9 }
  0xc4   :  { %v439_v35 = vadd.f32 %v4453_v33, %v438_v53  ;;  %v483_v58 = vmul.f32 %v400_v38, %v4815_v13  ;;  %v484_v48 = vmul.f32 %v413_v51, %v4817_v14  ;;  %v443_v45 = vstv %s442_s25 }
  0xc5   :  { %v446_v31 = vadd.f32 %v445_v55, %v444_v54  ;;  %v447_v34 = vmul.f32 %v426_v23, %v4795_v2  ;;  %v459_v62 = vadd.f32 %v458_v57, %v457_v11  ;;  %v460_v63 = vmul.f32 %v426_v23, %v4803_v6 }
  0xc6   :  { %v449_v24 = vmul.f32 %v439_v35, %v4797_v3  ;;  %v462_v42 = vmul.f32 %v439_v35, %v4805_v7  ;;  %v472_v33 = vadd.f32 %v471_v36, %v470_v32  ;;  %v473_v50 = vmul.f32 %v426_v23, %v4811_v10 }
  0xc7   :  { %v448_v46 = vadd.f32 %v447_v34, %v446_v31  ;;  %v461_v59 = vadd.f32 %v460_v63, %v459_v62  ;;  %v475_v56 = vmul.f32 %v439_v35, %v4813_v12  ;;  %v485_v60 = vadd.f32 %v484_v48, %v483_v58 }
  0xc8   :  { %v474_v39 = vadd.f32 %v473_v50, %v472_v33  ;;  %v486_v61 = vmul.f32 %v426_v23, %v4819_v15  ;;  %v488_v41 = vmul.f32 %v439_v35, %v4823_v17  ;;  %v496_v57 = vadd.f32 %v443_v45, %v440_v47 }
  0xc9   :  { %v450_v49 = vadd.f32 %v449_v24, %v448_v46  ;;  %v463_v44 = vadd.f32 %v462_v42, %v461_v59 }
  0xca   :  { %v476_v30 = vadd.f32 %v475_v56, %v474_v39  ;;  %v487_v27 = vadd.f32 %v486_v61, %v485_v60 }
  0xcb   :  { %v452_v28 = vadd.f32 %v451_v22, %v450_v49  ;;  %v465_v29 = vadd.f32 %v464_v25, %v463_v44  ;;  %v507_v22 = vmul.f32 %v496_v57, %v4825_v18  ;;  %v520_v25 = vmul.f32 %v496_v57, %v4827_v19 }
  0xcc   :  { %v478_v52 = vadd.f32 %v477_v40, %v476_v30  ;;  %v489_v53 = vadd.f32 %v488_v41, %v487_v27 }
  0xcd   :  { %v3188_v54 = vclamps-f32 %v452_v28, 100000.0  ;;  %v3189_v11 = vclamps-f32 %v465_v29, 100000.0 }
  0xce   :  { %v3190_v32 = vclamps-f32 %v478_v52, 100000.0  ;;  %v491_v55 = vadd.f32 %v490_v43, %v489_v53  ;;  %v533_v43 = vmul.f32 %v496_v57, %v4829_v20 }
  0xcf   :  { %v455_v36 = vmul.f32 %v3188_v54, %v443_v45  ;;  %v468_v58 = vmul.f32 %v3189_v11, %v443_v45  ;;  %v546_v11 = vmul.f32 %v496_v57, %v4832_v21 }
  0xd0   :  { %v481_v48 = vmul.f32 %v3190_v32, %v443_v45  ;;  %v3191_v31 = vclamps-f32 %v491_v55, 100000.0 }
  0xd1   :  { %v456_v34 = vadd.f32 %v455_v36, %v400_v38  ;;  %v469_v62 = vadd.f32 %v468_v58, %v413_v51 }
  0xd2   :  { %v482_v63 = vadd.f32 %v481_v48, %v426_v23  ;;  %v494_v24 = vmul.f32 %v3191_v31, %v443_v45  ;;  %v499_v48 = vstv %s7073_s17 }
  0xd3   :  { %v500_v42 = vmul.f32 %v456_v34, %v4791_v0  ;;  %v501_v33 = vmul.f32 %v469_v62, %v4793_v1  ;;  %v513_v50 = vmul.f32 %v456_v34, %v4799_v4  ;;  %v514_v47 = vmul.f32 %v469_v62, %v4801_v5 }
  0xd4   :  { %v495_v46 = vadd.f32 %v494_v24, %v439_v35  ;;  %v503_v38 = vmul.f32 %v482_v63, %v4795_v2  ;;  %v516_v51 = vmul.f32 %v482_v63, %v4803_v6  ;;  %v526_v23 = vmul.f32 %v456_v34, %v4807_v8 }
  0xd5   :  { %v502_v59 = vadd.f32 %v501_v33, %v500_v42  ;;  %v515_v56 = vadd.f32 %v514_v47, %v513_v50  ;;  %v527_v60 = vmul.f32 %v469_v62, %v4809_v9  ;;  %v529_v39 = vmul.f32 %v482_v63, %v4811_v10 }
  0xd6   :  { %v505_v40 = vmul.f32 %v495_v46, %v4797_v3  ;;  %v518_v61 = vmul.f32 %v495_v46, %v4805_v7  ;;  %v531_v35 = vmul.f32 %v495_v46, %v4813_v12  ;;  %v539_v41 = vmul.f32 %v456_v34, %v4815_v13 }
  0xd7   :  { %v504_v49 = vadd.f32 %v503_v38, %v502_v59  ;;  %v517_v44 = vadd.f32 %v516_v51, %v515_v56  ;;  %v528_v30 = vadd.f32 %v527_v60, %v526_v23  ;;  %v540_v27 = vmul.f32 %v469_v62, %v4817_v14 }
  0xd8   :  { %v542_v28 = vmul.f32 %v482_v63, %v4819_v15  ;;  %v544_v29 = vmul.f32 %v495_v46, %v4823_v17 }
  0xd9   :  { %v506_v45 = vadd.f32 %v505_v40, %v504_v49  ;;  %v519_v52 = vadd.f32 %v518_v61, %v517_v44  ;;  %v530_v53 = vadd.f32 %v529_v39, %v528_v30  ;;  %v541_v54 = vadd.f32 %v540_v27, %v539_v41 }
  0xdb   :  { %v508_v32 = vadd.f32 %v507_v22, %v506_v45  ;;  %v521_v55 = vadd.f32 %v520_v25, %v519_v52  ;;  %v532_v36 = vadd.f32 %v531_v35, %v530_v53  ;;  %v543_v58 = vadd.f32 %v542_v28, %v541_v54 }
  0xdd   :  { %v3192_v31 = vclamps-f32 %v508_v32, 100000.0  ;;  %v3193_v24 = vclamps-f32 %v521_v55, 100000.0  ;;  %v534_v42 = vadd.f32 %v533_v43, %v532_v36  ;;  %v545_v33 = vadd.f32 %v544_v29, %v543_v58 }
  0xdf   :  { %v511_v50 = vmul.f32 %v3192_v31, %v499_v48  ;;  %v524_v47 = vmul.f32 %v3193_v24, %v499_v48  ;;  %v3194_v38 = vclamps-f32 %v534_v42, 100000.0  ;;  %v547_v51 = vadd.f32 %v546_v11, %v545_v33 }
  0xe1   :  { %v512_v23 = vadd.f32 %v511_v50, %v456_v34   ;;  %v525_v59 = vadd.f32 %v524_v47, %v469_v62   ;;  %v537_v56 = vmul.f32 %v3194_v38, %v499_v48  ;;  %v3195_v60 = vclamps-f32 %v547_v51, 100000.0 }
  0xe2   :  { %v6978_v34 = vmov %v563_v26 }
  0xe3   :  { %v538_v39 = vadd.f32 %v537_v56, %v482_v63   ;;  %v550_v40 = vmul.f32 %v3195_v60, %v499_v48  ;;  %v552_v57 = vsel %vm135_vm0, %v512_v23, 0.0  ;;  %v6981_v41 = vmov %v525_v59 }
  0xe4   :  { %v553_v22 = vsel %vm136_vm1, %v525_v59, %v552_v57  ;;  %3032 = sbr.rel (%p3199_p4) target bundleno = 303 (0x12f), region = 122 }
  0xe5   :  { %v551_v25 = vadd.f32 %v550_v40, %v495_v46   ;;  %v554_v61 = vsel %vm137_vm2, %v538_v39, %v553_v22  ;;  %v6980_v63 = vmov %v538_v39  ;;  %v6982_v46 = vmov %v512_v23 }
  0xe7   :  { %v555_v35 = vsel %vm138_vm3, %v551_v25, %v554_v61  ;;  %v6979_v62 = vmov %v551_v25 }
  0xe8   :  { %556 = vst [vmem:[#allocation13 + $0x1] sm:$0x1] %v555_v35 }
  0xe9 LB: > { %v577_v49 = vmul.f32 %v4481_v59, %v4793_v1  ;;  %v576_v44 = vmul.f32 %v4485_v23, %v4791_v0  ;;  %v579_v30 = vmul.f32 %v4477_v39, %v4795_v2  ;;  %v589_v27 = vmul.f32 %v4485_v23, %v4799_v4  ;;  %s568_s26 = sadd.s32 1, %s4489_s26   ;;  %s4489_s26 = sphi %s5180_s26, %s568_s26   ;;  %v4485_v23 = vphi %v512_v23, %v6987_v23   ;;  %v4481_v59 = vphi %v525_v59, %v6986_v59   ;;  %v4477_v39 = vphi %v538_v39, %v6985_v39   ;;  %v4473_v25 = vphi %v551_v25, %v6984_v25   ;;  %v4469_v26 = vphi %v563_v26, %v6983_v26  }
  0xea   : > { %v581_v43 = vmul.f32 %v4473_v25, %v4797_v3  ;;  %v583_v28 = vmul.f32 %v4469_v26, %v4825_v18  ;;  %v590_v29 = vmul.f32 %v4481_v59, %v4801_v5  ;;  %v592_v45 = vmul.f32 %v4477_v39, %v4803_v6  ;;  %p567_p5 = scmp.ge.s32.totalorder %s568_s26, %s5095_s24 }
  0xeb   : > { %v578_v52 = vadd.f32 %v577_v49, %v576_v44  ;;  %v602_v53 = vmul.f32 %v4485_v23, %v4807_v8  ;;  %v603_v54 = vmul.f32 %v4481_v59, %v4809_v9  ;;  %v605_v11 = vmul.f32 %v4477_v39, %v4811_v10 }
  0xec   : > { %v591_v32 = vadd.f32 %v590_v29, %v589_v27  ;;  %v594_v55 = vmul.f32 %v4473_v25, %v4805_v7  ;;  %v607_v36 = vmul.f32 %v4473_v25, %v4813_v12  ;;  %v615_v58 = vmul.f32 %v4485_v23, %v4815_v13 }
  0xed   : > { %v580_v48 = vadd.f32 %v579_v30, %v578_v52  ;;  %v604_v31 = vadd.f32 %v603_v54, %v602_v53  ;;  %v616_v24 = vmul.f32 %v4481_v59, %v4817_v14  ;;  %v618_v42 = vmul.f32 %v4477_v39, %v4819_v15 }
  0xee   : > { %v593_v33 = vadd.f32 %v592_v45, %v591_v32  ;;  %v596_v50 = vmul.f32 %v4469_v26, %v4827_v19  ;;  %v609_v47 = vmul.f32 %v4469_v26, %v4829_v20  ;;  %v620_v60 = vmul.f32 %v4473_v25, %v4823_v17 }
  0xef   : > { %v582_v38 = vadd.f32 %v581_v43, %v580_v48  ;;  %v606_v51 = vadd.f32 %v605_v11, %v604_v31  ;;  %v617_v56 = vadd.f32 %v616_v24, %v615_v58  ;;  %v622_v35 = vmul.f32 %v4469_v26, %v4832_v21 }
  0xf0   : > { %v595_v40 = vadd.f32 %v594_v55, %v593_v33  ;;  %v628_v46 = vadd.f32 %v4469_v26, %v5088_v37 }
  0xf1   : > { %v584_v57 = vadd.f32 %v583_v28, %v582_v38  ;;  %v608_v22 = vadd.f32 %v607_v36, %v606_v51  ;;  %v619_v61 = vadd.f32 %v618_v42, %v617_v56 }
  0xf2   : > { %v597_v34 = vadd.f32 %v596_v50, %v595_v40  ;;  %v5220_v29 = vadd.f32 %v628_v46, %v5088_v37  ;;  %v636_v53 = vmul.f32 %v628_v46, %v4825_v18  ;;  %v649_v11 = vmul.f32 %v628_v46, %v4827_v19 }
  0xf3   : > { %v3200_v62 = vclamps-f32 %v584_v57, 100000.0  ;;  %v610_v63 = vadd.f32 %v609_v47, %v608_v22  ;;  %v621_v41 = vadd.f32 %v620_v60, %v619_v61  ;;  %v662_v26 = vmul.f32 %v628_v46, %v4829_v20 }
  0xf4   : > { %v3201_v49 = vclamps-f32 %v597_v34, 100000.0  ;;  %v5228_v32 = vadd.f32 %v5220_v29, %v5088_v37 }
  0xf5   : > { %v587_v44 = vmul.f32 %v3200_v62, %v5088_v37  ;;  %v3202_v30 = vclamps-f32 %v610_v63, 100000.0  ;;  %v623_v27 = vadd.f32 %v622_v35, %v621_v41 }
  0xf6   : > { %v600_v43 = vmul.f32 %v3201_v49, %v5088_v37  ;;  %v5250_v41 = vadd.f32 %v5228_v32, %v5088_v37  }
  0xf7   : > { %v588_v28 = vadd.f32 %v4485_v23, %v587_v44  ;;  %v613_v45 = vmul.f32 %v3202_v30, %v5088_v37  ;;  %v3203_v52 = vclamps-f32 %v623_v27, 100000.0 }
  0xf8   : > { %v601_v54 = vadd.f32 %v4481_v59, %v600_v43  ;;  %v675_v43 = vmul.f32 %v628_v46, %v4832_v21 }
  0xf9   : > { %v614_v55 = vadd.f32 %v4477_v39, %v613_v45  ;;  %v626_v36 = vmul.f32 %v3203_v52, %v5088_v37  ;;  %v629_v58 = vmul.f32 %v588_v28, %v4791_v0  ;;  %v642_v23 = vmul.f32 %v588_v28, %v4799_v4 }
  0xfa   : > { %v630_v48 = vmul.f32 %v601_v54, %v4793_v1  ;;  %v643_v31 = vmul.f32 %v601_v54, %v4801_v5  ;;  %v655_v59 = vmul.f32 %v588_v28, %v4807_v8  ;;  %v656_v24 = vmul.f32 %v601_v54, %v4809_v9 }
  0xfb   : > { %v627_v42 = vadd.f32 %v4473_v25, %v626_v36  ;;  %v632_v33 = vmul.f32 %v614_v55, %v4795_v2  ;;  %v645_v39 = vmul.f32 %v614_v55, %v4803_v6  ;;  %v658_v50 = vmul.f32 %v614_v55, %v4811_v10 }
  0xfc   : > { %v631_v47 = vadd.f32 %v630_v48, %v629_v58  ;;  %v644_v38 = vadd.f32 %v643_v31, %v642_v23  ;;  %v657_v51 = vadd.f32 %v656_v24, %v655_v59  ;;  %v668_v56 = vmul.f32 %v588_v28, %v4815_v13 }
  0xfd   : > { %v634_v60 = vmul.f32 %v627_v42, %v4797_v3  ;;  %v647_v40 = vmul.f32 %v627_v42, %v4805_v7  ;;  %v660_v57 = vmul.f32 %v627_v42, %v4813_v12  ;;  %v669_v22 = vmul.f32 %v601_v54, %v4817_v14 }
  0xfe   : > { %v633_v25 = vadd.f32 %v632_v33, %v631_v47  ;;  %v646_v61 = vadd.f32 %v645_v39, %v644_v38  ;;  %v659_v35 = vadd.f32 %v658_v50, %v657_v51  ;;  %v671_v34 = vmul.f32 %v614_v55, %v4819_v15 }
  0xff   : > { %v670_v62 = vadd.f32 %v669_v22, %v668_v56  ;;  %v673_v63 = vmul.f32 %v627_v42, %v4823_v17 }
 0x100   : > { %v635_v49 = vadd.f32 %v634_v60, %v633_v25  ;;  %v648_v44 = vadd.f32 %v647_v40, %v646_v61  ;;  %v661_v30 = vadd.f32 %v660_v57, %v659_v35 }
 0x101   : > { %v672_v27 = vadd.f32 %v671_v34, %v670_v62 }
 0x102   : > { %v637_v45 = vadd.f32 %v636_v53, %v635_v49  ;;  %v650_v52 = vadd.f32 %v649_v11, %v648_v44  ;;  %v663_v36 = vadd.f32 %v662_v26, %v661_v30  ;;  %v689_v53 = vmul.f32 %v5220_v29, %v4825_v18 }
 0x103   : > { %v674_v58 = vadd.f32 %v673_v63, %v672_v27 }
 0x104   : > { %v3204_v23 = vclamps-f32 %v637_v45, 100000.0  ;;  %v3205_v48 = vclamps-f32 %v650_v52, 100000.0  ;;  %v3206_v31 = vclamps-f32 %v663_v36, 100000.0  ;;  %v715_v45 = vmul.f32 %v5220_v29, %v4829_v20 }
 0x105   : > { %v676_v59 = vadd.f32 %v675_v43, %v674_v58  ;;  %v702_v43 = vmul.f32 %v5220_v29, %v4827_v19 }
 0x106   : > { %v640_v24 = vmul.f32 %v3204_v23, %v5088_v37  ;;  %v653_v33 = vmul.f32 %v3205_v48, %v5088_v37  ;;  %v666_v39 = vmul.f32 %v3206_v31, %v5088_v37 }
 0x107   : > { %v3207_v50 = vclamps-f32 %v676_v59, 100000.0 }
 0x108   : > { %v641_v47 = vadd.f32 %v640_v24, %v588_v28  ;;  %v654_v38 = vadd.f32 %v653_v33, %v601_v54  ;;  %v667_v51 = vadd.f32 %v666_v39, %v614_v55  ;;  %v728_v33 = vmul.f32 %v5220_v29, %v4832_v21 }
 0x109   : > { %v679_v46 = vmul.f32 %v3207_v50, %v5088_v37  ;;  %v755_v29 = vmul.f32 %v5228_v32, %v4827_v19 }
 0x10a   : > { %v682_v11 = vmul.f32 %v641_v47, %v4791_v0  ;;  %v683_v26 = vmul.f32 %v654_v38, %v4793_v1  ;;  %v685_v56 = vmul.f32 %v667_v51, %v4795_v2  ;;  %v695_v60 = vmul.f32 %v641_v47, %v4799_v4 }
 0x10b   : > { %v680_v40 = vadd.f32 %v679_v46, %v627_v42  ;;  %v696_v57 = vmul.f32 %v654_v38, %v4801_v5  ;;  %v698_v28 = vmul.f32 %v667_v51, %v4803_v6  ;;  %v708_v54 = vmul.f32 %v641_v47, %v4807_v8 }
 0x10c   : > { %v684_v55 = vadd.f32 %v683_v26, %v682_v11  ;;  %v709_v22 = vmul.f32 %v654_v38, %v4809_v9  ;;  %v711_v25 = vmul.f32 %v667_v51, %v4811_v10  ;;  %v721_v61 = vmul.f32 %v641_v47, %v4815_v13 }
 0x10d   : > { %v687_v35 = vmul.f32 %v680_v40, %v4797_v3  ;;  %v697_v34 = vadd.f32 %v696_v57, %v695_v60  ;;  %v700_v62 = vmul.f32 %v680_v40, %v4805_v7  ;;  %v713_v42 = vmul.f32 %v680_v40, %v4813_v12 }
 0x10e   : > { %v686_v63 = vadd.f32 %v685_v56, %v684_v55  ;;  %v710_v49 = vadd.f32 %v709_v22, %v708_v54  ;;  %v722_v44 = vmul.f32 %v654_v38, %v4817_v14  ;;  %v724_v30 = vmul.f32 %v667_v51, %v4819_v15 }
 0x10f   : > { %v699_v27 = vadd.f32 %v698_v28, %v697_v34  ;;  %v726_v23 = vmul.f32 %v680_v40, %v4823_v17 }
 0x110   : > { %v688_v52 = vadd.f32 %v687_v35, %v686_v63  ;;  %v712_v36 = vadd.f32 %v711_v25, %v710_v49  ;;  %v723_v58 = vadd.f32 %v722_v44, %v721_v61  ;;  %v742_v25 = vmul.f32 %v5228_v32, %v4825_v18 }
 0x111   : > { %v701_v48 = vadd.f32 %v700_v62, %v699_v27  ;;  %v768_v61 = vmul.f32 %v5228_v32, %v4829_v20 }
 0x112   : > { %v690_v31 = vadd.f32 %v689_v53, %v688_v52  ;;  %v714_v59 = vadd.f32 %v713_v42, %v712_v36  ;;  %v725_v24 = vadd.f32 %v724_v30, %v723_v58 }
 0x113   : > { %v703_v39 = vadd.f32 %v702_v43, %v701_v48 }
 0x114   : > { %v3208_v50 = vclamps-f32 %v690_v31, 100000.0  ;;  %v716_v46 = vadd.f32 %v715_v45, %v714_v59  ;;  %v727_v11 = vadd.f32 %v726_v23, %v725_v24 }
 0x115   : > { %v3209_v26 = vclamps-f32 %v703_v39, 100000.0 }
 0x116   : > { %v693_v56 = vmul.f32 %v3208_v50, %v5088_v37  ;;  %v3210_v60 = vclamps-f32 %v716_v46, 100000.0  ;;  %v729_v57 = vadd.f32 %v728_v33, %v727_v11 }
 0x117   : > { %v706_v28 = vmul.f32 %v3209_v26, %v5088_v37 }
 0x118   : > { %v694_v54 = vadd.f32 %v693_v56, %v641_v47  ;;  %v719_v55 = vmul.f32 %v3210_v60, %v5088_v37  ;;  %v3211_v53 = vclamps-f32 %v729_v57, 100000.0  ;;  %v781_v60 = vmul.f32 %v5228_v32, %v4832_v21 }
 0x119   : > { %v707_v22 = vadd.f32 %v706_v28, %v654_v38 }
 0x11a   : > { %v720_v35 = vadd.f32 %v719_v55, %v667_v51  ;;  %v732_v34 = vmul.f32 %v3211_v53, %v5088_v37  ;;  %v735_v62 = vmul.f32 %v694_v54, %v4791_v0  ;;  %v748_v47 = vmul.f32 %v694_v54, %v4799_v4 }
 0x11b   : > { %v736_v42 = vmul.f32 %v707_v22, %v4793_v1  ;;  %v749_v38 = vmul.f32 %v707_v22, %v4801_v5  ;;  %v761_v63 = vmul.f32 %v694_v54, %v4807_v8  ;;  %v762_v49 = vmul.f32 %v707_v22, %v4809_v9 }
 0x11c   : > { %v733_v44 = vadd.f32 %v732_v34, %v680_v40  ;;  %v738_v30 = vmul.f32 %v720_v35, %v4795_v2  ;;  %v751_v27 = vmul.f32 %v720_v35, %v4803_v6  ;;  %v764_v51 = vmul.f32 %v720_v35, %v4811_v10 }
 0x11d   : > { %v737_v43 = vadd.f32 %v736_v42, %v735_v62  ;;  %v750_v45 = vadd.f32 %v749_v38, %v748_v47  ;;  %v763_v52 = vadd.f32 %v762_v49, %v761_v63  ;;  %v774_v36 = vmul.f32 %v694_v54, %v4815_v13 }
 0x11e   : > { %v740_v58 = vmul.f32 %v733_v44, %v4797_v3  ;;  %v753_v23 = vmul.f32 %v733_v44, %v4805_v7  ;;  %v766_v48 = vmul.f32 %v733_v44, %v4813_v12  ;;  %v775_v31 = vmul.f32 %v707_v22, %v4817_v14 }
 0x11f   : > { %v739_v40 = vadd.f32 %v738_v30, %v737_v43  ;;  %v752_v59 = vadd.f32 %v751_v27, %v750_v45  ;;  %v765_v24 = vadd.f32 %v764_v51, %v763_v52  ;;  %v777_v33 = vmul.f32 %v720_v35, %v4819_v15 }
 0x120   : > { %v776_v39 = vadd.f32 %v775_v31, %v774_v36  ;;  %v779_v50 = vmul.f32 %v733_v44, %v4823_v17 }
 0x121   : > { %v741_v46 = vadd.f32 %v740_v58, %v739_v40  ;;  %v754_v11 = vadd.f32 %v753_v23, %v752_v59  ;;  %v767_v26 = vadd.f32 %v766_v48, %v765_v24 }
 0x122   : > { %v778_v56 = vadd.f32 %v777_v33, %v776_v39 }
 0x123   : > { %v743_v57 = vadd.f32 %v742_v25, %v741_v46  ;;  %v756_v28 = vadd.f32 %v755_v29, %v754_v11  ;;  %v769_v55 = vadd.f32 %v768_v61, %v767_v26  ;;  %v6983_v26 = vmov %v5250_v41 }
 0x124   : > { %v780_v53 = vadd.f32 %v779_v50, %v778_v56 }
 0x125   : > { %v3212_v34 = vclamps-f32 %v743_v57, 100000.0  ;;  %v3213_v62 = vclamps-f32 %v756_v28, 100000.0  ;;  %v3214_v47 = vclamps-f32 %v769_v55, 100000.0 }
 0x126   : > { %v782_v42 = vadd.f32 %v781_v60, %v780_v53 }
 0x127   : > { %v746_v38 = vmul.f32 %v3212_v34, %v5088_v37  ;;  %v759_v63 = vmul.f32 %v3213_v62, %v5088_v37  ;;  %v772_v49 = vmul.f32 %v3214_v47, %v5088_v37  ;;  %v6988_v34 = vmov (%p567_p5), %v5250_v41 }
 0x128   : > { %v3215_v30 = vclamps-f32 %v782_v42, 100000.0 }
 0x129   : > { %v747_v27 = vadd.f32 %v746_v38, %v694_v54   ;;  %v760_v51 = vadd.f32 %v759_v63, %v707_v22   ;;  %v773_v43 = vadd.f32 %v772_v49, %v720_v35  }
 0x12a   : > { %v785_v32 = vmul.f32 %v3215_v30, %v5088_v37  ;;  %570 = sbr.rel (!%p567_p5) target bundleno = 233 (0xe9), region = 128 }
 0x12b   : > { %v6985_v39 = vmov %v773_v43  ;;  %v6986_v59 = vmov %v760_v51  ;;  %v6987_v23 = vmov %v747_v27  ;;  %v6990_v63 = vmov (%p567_p5), %v773_v43 }
 0x12c   : > { %v786_v45 = vadd.f32 %v785_v32, %v733_v44   ;;  %v6991_v41 = vmov (%p567_p5), %v760_v51  ;;  %v6992_v46 = vmov (%p567_p5), %v747_v27 }
 0x12e   : > { %v6984_v25 = vmov %v786_v45  ;;  %v6989_v62 = vmov (%p567_p5), %v786_v45 }
 0x12f PF:  { %s3216_s27 = sshll.u32 %s5095_s24, 2  ;;  %v793_v37 = vmul.f32 %v4509_v46, %v4791_v0  ;;  %v794_v54 = vmul.f32 %v4505_v41, %v4793_v1  ;;  %v796_v22 = vmul.f32 %v4501_v63, %v4795_v2  ;;  %s5353_s28 = sld [smem:[#allocation7 + $0x2]]  ;;  %v806_v25 = vmul.f32 %v4509_v46, %v4799_v4  ;;  %v4509_v46 = vphi %v6982_v46, %v6992_v46   ;;  %v4505_v41 = vphi %v6981_v41, %v6991_v41   ;;  %v4501_v63 = vphi %v6980_v63, %v6990_v63   ;;  %v4497_v62 = vphi %v6979_v62, %v6989_v62   ;;  %v4493_v34 = vphi %v6978_v34, %v6988_v34  }
 0x130   :  { %s5356_s29 = ssub.s32 %s7071_s5, %s3216_s27  ;;  %v807_v29 = vmul.f32 %v4505_v41, %v4801_v5  ;;  %v809_v61 = vmul.f32 %v4501_v63, %v4803_v6  ;;  %s5362_s2 = sld [smem:[#allocation6 + $0x2]]  ;;  %v798_v44 = vmul.f32 %v4497_v62, %v4797_v3  ;;  %v800_v52 = vmul.f32 %v4493_v34, %v4825_v18 }
 0x131   :  { %p790_p6 = scmp.gt.s32.totalorder %s5356_s29, 0  ;;  %v795_v35 = vadd.f32 %v794_v54, %v793_v37  ;;  %v819_v36 = vmul.f32 %v4509_v46, %v4807_v8  ;;  %v811_v23 = vmul.f32 %v4497_v62, %v4805_v7  ;;  %v820_v48 = vmul.f32 %v4505_v41, %v4809_v9  ;;  %s5374_s4 = sld [smem:[#allocation2 + $0x2]] }
 0x132   :  { %v808_v58 = vadd.f32 %v807_v29, %v806_v25  ;;  %v822_v31 = vmul.f32 %v4501_v63, %v4811_v10  ;;  %v813_v59 = vmul.f32 %v4493_v34, %v4827_v19  ;;  %v832_v24 = vmul.f32 %v4509_v46, %v4815_v13  ;;  %p846_p8 = scmp.gt.s32.totalorder %s5356_s29, 1  ;;  %p902_p9 = scmp.gt.s32.totalorder %s5356_s29, 2 }
 0x133   :  { %v797_v40 = vadd.f32 %v796_v22, %v795_v35  ;;  %v833_v33 = vmul.f32 %v4505_v41, %v4817_v14  ;;  %s791_s30 = scalar_select %p790_p6, %s5058_s21, 0.0  ;;  %v821_v50 = vadd.f32 %v820_v48, %v819_v36  ;;  %v824_v11 = vmul.f32 %v4497_v62, %v4813_v12 }
 0x134   :  { %v810_v39 = vadd.f32 %v809_v61, %v808_v58  ;;  %v835_v26 = vmul.f32 %v4501_v63, %v4819_v15  ;;  %v837_v57 = vmul.f32 %v4497_v62, %v4823_v17  ;;  %v826_v53 = vmul.f32 %v4493_v34, %v4829_v20  ;;  %s847_s8 = scalar_select %p846_p8, %s5058_s21, 0.0 }
 0x135   :  { %v799_v56 = vadd.f32 %v798_v44, %v797_v40  ;;  %v834_v60 = vadd.f32 %v833_v33, %v832_v24  ;;  %v823_v55 = vadd.f32 %v822_v31, %v821_v50  ;;  %p963_p7 = scmp.gt.s32.totalorder %s5353_s28, 0  ;;  %v839_v38 = vmul.f32 %v4493_v34, %v4832_v21  ;;  %s7077_s21 = smov (!%p902_p9, %s5058_s21), 0.0 }
 0x136   :  { %v812_v28 = vadd.f32 %v811_v23, %v810_v39  ;;  %v5392_v49 = vstv %s5362_s2  ;;  %v792_v30 = vstv %s791_s30 }
 0x137   :  { %v801_v47 = vadd.f32 %v800_v52, %v799_v56  ;;  %v836_v42 = vadd.f32 %v835_v26, %v834_v60  ;;  %v825_v51 = vadd.f32 %v824_v11, %v823_v55  ;;  %s7075_s28 = smov (!%p963_p7, %s5353_s28), 0  ;;  %v845_v54 = vadd.f32 %v4493_v34, %v792_v30 }
 0x138   :  { %v814_v27 = vadd.f32 %v813_v59, %v812_v28  ;;  %v968_v22 = vstv %s5374_s4   ;;  %s5399_s7 = sshrl.u32 %s7075_s28, 2 }
 0x139   :  { %v3217_v43 = vclamps-f32 %v801_v47, 100000.0  ;;  %v838_v32 = vadd.f32 %v837_v57, %v836_v42  ;;  %v827_v37 = vadd.f32 %v826_v53, %v825_v51  ;;  %v856_v23 = vmul.f32 %v845_v54, %v4825_v18  ;;  %p3232_p10 = scmp.le.s32.totalorder %s5399_s7, 0 }
 0x13a   :  { %v3218_v45 = vclamps-f32 %v814_v27, 100000.0  ;;  %v869_v39 = vmul.f32 %v845_v54, %v4827_v19  ;;  %v882_v27 = vmul.f32 %v845_v54, %v4829_v20  ;;  %s5484_s9 = smov (!%p3232_p10), 0  }
 0x13b   :  { %v804_v25 = vmul.f32 %v3217_v43, %v792_v30  ;;  %v840_v29 = vadd.f32 %v839_v38, %v838_v32  ;;  %v3219_v35 = vclamps-f32 %v827_v37, 100000.0 }
 0x13c   :  { %v817_v61 = vmul.f32 %v3218_v45, %v792_v30 }
 0x13d   :  { %v805_v44 = vadd.f32 %v4509_v46, %v804_v25  ;;  %v3220_v52 = vclamps-f32 %v840_v29, 100000.0  ;;  %v830_v58 = vmul.f32 %v3219_v35, %v792_v30  ;;  %v895_v29 = vmul.f32 %v845_v54, %v4832_v21 }
 0x13e   :  { %v818_v36 = vadd.f32 %v4505_v41, %v817_v61 }
 0x13f   :  { %v843_v48 = vmul.f32 %v3220_v52, %v792_v30  ;;  %v849_v31 = vmul.f32 %v805_v44, %v4791_v0  ;;  %v862_v40 = vmul.f32 %v805_v44, %v4799_v4  ;;  %v875_v34 = vmul.f32 %v805_v44, %v4807_v8 }
 0x140   :  { %v831_v59 = vadd.f32 %v4501_v63, %v830_v58  ;;  %v850_v24 = vmul.f32 %v818_v36, %v4793_v1  ;;  %v863_v33 = vmul.f32 %v818_v36, %v4801_v5  ;;  %v876_v46 = vmul.f32 %v818_v36, %v4809_v9 }
 0x141   :  { %v844_v41 = vadd.f32 %v4497_v62, %v843_v48  ;;  %v888_v50 = vmul.f32 %v805_v44, %v4815_v13  ;;  %v889_v11 = vmul.f32 %v818_v36, %v4817_v14  ;;  %v848_v52 = vstv %s847_s8 }
 0x142   :  { %v851_v26 = vadd.f32 %v850_v24, %v849_v31  ;;  %v852_v63 = vmul.f32 %v831_v59, %v4795_v2  ;;  %v864_v56 = vadd.f32 %v863_v33, %v862_v40  ;;  %v865_v60 = vmul.f32 %v831_v59, %v4803_v6 }
 0x143   :  { %v854_v57 = vmul.f32 %v844_v41, %v4797_v3  ;;  %v867_v28 = vmul.f32 %v844_v41, %v4805_v7  ;;  %v877_v62 = vadd.f32 %v876_v46, %v875_v34  ;;  %v878_v55 = vmul.f32 %v831_v59, %v4811_v10 }
 0x144   :  { %v853_v53 = vadd.f32 %v852_v63, %v851_v26  ;;  %v866_v47 = vadd.f32 %v865_v60, %v864_v56  ;;  %v880_v42 = vmul.f32 %v844_v41, %v4813_v12  ;;  %v890_v38 = vadd.f32 %v889_v11, %v888_v50 }
 0x145   :  { %v879_v30 = vadd.f32 %v878_v55, %v877_v62  ;;  %v891_v51 = vmul.f32 %v831_v59, %v4819_v15  ;;  %v893_v43 = vmul.f32 %v844_v41, %v4823_v17  ;;  %v901_v33 = vadd.f32 %v848_v52, %v845_v54 }
 0x146   :  { %v855_v32 = vadd.f32 %v854_v57, %v853_v53  ;;  %v868_v45 = vadd.f32 %v867_v28, %v866_v47 }
 0x147   :  { %v881_v37 = vadd.f32 %v880_v42, %v879_v30  ;;  %v892_v25 = vadd.f32 %v891_v51, %v890_v38 }
 0x148   :  { %v857_v61 = vadd.f32 %v856_v23, %v855_v32  ;;  %v870_v35 = vadd.f32 %v869_v39, %v868_v45  ;;  %v912_v23 = vmul.f32 %v901_v33, %v4825_v18  ;;  %v925_v39 = vmul.f32 %v901_v33, %v4827_v19 }
 0x149   :  { %v883_v58 = vadd.f32 %v882_v27, %v881_v37  ;;  %v894_v48 = vadd.f32 %v893_v43, %v892_v25 }
 0x14a   :  { %v3221_v31 = vclamps-f32 %v857_v61, 100000.0  ;;  %v3222_v40 = vclamps-f32 %v870_v35, 100000.0 }
 0x14b   :  { %v3223_v34 = vclamps-f32 %v883_v58, 100000.0  ;;  %v896_v24 = vadd.f32 %v895_v29, %v894_v48  ;;  %v938_v29 = vmul.f32 %v901_v33, %v4829_v20 }
 0x14c   :  { %v860_v46 = vmul.f32 %v3221_v31, %v848_v52  ;;  %v873_v50 = vmul.f32 %v3222_v40, %v848_v52  ;;  %v951_v40 = vmul.f32 %v901_v33, %v4832_v21 }
 0x14d   :  { %v886_v11 = vmul.f32 %v3223_v34, %v848_v52  ;;  %v3224_v26 = vclamps-f32 %v896_v24, 100000.0 }
 0x14e   :  { %v861_v63 = vadd.f32 %v860_v46, %v805_v44  ;;  %v874_v56 = vadd.f32 %v873_v50, %v818_v36 }
 0x14f   :  { %v887_v60 = vadd.f32 %v886_v11, %v831_v59  ;;  %v899_v57 = vmul.f32 %v3224_v26, %v848_v52  ;;  %v904_v11 = vstv %s7077_s21 }
 0x150   :  { %v905_v28 = vmul.f32 %v861_v63, %v4791_v0  ;;  %v906_v62 = vmul.f32 %v874_v56, %v4793_v1  ;;  %v918_v55 = vmul.f32 %v861_v63, %v4799_v4  ;;  %v919_v54 = vmul.f32 %v874_v56, %v4801_v5 }
 0x151   :  { %v900_v53 = vadd.f32 %v899_v57, %v844_v41  ;;  %v908_v44 = vmul.f32 %v887_v60, %v4795_v2  ;;  %v921_v36 = vmul.f32 %v887_v60, %v4803_v6  ;;  %v931_v59 = vmul.f32 %v861_v63, %v4807_v8 }
 0x152   :  { %v907_v47 = vadd.f32 %v906_v62, %v905_v28  ;;  %v920_v42 = vadd.f32 %v919_v54, %v918_v55  ;;  %v932_v38 = vmul.f32 %v874_v56, %v4809_v9  ;;  %v934_v30 = vmul.f32 %v887_v60, %v4811_v10 }
 0x153   :  { %v910_v27 = vmul.f32 %v900_v53, %v4797_v3  ;;  %v923_v51 = vmul.f32 %v900_v53, %v4805_v7  ;;  %v936_v41 = vmul.f32 %v900_v53, %v4813_v12  ;;  %v944_v43 = vmul.f32 %v861_v63, %v4815_v13 }
 0x154   :  { %v909_v32 = vadd.f32 %v908_v44, %v907_v47  ;;  %v922_v45 = vadd.f32 %v921_v36, %v920_v42  ;;  %v933_v37 = vadd.f32 %v932_v38, %v931_v59  ;;  %v945_v25 = vmul.f32 %v874_v56, %v4817_v14 }
 0x155   :  { %v947_v61 = vmul.f32 %v887_v60, %v4819_v15  ;;  %v949_v35 = vmul.f32 %v900_v53, %v4823_v17 }
 0x156   :  { %v911_v52 = vadd.f32 %v910_v27, %v909_v32  ;;  %v924_v58 = vadd.f32 %v923_v51, %v922_v45  ;;  %v935_v48 = vadd.f32 %v934_v30, %v933_v37  ;;  %v946_v31 = vadd.f32 %v945_v25, %v944_v43 }
 0x158   :  { %v913_v34 = vadd.f32 %v912_v23, %v911_v52  ;;  %v926_v24 = vadd.f32 %v925_v39, %v924_v58  ;;  %v937_v46 = vadd.f32 %v936_v41, %v935_v48  ;;  %v948_v50 = vadd.f32 %v947_v61, %v946_v31 }
 0x15a   :  { %v3225_v26 = vclamps-f32 %v913_v34, 100000.0  ;;  %v3226_v57 = vclamps-f32 %v926_v24, 100000.0  ;;  %v939_v28 = vadd.f32 %v938_v29, %v937_v46  ;;  %v950_v62 = vadd.f32 %v949_v35, %v948_v50 }
 0x15c   :  { %v916_v55 = vmul.f32 %v3225_v26, %v904_v11  ;;  %v929_v54 = vmul.f32 %v3226_v57, %v904_v11  ;;  %v3227_v44 = vclamps-f32 %v939_v28, 100000.0  ;;  %v952_v36 = vadd.f32 %v951_v40, %v950_v62 }
 0x15e   :  { %v917_v59 = vadd.f32 %v916_v55, %v861_v63   ;;  %v930_v47 = vadd.f32 %v929_v54, %v874_v56   ;;  %v942_v42 = vmul.f32 %v3227_v44, %v904_v11  ;;  %v3228_v38 = vclamps-f32 %v952_v36, 100000.0 }
 0x15f   :  { %v6993_v63 = vmov %v968_v22 }
 0x160   :  { %v943_v30 = vadd.f32 %v942_v42, %v887_v60   ;;  %v955_v27 = vmul.f32 %v3228_v38, %v904_v11  ;;  %v957_v33 = vsel %vm135_vm0, %v917_v59, 0.0  ;;  %v6996_v43 = vmov %v930_v47 }
 0x161   :  { %v958_v23 = vsel %vm136_vm1, %v930_v47, %v957_v33  ;;  %3052 = sbr.rel (%p3232_p10) target bundleno = 428 (0x1ac), region = 133 }
 0x162   :  { %v956_v39 = vadd.f32 %v955_v27, %v900_v53   ;;  %v959_v51 = vsel %vm137_vm2, %v943_v30, %v958_v23  ;;  %v6995_v60 = vmov %v943_v30  ;;  %v6997_v53 = vmov %v917_v59 }
 0x164   :  { %v960_v41 = vsel %vm138_vm3, %v956_v39, %v959_v51  ;;  %v6994_v56 = vmov %v956_v39 }
 0x165   :  { %961 = vst [vmem:[#allocation13 + $0x2] sm:$0x1] %v960_v41 }
 0x166 LB: > { %v982_v32 = vmul.f32 %v4525_v47, %v4793_v1  ;;  %v981_v45 = vmul.f32 %v4529_v59, %v4791_v0  ;;  %v984_v37 = vmul.f32 %v4521_v30, %v4795_v2  ;;  %v994_v25 = vmul.f32 %v4529_v59, %v4799_v4  ;;  %s973_s9 = sadd.s32 1, %s4533_s9   ;;  %s4533_s9 = sphi %s5484_s9, %s973_s9   ;;  %v4529_v59 = vphi %v917_v59, %v7002_v59   ;;  %v4525_v47 = vphi %v930_v47, %v7001_v47   ;;  %v4521_v30 = vphi %v943_v30, %v7000_v30   ;;  %v4517_v39 = vphi %v956_v39, %v6999_v39   ;;  %v4513_v22 = vphi %v968_v22, %v6998_v22  }
 0x167   : > { %v986_v29 = vmul.f32 %v4517_v39, %v4797_v3  ;;  %v988_v61 = vmul.f32 %v4513_v22, %v4825_v18  ;;  %v995_v35 = vmul.f32 %v4525_v47, %v4801_v5  ;;  %v997_v52 = vmul.f32 %v4521_v30, %v4803_v6  ;;  %p972_p11 = scmp.ge.s32.totalorder %s973_s9, %s5399_s7 }
 0x168   : > { %v983_v58 = vadd.f32 %v982_v32, %v981_v45  ;;  %v1007_v48 = vmul.f32 %v4529_v59, %v4807_v8  ;;  %v1008_v31 = vmul.f32 %v4525_v47, %v4809_v9  ;;  %v1010_v40 = vmul.f32 %v4521_v30, %v4811_v10 }
 0x169   : > { %v996_v34 = vadd.f32 %v995_v35, %v994_v25  ;;  %v999_v24 = vmul.f32 %v4517_v39, %v4805_v7  ;;  %v1012_v46 = vmul.f32 %v4517_v39, %v4813_v12  ;;  %v1020_v50 = vmul.f32 %v4529_v59, %v4815_v13 }
 0x16a   : > { %v985_v11 = vadd.f32 %v984_v37, %v983_v58  ;;  %v1009_v26 = vadd.f32 %v1008_v31, %v1007_v48  ;;  %v1021_v57 = vmul.f32 %v4525_v47, %v4817_v14  ;;  %v1023_v28 = vmul.f32 %v4521_v30, %v4819_v15 }
 0x16b   : > { %v998_v62 = vadd.f32 %v997_v52, %v996_v34  ;;  %v1001_v55 = vmul.f32 %v4513_v22, %v4827_v19  ;;  %v1014_v54 = vmul.f32 %v4513_v22, %v4829_v20  ;;  %v1025_v38 = vmul.f32 %v4517_v39, %v4823_v17 }
 0x16c   : > { %v987_v44 = vadd.f32 %v986_v29, %v985_v11  ;;  %v1011_v36 = vadd.f32 %v1010_v40, %v1009_v26  ;;  %v1022_v42 = vadd.f32 %v1021_v57, %v1020_v50  ;;  %v1027_v41 = vmul.f32 %v4513_v22, %v4832_v21 }
 0x16d   : > { %v1000_v27 = vadd.f32 %v999_v24, %v998_v62  ;;  %v1033_v53 = vadd.f32 %v4513_v22, %v5392_v49 }
 0x16e   : > { %v989_v33 = vadd.f32 %v988_v61, %v987_v44  ;;  %v1013_v23 = vadd.f32 %v1012_v46, %v1011_v36  ;;  %v1024_v51 = vadd.f32 %v1023_v28, %v1022_v42 }
 0x16f   : > { %v1002_v63 = vadd.f32 %v1001_v55, %v1000_v27  ;;  %v5524_v35 = vadd.f32 %v1033_v53, %v5392_v49  ;;  %v1041_v48 = vmul.f32 %v1033_v53, %v4825_v18  ;;  %v1054_v40 = vmul.f32 %v1033_v53, %v4827_v19 }
 0x170   : > { %v3233_v56 = vclamps-f32 %v989_v33, 100000.0  ;;  %v1015_v60 = vadd.f32 %v1014_v54, %v1013_v23  ;;  %v1026_v43 = vadd.f32 %v1025_v38, %v1024_v51  ;;  %v1067_v22 = vmul.f32 %v1033_v53, %v4829_v20 }
 0x171   : > { %v3234_v32 = vclamps-f32 %v1002_v63, 100000.0  ;;  %v5532_v34 = vadd.f32 %v5524_v35, %v5392_v49 }
 0x172   : > { %v992_v45 = vmul.f32 %v3233_v56, %v5392_v49  ;;  %v3235_v37 = vclamps-f32 %v1015_v60, 100000.0  ;;  %v1028_v25 = vadd.f32 %v1027_v41, %v1026_v43 }
 0x173   : > { %v1005_v29 = vmul.f32 %v3234_v32, %v5392_v49  ;;  %v5554_v43 = vadd.f32 %v5532_v34, %v5392_v49  }
 0x174   : > { %v993_v61 = vadd.f32 %v4529_v59, %v992_v45  ;;  %v1018_v52 = vmul.f32 %v3235_v37, %v5392_v49  ;;  %v3236_v58 = vclamps-f32 %v1028_v25, 100000.0 }
 0x175   : > { %v1006_v31 = vadd.f32 %v4525_v47, %v1005_v29  ;;  %v1080_v29 = vmul.f32 %v1033_v53, %v4832_v21 }
 0x176   : > { %v1019_v24 = vadd.f32 %v4521_v30, %v1018_v52  ;;  %v1031_v46 = vmul.f32 %v3236_v58, %v5392_v49  ;;  %v1034_v50 = vmul.f32 %v993_v61, %v4791_v0  ;;  %v1047_v59 = vmul.f32 %v993_v61, %v4799_v4 }
 0x177   : > { %v1035_v11 = vmul.f32 %v1006_v31, %v4793_v1  ;;  %v1048_v26 = vmul.f32 %v1006_v31, %v4801_v5  ;;  %v1060_v47 = vmul.f32 %v993_v61, %v4807_v8  ;;  %v1061_v57 = vmul.f32 %v1006_v31, %v4809_v9 }
 0x178   : > { %v1032_v28 = vadd.f32 %v4517_v39, %v1031_v46  ;;  %v1037_v62 = vmul.f32 %v1019_v24, %v4795_v2  ;;  %v1050_v30 = vmul.f32 %v1019_v24, %v4803_v6  ;;  %v1063_v55 = vmul.f32 %v1019_v24, %v4811_v10 }
 0x179   : > { %v1036_v54 = vadd.f32 %v1035_v11, %v1034_v50  ;;  %v1049_v44 = vadd.f32 %v1048_v26, %v1047_v59  ;;  %v1062_v36 = vadd.f32 %v1061_v57, %v1060_v47  ;;  %v1073_v42 = vmul.f32 %v993_v61, %v4815_v13 }
 0x17a   : > { %v1039_v38 = vmul.f32 %v1032_v28, %v4797_v3  ;;  %v1052_v27 = vmul.f32 %v1032_v28, %v4805_v7  ;;  %v1065_v33 = vmul.f32 %v1032_v28, %v4813_v12  ;;  %v1074_v23 = vmul.f32 %v1006_v31, %v4817_v14 }
 0x17b   : > { %v1038_v39 = vadd.f32 %v1037_v62, %v1036_v54  ;;  %v1051_v51 = vadd.f32 %v1050_v30, %v1049_v44  ;;  %v1064_v41 = vadd.f32 %v1063_v55, %v1062_v36  ;;  %v1076_v63 = vmul.f32 %v1019_v24, %v4819_v15 }
 0x17c   : > { %v1075_v56 = vadd.f32 %v1074_v23, %v1073_v42  ;;  %v1078_v60 = vmul.f32 %v1032_v28, %v4823_v17 }
 0x17d   : > { %v1040_v32 = vadd.f32 %v1039_v38, %v1038_v39  ;;  %v1053_v45 = vadd.f32 %v1052_v27, %v1051_v51  ;;  %v1066_v37 = vadd.f32 %v1065_v33, %v1064_v41 }
 0x17e   : > { %v1077_v25 = vadd.f32 %v1076_v63, %v1075_v56 }
 0x17f   : > { %v1042_v52 = vadd.f32 %v1041_v48, %v1040_v32  ;;  %v1055_v58 = vadd.f32 %v1054_v40, %v1053_v45  ;;  %v1068_v46 = vadd.f32 %v1067_v22, %v1066_v37  ;;  %v1094_v48 = vmul.f32 %v5524_v35, %v4825_v18 }
 0x180   : > { %v1079_v50 = vadd.f32 %v1078_v60, %v1077_v25 }
 0x181   : > { %v3237_v59 = vclamps-f32 %v1042_v52, 100000.0  ;;  %v3238_v11 = vclamps-f32 %v1055_v58, 100000.0  ;;  %v3239_v26 = vclamps-f32 %v1068_v46, 100000.0  ;;  %v1120_v52 = vmul.f32 %v5524_v35, %v4829_v20 }
 0x182   : > { %v1081_v47 = vadd.f32 %v1080_v29, %v1079_v50  ;;  %v1107_v29 = vmul.f32 %v5524_v35, %v4827_v19 }
 0x183   : > { %v1045_v57 = vmul.f32 %v3237_v59, %v5392_v49  ;;  %v1058_v62 = vmul.f32 %v3238_v11, %v5392_v49  ;;  %v1071_v30 = vmul.f32 %v3239_v26, %v5392_v49 }
 0x184   : > { %v3240_v55 = vclamps-f32 %v1081_v47, 100000.0 }
 0x185   : > { %v1046_v54 = vadd.f32 %v1045_v57, %v993_v61  ;;  %v1059_v44 = vadd.f32 %v1058_v62, %v1006_v31  ;;  %v1072_v36 = vadd.f32 %v1071_v30, %v1019_v24  ;;  %v1133_v62 = vmul.f32 %v5524_v35, %v4832_v21 }
 0x186   : > { %v1084_v53 = vmul.f32 %v3240_v55, %v5392_v49  ;;  %v1160_v35 = vmul.f32 %v5532_v34, %v4827_v19 }
 0x187   : > { %v1087_v40 = vmul.f32 %v1046_v54, %v4791_v0  ;;  %v1088_v22 = vmul.f32 %v1059_v44, %v4793_v1  ;;  %v1090_v42 = vmul.f32 %v1072_v36, %v4795_v2  ;;  %v1100_v38 = vmul.f32 %v1046_v54, %v4799_v4 }
 0x188   : > { %v1085_v27 = vadd.f32 %v1084_v53, %v1032_v28  ;;  %v1101_v33 = vmul.f32 %v1059_v44, %v4801_v5  ;;  %v1103_v61 = vmul.f32 %v1072_v36, %v4803_v6  ;;  %v1113_v31 = vmul.f32 %v1046_v54, %v4807_v8 }
 0x189   : > { %v1089_v24 = vadd.f32 %v1088_v22, %v1087_v40  ;;  %v1114_v23 = vmul.f32 %v1059_v44, %v4809_v9  ;;  %v1116_v39 = vmul.f32 %v1072_v36, %v4811_v10  ;;  %v1126_v51 = vmul.f32 %v1046_v54, %v4815_v13 }
 0x18a   : > { %v1092_v41 = vmul.f32 %v1085_v27, %v4797_v3  ;;  %v1102_v63 = vadd.f32 %v1101_v33, %v1100_v38  ;;  %v1105_v56 = vmul.f32 %v1085_v27, %v4805_v7  ;;  %v1118_v28 = vmul.f32 %v1085_v27, %v4813_v12 }
 0x18b   : > { %v1091_v60 = vadd.f32 %v1090_v42, %v1089_v24  ;;  %v1115_v32 = vadd.f32 %v1114_v23, %v1113_v31  ;;  %v1127_v45 = vmul.f32 %v1059_v44, %v4817_v14  ;;  %v1129_v37 = vmul.f32 %v1072_v36, %v4819_v15 }
 0x18c   : > { %v1104_v25 = vadd.f32 %v1103_v61, %v1102_v63  ;;  %v1131_v59 = vmul.f32 %v1085_v27, %v4823_v17 }
 0x18d   : > { %v1093_v58 = vadd.f32 %v1092_v41, %v1091_v60  ;;  %v1117_v46 = vadd.f32 %v1116_v39, %v1115_v32  ;;  %v1128_v50 = vadd.f32 %v1127_v45, %v1126_v51  ;;  %v1147_v39 = vmul.f32 %v5532_v34, %v4825_v18 }
 0x18e   : > { %v1106_v11 = vadd.f32 %v1105_v56, %v1104_v25  ;;  %v1173_v51 = vmul.f32 %v5532_v34, %v4829_v20 }
 0x18f   : > { %v1095_v26 = vadd.f32 %v1094_v48, %v1093_v58  ;;  %v1119_v47 = vadd.f32 %v1118_v28, %v1117_v46  ;;  %v1130_v57 = vadd.f32 %v1129_v37, %v1128_v50 }
 0x190   : > { %v1108_v30 = vadd.f32 %v1107_v29, %v1106_v11 }
 0x191   : > { %v3241_v55 = vclamps-f32 %v1095_v26, 100000.0  ;;  %v1121_v53 = vadd.f32 %v1120_v52, %v1119_v47  ;;  %v1132_v40 = vadd.f32 %v1131_v59, %v1130_v57 }
 0x192   : > { %v3242_v22 = vclamps-f32 %v1108_v30, 100000.0 }
 0x193   : > { %v1098_v42 = vmul.f32 %v3241_v55, %v5392_v49  ;;  %v3243_v38 = vclamps-f32 %v1121_v53, 100000.0  ;;  %v1134_v33 = vadd.f32 %v1133_v62, %v1132_v40 }
 0x194   : > { %v1111_v61 = vmul.f32 %v3242_v22, %v5392_v49 }
 0x195   : > { %v1099_v31 = vadd.f32 %v1098_v42, %v1046_v54  ;;  %v1124_v24 = vmul.f32 %v3243_v38, %v5392_v49  ;;  %v3244_v48 = vclamps-f32 %v1134_v33, 100000.0  ;;  %v1186_v38 = vmul.f32 %v5532_v34, %v4832_v21 }
 0x196   : > { %v1112_v23 = vadd.f32 %v1111_v61, %v1059_v44 }
 0x197   : > { %v1125_v41 = vadd.f32 %v1124_v24, %v1072_v36  ;;  %v1137_v63 = vmul.f32 %v3244_v48, %v5392_v49  ;;  %v1140_v56 = vmul.f32 %v1099_v31, %v4791_v0  ;;  %v1153_v54 = vmul.f32 %v1099_v31, %v4799_v4 }
 0x198   : > { %v1141_v28 = vmul.f32 %v1112_v23, %v4793_v1  ;;  %v1154_v44 = vmul.f32 %v1112_v23, %v4801_v5  ;;  %v1166_v60 = vmul.f32 %v1099_v31, %v4807_v8  ;;  %v1167_v32 = vmul.f32 %v1112_v23, %v4809_v9 }
 0x199   : > { %v1138_v45 = vadd.f32 %v1137_v63, %v1085_v27  ;;  %v1143_v37 = vmul.f32 %v1125_v41, %v4795_v2  ;;  %v1156_v25 = vmul.f32 %v1125_v41, %v4803_v6  ;;  %v1169_v36 = vmul.f32 %v1125_v41, %v4811_v10 }
 0x19a   : > { %v1142_v29 = vadd.f32 %v1141_v28, %v1140_v56  ;;  %v1155_v52 = vadd.f32 %v1154_v44, %v1153_v54  ;;  %v1168_v58 = vadd.f32 %v1167_v32, %v1166_v60  ;;  %v1179_v46 = vmul.f32 %v1099_v31, %v4815_v13 }
 0x19b   : > { %v1145_v50 = vmul.f32 %v1138_v45, %v4797_v3  ;;  %v1158_v59 = vmul.f32 %v1138_v45, %v4805_v7  ;;  %v1171_v11 = vmul.f32 %v1138_v45, %v4813_v12  ;;  %v1180_v26 = vmul.f32 %v1112_v23, %v4817_v14 }
 0x19c   : > { %v1144_v27 = vadd.f32 %v1143_v37, %v1142_v29  ;;  %v1157_v47 = vadd.f32 %v1156_v25, %v1155_v52  ;;  %v1170_v57 = vadd.f32 %v1169_v36, %v1168_v58  ;;  %v1182_v62 = vmul.f32 %v1125_v41, %v4819_v15 }
 0x19d   : > { %v1181_v30 = vadd.f32 %v1180_v26, %v1179_v46  ;;  %v1184_v55 = vmul.f32 %v1138_v45, %v4823_v17 }
 0x19e   : > { %v1146_v53 = vadd.f32 %v1145_v50, %v1144_v27  ;;  %v1159_v40 = vadd.f32 %v1158_v59, %v1157_v47  ;;  %v1172_v22 = vadd.f32 %v1171_v11, %v1170_v57 }
 0x19f   : > { %v1183_v42 = vadd.f32 %v1182_v62, %v1181_v30 }
 0x1a0   : > { %v1148_v33 = vadd.f32 %v1147_v39, %v1146_v53  ;;  %v1161_v61 = vadd.f32 %v1160_v35, %v1159_v40  ;;  %v1174_v24 = vadd.f32 %v1173_v51, %v1172_v22  ;;  %v6998_v22 = vmov %v5554_v43 }
 0x1a1   : > { %v1185_v48 = vadd.f32 %v1184_v55, %v1183_v42 }
 0x1a2   : > { %v3245_v63 = vclamps-f32 %v1148_v33, 100000.0  ;;  %v3246_v56 = vclamps-f32 %v1161_v61, 100000.0  ;;  %v3247_v54 = vclamps-f32 %v1174_v24, 100000.0 }
 0x1a3   : > { %v1187_v28 = vadd.f32 %v1186_v38, %v1185_v48 }
 0x1a4   : > { %v1151_v44 = vmul.f32 %v3245_v63, %v5392_v49  ;;  %v1164_v60 = vmul.f32 %v3246_v56, %v5392_v49  ;;  %v1177_v32 = vmul.f32 %v3247_v54, %v5392_v49  ;;  %v7003_v63 = vmov (%p972_p11), %v5554_v43 }
 0x1a5   : > { %v3248_v37 = vclamps-f32 %v1187_v28, 100000.0 }
 0x1a6   : > { %v1152_v25 = vadd.f32 %v1151_v44, %v1099_v31   ;;  %v1165_v36 = vadd.f32 %v1164_v60, %v1112_v23   ;;  %v1178_v29 = vadd.f32 %v1177_v32, %v1125_v41  }
 0x1a7   : > { %v1190_v34 = vmul.f32 %v3248_v37, %v5392_v49  ;;  %975 = sbr.rel (!%p972_p11) target bundleno = 358 (0x166), region = 139 }
 0x1a8   : > { %v7000_v30 = vmov %v1178_v29  ;;  %v7001_v47 = vmov %v1165_v36  ;;  %v7002_v59 = vmov %v1152_v25  ;;  %v7005_v60 = vmov (%p972_p11), %v1178_v29 }
 0x1a9   : > { %v1191_v52 = vadd.f32 %v1190_v34, %v1138_v45   ;;  %v7006_v43 = vmov (%p972_p11), %v1165_v36  ;;  %v7007_v53 = vmov (%p972_p11), %v1152_v25 }
 0x1ab   : > { %v6999_v39 = vmov %v1191_v52  ;;  %v7004_v56 = vmov (%p972_p11), %v1191_v52 }
 0x1ac PF:  { %s3249_s10 = sshll.u32 %s5399_s7, 2  ;;  %v1198_v49 = vmul.f32 %v4553_v53, %v4791_v0  ;;  %v1199_v31 = vmul.f32 %v4549_v43, %v4793_v1  ;;  %v1201_v23 = vmul.f32 %v4545_v60, %v4795_v2  ;;  %s5657_s11 = sld [smem:[#allocation7 + $0x3]]  ;;  %v1211_v39 = vmul.f32 %v4553_v53, %v4799_v4  ;;  %v4553_v53 = vphi %v6997_v53, %v7007_v53   ;;  %v4549_v43 = vphi %v6996_v43, %v7006_v43   ;;  %v4545_v60 = vphi %v6995_v60, %v7005_v60   ;;  %v4541_v56 = vphi %v6994_v56, %v7004_v56   ;;  %v4537_v63 = vphi %v6993_v63, %v7003_v63  }
 0x1ad   :  { %s5660_s12 = ssub.s32 %s7075_s28, %s3249_s10  ;;  %v1212_v35 = vmul.f32 %v4549_v43, %v4801_v5  ;;  %v1214_v51 = vmul.f32 %v4545_v60, %v4803_v6  ;;  %s5666_s13 = sld [smem:[#allocation6 + $0x3]]  ;;  %v1203_v45 = vmul.f32 %v4541_v56, %v4797_v3  ;;  %v1205_v58 = vmul.f32 %v4537_v63, %v4825_v18 }
 0x1ae   :  { %p1195_p12 = scmp.gt.s32.totalorder %s5660_s12, 0  ;;  %v1200_v41 = vadd.f32 %v1199_v31, %v1198_v49  ;;  %v1224_v46 = vmul.f32 %v4553_v53, %v4807_v8  ;;  %v1216_v59 = vmul.f32 %v4541_v56, %v4805_v7  ;;  %v1225_v11 = vmul.f32 %v4549_v43, %v4809_v9  ;;  %s5678_s14 = sld [smem:[#allocation2 + $0x3]] }
 0x1af   :  { %v1213_v50 = vadd.f32 %v1212_v35, %v1211_v39  ;;  %v1227_v26 = vmul.f32 %v4545_v60, %v4811_v10  ;;  %v1218_v47 = vmul.f32 %v4537_v63, %v4827_v19  ;;  %v1237_v57 = vmul.f32 %v4553_v53, %v4815_v13  ;;  %p1251_p0 = scmp.gt.s32.totalorder %s5660_s12, 1  ;;  %p1307_p1 = scmp.gt.s32.totalorder %s5660_s12, 2 }
 0x1b0   :  { %v1202_v27 = vadd.f32 %v1201_v23, %v1200_v41  ;;  %v1238_v62 = vmul.f32 %v4549_v43, %v4817_v14  ;;  %s1196_s15 = scalar_select %p1195_p12, %s5362_s2, 0.0  ;;  %v1226_v55 = vadd.f32 %v1225_v11, %v1224_v46  ;;  %v1229_v40 = vmul.f32 %v4541_v56, %v4813_v12 }
 0x1b1   :  { %v1215_v30 = vadd.f32 %v1214_v51, %v1213_v50  ;;  %v1240_v22 = vmul.f32 %v4545_v60, %v4819_v15  ;;  %v1242_v33 = vmul.f32 %v4541_v56, %v4823_v17  ;;  %v1231_v48 = vmul.f32 %v4537_v63, %v4829_v20  ;;  %s1252_s16 = scalar_select %p1251_p0, %s5362_s2, 0.0 }
 0x1b2   :  { %v1204_v42 = vadd.f32 %v1203_v45, %v1202_v27  ;;  %v1239_v38 = vadd.f32 %v1238_v62, %v1237_v57  ;;  %v1228_v24 = vadd.f32 %v1227_v26, %v1226_v55  ;;  %p1368_p13 = scmp.gt.s32.totalorder %s5657_s11, 0  ;;  %v1244_v44 = vmul.f32 %v4537_v63, %v4832_v21  ;;  %s7081_s2 = smov (!%p1307_p1, %s5362_s2), 0.0 }
 0x1b3   :  { %v1217_v61 = vadd.f32 %v1216_v59, %v1215_v30  ;;  %v5696_v32 = vstv %s5666_s13  ;;  %v1197_v37 = vstv %s1196_s15 }
 0x1b4   :  { %v1206_v54 = vadd.f32 %v1205_v58, %v1204_v42  ;;  %v1241_v28 = vadd.f32 %v1240_v22, %v1239_v38  ;;  %v1230_v36 = vadd.f32 %v1229_v40, %v1228_v24  ;;  %s7079_s11 = smov (!%p1368_p13, %s5657_s11), 0  ;;  %v1250_v31 = vadd.f32 %v4537_v63, %v1197_v37 }
 0x1b5   :  { %v1219_v25 = vadd.f32 %v1218_v47, %v1217_v61  ;;  %v1373_v23 = vstv %s5678_s14   ;;  %s5703_s1 = sshrl.u32 %s7079_s11, 2 }
 0x1b6   :  { %v3250_v29 = vclamps-f32 %v1206_v54, 100000.0  ;;  %v1243_v34 = vadd.f32 %v1242_v33, %v1241_v28  ;;  %v1232_v49 = vadd.f32 %v1231_v48, %v1230_v36  ;;  %v1261_v59 = vmul.f32 %v1250_v31, %v4825_v18  ;;  %p3265_p2 = scmp.le.s32.totalorder %s5703_s1, 0 }
 0x1b7   :  { %v3251_v52 = vclamps-f32 %v1219_v25, 100000.0  ;;  %v1274_v30 = vmul.f32 %v1250_v31, %v4827_v19  ;;  %v1287_v25 = vmul.f32 %v1250_v31, %v4829_v20  ;;  %s5788_s17 = smov (!%p3265_p2), 0  }
 0x1b8   :  { %v1209_v39 = vmul.f32 %v3250_v29, %v1197_v37  ;;  %v1245_v35 = vadd.f32 %v1244_v44, %v1243_v34  ;;  %v3252_v41 = vclamps-f32 %v1232_v49, 100000.0 }
 0x1b9   :  { %v1222_v51 = vmul.f32 %v3251_v52, %v1197_v37 }
 0x1ba   :  { %v1210_v45 = vadd.f32 %v4553_v53, %v1209_v39  ;;  %v3253_v58 = vclamps-f32 %v1245_v35, 100000.0  ;;  %v1235_v50 = vmul.f32 %v3252_v41, %v1197_v37  ;;  %v1300_v35 = vmul.f32 %v1250_v31, %v4832_v21 }
 0x1bb   :  { %v1223_v46 = vadd.f32 %v4549_v43, %v1222_v51 }
 0x1bc   :  { %v1248_v11 = vmul.f32 %v3253_v58, %v1197_v37  ;;  %v1254_v26 = vmul.f32 %v1210_v45, %v4791_v0  ;;  %v1267_v27 = vmul.f32 %v1210_v45, %v4799_v4  ;;  %v1280_v63 = vmul.f32 %v1210_v45, %v4807_v8 }
 0x1bd   :  { %v1236_v47 = vadd.f32 %v4545_v60, %v1235_v50  ;;  %v1255_v57 = vmul.f32 %v1223_v46, %v4793_v1  ;;  %v1268_v62 = vmul.f32 %v1223_v46, %v4801_v5  ;;  %v1281_v53 = vmul.f32 %v1223_v46, %v4809_v9 }
 0x1be   :  { %v1249_v43 = vadd.f32 %v4541_v56, %v1248_v11  ;;  %v1293_v55 = vmul.f32 %v1210_v45, %v4815_v13  ;;  %v1294_v40 = vmul.f32 %v1223_v46, %v4817_v14  ;;  %v1253_v58 = vstv %s1252_s16 }
 0x1bf   :  { %v1256_v22 = vadd.f32 %v1255_v57, %v1254_v26  ;;  %v1257_v60 = vmul.f32 %v1236_v47, %v4795_v2  ;;  %v1269_v42 = vadd.f32 %v1268_v62, %v1267_v27  ;;  %v1270_v38 = vmul.f32 %v1236_v47, %v4803_v6 }
 0x1c0   :  { %v1259_v33 = vmul.f32 %v1249_v43, %v4797_v3  ;;  %v1272_v61 = vmul.f32 %v1249_v43, %v4805_v7  ;;  %v1282_v56 = vadd.f32 %v1281_v53, %v1280_v63  ;;  %v1283_v24 = vmul.f32 %v1236_v47, %v4811_v10 }
 0x1c1   :  { %v1258_v48 = vadd.f32 %v1257_v60, %v1256_v22  ;;  %v1271_v54 = vadd.f32 %v1270_v38, %v1269_v42  ;;  %v1285_v28 = vmul.f32 %v1249_v43, %v4813_v12  ;;  %v1295_v44 = vadd.f32 %v1294_v40, %v1293_v55 }
 0x1c2   :  { %v1284_v37 = vadd.f32 %v1283_v24, %v1282_v56  ;;  %v1296_v36 = vmul.f32 %v1236_v47, %v4819_v15  ;;  %v1298_v29 = vmul.f32 %v1249_v43, %v4823_v17  ;;  %v1306_v62 = vadd.f32 %v1253_v58, %v1250_v31 }
 0x1c3   :  { %v1260_v34 = vadd.f32 %v1259_v33, %v1258_v48  ;;  %v1273_v52 = vadd.f32 %v1272_v61, %v1271_v54 }
 0x1c4   :  { %v1286_v49 = vadd.f32 %v1285_v28, %v1284_v37  ;;  %v1297_v39 = vadd.f32 %v1296_v36, %v1295_v44 }
 0x1c5   :  { %v1262_v51 = vadd.f32 %v1261_v59, %v1260_v34  ;;  %v1275_v41 = vadd.f32 %v1274_v30, %v1273_v52  ;;  %v1317_v59 = vmul.f32 %v1306_v62, %v4825_v18  ;;  %v1330_v30 = vmul.f32 %v1306_v62, %v4827_v19 }
 0x1c6   :  { %v1288_v50 = vadd.f32 %v1287_v25, %v1286_v49  ;;  %v1299_v11 = vadd.f32 %v1298_v29, %v1297_v39 }
 0x1c7   :  { %v3254_v26 = vclamps-f32 %v1262_v51, 100000.0  ;;  %v3255_v27 = vclamps-f32 %v1275_v41, 100000.0 }
 0x1c8   :  { %v3256_v63 = vclamps-f32 %v1288_v50, 100000.0  ;;  %v1301_v57 = vadd.f32 %v1300_v35, %v1299_v11  ;;  %v1343_v35 = vmul.f32 %v1306_v62, %v4829_v20 }
 0x1c9   :  { %v1265_v53 = vmul.f32 %v3254_v26, %v1253_v58  ;;  %v1278_v55 = vmul.f32 %v3255_v27, %v1253_v58  ;;  %v1356_v27 = vmul.f32 %v1306_v62, %v4832_v21 }
 0x1ca   :  { %v1291_v40 = vmul.f32 %v3256_v63, %v1253_v58  ;;  %v3257_v22 = vclamps-f32 %v1301_v57, 100000.0 }
 0x1cb   :  { %v1266_v60 = vadd.f32 %v1265_v53, %v1210_v45  ;;  %v1279_v42 = vadd.f32 %v1278_v55, %v1223_v46 }
 0x1cc   :  { %v1292_v38 = vadd.f32 %v1291_v40, %v1236_v47  ;;  %v1304_v33 = vmul.f32 %v3257_v22, %v1253_v58  ;;  %v1309_v40 = vstv %s7081_s2 }
 0x1cd   :  { %v1310_v61 = vmul.f32 %v1266_v60, %v4791_v0  ;;  %v1311_v56 = vmul.f32 %v1279_v42, %v4793_v1  ;;  %v1323_v24 = vmul.f32 %v1266_v60, %v4799_v4  ;;  %v1324_v31 = vmul.f32 %v1279_v42, %v4801_v5 }
 0x1ce   :  { %v1305_v48 = vadd.f32 %v1304_v33, %v1249_v43  ;;  %v1313_v45 = vmul.f32 %v1292_v38, %v4795_v2  ;;  %v1326_v46 = vmul.f32 %v1292_v38, %v4803_v6  ;;  %v1336_v47 = vmul.f32 %v1266_v60, %v4807_v8 }
 0x1cf   :  { %v1312_v54 = vadd.f32 %v1311_v56, %v1310_v61  ;;  %v1325_v28 = vadd.f32 %v1324_v31, %v1323_v24  ;;  %v1337_v44 = vmul.f32 %v1279_v42, %v4809_v9  ;;  %v1339_v37 = vmul.f32 %v1292_v38, %v4811_v10 }
 0x1d0   :  { %v1315_v25 = vmul.f32 %v1305_v48, %v4797_v3  ;;  %v1328_v36 = vmul.f32 %v1305_v48, %v4805_v7  ;;  %v1341_v43 = vmul.f32 %v1305_v48, %v4813_v12  ;;  %v1349_v29 = vmul.f32 %v1266_v60, %v4815_v13 }
 0x1d1   :  { %v1314_v34 = vadd.f32 %v1313_v45, %v1312_v54  ;;  %v1327_v52 = vadd.f32 %v1326_v46, %v1325_v28  ;;  %v1338_v49 = vadd.f32 %v1337_v44, %v1336_v47  ;;  %v1350_v39 = vmul.f32 %v1279_v42, %v4817_v14 }
 0x1d2   :  { %v1352_v51 = vmul.f32 %v1292_v38, %v4819_v15  ;;  %v1354_v41 = vmul.f32 %v1305_v48, %v4823_v17 }
 0x1d3   :  { %v1316_v58 = vadd.f32 %v1315_v25, %v1314_v34  ;;  %v1329_v50 = vadd.f32 %v1328_v36, %v1327_v52  ;;  %v1340_v11 = vadd.f32 %v1339_v37, %v1338_v49  ;;  %v1351_v26 = vadd.f32 %v1350_v39, %v1349_v29 }
 0x1d5   :  { %v1318_v63 = vadd.f32 %v1317_v59, %v1316_v58  ;;  %v1331_v57 = vadd.f32 %v1330_v30, %v1329_v50  ;;  %v1342_v53 = vadd.f32 %v1341_v43, %v1340_v11  ;;  %v1353_v55 = vadd.f32 %v1352_v51, %v1351_v26 }
 0x1d7   :  { %v3258_v22 = vclamps-f32 %v1318_v63, 100000.0  ;;  %v3259_v33 = vclamps-f32 %v1331_v57, 100000.0  ;;  %v1344_v61 = vadd.f32 %v1343_v35, %v1342_v53  ;;  %v1355_v56 = vadd.f32 %v1354_v41, %v1353_v55 }
 0x1d9   :  { %v1321_v24 = vmul.f32 %v3258_v22, %v1309_v40  ;;  %v1334_v31 = vmul.f32 %v3259_v33, %v1309_v40  ;;  %v3260_v45 = vclamps-f32 %v1344_v61, 100000.0  ;;  %v1357_v46 = vadd.f32 %v1356_v27, %v1355_v56 }
 0x1db   :  { %v1322_v47 = vadd.f32 %v1321_v24, %v1266_v60   ;;  %v1335_v54 = vadd.f32 %v1334_v31, %v1279_v42   ;;  %v1347_v28 = vmul.f32 %v3260_v45, %v1309_v40  ;;  %v3261_v44 = vclamps-f32 %v1357_v46, 100000.0 }
 0x1dc   :  { %v7008_v60 = vmov %v1373_v23 }
 0x1dd   :  { %v1348_v37 = vadd.f32 %v1347_v28, %v1292_v38   ;;  %v1360_v25 = vmul.f32 %v3261_v44, %v1309_v40  ;;  %v1362_v62 = vsel %vm135_vm0, %v1322_v47, 0.0  ;;  %v7011_v29 = vmov %v1335_v54 }
 0x1de   :  { %v1363_v59 = vsel %vm136_vm1, %v1335_v54, %v1362_v62  ;;  %3072 = sbr.rel (%p3265_p2) target bundleno = 553 (0x229), region = 144 }
 0x1df   :  { %v1361_v30 = vadd.f32 %v1360_v25, %v1305_v48   ;;  %v1364_v36 = vsel %vm137_vm2, %v1348_v37, %v1363_v59  ;;  %v7010_v38 = vmov %v1348_v37  ;;  %v7012_v48 = vmov %v1322_v47 }
 0x1e1   :  { %v1365_v43 = vsel %vm138_vm3, %v1361_v30, %v1364_v36  ;;  %v7009_v42 = vmov %v1361_v30 }
 0x1e2   :  { %1366 = vst [vmem:[#allocation13 + $0x3] sm:$0x1] %v1365_v43 }
 0x1e3 LB: > { %v1387_v34 = vmul.f32 %v4569_v54, %v4793_v1  ;;  %v1386_v52 = vmul.f32 %v4573_v47, %v4791_v0  ;;  %v1389_v49 = vmul.f32 %v4565_v37, %v4795_v2  ;;  %v1399_v39 = vmul.f32 %v4573_v47, %v4799_v4  ;;  %s1378_s17 = sadd.s32 1, %s4577_s17   ;;  %s4577_s17 = sphi %s5788_s17, %s1378_s17   ;;  %v4573_v47 = vphi %v1322_v47, %v7017_v47   ;;  %v4569_v54 = vphi %v1335_v54, %v7016_v54   ;;  %v4565_v37 = vphi %v1348_v37, %v7015_v37   ;;  %v4561_v30 = vphi %v1361_v30, %v7014_v30   ;;  %v4557_v23 = vphi %v1373_v23, %v7013_v23  }
 0x1e4   : > { %v1391_v35 = vmul.f32 %v4561_v30, %v4797_v3  ;;  %v1393_v51 = vmul.f32 %v4557_v23, %v4825_v18  ;;  %v1400_v41 = vmul.f32 %v4569_v54, %v4801_v5  ;;  %v1402_v58 = vmul.f32 %v4565_v37, %v4803_v6  ;;  %p1377_p3 = scmp.ge.s32.totalorder %s1378_s17, %s5703_s1 }
 0x1e5   : > { %v1388_v50 = vadd.f32 %v1387_v34, %v1386_v52  ;;  %v1412_v11 = vmul.f32 %v4573_v47, %v4807_v8  ;;  %v1413_v26 = vmul.f32 %v4569_v54, %v4809_v9  ;;  %v1415_v27 = vmul.f32 %v4565_v37, %v4811_v10 }
 0x1e6   : > { %v1401_v63 = vadd.f32 %v1400_v41, %v1399_v39  ;;  %v1404_v57 = vmul.f32 %v4561_v30, %v4805_v7  ;;  %v1417_v53 = vmul.f32 %v4561_v30, %v4813_v12  ;;  %v1425_v55 = vmul.f32 %v4573_v47, %v4815_v13 }
 0x1e7   : > { %v1390_v40 = vadd.f32 %v1389_v49, %v1388_v50  ;;  %v1414_v22 = vadd.f32 %v1413_v26, %v1412_v11  ;;  %v1426_v33 = vmul.f32 %v4569_v54, %v4817_v14  ;;  %v1428_v61 = vmul.f32 %v4565_v37, %v4819_v15 }
 0x1e8   : > { %v1403_v56 = vadd.f32 %v1402_v58, %v1401_v63  ;;  %v1406_v24 = vmul.f32 %v4557_v23, %v4827_v19  ;;  %v1419_v31 = vmul.f32 %v4557_v23, %v4829_v20  ;;  %v1430_v44 = vmul.f32 %v4561_v30, %v4823_v17 }
 0x1e9   : > { %v1392_v45 = vadd.f32 %v1391_v35, %v1390_v40  ;;  %v1416_v46 = vadd.f32 %v1415_v27, %v1414_v22  ;;  %v1427_v28 = vadd.f32 %v1426_v33, %v1425_v55  ;;  %v1432_v43 = vmul.f32 %v4557_v23, %v4832_v21 }
 0x1ea   : > { %v1405_v25 = vadd.f32 %v1404_v57, %v1403_v56  ;;  %v1438_v48 = vadd.f32 %v4557_v23, %v5696_v32 }
 0x1eb   : > { %v1394_v62 = vadd.f32 %v1393_v51, %v1392_v45  ;;  %v1418_v59 = vadd.f32 %v1417_v53, %v1416_v46  ;;  %v1429_v36 = vadd.f32 %v1428_v61, %v1427_v28 }
 0x1ec   : > { %v1407_v60 = vadd.f32 %v1406_v24, %v1405_v25  ;;  %v5828_v41 = vadd.f32 %v1438_v48, %v5696_v32  ;;  %v1446_v11 = vmul.f32 %v1438_v48, %v4825_v18  ;;  %v1459_v27 = vmul.f32 %v1438_v48, %v4827_v19 }
 0x1ed   : > { %v3266_v42 = vclamps-f32 %v1394_v62, 100000.0  ;;  %v1420_v38 = vadd.f32 %v1419_v31, %v1418_v59  ;;  %v1431_v29 = vadd.f32 %v1430_v44, %v1429_v36  ;;  %v1472_v23 = vmul.f32 %v1438_v48, %v4829_v20 }
 0x1ee   : > { %v3267_v34 = vclamps-f32 %v1407_v60, 100000.0  ;;  %v5836_v63 = vadd.f32 %v5828_v41, %v5696_v32 }
 0x1ef   : > { %v1397_v52 = vmul.f32 %v3266_v42, %v5696_v32  ;;  %v3268_v49 = vclamps-f32 %v1420_v38, 100000.0  ;;  %v1433_v39 = vadd.f32 %v1432_v43, %v1431_v29 }
 0x1f0   : > { %v1410_v35 = vmul.f32 %v3267_v34, %v5696_v32  ;;  %v5858_v29 = vadd.f32 %v5836_v63, %v5696_v32  }
 0x1f1   : > { %v1398_v51 = vadd.f32 %v4573_v47, %v1397_v52  ;;  %v1423_v58 = vmul.f32 %v3268_v49, %v5696_v32  ;;  %v3269_v50 = vclamps-f32 %v1433_v39, 100000.0 }
 0x1f2   : > { %v1411_v26 = vadd.f32 %v4569_v54, %v1410_v35  ;;  %v1485_v35 = vmul.f32 %v1438_v48, %v4832_v21 }
 0x1f3   : > { %v1424_v57 = vadd.f32 %v4565_v37, %v1423_v58  ;;  %v1436_v53 = vmul.f32 %v3269_v50, %v5696_v32  ;;  %v1439_v55 = vmul.f32 %v1398_v51, %v4791_v0  ;;  %v1452_v47 = vmul.f32 %v1398_v51, %v4799_v4 }
 0x1f4   : > { %v1440_v40 = vmul.f32 %v1411_v26, %v4793_v1  ;;  %v1453_v22 = vmul.f32 %v1411_v26, %v4801_v5  ;;  %v1465_v54 = vmul.f32 %v1398_v51, %v4807_v8  ;;  %v1466_v33 = vmul.f32 %v1411_v26, %v4809_v9 }
 0x1f5   : > { %v1437_v61 = vadd.f32 %v4561_v30, %v1436_v53  ;;  %v1442_v56 = vmul.f32 %v1424_v57, %v4795_v2  ;;  %v1455_v37 = vmul.f32 %v1424_v57, %v4803_v6  ;;  %v1468_v24 = vmul.f32 %v1424_v57, %v4811_v10 }
 0x1f6   : > { %v1441_v31 = vadd.f32 %v1440_v40, %v1439_v55  ;;  %v1454_v45 = vadd.f32 %v1453_v22, %v1452_v47  ;;  %v1467_v46 = vadd.f32 %v1466_v33, %v1465_v54  ;;  %v1478_v28 = vmul.f32 %v1398_v51, %v4815_v13 }
 0x1f7   : > { %v1444_v44 = vmul.f32 %v1437_v61, %v4797_v3  ;;  %v1457_v25 = vmul.f32 %v1437_v61, %v4805_v7  ;;  %v1470_v62 = vmul.f32 %v1437_v61, %v4813_v12  ;;  %v1479_v59 = vmul.f32 %v1411_v26, %v4817_v14 }
 0x1f8   : > { %v1443_v30 = vadd.f32 %v1442_v56, %v1441_v31  ;;  %v1456_v36 = vadd.f32 %v1455_v37, %v1454_v45  ;;  %v1469_v43 = vadd.f32 %v1468_v24, %v1467_v46  ;;  %v1481_v60 = vmul.f32 %v1424_v57, %v4819_v15 }
 0x1f9   : > { %v1480_v42 = vadd.f32 %v1479_v59, %v1478_v28  ;;  %v1483_v38 = vmul.f32 %v1437_v61, %v4823_v17 }
 0x1fa   : > { %v1445_v34 = vadd.f32 %v1444_v44, %v1443_v30  ;;  %v1458_v52 = vadd.f32 %v1457_v25, %v1456_v36  ;;  %v1471_v49 = vadd.f32 %v1470_v62, %v1469_v43 }
 0x1fb   : > { %v1482_v39 = vadd.f32 %v1481_v60, %v1480_v42 }
 0x1fc   : > { %v1447_v58 = vadd.f32 %v1446_v11, %v1445_v34  ;;  %v1460_v50 = vadd.f32 %v1459_v27, %v1458_v52  ;;  %v1473_v53 = vadd.f32 %v1472_v23, %v1471_v49  ;;  %v1499_v11 = vmul.f32 %v5828_v41, %v4825_v18 }
 0x1fd   : > { %v1484_v55 = vadd.f32 %v1483_v38, %v1482_v39 }
 0x1fe   : > { %v3270_v47 = vclamps-f32 %v1447_v58, 100000.0  ;;  %v3271_v40 = vclamps-f32 %v1460_v50, 100000.0  ;;  %v3272_v22 = vclamps-f32 %v1473_v53, 100000.0  ;;  %v1525_v58 = vmul.f32 %v5828_v41, %v4829_v20 }
 0x1ff   : > { %v1486_v54 = vadd.f32 %v1485_v35, %v1484_v55  ;;  %v1512_v35 = vmul.f32 %v5828_v41, %v4827_v19 }
 0x200   : > { %v1450_v33 = vmul.f32 %v3270_v47, %v5696_v32  ;;  %v1463_v56 = vmul.f32 %v3271_v40, %v5696_v32  ;;  %v1476_v37 = vmul.f32 %v3272_v22, %v5696_v32 }
 0x201   : > { %v3273_v24 = vclamps-f32 %v1486_v54, 100000.0 }
 0x202   : > { %v1451_v31 = vadd.f32 %v1450_v33, %v1398_v51  ;;  %v1464_v45 = vadd.f32 %v1463_v56, %v1411_v26  ;;  %v1477_v46 = vadd.f32 %v1476_v37, %v1424_v57  ;;  %v1538_v56 = vmul.f32 %v5828_v41, %v4832_v21 }
 0x203   : > { %v1489_v48 = vmul.f32 %v3273_v24, %v5696_v32  ;;  %v1565_v41 = vmul.f32 %v5836_v63, %v4827_v19 }
 0x204   : > { %v1492_v27 = vmul.f32 %v1451_v31, %v4791_v0  ;;  %v1493_v23 = vmul.f32 %v1464_v45, %v4793_v1  ;;  %v1495_v28 = vmul.f32 %v1477_v46, %v4795_v2  ;;  %v1505_v44 = vmul.f32 %v1451_v31, %v4799_v4 }
 0x205   : > { %v1490_v25 = vadd.f32 %v1489_v48, %v1437_v61  ;;  %v1506_v62 = vmul.f32 %v1464_v45, %v4801_v5  ;;  %v1508_v51 = vmul.f32 %v1477_v46, %v4803_v6  ;;  %v1518_v26 = vmul.f32 %v1451_v31, %v4807_v8 }
 0x206   : > { %v1494_v57 = vadd.f32 %v1493_v23, %v1492_v27  ;;  %v1519_v59 = vmul.f32 %v1464_v45, %v4809_v9  ;;  %v1521_v30 = vmul.f32 %v1477_v46, %v4811_v10  ;;  %v1531_v36 = vmul.f32 %v1451_v31, %v4815_v13 }
 0x207   : > { %v1497_v43 = vmul.f32 %v1490_v25, %v4797_v3  ;;  %v1507_v60 = vadd.f32 %v1506_v62, %v1505_v44  ;;  %v1510_v42 = vmul.f32 %v1490_v25, %v4805_v7  ;;  %v1523_v61 = vmul.f32 %v1490_v25, %v4813_v12 }
 0x208   : > { %v1496_v38 = vadd.f32 %v1495_v28, %v1494_v57  ;;  %v1520_v34 = vadd.f32 %v1519_v59, %v1518_v26  ;;  %v1532_v52 = vmul.f32 %v1464_v45, %v4817_v14  ;;  %v1534_v49 = vmul.f32 %v1477_v46, %v4819_v15 }
 0x209   : > { %v1509_v39 = vadd.f32 %v1508_v51, %v1507_v60  ;;  %v1536_v47 = vmul.f32 %v1490_v25, %v4823_v17 }
 0x20a   : > { %v1498_v50 = vadd.f32 %v1497_v43, %v1496_v38  ;;  %v1522_v53 = vadd.f32 %v1521_v30, %v1520_v34  ;;  %v1533_v55 = vadd.f32 %v1532_v52, %v1531_v36  ;;  %v1552_v30 = vmul.f32 %v5836_v63, %v4825_v18 }
 0x20b   : > { %v1511_v40 = vadd.f32 %v1510_v42, %v1509_v39  ;;  %v1578_v36 = vmul.f32 %v5836_v63, %v4829_v20 }
 0x20c   : > { %v1500_v22 = vadd.f32 %v1499_v11, %v1498_v50  ;;  %v1524_v54 = vadd.f32 %v1523_v61, %v1522_v53  ;;  %v1535_v33 = vadd.f32 %v1534_v49, %v1533_v55 }
 0x20d   : > { %v1513_v37 = vadd.f32 %v1512_v35, %v1511_v40 }
 0x20e   : > { %v3274_v24 = vclamps-f32 %v1500_v22, 100000.0  ;;  %v1526_v48 = vadd.f32 %v1525_v58, %v1524_v54  ;;  %v1537_v27 = vadd.f32 %v1536_v47, %v1535_v33 }
 0x20f   : > { %v3275_v23 = vclamps-f32 %v1513_v37, 100000.0 }
 0x210   : > { %v1503_v28 = vmul.f32 %v3274_v24, %v5696_v32  ;;  %v3276_v44 = vclamps-f32 %v1526_v48, 100000.0  ;;  %v1539_v62 = vadd.f32 %v1538_v56, %v1537_v27 }
 0x211   : > { %v1516_v51 = vmul.f32 %v3275_v23, %v5696_v32 }
 0x212   : > { %v1504_v26 = vadd.f32 %v1503_v28, %v1451_v31  ;;  %v1529_v57 = vmul.f32 %v3276_v44, %v5696_v32  ;;  %v3277_v11 = vclamps-f32 %v1539_v62, 100000.0  ;;  %v1591_v44 = vmul.f32 %v5836_v63, %v4832_v21 }
 0x213   : > { %v1517_v59 = vadd.f32 %v1516_v51, %v1464_v45 }
 0x214   : > { %v1530_v43 = vadd.f32 %v1529_v57, %v1477_v46  ;;  %v1542_v60 = vmul.f32 %v3277_v11, %v5696_v32  ;;  %v1545_v42 = vmul.f32 %v1504_v26, %v4791_v0  ;;  %v1558_v31 = vmul.f32 %v1504_v26, %v4799_v4 }
 0x215   : > { %v1546_v61 = vmul.f32 %v1517_v59, %v4793_v1  ;;  %v1559_v45 = vmul.f32 %v1517_v59, %v4801_v5  ;;  %v1571_v38 = vmul.f32 %v1504_v26, %v4807_v8  ;;  %v1572_v34 = vmul.f32 %v1517_v59, %v4809_v9 }
 0x216   : > { %v1543_v52 = vadd.f32 %v1542_v60, %v1490_v25  ;;  %v1548_v49 = vmul.f32 %v1530_v43, %v4795_v2  ;;  %v1561_v39 = vmul.f32 %v1530_v43, %v4803_v6  ;;  %v1574_v46 = vmul.f32 %v1530_v43, %v4811_v10 }
 0x217   : > { %v1547_v35 = vadd.f32 %v1546_v61, %v1545_v42  ;;  %v1560_v58 = vadd.f32 %v1559_v45, %v1558_v31  ;;  %v1573_v50 = vadd.f32 %v1572_v34, %v1571_v38  ;;  %v1584_v53 = vmul.f32 %v1504_v26, %v4815_v13 }
 0x218   : > { %v1550_v55 = vmul.f32 %v1543_v52, %v4797_v3  ;;  %v1563_v47 = vmul.f32 %v1543_v52, %v4805_v7  ;;  %v1576_v40 = vmul.f32 %v1543_v52, %v4813_v12  ;;  %v1585_v22 = vmul.f32 %v1517_v59, %v4817_v14 }
 0x219   : > { %v1549_v25 = vadd.f32 %v1548_v49, %v1547_v35  ;;  %v1562_v54 = vadd.f32 %v1561_v39, %v1560_v58  ;;  %v1575_v33 = vadd.f32 %v1574_v46, %v1573_v50  ;;  %v1587_v56 = vmul.f32 %v1530_v43, %v4819_v15 }
 0x21a   : > { %v1586_v37 = vadd.f32 %v1585_v22, %v1584_v53  ;;  %v1589_v24 = vmul.f32 %v1543_v52, %v4823_v17 }
 0x21b   : > { %v1551_v48 = vadd.f32 %v1550_v55, %v1549_v25  ;;  %v1564_v27 = vadd.f32 %v1563_v47, %v1562_v54  ;;  %v1577_v23 = vadd.f32 %v1576_v40, %v1575_v33 }
 0x21c   : > { %v1588_v28 = vadd.f32 %v1587_v56, %v1586_v37 }
 0x21d   : > { %v1553_v62 = vadd.f32 %v1552_v30, %v1551_v48  ;;  %v1566_v51 = vadd.f32 %v1565_v41, %v1564_v27  ;;  %v1579_v57 = vadd.f32 %v1578_v36, %v1577_v23  ;;  %v7013_v23 = vmov %v5858_v29 }
 0x21e   : > { %v1590_v11 = vadd.f32 %v1589_v24, %v1588_v28 }
 0x21f   : > { %v3278_v60 = vclamps-f32 %v1553_v62, 100000.0  ;;  %v3279_v42 = vclamps-f32 %v1566_v51, 100000.0  ;;  %v3280_v31 = vclamps-f32 %v1579_v57, 100000.0 }
 0x220   : > { %v1592_v61 = vadd.f32 %v1591_v44, %v1590_v11 }
 0x221   : > { %v1556_v45 = vmul.f32 %v3278_v60, %v5696_v32  ;;  %v1569_v38 = vmul.f32 %v3279_v42, %v5696_v32  ;;  %v1582_v34 = vmul.f32 %v3280_v31, %v5696_v32  ;;  %v7018_v60 = vmov (%p1377_p3), %v5858_v29 }
 0x222   : > { %v3281_v49 = vclamps-f32 %v1592_v61, 100000.0 }
 0x223   : > { %v1557_v39 = vadd.f32 %v1556_v45, %v1504_v26   ;;  %v1570_v46 = vadd.f32 %v1569_v38, %v1517_v59   ;;  %v1583_v35 = vadd.f32 %v1582_v34, %v1530_v43  }
 0x224   : > { %v1595_v63 = vmul.f32 %v3281_v49, %v5696_v32  ;;  %1380 = sbr.rel (!%p1377_p3) target bundleno = 483 (0x1e3), region = 150 }
 0x225   : > { %v7015_v37 = vmov %v1583_v35  ;;  %v7016_v54 = vmov %v1570_v46  ;;  %v7017_v47 = vmov %v1557_v39  ;;  %v7020_v38 = vmov (%p1377_p3), %v1583_v35 }
 0x226   : > { %v1596_v58 = vadd.f32 %v1595_v63, %v1543_v52   ;;  %v7021_v29 = vmov (%p1377_p3), %v1570_v46  ;;  %v7022_v48 = vmov (%p1377_p3), %v1557_v39 }
 0x228   : > { %v7014_v30 = vmov %v1596_v58  ;;  %v7019_v42 = vmov (%p1377_p3), %v1596_v58 }
 0x229 PF:  { %s3282_s0 = sshll.u32 %s5703_s1, 2  ;;  %v1603_v32 = vmul.f32 %v4597_v48, %v4791_v0  ;;  %v1604_v26 = vmul.f32 %v4593_v29, %v4793_v1  ;;  %v1606_v59 = vmul.f32 %v4589_v38, %v4795_v2  ;;  %s5961_s18 = sld [smem:[#allocation7 + $0x4]]  ;;  %v1616_v30 = vmul.f32 %v4597_v48, %v4799_v4  ;;  %v4597_v48 = vphi %v7012_v48, %v7022_v48   ;;  %v4593_v29 = vphi %v7011_v29, %v7021_v29   ;;  %v4589_v38 = vphi %v7010_v38, %v7020_v38   ;;  %v4585_v42 = vphi %v7009_v42, %v7019_v42   ;;  %v4581_v60 = vphi %v7008_v60, %v7018_v60  }
 0x22a   :  { %s5964_s19 = ssub.s32 %s7079_s11, %s3282_s0  ;;  %v1617_v41 = vmul.f32 %v4593_v29, %v4801_v5  ;;  %v1619_v36 = vmul.f32 %v4589_v38, %v4803_v6  ;;  %s5970_s3 = sld [smem:[#allocation6 + $0x4]]  ;;  %v1608_v52 = vmul.f32 %v4585_v42, %v4797_v3  ;;  %v1610_v50 = vmul.f32 %v4581_v60, %v4825_v18 }
 0x22b   :  { %p1600_p4 = scmp.gt.s32.totalorder %s5964_s19, 0  ;;  %v1605_v43 = vadd.f32 %v1604_v26, %v1603_v32  ;;  %v1629_v53 = vmul.f32 %v4597_v48, %v4807_v8  ;;  %v1621_v47 = vmul.f32 %v4585_v42, %v4805_v7  ;;  %v1630_v40 = vmul.f32 %v4593_v29, %v4809_v9  ;;  %s5982_s5 = sld [smem:[#allocation2 + $0x4]] }
 0x22c   :  { %v1618_v55 = vadd.f32 %v1617_v41, %v1616_v30  ;;  %v1632_v22 = vmul.f32 %v4589_v38, %v4811_v10  ;;  %v1623_v54 = vmul.f32 %v4581_v60, %v4827_v19  ;;  %v1642_v33 = vmul.f32 %v4597_v48, %v4815_v13  ;;  %p1656_p6 = scmp.gt.s32.totalorder %s5964_s19, 1  ;;  %p1712_p7 = scmp.gt.s32.totalorder %s5964_s19, 2 }
 0x22d   :  { %v1607_v25 = vadd.f32 %v1606_v59, %v1605_v43  ;;  %v1643_v56 = vmul.f32 %v4593_v29, %v4817_v14  ;;  %s1601_s20 = scalar_select %p1600_p4, %s5666_s13, 0.0  ;;  %v1631_v24 = vadd.f32 %v1630_v40, %v1629_v53  ;;  %v1634_v27 = vmul.f32 %v4585_v42, %v4813_v12 }
 0x22e   :  { %v1620_v37 = vadd.f32 %v1619_v36, %v1618_v55  ;;  %v1645_v23 = vmul.f32 %v4589_v38, %v4819_v15  ;;  %v1647_v62 = vmul.f32 %v4585_v42, %v4823_v17  ;;  %v1636_v11 = vmul.f32 %v4581_v60, %v4829_v20  ;;  %s1657_s22 = scalar_select %p1656_p6, %s5666_s13, 0.0 }
 0x22f   :  { %v1609_v28 = vadd.f32 %v1608_v52, %v1607_v25  ;;  %v1644_v44 = vadd.f32 %v1643_v56, %v1642_v33  ;;  %v1633_v57 = vadd.f32 %v1632_v22, %v1631_v24  ;;  %p1773_p5 = scmp.gt.s32.totalorder %s5961_s18, 0  ;;  %v1649_v45 = vmul.f32 %v4581_v60, %v4832_v21  ;;  %s7085_s13 = smov (!%p1712_p7, %s5666_s13), 0.0 }
 0x230   :  { %v1622_v51 = vadd.f32 %v1621_v47, %v1620_v37  ;;  %v6000_v34 = vstv %s5970_s3  ;;  %v1602_v49 = vstv %s1601_s20 }
 0x231   :  { %v1611_v31 = vadd.f32 %v1610_v50, %v1609_v28  ;;  %v1646_v61 = vadd.f32 %v1645_v23, %v1644_v44  ;;  %v1635_v46 = vadd.f32 %v1634_v27, %v1633_v57  ;;  %s7083_s18 = smov (!%p1773_p5, %s5961_s18), 0  ;;  %v1655_v26 = vadd.f32 %v4581_v60, %v1602_v49 }
 0x232   :  { %v1624_v39 = vadd.f32 %v1623_v54, %v1622_v51  ;;  %v1778_v59 = vstv %s5982_s5   ;;  %s6007_s21 = sshrl.u32 %s7083_s18, 2 }
 0x233   :  { %v3283_v35 = vclamps-f32 %v1611_v31, 100000.0  ;;  %v1648_v63 = vadd.f32 %v1647_v62, %v1646_v61  ;;  %v1637_v32 = vadd.f32 %v1636_v11, %v1635_v46  ;;  %v1666_v47 = vmul.f32 %v1655_v26, %v4825_v18  ;;  %p3298_p8 = scmp.le.s32.totalorder %s6007_s21, 0 }
 0x234   :  { %v3284_v58 = vclamps-f32 %v1624_v39, 100000.0  ;;  %v1679_v37 = vmul.f32 %v1655_v26, %v4827_v19  ;;  %v1692_v39 = vmul.f32 %v1655_v26, %v4829_v20  ;;  %s6092_s23 = smov (!%p3298_p8), 0  }
 0x235   :  { %v1614_v30 = vmul.f32 %v3283_v35, %v1602_v49  ;;  %v1650_v41 = vadd.f32 %v1649_v45, %v1648_v63  ;;  %v3285_v43 = vclamps-f32 %v1637_v32, 100000.0 }
 0x236   :  { %v1627_v36 = vmul.f32 %v3284_v58, %v1602_v49 }
 0x237   :  { %v1615_v52 = vadd.f32 %v4597_v48, %v1614_v30  ;;  %v3286_v50 = vclamps-f32 %v1650_v41, 100000.0  ;;  %v1640_v55 = vmul.f32 %v3285_v43, %v1602_v49  ;;  %v1705_v41 = vmul.f32 %v1655_v26, %v4832_v21 }
 0x238   :  { %v1628_v53 = vadd.f32 %v4593_v29, %v1627_v36 }
 0x239   :  { %v1653_v40 = vmul.f32 %v3286_v50, %v1602_v49  ;;  %v1659_v22 = vmul.f32 %v1615_v52, %v4791_v0  ;;  %v1672_v25 = vmul.f32 %v1615_v52, %v4799_v4  ;;  %v1685_v60 = vmul.f32 %v1615_v52, %v4807_v8 }
 0x23a   :  { %v1641_v54 = vadd.f32 %v4589_v38, %v1640_v55  ;;  %v1660_v33 = vmul.f32 %v1628_v53, %v4793_v1  ;;  %v1673_v56 = vmul.f32 %v1628_v53, %v4801_v5  ;;  %v1686_v48 = vmul.f32 %v1628_v53, %v4809_v9 }
 0x23b   :  { %v1654_v29 = vadd.f32 %v4585_v42, %v1653_v40  ;;  %v1698_v24 = vmul.f32 %v1615_v52, %v4815_v13  ;;  %v1699_v27 = vmul.f32 %v1628_v53, %v4817_v14  ;;  %v1658_v50 = vstv %s1657_s22 }
 0x23c   :  { %v1661_v23 = vadd.f32 %v1660_v33, %v1659_v22  ;;  %v1662_v38 = vmul.f32 %v1641_v54, %v4795_v2  ;;  %v1674_v28 = vadd.f32 %v1673_v56, %v1672_v25  ;;  %v1675_v44 = vmul.f32 %v1641_v54, %v4803_v6 }
 0x23d   :  { %v1664_v62 = vmul.f32 %v1654_v29, %v4797_v3  ;;  %v1677_v51 = vmul.f32 %v1654_v29, %v4805_v7  ;;  %v1687_v42 = vadd.f32 %v1686_v48, %v1685_v60  ;;  %v1688_v57 = vmul.f32 %v1641_v54, %v4811_v10 }
 0x23e   :  { %v1663_v11 = vadd.f32 %v1662_v38, %v1661_v23  ;;  %v1676_v31 = vadd.f32 %v1675_v44, %v1674_v28  ;;  %v1690_v61 = vmul.f32 %v1654_v29, %v4813_v12  ;;  %v1700_v45 = vadd.f32 %v1699_v27, %v1698_v24 }
 0x23f   :  { %v1689_v49 = vadd.f32 %v1688_v57, %v1687_v42  ;;  %v1701_v46 = vmul.f32 %v1641_v54, %v4819_v15  ;;  %v1703_v35 = vmul.f32 %v1654_v29, %v4823_v17  ;;  %v1711_v56 = vadd.f32 %v1658_v50, %v1655_v26 }
 0x240   :  { %v1665_v63 = vadd.f32 %v1664_v62, %v1663_v11  ;;  %v1678_v58 = vadd.f32 %v1677_v51, %v1676_v31 }
 0x241   :  { %v1691_v32 = vadd.f32 %v1690_v61, %v1689_v49  ;;  %v1702_v30 = vadd.f32 %v1701_v46, %v1700_v45 }
 0x242   :  { %v1667_v36 = vadd.f32 %v1666_v47, %v1665_v63  ;;  %v1680_v43 = vadd.f32 %v1679_v37, %v1678_v58  ;;  %v1722_v47 = vmul.f32 %v1711_v56, %v4825_v18  ;;  %v1735_v37 = vmul.f32 %v1711_v56, %v4827_v19 }
 0x243   :  { %v1693_v55 = vadd.f32 %v1692_v39, %v1691_v32  ;;  %v1704_v40 = vadd.f32 %v1703_v35, %v1702_v30 }
 0x244   :  { %v3287_v22 = vclamps-f32 %v1667_v36, 100000.0  ;;  %v3288_v25 = vclamps-f32 %v1680_v43, 100000.0 }
 0x245   :  { %v3289_v60 = vclamps-f32 %v1693_v55, 100000.0  ;;  %v1706_v33 = vadd.f32 %v1705_v41, %v1704_v40  ;;  %v1748_v41 = vmul.f32 %v1711_v56, %v4829_v20 }
 0x246   :  { %v1670_v48 = vmul.f32 %v3287_v22, %v1658_v50  ;;  %v1683_v24 = vmul.f32 %v3288_v25, %v1658_v50  ;;  %v1761_v25 = vmul.f32 %v1711_v56, %v4832_v21 }
 0x247   :  { %v1696_v27 = vmul.f32 %v3289_v60, %v1658_v50  ;;  %v3290_v23 = vclamps-f32 %v1706_v33, 100000.0 }
 0x248   :  { %v1671_v38 = vadd.f32 %v1670_v48, %v1615_v52  ;;  %v1684_v28 = vadd.f32 %v1683_v24, %v1628_v53 }
 0x249   :  { %v1697_v44 = vadd.f32 %v1696_v27, %v1641_v54  ;;  %v1709_v62 = vmul.f32 %v3290_v23, %v1658_v50  ;;  %v1714_v27 = vstv %s7085_s13 }
 0x24a   :  { %v1715_v51 = vmul.f32 %v1671_v38, %v4791_v0  ;;  %v1716_v42 = vmul.f32 %v1684_v28, %v4793_v1  ;;  %v1728_v57 = vmul.f32 %v1671_v38, %v4799_v4  ;;  %v1729_v26 = vmul.f32 %v1684_v28, %v4801_v5 }
 0x24b   :  { %v1710_v11 = vadd.f32 %v1709_v62, %v1654_v29  ;;  %v1718_v52 = vmul.f32 %v1697_v44, %v4795_v2  ;;  %v1731_v53 = vmul.f32 %v1697_v44, %v4803_v6  ;;  %v1741_v54 = vmul.f32 %v1671_v38, %v4807_v8 }
 0x24c   :  { %v1717_v31 = vadd.f32 %v1716_v42, %v1715_v51  ;;  %v1730_v61 = vadd.f32 %v1729_v26, %v1728_v57  ;;  %v1742_v45 = vmul.f32 %v1684_v28, %v4809_v9  ;;  %v1744_v49 = vmul.f32 %v1697_v44, %v4811_v10 }
 0x24d   :  { %v1720_v39 = vmul.f32 %v1710_v11, %v4797_v3  ;;  %v1733_v46 = vmul.f32 %v1710_v11, %v4805_v7  ;;  %v1746_v29 = vmul.f32 %v1710_v11, %v4813_v12  ;;  %v1754_v35 = vmul.f32 %v1671_v38, %v4815_v13 }
 0x24e   :  { %v1719_v63 = vadd.f32 %v1718_v52, %v1717_v31  ;;  %v1732_v58 = vadd.f32 %v1731_v53, %v1730_v61  ;;  %v1743_v32 = vadd.f32 %v1742_v45, %v1741_v54  ;;  %v1755_v30 = vmul.f32 %v1684_v28, %v4817_v14 }
 0x24f   :  { %v1757_v36 = vmul.f32 %v1697_v44, %v4819_v15  ;;  %v1759_v43 = vmul.f32 %v1710_v11, %v4823_v17 }
 0x250   :  { %v1721_v50 = vadd.f32 %v1720_v39, %v1719_v63  ;;  %v1734_v55 = vadd.f32 %v1733_v46, %v1732_v58  ;;  %v1745_v40 = vadd.f32 %v1744_v49, %v1743_v32  ;;  %v1756_v22 = vadd.f32 %v1755_v30, %v1754_v35 }
 0x252   :  { %v1723_v60 = vadd.f32 %v1722_v47, %v1721_v50  ;;  %v1736_v33 = vadd.f32 %v1735_v37, %v1734_v55  ;;  %v1747_v48 = vadd.f32 %v1746_v29, %v1745_v40  ;;  %v1758_v24 = vadd.f32 %v1757_v36, %v1756_v22 }
 0x254   :  { %v3291_v23 = vclamps-f32 %v1723_v60, 100000.0  ;;  %v3292_v62 = vclamps-f32 %v1736_v33, 100000.0  ;;  %v1749_v51 = vadd.f32 %v1748_v41, %v1747_v48  ;;  %v1760_v42 = vadd.f32 %v1759_v43, %v1758_v24 }
 0x256   :  { %v1726_v57 = vmul.f32 %v3291_v23, %v1714_v27  ;;  %v1739_v26 = vmul.f32 %v3292_v62, %v1714_v27  ;;  %v3293_v52 = vclamps-f32 %v1749_v51, 100000.0  ;;  %v1762_v53 = vadd.f32 %v1761_v25, %v1760_v42 }
 0x258   :  { %v1727_v54 = vadd.f32 %v1726_v57, %v1671_v38   ;;  %v1740_v31 = vadd.f32 %v1739_v26, %v1684_v28   ;;  %v1752_v61 = vmul.f32 %v3293_v52, %v1714_v27  ;;  %v3294_v45 = vclamps-f32 %v1762_v53, 100000.0 }
 0x259   :  { %v7023_v38 = vmov %v1778_v59 }
 0x25a   :  { %v1753_v49 = vadd.f32 %v1752_v61, %v1697_v44   ;;  %v1765_v39 = vmul.f32 %v3294_v45, %v1714_v27  ;;  %v1767_v56 = vsel %vm135_vm0, %v1727_v54, 0.0  ;;  %v7026_v35 = vmov %v1740_v31 }
 0x25b   :  { %v1768_v47 = vsel %vm136_vm1, %v1740_v31, %v1767_v56  ;;  %3092 = sbr.rel (%p3298_p8) target bundleno = 678 (0x2a6), region = 155 }
 0x25c   :  { %v1766_v37 = vadd.f32 %v1765_v39, %v1710_v11   ;;  %v1769_v46 = vsel %vm137_vm2, %v1753_v49, %v1768_v47  ;;  %v7025_v44 = vmov %v1753_v49  ;;  %v7027_v11 = vmov %v1727_v54 }
 0x25e   :  { %v1770_v29 = vsel %vm138_vm3, %v1766_v37, %v1769_v46  ;;  %v7024_v28 = vmov %v1766_v37 }
 0x25f   :  { %1771 = vst [vmem:[#allocation13 + $0x4] sm:$0x1] %v1770_v29 }
 0x260 LB: > { %v1792_v63 = vmul.f32 %v4613_v31, %v4793_v1  ;;  %v1791_v58 = vmul.f32 %v4617_v54, %v4791_v0  ;;  %v1794_v32 = vmul.f32 %v4609_v49, %v4795_v2  ;;  %v1804_v30 = vmul.f32 %v4617_v54, %v4799_v4  ;;  %s1783_s23 = sadd.s32 1, %s4621_s23   ;;  %s4621_s23 = sphi %s6092_s23, %s1783_s23   ;;  %v4617_v54 = vphi %v1727_v54, %v7032_v54   ;;  %v4613_v31 = vphi %v1740_v31, %v7031_v31   ;;  %v4609_v49 = vphi %v1753_v49, %v7030_v49   ;;  %v4605_v37 = vphi %v1766_v37, %v7029_v37   ;;  %v4601_v59 = vphi %v1778_v59, %v7028_v59  }
 0x261   : > { %v1796_v41 = vmul.f32 %v4605_v37, %v4797_v3  ;;  %v1798_v36 = vmul.f32 %v4601_v59, %v4825_v18  ;;  %v1805_v43 = vmul.f32 %v4613_v31, %v4801_v5  ;;  %v1807_v50 = vmul.f32 %v4609_v49, %v4803_v6  ;;  %p1782_p9 = scmp.ge.s32.totalorder %s1783_s23, %s6007_s21 }
 0x262   : > { %v1793_v55 = vadd.f32 %v1792_v63, %v1791_v58  ;;  %v1817_v40 = vmul.f32 %v4617_v54, %v4807_v8  ;;  %v1818_v22 = vmul.f32 %v4613_v31, %v4809_v9  ;;  %v1820_v25 = vmul.f32 %v4609_v49, %v4811_v10 }
 0x263   : > { %v1806_v60 = vadd.f32 %v1805_v43, %v1804_v30  ;;  %v1809_v33 = vmul.f32 %v4605_v37, %v4805_v7  ;;  %v1822_v48 = vmul.f32 %v4605_v37, %v4813_v12  ;;  %v1830_v24 = vmul.f32 %v4617_v54, %v4815_v13 }
 0x264   : > { %v1795_v27 = vadd.f32 %v1794_v32, %v1793_v55  ;;  %v1819_v23 = vadd.f32 %v1818_v22, %v1817_v40  ;;  %v1831_v62 = vmul.f32 %v4613_v31, %v4817_v14  ;;  %v1833_v51 = vmul.f32 %v4609_v49, %v4819_v15 }
 0x265   : > { %v1808_v42 = vadd.f32 %v1807_v50, %v1806_v60  ;;  %v1811_v57 = vmul.f32 %v4601_v59, %v4827_v19  ;;  %v1824_v26 = vmul.f32 %v4601_v59, %v4829_v20  ;;  %v1835_v45 = vmul.f32 %v4605_v37, %v4823_v17 }
 0x266   : > { %v1797_v52 = vadd.f32 %v1796_v41, %v1795_v27  ;;  %v1821_v53 = vadd.f32 %v1820_v25, %v1819_v23  ;;  %v1832_v61 = vadd.f32 %v1831_v62, %v1830_v24  ;;  %v1837_v29 = vmul.f32 %v4601_v59, %v4832_v21 }
 0x267   : > { %v1810_v39 = vadd.f32 %v1809_v33, %v1808_v42  ;;  %v1843_v11 = vadd.f32 %v4601_v59, %v6000_v34 }
 0x268   : > { %v1799_v56 = vadd.f32 %v1798_v36, %v1797_v52  ;;  %v1823_v47 = vadd.f32 %v1822_v48, %v1821_v53  ;;  %v1834_v46 = vadd.f32 %v1833_v51, %v1832_v61 }
 0x269   : > { %v1812_v38 = vadd.f32 %v1811_v57, %v1810_v39  ;;  %v6132_v43 = vadd.f32 %v1843_v11, %v6000_v34  ;;  %v1851_v40 = vmul.f32 %v1843_v11, %v4825_v18  ;;  %v1864_v25 = vmul.f32 %v1843_v11, %v4827_v19 }
 0x26a   : > { %v3299_v28 = vclamps-f32 %v1799_v56, 100000.0  ;;  %v1825_v44 = vadd.f32 %v1824_v26, %v1823_v47  ;;  %v1836_v35 = vadd.f32 %v1835_v45, %v1834_v46  ;;  %v1877_v59 = vmul.f32 %v1843_v11, %v4829_v20 }
 0x26b   : > { %v3300_v63 = vclamps-f32 %v1812_v38, 100000.0  ;;  %v6140_v60 = vadd.f32 %v6132_v43, %v6000_v34 }
 0x26c   : > { %v1802_v58 = vmul.f32 %v3299_v28, %v6000_v34  ;;  %v3301_v32 = vclamps-f32 %v1825_v44, 100000.0  ;;  %v1838_v30 = vadd.f32 %v1837_v29, %v1836_v35 }
 0x26d   : > { %v1815_v41 = vmul.f32 %v3300_v63, %v6000_v34  ;;  %v6162_v35 = vadd.f32 %v6140_v60, %v6000_v34  }
 0x26e   : > { %v1803_v36 = vadd.f32 %v4617_v54, %v1802_v58  ;;  %v1828_v50 = vmul.f32 %v3301_v32, %v6000_v34  ;;  %v3302_v55 = vclamps-f32 %v1838_v30, 100000.0 }
 0x26f   : > { %v1816_v22 = vadd.f32 %v4613_v31, %v1815_v41  ;;  %v1890_v41 = vmul.f32 %v1843_v11, %v4832_v21 }
 0x270   : > { %v1829_v33 = vadd.f32 %v4609_v49, %v1828_v50  ;;  %v1841_v48 = vmul.f32 %v3302_v55, %v6000_v34  ;;  %v1844_v24 = vmul.f32 %v1803_v36, %v4791_v0  ;;  %v1857_v54 = vmul.f32 %v1803_v36, %v4799_v4 }
 0x271   : > { %v1845_v27 = vmul.f32 %v1816_v22, %v4793_v1  ;;  %v1858_v23 = vmul.f32 %v1816_v22, %v4801_v5  ;;  %v1870_v31 = vmul.f32 %v1803_v36, %v4807_v8  ;;  %v1871_v62 = vmul.f32 %v1816_v22, %v4809_v9 }
 0x272   : > { %v1842_v51 = vadd.f32 %v4605_v37, %v1841_v48  ;;  %v1847_v42 = vmul.f32 %v1829_v33, %v4795_v2  ;;  %v1860_v49 = vmul.f32 %v1829_v33, %v4803_v6  ;;  %v1873_v57 = vmul.f32 %v1829_v33, %v4811_v10 }
 0x273   : > { %v1846_v26 = vadd.f32 %v1845_v27, %v1844_v24  ;;  %v1859_v52 = vadd.f32 %v1858_v23, %v1857_v54  ;;  %v1872_v53 = vadd.f32 %v1871_v62, %v1870_v31  ;;  %v1883_v61 = vmul.f32 %v1803_v36, %v4815_v13 }
 0x274   : > { %v1849_v45 = vmul.f32 %v1842_v51, %v4797_v3  ;;  %v1862_v39 = vmul.f32 %v1842_v51, %v4805_v7  ;;  %v1875_v56 = vmul.f32 %v1842_v51, %v4813_v12  ;;  %v1884_v47 = vmul.f32 %v1816_v22, %v4817_v14 }
 0x275   : > { %v1848_v37 = vadd.f32 %v1847_v42, %v1846_v26  ;;  %v1861_v46 = vadd.f32 %v1860_v49, %v1859_v52  ;;  %v1874_v29 = vadd.f32 %v1873_v57, %v1872_v53  ;;  %v1886_v38 = vmul.f32 %v1829_v33, %v4819_v15 }
 0x276   : > { %v1885_v28 = vadd.f32 %v1884_v47, %v1883_v61  ;;  %v1888_v44 = vmul.f32 %v1842_v51, %v4823_v17 }
 0x277   : > { %v1850_v63 = vadd.f32 %v1849_v45, %v1848_v37  ;;  %v1863_v58 = vadd.f32 %v1862_v39, %v1861_v46  ;;  %v1876_v32 = vadd.f32 %v1875_v56, %v1874_v29 }
 0x278   : > { %v1887_v30 = vadd.f32 %v1886_v38, %v1885_v28 }
 0x279   : > { %v1852_v50 = vadd.f32 %v1851_v40, %v1850_v63  ;;  %v1865_v55 = vadd.f32 %v1864_v25, %v1863_v58  ;;  %v1878_v48 = vadd.f32 %v1877_v59, %v1876_v32  ;;  %v1904_v40 = vmul.f32 %v6132_v43, %v4825_v18 }
 0x27a   : > { %v1889_v24 = vadd.f32 %v1888_v44, %v1887_v30 }
 0x27b   : > { %v3303_v54 = vclamps-f32 %v1852_v50, 100000.0  ;;  %v3304_v27 = vclamps-f32 %v1865_v55, 100000.0  ;;  %v3305_v23 = vclamps-f32 %v1878_v48, 100000.0  ;;  %v1930_v50 = vmul.f32 %v6132_v43, %v4829_v20 }
 0x27c   : > { %v1891_v31 = vadd.f32 %v1890_v41, %v1889_v24  ;;  %v1917_v41 = vmul.f32 %v6132_v43, %v4827_v19 }
 0x27d   : > { %v1855_v62 = vmul.f32 %v3303_v54, %v6000_v34  ;;  %v1868_v42 = vmul.f32 %v3304_v27, %v6000_v34  ;;  %v1881_v49 = vmul.f32 %v3305_v23, %v6000_v34 }
 0x27e   : > { %v3306_v57 = vclamps-f32 %v1891_v31, 100000.0 }
 0x27f   : > { %v1856_v26 = vadd.f32 %v1855_v62, %v1803_v36  ;;  %v1869_v52 = vadd.f32 %v1868_v42, %v1816_v22  ;;  %v1882_v53 = vadd.f32 %v1881_v49, %v1829_v33  ;;  %v1943_v42 = vmul.f32 %v6132_v43, %v4832_v21 }
 0x280   : > { %v1894_v11 = vmul.f32 %v3306_v57, %v6000_v34  ;;  %v1970_v43 = vmul.f32 %v6140_v60, %v4827_v19 }
 0x281   : > { %v1897_v25 = vmul.f32 %v1856_v26, %v4791_v0  ;;  %v1898_v59 = vmul.f32 %v1869_v52, %v4793_v1  ;;  %v1900_v61 = vmul.f32 %v1882_v53, %v4795_v2  ;;  %v1910_v45 = vmul.f32 %v1856_v26, %v4799_v4 }
 0x282   : > { %v1895_v39 = vadd.f32 %v1894_v11, %v1842_v51  ;;  %v1911_v56 = vmul.f32 %v1869_v52, %v4801_v5  ;;  %v1913_v36 = vmul.f32 %v1882_v53, %v4803_v6  ;;  %v1923_v22 = vmul.f32 %v1856_v26, %v4807_v8 }
 0x283   : > { %v1899_v33 = vadd.f32 %v1898_v59, %v1897_v25  ;;  %v1924_v47 = vmul.f32 %v1869_v52, %v4809_v9  ;;  %v1926_v37 = vmul.f32 %v1882_v53, %v4811_v10  ;;  %v1936_v46 = vmul.f32 %v1856_v26, %v4815_v13 }
 0x284   : > { %v1902_v29 = vmul.f32 %v1895_v39, %v4797_v3  ;;  %v1912_v38 = vadd.f32 %v1911_v56, %v1910_v45  ;;  %v1915_v28 = vmul.f32 %v1895_v39, %v4805_v7  ;;  %v1928_v51 = vmul.f32 %v1895_v39, %v4813_v12 }
 0x285   : > { %v1901_v44 = vadd.f32 %v1900_v61, %v1899_v33  ;;  %v1925_v63 = vadd.f32 %v1924_v47, %v1923_v22  ;;  %v1937_v58 = vmul.f32 %v1869_v52, %v4817_v14  ;;  %v1939_v32 = vmul.f32 %v1882_v53, %v4819_v15 }
 0x286   : > { %v1914_v30 = vadd.f32 %v1913_v36, %v1912_v38  ;;  %v1941_v54 = vmul.f32 %v1895_v39, %v4823_v17 }
 0x287   : > { %v1903_v55 = vadd.f32 %v1902_v29, %v1901_v44  ;;  %v1927_v48 = vadd.f32 %v1926_v37, %v1925_v63  ;;  %v1938_v24 = vadd.f32 %v1937_v58, %v1936_v46  ;;  %v1957_v37 = vmul.f32 %v6140_v60, %v4825_v18 }
 0x288   : > { %v1916_v27 = vadd.f32 %v1915_v28, %v1914_v30  ;;  %v1983_v46 = vmul.f32 %v6140_v60, %v4829_v20 }
 0x289   : > { %v1905_v23 = vadd.f32 %v1904_v40, %v1903_v55  ;;  %v1929_v31 = vadd.f32 %v1928_v51, %v1927_v48  ;;  %v1940_v62 = vadd.f32 %v1939_v32, %v1938_v24 }
 0x28a   : > { %v1918_v49 = vadd.f32 %v1917_v41, %v1916_v27 }
 0x28b   : > { %v3307_v57 = vclamps-f32 %v1905_v23, 100000.0  ;;  %v1931_v11 = vadd.f32 %v1930_v50, %v1929_v31  ;;  %v1942_v25 = vadd.f32 %v1941_v54, %v1940_v62 }
 0x28c   : > { %v3308_v59 = vclamps-f32 %v1918_v49, 100000.0 }
 0x28d   : > { %v1908_v61 = vmul.f32 %v3307_v57, %v6000_v34  ;;  %v3309_v45 = vclamps-f32 %v1931_v11, 100000.0  ;;  %v1944_v56 = vadd.f32 %v1943_v42, %v1942_v25 }
 0x28e   : > { %v1921_v36 = vmul.f32 %v3308_v59, %v6000_v34 }
 0x28f   : > { %v1909_v22 = vadd.f32 %v1908_v61, %v1856_v26  ;;  %v1934_v33 = vmul.f32 %v3309_v45, %v6000_v34  ;;  %v3310_v40 = vclamps-f32 %v1944_v56, 100000.0  ;;  %v1996_v45 = vmul.f32 %v6140_v60, %v4832_v21 }
 0x290   : > { %v1922_v47 = vadd.f32 %v1921_v36, %v1869_v52 }
 0x291   : > { %v1935_v29 = vadd.f32 %v1934_v33, %v1882_v53  ;;  %v1947_v38 = vmul.f32 %v3310_v40, %v6000_v34  ;;  %v1950_v28 = vmul.f32 %v1909_v22, %v4791_v0  ;;  %v1963_v26 = vmul.f32 %v1909_v22, %v4799_v4 }
 0x292   : > { %v1951_v51 = vmul.f32 %v1922_v47, %v4793_v1  ;;  %v1964_v52 = vmul.f32 %v1922_v47, %v4801_v5  ;;  %v1976_v44 = vmul.f32 %v1909_v22, %v4807_v8  ;;  %v1977_v63 = vmul.f32 %v1922_v47, %v4809_v9 }
 0x293   : > { %v1948_v58 = vadd.f32 %v1947_v38, %v1895_v39  ;;  %v1953_v32 = vmul.f32 %v1935_v29, %v4795_v2  ;;  %v1966_v30 = vmul.f32 %v1935_v29, %v4803_v6  ;;  %v1979_v53 = vmul.f32 %v1935_v29, %v4811_v10 }
 0x294   : > { %v1952_v41 = vadd.f32 %v1951_v51, %v1950_v28  ;;  %v1965_v50 = vadd.f32 %v1964_v52, %v1963_v26  ;;  %v1978_v55 = vadd.f32 %v1977_v63, %v1976_v44  ;;  %v1989_v48 = vmul.f32 %v1909_v22, %v4815_v13 }
 0x295   : > { %v1955_v24 = vmul.f32 %v1948_v58, %v4797_v3  ;;  %v1968_v54 = vmul.f32 %v1948_v58, %v4805_v7  ;;  %v1981_v27 = vmul.f32 %v1948_v58, %v4813_v12  ;;  %v1990_v23 = vmul.f32 %v1922_v47, %v4817_v14 }
 0x296   : > { %v1954_v39 = vadd.f32 %v1953_v32, %v1952_v41  ;;  %v1967_v31 = vadd.f32 %v1966_v30, %v1965_v50  ;;  %v1980_v62 = vadd.f32 %v1979_v53, %v1978_v55  ;;  %v1992_v42 = vmul.f32 %v1935_v29, %v4819_v15 }
 0x297   : > { %v1991_v49 = vadd.f32 %v1990_v23, %v1989_v48  ;;  %v1994_v57 = vmul.f32 %v1948_v58, %v4823_v17 }
 0x298   : > { %v1956_v11 = vadd.f32 %v1955_v24, %v1954_v39  ;;  %v1969_v25 = vadd.f32 %v1968_v54, %v1967_v31  ;;  %v1982_v59 = vadd.f32 %v1981_v27, %v1980_v62 }
 0x299   : > { %v1993_v61 = vadd.f32 %v1992_v42, %v1991_v49 }
 0x29a   : > { %v1958_v56 = vadd.f32 %v1957_v37, %v1956_v11  ;;  %v1971_v36 = vadd.f32 %v1970_v43, %v1969_v25  ;;  %v1984_v33 = vadd.f32 %v1983_v46, %v1982_v59  ;;  %v7028_v59 = vmov %v6162_v35 }
 0x29b   : > { %v1995_v40 = vadd.f32 %v1994_v57, %v1993_v61 }
 0x29c   : > { %v3311_v38 = vclamps-f32 %v1958_v56, 100000.0  ;;  %v3312_v28 = vclamps-f32 %v1971_v36, 100000.0  ;;  %v3313_v26 = vclamps-f32 %v1984_v33, 100000.0 }
 0x29d   : > { %v1997_v51 = vadd.f32 %v1996_v45, %v1995_v40 }
 0x29e   : > { %v1961_v52 = vmul.f32 %v3311_v38, %v6000_v34  ;;  %v1974_v44 = vmul.f32 %v3312_v28, %v6000_v34  ;;  %v1987_v63 = vmul.f32 %v3313_v26, %v6000_v34  ;;  %v7033_v38 = vmov (%p1782_p9), %v6162_v35 }
 0x29f   : > { %v3314_v32 = vclamps-f32 %v1997_v51, 100000.0 }
 0x2a0   : > { %v1962_v30 = vadd.f32 %v1961_v52, %v1909_v22   ;;  %v1975_v53 = vadd.f32 %v1974_v44, %v1922_v47   ;;  %v1988_v41 = vadd.f32 %v1987_v63, %v1935_v29  }
 0x2a1   : > { %v2000_v60 = vmul.f32 %v3314_v32, %v6000_v34  ;;  %1785 = sbr.rel (!%p1782_p9) target bundleno = 608 (0x260), region = 161 }
 0x2a2   : > { %v7030_v49 = vmov %v1988_v41  ;;  %v7031_v31 = vmov %v1975_v53  ;;  %v7032_v54 = vmov %v1962_v30  ;;  %v7035_v44 = vmov (%p1782_p9), %v1988_v41 }
 0x2a3   : > { %v2001_v50 = vadd.f32 %v2000_v60, %v1948_v58   ;;  %v7036_v35 = vmov (%p1782_p9), %v1975_v53  ;;  %v7037_v11 = vmov (%p1782_p9), %v1962_v30 }
 0x2a5   : > { %v7029_v37 = vmov %v2001_v50  ;;  %v7034_v28 = vmov (%p1782_p9), %v2001_v50 }
 0x2a6 PF:  { %s3315_s24 = sshll.u32 %s6007_s21, 2  ;;  %v2008_v34 = vmul.f32 %v4641_v11, %v4791_v0  ;;  %v2009_v22 = vmul.f32 %v4637_v35, %v4793_v1  ;;  %v2011_v47 = vmul.f32 %v4633_v44, %v4795_v2  ;;  %s6265_s25 = sld [smem:[#allocation7 + $0x5]]  ;;  %v2021_v37 = vmul.f32 %v4641_v11, %v4799_v4  ;;  %v4641_v11 = vphi %v7027_v11, %v7037_v11   ;;  %v4637_v35 = vphi %v7026_v35, %v7036_v35   ;;  %v4633_v44 = vphi %v7025_v44, %v7035_v44   ;;  %v4629_v28 = vphi %v7024_v28, %v7034_v28   ;;  %v4625_v38 = vphi %v7023_v38, %v7033_v38  }
 0x2a7   :  { %s6268_s26 = ssub.s32 %s7083_s18, %s3315_s24  ;;  %v2022_v43 = vmul.f32 %v4637_v35, %v4801_v5  ;;  %v2024_v46 = vmul.f32 %v4633_v44, %v4803_v6  ;;  %s6274_s27 = sld [smem:[#allocation6 + $0x5]]  ;;  %v2013_v58 = vmul.f32 %v4629_v28, %v4797_v3  ;;  %v2015_v55 = vmul.f32 %v4625_v38, %v4825_v18 }
 0x2a8   :  { %p2005_p10 = scmp.gt.s32.totalorder %s6268_s26, 0  ;;  %v2010_v29 = vadd.f32 %v2009_v22, %v2008_v34  ;;  %v2034_v48 = vmul.f32 %v4641_v11, %v4807_v8  ;;  %v2026_v54 = vmul.f32 %v4629_v28, %v4805_v7  ;;  %v2035_v27 = vmul.f32 %v4637_v35, %v4809_v9  ;;  %s6286_s28 = sld [smem:[#allocation2 + $0x5]] }
 0x2a9   :  { %v2023_v24 = vadd.f32 %v2022_v43, %v2021_v37  ;;  %v2037_v23 = vmul.f32 %v4633_v44, %v4811_v10  ;;  %v2028_v31 = vmul.f32 %v4625_v38, %v4827_v19  ;;  %v2047_v62 = vmul.f32 %v4641_v11, %v4815_v13  ;;  %p2061_p12 = scmp.gt.s32.totalorder %s6268_s26, 1  ;;  %p2117_p13 = scmp.gt.s32.totalorder %s6268_s26, 2 }
 0x2aa   :  { %v2012_v39 = vadd.f32 %v2011_v47, %v2010_v29  ;;  %v2048_v42 = vmul.f32 %v4637_v35, %v4817_v14  ;;  %s2006_s29 = scalar_select %p2005_p10, %s5970_s3, 0.0  ;;  %v2036_v57 = vadd.f32 %v2035_v27, %v2034_v48  ;;  %v2039_v25 = vmul.f32 %v4629_v28, %v4813_v12 }
 0x2ab   :  { %v2025_v49 = vadd.f32 %v2024_v46, %v2023_v24  ;;  %v2050_v59 = vmul.f32 %v4633_v44, %v4819_v15  ;;  %v2052_v56 = vmul.f32 %v4629_v28, %v4823_v17  ;;  %v2041_v40 = vmul.f32 %v4625_v38, %v4829_v20  ;;  %s2062_s4 = scalar_select %p2061_p12, %s5970_s3, 0.0 }
 0x2ac   :  { %v2014_v61 = vadd.f32 %v2013_v58, %v2012_v39  ;;  %v2049_v45 = vadd.f32 %v2048_v42, %v2047_v62  ;;  %v2038_v33 = vadd.f32 %v2037_v23, %v2036_v57  ;;  %p2178_p11 = scmp.gt.s32.totalorder %s6265_s25, 0  ;;  %v2054_v52 = vmul.f32 %v4625_v38, %v4832_v21  ;;  %s7089_s3 = smov (!%p2117_p13, %s5970_s3), 0.0 }
 0x2ad   :  { %v2027_v36 = vadd.f32 %v2026_v54, %v2025_v49  ;;  %v6304_v63 = vstv %s6274_s27  ;;  %v2007_v32 = vstv %s2006_s29 }
 0x2ae   :  { %v2016_v26 = vadd.f32 %v2015_v55, %v2014_v61  ;;  %v2051_v51 = vadd.f32 %v2050_v59, %v2049_v45  ;;  %v2040_v53 = vadd.f32 %v2039_v25, %v2038_v33  ;;  %s7087_s25 = smov (!%p2178_p11, %s6265_s25), 0  ;;  %v2060_v22 = vadd.f32 %v4625_v38, %v2007_v32 }
 0x2af   :  { %v2029_v30 = vadd.f32 %v2028_v31, %v2027_v36  ;;  %v2183_v47 = vstv %s6286_s28   ;;  %s6311_s2 = sshrl.u32 %s7087_s25, 2 }
 0x2b0   :  { %v3316_v41 = vclamps-f32 %v2016_v26, 100000.0  ;;  %v2053_v60 = vadd.f32 %v2052_v56, %v2051_v51  ;;  %v2042_v34 = vadd.f32 %v2041_v40, %v2040_v53  ;;  %v2071_v54 = vmul.f32 %v2060_v22, %v4825_v18  ;;  %p3331_p0 = scmp.le.s32.totalorder %s6311_s2, 0 }
 0x2b1   :  { %v3317_v50 = vclamps-f32 %v2029_v30, 100000.0  ;;  %v2084_v49 = vmul.f32 %v2060_v22, %v4827_v19  ;;  %v2097_v30 = vmul.f32 %v2060_v22, %v4829_v20  ;;  %s6396_s30 = smov (!%p3331_p0), 0  }
 0x2b2   :  { %v2019_v37 = vmul.f32 %v3316_v41, %v2007_v32  ;;  %v2055_v43 = vadd.f32 %v2054_v52, %v2053_v60  ;;  %v3318_v29 = vclamps-f32 %v2042_v34, 100000.0 }
 0x2b3   :  { %v2032_v46 = vmul.f32 %v3317_v50, %v2007_v32 }
 0x2b4   :  { %v2020_v58 = vadd.f32 %v4641_v11, %v2019_v37  ;;  %v3319_v55 = vclamps-f32 %v2055_v43, 100000.0  ;;  %v2045_v24 = vmul.f32 %v3318_v29, %v2007_v32  ;;  %v2110_v43 = vmul.f32 %v2060_v22, %v4832_v21 }
 0x2b5   :  { %v2033_v48 = vadd.f32 %v4637_v35, %v2032_v46 }
 0x2b6   :  { %v2058_v27 = vmul.f32 %v3319_v55, %v2007_v32  ;;  %v2064_v23 = vmul.f32 %v2020_v58, %v4791_v0  ;;  %v2077_v39 = vmul.f32 %v2020_v58, %v4799_v4  ;;  %v2090_v38 = vmul.f32 %v2020_v58, %v4807_v8 }
 0x2b7   :  { %v2046_v31 = vadd.f32 %v4633_v44, %v2045_v24  ;;  %v2065_v62 = vmul.f32 %v2033_v48, %v4793_v1  ;;  %v2078_v42 = vmul.f32 %v2033_v48, %v4801_v5  ;;  %v2091_v11 = vmul.f32 %v2033_v48, %v4809_v9 }
 0x2b8   :  { %v2059_v35 = vadd.f32 %v4629_v28, %v2058_v27  ;;  %v2103_v57 = vmul.f32 %v2020_v58, %v4815_v13  ;;  %v2104_v25 = vmul.f32 %v2033_v48, %v4817_v14  ;;  %v2063_v55 = vstv %s2062_s4 }
 0x2b9   :  { %v2066_v59 = vadd.f32 %v2065_v62, %v2064_v23  ;;  %v2067_v44 = vmul.f32 %v2046_v31, %v4795_v2  ;;  %v2079_v61 = vadd.f32 %v2078_v42, %v2077_v39  ;;  %v2080_v45 = vmul.f32 %v2046_v31, %v4803_v6 }
 0x2ba   :  { %v2069_v56 = vmul.f32 %v2059_v35, %v4797_v3  ;;  %v2082_v36 = vmul.f32 %v2059_v35, %v4805_v7  ;;  %v2092_v28 = vadd.f32 %v2091_v11, %v2090_v38  ;;  %v2093_v33 = vmul.f32 %v2046_v31, %v4811_v10 }
 0x2bb   :  { %v2068_v40 = vadd.f32 %v2067_v44, %v2066_v59  ;;  %v2081_v26 = vadd.f32 %v2080_v45, %v2079_v61  ;;  %v2095_v51 = vmul.f32 %v2059_v35, %v4813_v12  ;;  %v2105_v52 = vadd.f32 %v2104_v25, %v2103_v57 }
 0x2bc   :  { %v2094_v32 = vadd.f32 %v2093_v33, %v2092_v28  ;;  %v2106_v53 = vmul.f32 %v2046_v31, %v4819_v15  ;;  %v2108_v41 = vmul.f32 %v2059_v35, %v4823_v17  ;;  %v2116_v42 = vadd.f32 %v2063_v55, %v2060_v22 }
 0x2bd   :  { %v2070_v60 = vadd.f32 %v2069_v56, %v2068_v40  ;;  %v2083_v50 = vadd.f32 %v2082_v36, %v2081_v26 }
 0x2be   :  { %v2096_v34 = vadd.f32 %v2095_v51, %v2094_v32  ;;  %v2107_v37 = vadd.f32 %v2106_v53, %v2105_v52 }
 0x2bf   :  { %v2072_v46 = vadd.f32 %v2071_v54, %v2070_v60  ;;  %v2085_v29 = vadd.f32 %v2084_v49, %v2083_v50  ;;  %v2127_v54 = vmul.f32 %v2116_v42, %v4825_v18  ;;  %v2140_v49 = vmul.f32 %v2116_v42, %v4827_v19 }
 0x2c0   :  { %v2098_v24 = vadd.f32 %v2097_v30, %v2096_v34  ;;  %v2109_v27 = vadd.f32 %v2108_v41, %v2107_v37 }
 0x2c1   :  { %v3320_v23 = vclamps-f32 %v2072_v46, 100000.0  ;;  %v3321_v39 = vclamps-f32 %v2085_v29, 100000.0 }
 0x2c2   :  { %v3322_v38 = vclamps-f32 %v2098_v24, 100000.0  ;;  %v2111_v62 = vadd.f32 %v2110_v43, %v2109_v27  ;;  %v2153_v43 = vmul.f32 %v2116_v42, %v4829_v20 }
 0x2c3   :  { %v2075_v11 = vmul.f32 %v3320_v23, %v2063_v55  ;;  %v2088_v57 = vmul.f32 %v3321_v39, %v2063_v55  ;;  %v2166_v39 = vmul.f32 %v2116_v42, %v4832_v21 }
 0x2c4   :  { %v2101_v25 = vmul.f32 %v3322_v38, %v2063_v55  ;;  %v3323_v59 = vclamps-f32 %v2111_v62, 100000.0 }
 0x2c5   :  { %v2076_v44 = vadd.f32 %v2075_v11, %v2020_v58  ;;  %v2089_v61 = vadd.f32 %v2088_v57, %v2033_v48 }
 0x2c6   :  { %v2102_v45 = vadd.f32 %v2101_v25, %v2046_v31  ;;  %v2114_v56 = vmul.f32 %v3323_v59, %v2063_v55  ;;  %v2119_v25 = vstv %s7089_s3 }
 0x2c7   :  { %v2120_v36 = vmul.f32 %v2076_v44, %v4791_v0  ;;  %v2121_v28 = vmul.f32 %v2089_v61, %v4793_v1  ;;  %v2133_v33 = vmul.f32 %v2076_v44, %v4799_v4  ;;  %v2134_v22 = vmul.f32 %v2089_v61, %v4801_v5 }
 0x2c8   :  { %v2115_v40 = vadd.f32 %v2114_v56, %v2059_v35  ;;  %v2123_v58 = vmul.f32 %v2102_v45, %v4795_v2  ;;  %v2136_v48 = vmul.f32 %v2102_v45, %v4803_v6  ;;  %v2146_v31 = vmul.f32 %v2076_v44, %v4807_v8 }
 0x2c9   :  { %v2122_v26 = vadd.f32 %v2121_v28, %v2120_v36  ;;  %v2135_v51 = vadd.f32 %v2134_v22, %v2133_v33  ;;  %v2147_v52 = vmul.f32 %v2089_v61, %v4809_v9  ;;  %v2149_v32 = vmul.f32 %v2102_v45, %v4811_v10 }
 0x2ca   :  { %v2125_v30 = vmul.f32 %v2115_v40, %v4797_v3  ;;  %v2138_v53 = vmul.f32 %v2115_v40, %v4805_v7  ;;  %v2151_v35 = vmul.f32 %v2115_v40, %v4813_v12  ;;  %v2159_v41 = vmul.f32 %v2076_v44, %v4815_v13 }
 0x2cb   :  { %v2124_v60 = vadd.f32 %v2123_v58, %v2122_v26  ;;  %v2137_v50 = vadd.f32 %v2136_v48, %v2135_v51  ;;  %v2148_v34 = vadd.f32 %v2147_v52, %v2146_v31  ;;  %v2160_v37 = vmul.f32 %v2089_v61, %v4817_v14 }
 0x2cc   :  { %v2162_v46 = vmul.f32 %v2102_v45, %v4819_v15  ;;  %v2164_v29 = vmul.f32 %v2115_v40, %v4823_v17 }
 0x2cd   :  { %v2126_v55 = vadd.f32 %v2125_v30, %v2124_v60  ;;  %v2139_v24 = vadd.f32 %v2138_v53, %v2137_v50  ;;  %v2150_v27 = vadd.f32 %v2149_v32, %v2148_v34  ;;  %v2161_v23 = vadd.f32 %v2160_v37, %v2159_v41 }
 0x2cf   :  { %v2128_v38 = vadd.f32 %v2127_v54, %v2126_v55  ;;  %v2141_v62 = vadd.f32 %v2140_v49, %v2139_v24  ;;  %v2152_v11 = vadd.f32 %v2151_v35, %v2150_v27  ;;  %v2163_v57 = vadd.f32 %v2162_v46, %v2161_v23 }
 0x2d1   :  { %v3324_v59 = vclamps-f32 %v2128_v38, 100000.0  ;;  %v3325_v56 = vclamps-f32 %v2141_v62, 100000.0  ;;  %v2154_v36 = vadd.f32 %v2153_v43, %v2152_v11  ;;  %v2165_v28 = vadd.f32 %v2164_v29, %v2163_v57 }
 0x2d3   :  { %v2131_v33 = vmul.f32 %v3324_v59, %v2119_v25  ;;  %v2144_v22 = vmul.f32 %v3325_v56, %v2119_v25  ;;  %v3326_v58 = vclamps-f32 %v2154_v36, 100000.0  ;;  %v2167_v48 = vadd.f32 %v2166_v39, %v2165_v28 }
 0x2d5   :  { %v2132_v31 = vadd.f32 %v2131_v33, %v2076_v44   ;;  %v2145_v26 = vadd.f32 %v2144_v22, %v2089_v61   ;;  %v2157_v51 = vmul.f32 %v3326_v58, %v2119_v25  ;;  %v3327_v52 = vclamps-f32 %v2167_v48, 100000.0 }
 0x2d6   :  { %v7038_v44 = vmov %v2183_v47 }
 0x2d7   :  { %v2158_v32 = vadd.f32 %v2157_v51, %v2102_v45   ;;  %v2170_v30 = vmul.f32 %v3327_v52, %v2119_v25  ;;  %v2172_v42 = vsel %vm135_vm0, %v2132_v31, 0.0  ;;  %v7041_v41 = vmov %v2145_v26 }
 0x2d8   :  { %v2173_v54 = vsel %vm136_vm1, %v2145_v26, %v2172_v42  ;;  %3112 = sbr.rel (%p3331_p0) target bundleno = 803 (0x323), region = 166 }
 0x2d9   :  { %v2171_v49 = vadd.f32 %v2170_v30, %v2115_v40   ;;  %v2174_v53 = vsel %vm137_vm2, %v2158_v32, %v2173_v54  ;;  %v7040_v45 = vmov %v2158_v32  ;;  %v7042_v40 = vmov %v2132_v31 }
 0x2db   :  { %v2175_v35 = vsel %vm138_vm3, %v2171_v49, %v2174_v53  ;;  %v7039_v61 = vmov %v2171_v49 }
 0x2dc   :  { %2176 = vst [vmem:[#allocation13 + $0x5] sm:$0x1] %v2175_v35 }
 0x2dd LB: > { %v2197_v60 = vmul.f32 %v4657_v26, %v4793_v1  ;;  %v2196_v50 = vmul.f32 %v4661_v31, %v4791_v0  ;;  %v2199_v34 = vmul.f32 %v4653_v32, %v4795_v2  ;;  %v2209_v37 = vmul.f32 %v4661_v31, %v4799_v4  ;;  %s2188_s30 = sadd.s32 1, %s4665_s30   ;;  %s4665_s30 = sphi %s6396_s30, %s2188_s30   ;;  %v4661_v31 = vphi %v2132_v31, %v7047_v31   ;;  %v4657_v26 = vphi %v2145_v26, %v7046_v26   ;;  %v4653_v32 = vphi %v2158_v32, %v7045_v32   ;;  %v4649_v49 = vphi %v2171_v49, %v7044_v49   ;;  %v4645_v47 = vphi %v2183_v47, %v7043_v47  }
 0x2de   : > { %v2201_v43 = vmul.f32 %v4649_v49, %v4797_v3  ;;  %v2203_v46 = vmul.f32 %v4645_v47, %v4825_v18  ;;  %v2210_v29 = vmul.f32 %v4657_v26, %v4801_v5  ;;  %v2212_v55 = vmul.f32 %v4653_v32, %v4803_v6  ;;  %p2187_p1 = scmp.ge.s32.totalorder %s2188_s30, %s6311_s2 }
 0x2df   : > { %v2198_v24 = vadd.f32 %v2197_v60, %v2196_v50  ;;  %v2222_v27 = vmul.f32 %v4661_v31, %v4807_v8  ;;  %v2223_v23 = vmul.f32 %v4657_v26, %v4809_v9  ;;  %v2225_v39 = vmul.f32 %v4653_v32, %v4811_v10 }
 0x2e0   : > { %v2211_v38 = vadd.f32 %v2210_v29, %v2209_v37  ;;  %v2214_v62 = vmul.f32 %v4649_v49, %v4805_v7  ;;  %v2227_v11 = vmul.f32 %v4649_v49, %v4813_v12  ;;  %v2235_v57 = vmul.f32 %v4661_v31, %v4815_v13 }
 0x2e1   : > { %v2200_v25 = vadd.f32 %v2199_v34, %v2198_v24  ;;  %v2224_v59 = vadd.f32 %v2223_v23, %v2222_v27  ;;  %v2236_v56 = vmul.f32 %v4657_v26, %v4817_v14  ;;  %v2238_v36 = vmul.f32 %v4653_v32, %v4819_v15 }
 0x2e2   : > { %v2213_v28 = vadd.f32 %v2212_v55, %v2211_v38  ;;  %v2216_v33 = vmul.f32 %v4645_v47, %v4827_v19  ;;  %v2229_v22 = vmul.f32 %v4645_v47, %v4829_v20  ;;  %v2240_v52 = vmul.f32 %v4649_v49, %v4823_v17 }
 0x2e3   : > { %v2202_v58 = vadd.f32 %v2201_v43, %v2200_v25  ;;  %v2226_v48 = vadd.f32 %v2225_v39, %v2224_v59  ;;  %v2237_v51 = vadd.f32 %v2236_v56, %v2235_v57  ;;  %v2242_v35 = vmul.f32 %v4645_v47, %v4832_v21 }
 0x2e4   : > { %v2215_v30 = vadd.f32 %v2214_v62, %v2213_v28  ;;  %v2248_v40 = vadd.f32 %v4645_v47, %v6304_v63 }
 0x2e5   : > { %v2204_v42 = vadd.f32 %v2203_v46, %v2202_v58  ;;  %v2228_v54 = vadd.f32 %v2227_v11, %v2226_v48  ;;  %v2239_v53 = vadd.f32 %v2238_v36, %v2237_v51 }
 0x2e6   : > { %v2217_v44 = vadd.f32 %v2216_v33, %v2215_v30  ;;  %v6436_v29 = vadd.f32 %v2248_v40, %v6304_v63  ;;  %v2256_v27 = vmul.f32 %v2248_v40, %v4825_v18  ;;  %v2269_v39 = vmul.f32 %v2248_v40, %v4827_v19 }
 0x2e7   : > { %v3332_v61 = vclamps-f32 %v2204_v42, 100000.0  ;;  %v2230_v45 = vadd.f32 %v2229_v22, %v2228_v54  ;;  %v2241_v41 = vadd.f32 %v2240_v52, %v2239_v53  ;;  %v2282_v47 = vmul.f32 %v2248_v40, %v4829_v20 }
 0x2e8   : > { %v3333_v60 = vclamps-f32 %v2217_v44, 100000.0  ;;  %v6444_v38 = vadd.f32 %v6436_v29, %v6304_v63 }
 0x2e9   : > { %v2207_v50 = vmul.f32 %v3332_v61, %v6304_v63  ;;  %v3334_v34 = vclamps-f32 %v2230_v45, 100000.0  ;;  %v2243_v37 = vadd.f32 %v2242_v35, %v2241_v41 }
 0x2ea   : > { %v2220_v43 = vmul.f32 %v3333_v60, %v6304_v63  ;;  %v6466_v41 = vadd.f32 %v6444_v38, %v6304_v63  }
 0x2eb   : > { %v2208_v46 = vadd.f32 %v4661_v31, %v2207_v50  ;;  %v2233_v55 = vmul.f32 %v3334_v34, %v6304_v63  ;;  %v3335_v24 = vclamps-f32 %v2243_v37, 100000.0 }
 0x2ec   : > { %v2221_v23 = vadd.f32 %v4657_v26, %v2220_v43  ;;  %v2295_v43 = vmul.f32 %v2248_v40, %v4832_v21 }
 0x2ed   : > { %v2234_v62 = vadd.f32 %v4653_v32, %v2233_v55  ;;  %v2246_v11 = vmul.f32 %v3335_v24, %v6304_v63  ;;  %v2249_v57 = vmul.f32 %v2208_v46, %v4791_v0  ;;  %v2262_v31 = vmul.f32 %v2208_v46, %v4799_v4 }
 0x2ee   : > { %v2250_v25 = vmul.f32 %v2221_v23, %v4793_v1  ;;  %v2263_v59 = vmul.f32 %v2221_v23, %v4801_v5  ;;  %v2275_v26 = vmul.f32 %v2208_v46, %v4807_v8  ;;  %v2276_v56 = vmul.f32 %v2221_v23, %v4809_v9 }
 0x2ef   : > { %v2247_v36 = vadd.f32 %v4649_v49, %v2246_v11  ;;  %v2252_v28 = vmul.f32 %v2234_v62, %v4795_v2  ;;  %v2265_v32 = vmul.f32 %v2234_v62, %v4803_v6  ;;  %v2278_v33 = vmul.f32 %v2234_v62, %v4811_v10 }
 0x2f0   : > { %v2251_v22 = vadd.f32 %v2250_v25, %v2249_v57  ;;  %v2264_v58 = vadd.f32 %v2263_v59, %v2262_v31  ;;  %v2277_v48 = vadd.f32 %v2276_v56, %v2275_v26  ;;  %v2288_v51 = vmul.f32 %v2208_v46, %v4815_v13 }
 0x2f1   : > { %v2254_v52 = vmul.f32 %v2247_v36, %v4797_v3  ;;  %v2267_v30 = vmul.f32 %v2247_v36, %v4805_v7  ;;  %v2280_v42 = vmul.f32 %v2247_v36, %v4813_v12  ;;  %v2289_v54 = vmul.f32 %v2221_v23, %v4817_v14 }
 0x2f2   : > { %v2253_v49 = vadd.f32 %v2252_v28, %v2251_v22  ;;  %v2266_v53 = vadd.f32 %v2265_v32, %v2264_v58  ;;  %v2279_v35 = vadd.f32 %v2278_v33, %v2277_v48  ;;  %v2291_v44 = vmul.f32 %v2234_v62, %v4819_v15 }
 0x2f3   : > { %v2290_v61 = vadd.f32 %v2289_v54, %v2288_v51  ;;  %v2293_v45 = vmul.f32 %v2247_v36, %v4823_v17 }
 0x2f4   : > { %v2255_v60 = vadd.f32 %v2254_v52, %v2253_v49  ;;  %v2268_v50 = vadd.f32 %v2267_v30, %v2266_v53  ;;  %v2281_v34 = vadd.f32 %v2280_v42, %v2279_v35 }
 0x2f5   : > { %v2292_v37 = vadd.f32 %v2291_v44, %v2290_v61 }
 0x2f6   : > { %v2257_v55 = vadd.f32 %v2256_v27, %v2255_v60  ;;  %v2270_v24 = vadd.f32 %v2269_v39, %v2268_v50  ;;  %v2283_v11 = vadd.f32 %v2282_v47, %v2281_v34  ;;  %v2309_v27 = vmul.f32 %v6436_v29, %v4825_v18 }
 0x2f7   : > { %v2294_v57 = vadd.f32 %v2293_v45, %v2292_v37 }
 0x2f8   : > { %v3336_v31 = vclamps-f32 %v2257_v55, 100000.0  ;;  %v3337_v25 = vclamps-f32 %v2270_v24, 100000.0  ;;  %v3338_v59 = vclamps-f32 %v2283_v11, 100000.0  ;;  %v2335_v55 = vmul.f32 %v6436_v29, %v4829_v20 }
 0x2f9   : > { %v2296_v26 = vadd.f32 %v2295_v43, %v2294_v57  ;;  %v2322_v43 = vmul.f32 %v6436_v29, %v4827_v19 }
 0x2fa   : > { %v2260_v56 = vmul.f32 %v3336_v31, %v6304_v63  ;;  %v2273_v28 = vmul.f32 %v3337_v25, %v6304_v63  ;;  %v2286_v32 = vmul.f32 %v3338_v59, %v6304_v63 }
 0x2fb   : > { %v3339_v33 = vclamps-f32 %v2296_v26, 100000.0 }
 0x2fc   : > { %v2261_v22 = vadd.f32 %v2260_v56, %v2208_v46  ;;  %v2274_v58 = vadd.f32 %v2273_v28, %v2221_v23  ;;  %v2287_v48 = vadd.f32 %v2286_v32, %v2234_v62  ;;  %v2348_v28 = vmul.f32 %v6436_v29, %v4832_v21 }
 0x2fd   : > { %v2299_v40 = vmul.f32 %v3339_v33, %v6304_v63  ;;  %v2375_v29 = vmul.f32 %v6444_v38, %v4827_v19 }
 0x2fe   : > { %v2302_v39 = vmul.f32 %v2261_v22, %v4791_v0  ;;  %v2303_v47 = vmul.f32 %v2274_v58, %v4793_v1  ;;  %v2305_v51 = vmul.f32 %v2287_v48, %v4795_v2  ;;  %v2315_v52 = vmul.f32 %v2261_v22, %v4799_v4 }
 0x2ff   : > { %v2300_v30 = vadd.f32 %v2299_v40, %v2247_v36  ;;  %v2316_v42 = vmul.f32 %v2274_v58, %v4801_v5  ;;  %v2318_v46 = vmul.f32 %v2287_v48, %v4803_v6  ;;  %v2328_v23 = vmul.f32 %v2261_v22, %v4807_v8 }
 0x300   : > { %v2304_v62 = vadd.f32 %v2303_v47, %v2302_v39  ;;  %v2329_v54 = vmul.f32 %v2274_v58, %v4809_v9  ;;  %v2331_v49 = vmul.f32 %v2287_v48, %v4811_v10  ;;  %v2341_v53 = vmul.f32 %v2261_v22, %v4815_v13 }
 0x301   : > { %v2307_v35 = vmul.f32 %v2300_v30, %v4797_v3  ;;  %v2317_v44 = vadd.f32 %v2316_v42, %v2315_v52  ;;  %v2320_v61 = vmul.f32 %v2300_v30, %v4805_v7  ;;  %v2333_v36 = vmul.f32 %v2300_v30, %v4813_v12 }
 0x302   : > { %v2306_v45 = vadd.f32 %v2305_v51, %v2304_v62  ;;  %v2330_v60 = vadd.f32 %v2329_v54, %v2328_v23  ;;  %v2342_v50 = vmul.f32 %v2274_v58, %v4817_v14  ;;  %v2344_v34 = vmul.f32 %v2287_v48, %v4819_v15 }
 0x303   : > { %v2319_v37 = vadd.f32 %v2318_v46, %v2317_v44  ;;  %v2346_v31 = vmul.f32 %v2300_v30, %v4823_v17 }
 0x304   : > { %v2308_v24 = vadd.f32 %v2307_v35, %v2306_v45  ;;  %v2332_v11 = vadd.f32 %v2331_v49, %v2330_v60  ;;  %v2343_v57 = vadd.f32 %v2342_v50, %v2341_v53  ;;  %v2362_v49 = vmul.f32 %v6444_v38, %v4825_v18 }
 0x305   : > { %v2321_v25 = vadd.f32 %v2320_v61, %v2319_v37  ;;  %v2388_v53 = vmul.f32 %v6444_v38, %v4829_v20 }
 0x306   : > { %v2310_v59 = vadd.f32 %v2309_v27, %v2308_v24  ;;  %v2334_v26 = vadd.f32 %v2333_v36, %v2332_v11  ;;  %v2345_v56 = vadd.f32 %v2344_v34, %v2343_v57 }
 0x307   : > { %v2323_v32 = vadd.f32 %v2322_v43, %v2321_v25 }
 0x308   : > { %v3340_v33 = vclamps-f32 %v2310_v59, 100000.0  ;;  %v2336_v40 = vadd.f32 %v2335_v55, %v2334_v26  ;;  %v2347_v39 = vadd.f32 %v2346_v31, %v2345_v56 }
 0x309   : > { %v3341_v47 = vclamps-f32 %v2323_v32, 100000.0 }
 0x30a   : > { %v2313_v51 = vmul.f32 %v3340_v33, %v6304_v63  ;;  %v3342_v52 = vclamps-f32 %v2336_v40, 100000.0  ;;  %v2349_v42 = vadd.f32 %v2348_v28, %v2347_v39 }
 0x30b   : > { %v2326_v46 = vmul.f32 %v3341_v47, %v6304_v63 }
 0x30c   : > { %v2314_v23 = vadd.f32 %v2313_v51, %v2261_v22  ;;  %v2339_v62 = vmul.f32 %v3342_v52, %v6304_v63  ;;  %v3343_v27 = vclamps-f32 %v2349_v42, 100000.0  ;;  %v2401_v52 = vmul.f32 %v6444_v38, %v4832_v21 }
 0x30d   : > { %v2327_v54 = vadd.f32 %v2326_v46, %v2274_v58 }
 0x30e   : > { %v2340_v35 = vadd.f32 %v2339_v62, %v2287_v48  ;;  %v2352_v44 = vmul.f32 %v3343_v27, %v6304_v63  ;;  %v2355_v61 = vmul.f32 %v2314_v23, %v4791_v0  ;;  %v2368_v22 = vmul.f32 %v2314_v23, %v4799_v4 }
 0x30f   : > { %v2356_v36 = vmul.f32 %v2327_v54, %v4793_v1  ;;  %v2369_v58 = vmul.f32 %v2327_v54, %v4801_v5  ;;  %v2381_v45 = vmul.f32 %v2314_v23, %v4807_v8  ;;  %v2382_v60 = vmul.f32 %v2327_v54, %v4809_v9 }
 0x310   : > { %v2353_v50 = vadd.f32 %v2352_v44, %v2300_v30  ;;  %v2358_v34 = vmul.f32 %v2340_v35, %v4795_v2  ;;  %v2371_v37 = vmul.f32 %v2340_v35, %v4803_v6  ;;  %v2384_v48 = vmul.f32 %v2340_v35, %v4811_v10 }
 0x311   : > { %v2357_v43 = vadd.f32 %v2356_v36, %v2355_v61  ;;  %v2370_v55 = vadd.f32 %v2369_v58, %v2368_v22  ;;  %v2383_v24 = vadd.f32 %v2382_v60, %v2381_v45  ;;  %v2394_v11 = vmul.f32 %v2314_v23, %v4815_v13 }
 0x312   : > { %v2360_v57 = vmul.f32 %v2353_v50, %v4797_v3  ;;  %v2373_v31 = vmul.f32 %v2353_v50, %v4805_v7  ;;  %v2386_v25 = vmul.f32 %v2353_v50, %v4813_v12  ;;  %v2395_v59 = vmul.f32 %v2327_v54, %v4817_v14 }
 0x313   : > { %v2359_v30 = vadd.f32 %v2358_v34, %v2357_v43  ;;  %v2372_v26 = vadd.f32 %v2371_v37, %v2370_v55  ;;  %v2385_v56 = vadd.f32 %v2384_v48, %v2383_v24  ;;  %v2397_v28 = vmul.f32 %v2340_v35, %v4819_v15 }
 0x314   : > { %v2396_v32 = vadd.f32 %v2395_v59, %v2394_v11  ;;  %v2399_v33 = vmul.f32 %v2353_v50, %v4823_v17 }
 0x315   : > { %v2361_v40 = vadd.f32 %v2360_v57, %v2359_v30  ;;  %v2374_v39 = vadd.f32 %v2373_v31, %v2372_v26  ;;  %v2387_v47 = vadd.f32 %v2386_v25, %v2385_v56 }
 0x316   : > { %v2398_v51 = vadd.f32 %v2397_v28, %v2396_v32 }
 0x317   : > { %v2363_v42 = vadd.f32 %v2362_v49, %v2361_v40  ;;  %v2376_v46 = vadd.f32 %v2375_v29, %v2374_v39  ;;  %v2389_v62 = vadd.f32 %v2388_v53, %v2387_v47  ;;  %v7043_v47 = vmov %v6466_v41 }
 0x318   : > { %v2400_v27 = vadd.f32 %v2399_v33, %v2398_v51 }
 0x319   : > { %v3344_v44 = vclamps-f32 %v2363_v42, 100000.0  ;;  %v3345_v61 = vclamps-f32 %v2376_v46, 100000.0  ;;  %v3346_v22 = vclamps-f32 %v2389_v62, 100000.0 }
 0x31a   : > { %v2402_v36 = vadd.f32 %v2401_v52, %v2400_v27 }
 0x31b   : > { %v2366_v58 = vmul.f32 %v3344_v44, %v6304_v63  ;;  %v2379_v45 = vmul.f32 %v3345_v61, %v6304_v63  ;;  %v2392_v60 = vmul.f32 %v3346_v22, %v6304_v63  ;;  %v7048_v44 = vmov (%p2187_p1), %v6466_v41 }
 0x31c   : > { %v3347_v34 = vclamps-f32 %v2402_v36, 100000.0 }
 0x31d   : > { %v2367_v37 = vadd.f32 %v2366_v58, %v2314_v23   ;;  %v2380_v48 = vadd.f32 %v2379_v45, %v2327_v54   ;;  %v2393_v43 = vadd.f32 %v2392_v60, %v2340_v35  }
 0x31e   : > { %v2405_v38 = vmul.f32 %v3347_v34, %v6304_v63  ;;  %2190 = sbr.rel (!%p2187_p1) target bundleno = 733 (0x2dd), region = 172 }
 0x31f   : > { %v7045_v32 = vmov %v2393_v43  ;;  %v7046_v26 = vmov %v2380_v48  ;;  %v7047_v31 = vmov %v2367_v37  ;;  %v7050_v45 = vmov (%p2187_p1), %v2393_v43 }
 0x320   : > { %v2406_v55 = vadd.f32 %v2405_v38, %v2353_v50   ;;  %v7051_v41 = vmov (%p2187_p1), %v2380_v48  ;;  %v7052_v40 = vmov (%p2187_p1), %v2367_v37 }
 0x322   : > { %v7044_v49 = vmov %v2406_v55  ;;  %v7049_v61 = vmov (%p2187_p1), %v2406_v55 }
 0x323 PF:  { %s3348_s7 = sshll.u32 %s6311_s2, 2  ;;  %v2413_v63 = vmul.f32 %v4685_v40, %v4791_v0  ;;  %v2414_v23 = vmul.f32 %v4681_v41, %v4793_v1  ;;  %v2416_v54 = vmul.f32 %v4677_v45, %v4795_v2  ;;  %s6569_s8 = sld [smem:[#allocation7 + $0x6]]  ;;  %v2426_v49 = vmul.f32 %v4685_v40, %v4799_v4  ;;  %v4685_v40 = vphi %v7042_v40, %v7052_v40   ;;  %v4681_v41 = vphi %v7041_v41, %v7051_v41   ;;  %v4677_v45 = vphi %v7040_v45, %v7050_v45   ;;  %v4673_v61 = vphi %v7039_v61, %v7049_v61   ;;  %v4669_v44 = vphi %v7038_v44, %v7048_v44  }
 0x324   :  { %s6572_s9 = ssub.s32 %s7087_s25, %s3348_s7  ;;  %v2427_v29 = vmul.f32 %v4681_v41, %v4801_v5  ;;  %v2429_v53 = vmul.f32 %v4677_v45, %v4803_v6  ;;  %s6578_s10 = sld [smem:[#allocation6 + $0x6]]  ;;  %v2418_v50 = vmul.f32 %v4673_v61, %v4797_v3  ;;  %v2420_v24 = vmul.f32 %v4669_v44, %v4825_v18 }
 0x325   :  { %p2410_p2 = scmp.gt.s32.totalorder %s6572_s9, 0  ;;  %v2415_v35 = vadd.f32 %v2414_v23, %v2413_v63  ;;  %v2439_v11 = vmul.f32 %v4685_v40, %v4807_v8  ;;  %v2431_v31 = vmul.f32 %v4673_v61, %v4805_v7  ;;  %v2440_v25 = vmul.f32 %v4681_v41, %v4809_v9  ;;  %s6590_s11 = sld [smem:[#allocation2 + $0x6]] }
 0x326   :  { %v2428_v57 = vadd.f32 %v2427_v29, %v2426_v49  ;;  %v2442_v59 = vmul.f32 %v4677_v45, %v4811_v10  ;;  %v2433_v26 = vmul.f32 %v4669_v44, %v4827_v19  ;;  %v2452_v56 = vmul.f32 %v4685_v40, %v4815_v13  ;;  %p2466_p4 = scmp.gt.s32.totalorder %s6572_s9, 1  ;;  %p2522_p5 = scmp.gt.s32.totalorder %s6572_s9, 2 }
 0x327   :  { %v2417_v30 = vadd.f32 %v2416_v54, %v2415_v35  ;;  %v2453_v28 = vmul.f32 %v4681_v41, %v4817_v14  ;;  %s2411_s12 = scalar_select %p2410_p2, %s6274_s27, 0.0  ;;  %v2441_v33 = vadd.f32 %v2440_v25, %v2439_v11  ;;  %v2444_v39 = vmul.f32 %v4673_v61, %v4813_v12 }
 0x328   :  { %v2430_v32 = vadd.f32 %v2429_v53, %v2428_v57  ;;  %v2455_v47 = vmul.f32 %v4677_v45, %v4819_v15  ;;  %v2457_v42 = vmul.f32 %v4673_v61, %v4823_v17  ;;  %v2446_v27 = vmul.f32 %v4669_v44, %v4829_v20  ;;  %s2467_s14 = scalar_select %p2466_p4, %s6274_s27, 0.0 }
 0x329   :  { %v2419_v51 = vadd.f32 %v2418_v50, %v2417_v30  ;;  %v2454_v52 = vadd.f32 %v2453_v28, %v2452_v56  ;;  %v2443_v62 = vadd.f32 %v2442_v59, %v2441_v33  ;;  %p2583_p3 = scmp.gt.s32.totalorder %s6569_s8, 0  ;;  %v2459_v58 = vmul.f32 %v4669_v44, %v4832_v21  ;;  %s7093_s27 = smov (!%p2522_p5, %s6274_s27), 0.0 }
 0x32a   :  { %v2432_v46 = vadd.f32 %v2431_v31, %v2430_v32  ;;  %v6608_v60 = vstv %s6578_s10  ;;  %v2412_v34 = vstv %s2411_s12 }
 0x32b   :  { %v2421_v22 = vadd.f32 %v2420_v24, %v2419_v51  ;;  %v2456_v36 = vadd.f32 %v2455_v47, %v2454_v52  ;;  %v2445_v48 = vadd.f32 %v2444_v39, %v2443_v62  ;;  %s7091_s8 = smov (!%p2583_p3, %s6569_s8), 0  ;;  %v2465_v23 = vadd.f32 %v4669_v44, %v2412_v34 }
 0x32c   :  { %v2434_v37 = vadd.f32 %v2433_v26, %v2432_v46  ;;  %v2588_v54 = vstv %s6590_s11   ;;  %s6615_s13 = sshrl.u32 %s7091_s8, 2 }
 0x32d   :  { %v3349_v43 = vclamps-f32 %v2421_v22, 100000.0  ;;  %v2458_v38 = vadd.f32 %v2457_v42, %v2456_v36  ;;  %v2447_v63 = vadd.f32 %v2446_v27, %v2445_v48  ;;  %v2476_v31 = vmul.f32 %v2465_v23, %v4825_v18  ;;  %p3364_p6 = scmp.le.s32.totalorder %s6615_s13, 0 }
 0x32e   :  { %v3350_v55 = vclamps-f32 %v2434_v37, 100000.0  ;;  %v2489_v32 = vmul.f32 %v2465_v23, %v4827_v19  ;;  %v2502_v37 = vmul.f32 %v2465_v23, %v4829_v20  ;;  %s6700_s15 = smov (!%p3364_p6), 0  }
 0x32f   :  { %v2424_v49 = vmul.f32 %v3349_v43, %v2412_v34  ;;  %v2460_v29 = vadd.f32 %v2459_v58, %v2458_v38  ;;  %v3351_v35 = vclamps-f32 %v2447_v63, 100000.0 }
 0x330   :  { %v2437_v53 = vmul.f32 %v3350_v55, %v2412_v34 }
 0x331   :  { %v2425_v50 = vadd.f32 %v4685_v40, %v2424_v49  ;;  %v3352_v24 = vclamps-f32 %v2460_v29, 100000.0  ;;  %v2450_v57 = vmul.f32 %v3351_v35, %v2412_v34  ;;  %v2515_v29 = vmul.f32 %v2465_v23, %v4832_v21 }
 0x332   :  { %v2438_v11 = vadd.f32 %v4681_v41, %v2437_v53 }
 0x333   :  { %v2463_v25 = vmul.f32 %v3352_v24, %v2412_v34  ;;  %v2469_v59 = vmul.f32 %v2425_v50, %v4791_v0  ;;  %v2482_v30 = vmul.f32 %v2425_v50, %v4799_v4  ;;  %v2495_v44 = vmul.f32 %v2425_v50, %v4807_v8 }
 0x334   :  { %v2451_v26 = vadd.f32 %v4677_v45, %v2450_v57  ;;  %v2470_v56 = vmul.f32 %v2438_v11, %v4793_v1  ;;  %v2483_v28 = vmul.f32 %v2438_v11, %v4801_v5  ;;  %v2496_v40 = vmul.f32 %v2438_v11, %v4809_v9 }
 0x335   :  { %v2464_v41 = vadd.f32 %v4673_v61, %v2463_v25  ;;  %v2508_v33 = vmul.f32 %v2425_v50, %v4815_v13  ;;  %v2509_v39 = vmul.f32 %v2438_v11, %v4817_v14  ;;  %v2468_v24 = vstv %s2467_s14 }
 0x336   :  { %v2471_v47 = vadd.f32 %v2470_v56, %v2469_v59  ;;  %v2472_v45 = vmul.f32 %v2451_v26, %v4795_v2  ;;  %v2484_v51 = vadd.f32 %v2483_v28, %v2482_v30  ;;  %v2485_v52 = vmul.f32 %v2451_v26, %v4803_v6 }
 0x337   :  { %v2474_v42 = vmul.f32 %v2464_v41, %v4797_v3  ;;  %v2487_v46 = vmul.f32 %v2464_v41, %v4805_v7  ;;  %v2497_v61 = vadd.f32 %v2496_v40, %v2495_v44  ;;  %v2498_v62 = vmul.f32 %v2451_v26, %v4811_v10 }
 0x338   :  { %v2473_v27 = vadd.f32 %v2472_v45, %v2471_v47  ;;  %v2486_v22 = vadd.f32 %v2485_v52, %v2484_v51  ;;  %v2500_v36 = vmul.f32 %v2464_v41, %v4813_v12  ;;  %v2510_v58 = vadd.f32 %v2509_v39, %v2508_v33 }
 0x339   :  { %v2499_v34 = vadd.f32 %v2498_v62, %v2497_v61  ;;  %v2511_v48 = vmul.f32 %v2451_v26, %v4819_v15  ;;  %v2513_v43 = vmul.f32 %v2464_v41, %v4823_v17  ;;  %v2521_v28 = vadd.f32 %v2468_v24, %v2465_v23 }
 0x33a   :  { %v2475_v38 = vadd.f32 %v2474_v42, %v2473_v27  ;;  %v2488_v55 = vadd.f32 %v2487_v46, %v2486_v22 }
 0x33b   :  { %v2501_v63 = vadd.f32 %v2500_v36, %v2499_v34  ;;  %v2512_v49 = vadd.f32 %v2511_v48, %v2510_v58 }
 0x33c   :  { %v2477_v53 = vadd.f32 %v2476_v31, %v2475_v38  ;;  %v2490_v35 = vadd.f32 %v2489_v32, %v2488_v55  ;;  %v2532_v31 = vmul.f32 %v2521_v28, %v4825_v18  ;;  %v2545_v32 = vmul.f32 %v2521_v28, %v4827_v19 }
 0x33d   :  { %v2503_v57 = vadd.f32 %v2502_v37, %v2501_v63  ;;  %v2514_v25 = vadd.f32 %v2513_v43, %v2512_v49 }
 0x33e   :  { %v3353_v59 = vclamps-f32 %v2477_v53, 100000.0  ;;  %v3354_v30 = vclamps-f32 %v2490_v35, 100000.0 }
 0x33f   :  { %v3355_v44 = vclamps-f32 %v2503_v57, 100000.0  ;;  %v2516_v56 = vadd.f32 %v2515_v29, %v2514_v25  ;;  %v2558_v29 = vmul.f32 %v2521_v28, %v4829_v20 }
 0x340   :  { %v2480_v40 = vmul.f32 %v3353_v59, %v2468_v24  ;;  %v2493_v33 = vmul.f32 %v3354_v30, %v2468_v24  ;;  %v2571_v30 = vmul.f32 %v2521_v28, %v4832_v21 }
 0x341   :  { %v2506_v39 = vmul.f32 %v3355_v44, %v2468_v24  ;;  %v3356_v47 = vclamps-f32 %v2516_v56, 100000.0 }
 0x342   :  { %v2481_v45 = vadd.f32 %v2480_v40, %v2425_v50  ;;  %v2494_v51 = vadd.f32 %v2493_v33, %v2438_v11 }
 0x343   :  { %v2507_v52 = vadd.f32 %v2506_v39, %v2451_v26  ;;  %v2519_v42 = vmul.f32 %v3356_v47, %v2468_v24  ;;  %v2524_v39 = vstv %s7093_s27 }
 0x344   :  { %v2525_v46 = vmul.f32 %v2481_v45, %v4791_v0  ;;  %v2526_v61 = vmul.f32 %v2494_v51, %v4793_v1  ;;  %v2538_v62 = vmul.f32 %v2481_v45, %v4799_v4  ;;  %v2539_v23 = vmul.f32 %v2494_v51, %v4801_v5 }
 0x345   :  { %v2520_v27 = vadd.f32 %v2519_v42, %v2464_v41  ;;  %v2528_v50 = vmul.f32 %v2507_v52, %v4795_v2  ;;  %v2541_v11 = vmul.f32 %v2507_v52, %v4803_v6  ;;  %v2551_v26 = vmul.f32 %v2481_v45, %v4807_v8 }
 0x346   :  { %v2527_v22 = vadd.f32 %v2526_v61, %v2525_v46  ;;  %v2540_v36 = vadd.f32 %v2539_v23, %v2538_v62  ;;  %v2552_v58 = vmul.f32 %v2494_v51, %v4809_v9  ;;  %v2554_v34 = vmul.f32 %v2507_v52, %v4811_v10 }
 0x347   :  { %v2530_v37 = vmul.f32 %v2520_v27, %v4797_v3  ;;  %v2543_v48 = vmul.f32 %v2520_v27, %v4805_v7  ;;  %v2556_v41 = vmul.f32 %v2520_v27, %v4813_v12  ;;  %v2564_v43 = vmul.f32 %v2481_v45, %v4815_v13 }
 0x348   :  { %v2529_v38 = vadd.f32 %v2528_v50, %v2527_v22  ;;  %v2542_v55 = vadd.f32 %v2541_v11, %v2540_v36  ;;  %v2553_v63 = vadd.f32 %v2552_v58, %v2551_v26  ;;  %v2565_v49 = vmul.f32 %v2494_v51, %v4817_v14 }
 0x349   :  { %v2567_v53 = vmul.f32 %v2507_v52, %v4819_v15  ;;  %v2569_v35 = vmul.f32 %v2520_v27, %v4823_v17 }
 0x34a   :  { %v2531_v24 = vadd.f32 %v2530_v37, %v2529_v38  ;;  %v2544_v57 = vadd.f32 %v2543_v48, %v2542_v55  ;;  %v2555_v25 = vadd.f32 %v2554_v34, %v2553_v63  ;;  %v2566_v59 = vadd.f32 %v2565_v49, %v2564_v43 }
 0x34c   :  { %v2533_v44 = vadd.f32 %v2532_v31, %v2531_v24  ;;  %v2546_v56 = vadd.f32 %v2545_v32, %v2544_v57  ;;  %v2557_v40 = vadd.f32 %v2556_v41, %v2555_v25  ;;  %v2568_v33 = vadd.f32 %v2567_v53, %v2566_v59 }
 0x34e   :  { %v3357_v47 = vclamps-f32 %v2533_v44, 100000.0  ;;  %v3358_v42 = vclamps-f32 %v2546_v56, 100000.0  ;;  %v2559_v46 = vadd.f32 %v2558_v29, %v2557_v40  ;;  %v2570_v61 = vadd.f32 %v2569_v35, %v2568_v33 }
 0x350   :  { %v2536_v62 = vmul.f32 %v3357_v47, %v2524_v39  ;;  %v2549_v23 = vmul.f32 %v3358_v42, %v2524_v39  ;;  %v3359_v50 = vclamps-f32 %v2559_v46, 100000.0  ;;  %v2572_v11 = vadd.f32 %v2571_v30, %v2570_v61 }
 0x352   :  { %v2537_v26 = vadd.f32 %v2536_v62, %v2481_v45   ;;  %v2550_v22 = vadd.f32 %v2549_v23, %v2494_v51   ;;  %v2562_v36 = vmul.f32 %v3359_v50, %v2524_v39  ;;  %v3360_v58 = vclamps-f32 %v2572_v11, 100000.0 }
 0x353   :  { %v7053_v45 = vmov %v2588_v54 }
 0x354   :  { %v2563_v34 = vadd.f32 %v2562_v36, %v2507_v52   ;;  %v2575_v37 = vmul.f32 %v3360_v58, %v2524_v39  ;;  %v2577_v28 = vsel %vm135_vm0, %v2537_v26, 0.0  ;;  %v7056_v43 = vmov %v2550_v22 }
 0x355   :  { %v2578_v31 = vsel %vm136_vm1, %v2550_v22, %v2577_v28  ;;  %3132 = sbr.rel (%p3364_p6) target bundleno = 928 (0x3a0), region = 177 }
 0x356   :  { %v2576_v32 = vadd.f32 %v2575_v37, %v2520_v27   ;;  %v2579_v48 = vsel %vm137_vm2, %v2563_v34, %v2578_v31  ;;  %v7055_v52 = vmov %v2563_v34  ;;  %v7057_v27 = vmov %v2537_v26 }
 0x358   :  { %v2580_v41 = vsel %vm138_vm3, %v2576_v32, %v2579_v48  ;;  %v7054_v51 = vmov %v2576_v32 }
 0x359   :  { %2581 = vst [vmem:[#allocation13 + $0x6] sm:$0x1] %v2580_v41 }
 0x35a LB: > { %v2602_v38 = vmul.f32 %v4701_v22, %v4793_v1  ;;  %v2601_v55 = vmul.f32 %v4705_v26, %v4791_v0  ;;  %v2604_v63 = vmul.f32 %v4697_v34, %v4795_v2  ;;  %v2614_v49 = vmul.f32 %v4705_v26, %v4799_v4  ;;  %s2593_s15 = sadd.s32 1, %s4709_s15   ;;  %s4709_s15 = sphi %s6700_s15, %s2593_s15   ;;  %v4705_v26 = vphi %v2537_v26, %v7062_v26   ;;  %v4701_v22 = vphi %v2550_v22, %v7061_v22   ;;  %v4697_v34 = vphi %v2563_v34, %v7060_v34   ;;  %v4693_v32 = vphi %v2576_v32, %v7059_v32   ;;  %v4689_v54 = vphi %v2588_v54, %v7058_v54  }
 0x35b   : > { %v2606_v29 = vmul.f32 %v4693_v32, %v4797_v3  ;;  %v2608_v53 = vmul.f32 %v4689_v54, %v4825_v18  ;;  %v2615_v35 = vmul.f32 %v4701_v22, %v4801_v5  ;;  %v2617_v24 = vmul.f32 %v4697_v34, %v4803_v6  ;;  %p2592_p7 = scmp.ge.s32.totalorder %s2593_s15, %s6615_s13 }
 0x35c   : > { %v2603_v57 = vadd.f32 %v2602_v38, %v2601_v55  ;;  %v2627_v25 = vmul.f32 %v4705_v26, %v4807_v8  ;;  %v2628_v59 = vmul.f32 %v4701_v22, %v4809_v9  ;;  %v2630_v30 = vmul.f32 %v4697_v34, %v4811_v10 }
 0x35d   : > { %v2616_v44 = vadd.f32 %v2615_v35, %v2614_v49  ;;  %v2619_v56 = vmul.f32 %v4693_v32, %v4805_v7  ;;  %v2632_v40 = vmul.f32 %v4693_v32, %v4813_v12  ;;  %v2640_v33 = vmul.f32 %v4705_v26, %v4815_v13 }
 0x35e   : > { %v2605_v39 = vadd.f32 %v2604_v63, %v2603_v57  ;;  %v2629_v47 = vadd.f32 %v2628_v59, %v2627_v25  ;;  %v2641_v42 = vmul.f32 %v4701_v22, %v4817_v14  ;;  %v2643_v46 = vmul.f32 %v4697_v34, %v4819_v15 }
 0x35f   : > { %v2618_v61 = vadd.f32 %v2617_v24, %v2616_v44  ;;  %v2621_v62 = vmul.f32 %v4689_v54, %v4827_v19  ;;  %v2634_v23 = vmul.f32 %v4689_v54, %v4829_v20  ;;  %v2645_v58 = vmul.f32 %v4693_v32, %v4823_v17 }
 0x360   : > { %v2607_v50 = vadd.f32 %v2606_v29, %v2605_v39  ;;  %v2631_v11 = vadd.f32 %v2630_v30, %v2629_v47  ;;  %v2642_v36 = vadd.f32 %v2641_v42, %v2640_v33  ;;  %v2647_v41 = vmul.f32 %v4689_v54, %v4832_v21 }
 0x361   : > { %v2620_v37 = vadd.f32 %v2619_v56, %v2618_v61  ;;  %v2653_v27 = vadd.f32 %v4689_v54, %v6608_v60 }
 0x362   : > { %v2609_v28 = vadd.f32 %v2608_v53, %v2607_v50  ;;  %v2633_v31 = vadd.f32 %v2632_v40, %v2631_v11  ;;  %v2644_v48 = vadd.f32 %v2643_v46, %v2642_v36 }
 0x363   : > { %v2622_v45 = vadd.f32 %v2621_v62, %v2620_v37  ;;  %v6740_v35 = vadd.f32 %v2653_v27, %v6608_v60  ;;  %v2661_v25 = vmul.f32 %v2653_v27, %v4825_v18  ;;  %v2674_v30 = vmul.f32 %v2653_v27, %v4827_v19 }
 0x364   : > { %v3365_v51 = vclamps-f32 %v2609_v28, 100000.0  ;;  %v2635_v52 = vadd.f32 %v2634_v23, %v2633_v31  ;;  %v2646_v43 = vadd.f32 %v2645_v58, %v2644_v48  ;;  %v2687_v54 = vmul.f32 %v2653_v27, %v4829_v20 }
 0x365   : > { %v3366_v38 = vclamps-f32 %v2622_v45, 100000.0  ;;  %v6748_v44 = vadd.f32 %v6740_v35, %v6608_v60 }
 0x366   : > { %v2612_v55 = vmul.f32 %v3365_v51, %v6608_v60  ;;  %v3367_v63 = vclamps-f32 %v2635_v52, 100000.0  ;;  %v2648_v49 = vadd.f32 %v2647_v41, %v2646_v43 }
 0x367   : > { %v2625_v29 = vmul.f32 %v3366_v38, %v6608_v60  ;;  %v6770_v43 = vadd.f32 %v6748_v44, %v6608_v60  }
 0x368   : > { %v2613_v53 = vadd.f32 %v4705_v26, %v2612_v55  ;;  %v2638_v24 = vmul.f32 %v3367_v63, %v6608_v60  ;;  %v3368_v57 = vclamps-f32 %v2648_v49, 100000.0 }
 0x369   : > { %v2626_v59 = vadd.f32 %v4701_v22, %v2625_v29  ;;  %v2700_v29 = vmul.f32 %v2653_v27, %v4832_v21 }
 0x36a   : > { %v2639_v56 = vadd.f32 %v4697_v34, %v2638_v24  ;;  %v2651_v40 = vmul.f32 %v3368_v57, %v6608_v60  ;;  %v2654_v33 = vmul.f32 %v2613_v53, %v4791_v0  ;;  %v2667_v26 = vmul.f32 %v2613_v53, %v4799_v4 }
 0x36b   : > { %v2655_v39 = vmul.f32 %v2626_v59, %v4793_v1  ;;  %v2668_v47 = vmul.f32 %v2626_v59, %v4801_v5  ;;  %v2680_v22 = vmul.f32 %v2613_v53, %v4807_v8  ;;  %v2681_v42 = vmul.f32 %v2626_v59, %v4809_v9 }
 0x36c   : > { %v2652_v46 = vadd.f32 %v4693_v32, %v2651_v40  ;;  %v2657_v61 = vmul.f32 %v2639_v56, %v4795_v2  ;;  %v2670_v34 = vmul.f32 %v2639_v56, %v4803_v6  ;;  %v2683_v62 = vmul.f32 %v2639_v56, %v4811_v10 }
 0x36d   : > { %v2656_v23 = vadd.f32 %v2655_v39, %v2654_v33  ;;  %v2669_v50 = vadd.f32 %v2668_v47, %v2667_v26  ;;  %v2682_v11 = vadd.f32 %v2681_v42, %v2680_v22  ;;  %v2693_v36 = vmul.f32 %v2613_v53, %v4815_v13 }
 0x36e   : > { %v2659_v58 = vmul.f32 %v2652_v46, %v4797_v3  ;;  %v2672_v37 = vmul.f32 %v2652_v46, %v4805_v7  ;;  %v2685_v28 = vmul.f32 %v2652_v46, %v4813_v12  ;;  %v2694_v31 = vmul.f32 %v2626_v59, %v4817_v14 }
 0x36f   : > { %v2658_v32 = vadd.f32 %v2657_v61, %v2656_v23  ;;  %v2671_v48 = vadd.f32 %v2670_v34, %v2669_v50  ;;  %v2684_v41 = vadd.f32 %v2683_v62, %v2682_v11  ;;  %v2696_v45 = vmul.f32 %v2639_v56, %v4819_v15 }
 0x370   : > { %v2695_v51 = vadd.f32 %v2694_v31, %v2693_v36  ;;  %v2698_v52 = vmul.f32 %v2652_v46, %v4823_v17 }
 0x371   : > { %v2660_v38 = vadd.f32 %v2659_v58, %v2658_v32  ;;  %v2673_v55 = vadd.f32 %v2672_v37, %v2671_v48  ;;  %v2686_v63 = vadd.f32 %v2685_v28, %v2684_v41 }
 0x372   : > { %v2697_v49 = vadd.f32 %v2696_v45, %v2695_v51 }
 0x373   : > { %v2662_v24 = vadd.f32 %v2661_v25, %v2660_v38  ;;  %v2675_v57 = vadd.f32 %v2674_v30, %v2673_v55  ;;  %v2688_v40 = vadd.f32 %v2687_v54, %v2686_v63  ;;  %v2714_v25 = vmul.f32 %v6740_v35, %v4825_v18 }
 0x374   : > { %v2699_v33 = vadd.f32 %v2698_v52, %v2697_v49 }
 0x375   : > { %v3369_v26 = vclamps-f32 %v2662_v24, 100000.0  ;;  %v3370_v39 = vclamps-f32 %v2675_v57, 100000.0  ;;  %v3371_v47 = vclamps-f32 %v2688_v40, 100000.0  ;;  %v2740_v24 = vmul.f32 %v6740_v35, %v4829_v20 }
 0x376   : > { %v2701_v22 = vadd.f32 %v2700_v29, %v2699_v33  ;;  %v2727_v29 = vmul.f32 %v6740_v35, %v4827_v19 }
 0x377   : > { %v2665_v42 = vmul.f32 %v3369_v26, %v6608_v60  ;;  %v2678_v61 = vmul.f32 %v3370_v39, %v6608_v60  ;;  %v2691_v34 = vmul.f32 %v3371_v47, %v6608_v60 }
 0x378   : > { %v3372_v62 = vclamps-f32 %v2701_v22, 100000.0 }
 0x379   : > { %v2666_v23 = vadd.f32 %v2665_v42, %v2613_v53  ;;  %v2679_v50 = vadd.f32 %v2678_v61, %v2626_v59  ;;  %v2692_v11 = vadd.f32 %v2691_v34, %v2639_v56  ;;  %v2753_v61 = vmul.f32 %v6740_v35, %v4832_v21 }
 0x37a   : > { %v2704_v27 = vmul.f32 %v3372_v62, %v6608_v60  ;;  %v2780_v35 = vmul.f32 %v6748_v44, %v4827_v19 }
 0x37b   : > { %v2707_v30 = vmul.f32 %v2666_v23, %v4791_v0  ;;  %v2708_v54 = vmul.f32 %v2679_v50, %v4793_v1  ;;  %v2710_v36 = vmul.f32 %v2692_v11, %v4795_v2  ;;  %v2720_v58 = vmul.f32 %v2666_v23, %v4799_v4 }
 0x37c   : > { %v2705_v37 = vadd.f32 %v2704_v27, %v2652_v46  ;;  %v2721_v28 = vmul.f32 %v2679_v50, %v4801_v5  ;;  %v2723_v53 = vmul.f32 %v2692_v11, %v4803_v6  ;;  %v2733_v59 = vmul.f32 %v2666_v23, %v4807_v8 }
 0x37d   : > { %v2709_v56 = vadd.f32 %v2708_v54, %v2707_v30  ;;  %v2734_v31 = vmul.f32 %v2679_v50, %v4809_v9  ;;  %v2736_v32 = vmul.f32 %v2692_v11, %v4811_v10  ;;  %v2746_v48 = vmul.f32 %v2666_v23, %v4815_v13 }
 0x37e   : > { %v2712_v41 = vmul.f32 %v2705_v37, %v4797_v3  ;;  %v2722_v45 = vadd.f32 %v2721_v28, %v2720_v58  ;;  %v2725_v51 = vmul.f32 %v2705_v37, %v4805_v7  ;;  %v2738_v46 = vmul.f32 %v2705_v37, %v4813_v12 }
 0x37f   : > { %v2711_v52 = vadd.f32 %v2710_v36, %v2709_v56  ;;  %v2735_v38 = vadd.f32 %v2734_v31, %v2733_v59  ;;  %v2747_v55 = vmul.f32 %v2679_v50, %v4817_v14  ;;  %v2749_v63 = vmul.f32 %v2692_v11, %v4819_v15 }
 0x380   : > { %v2724_v49 = vadd.f32 %v2723_v53, %v2722_v45  ;;  %v2751_v26 = vmul.f32 %v2705_v37, %v4823_v17 }
 0x381   : > { %v2713_v57 = vadd.f32 %v2712_v41, %v2711_v52  ;;  %v2737_v40 = vadd.f32 %v2736_v32, %v2735_v38  ;;  %v2748_v33 = vadd.f32 %v2747_v55, %v2746_v48  ;;  %v2767_v32 = vmul.f32 %v6748_v44, %v4825_v18 }
 0x382   : > { %v2726_v39 = vadd.f32 %v2725_v51, %v2724_v49  ;;  %v2793_v48 = vmul.f32 %v6748_v44, %v4829_v20 }
 0x383   : > { %v2715_v47 = vadd.f32 %v2714_v25, %v2713_v57  ;;  %v2739_v22 = vadd.f32 %v2738_v46, %v2737_v40  ;;  %v2750_v42 = vadd.f32 %v2749_v63, %v2748_v33 }
 0x384   : > { %v2728_v34 = vadd.f32 %v2727_v29, %v2726_v39 }
 0x385   : > { %v3373_v62 = vclamps-f32 %v2715_v47, 100000.0  ;;  %v2741_v27 = vadd.f32 %v2740_v24, %v2739_v22  ;;  %v2752_v30 = vadd.f32 %v2751_v26, %v2750_v42 }
 0x386   : > { %v3374_v54 = vclamps-f32 %v2728_v34, 100000.0 }
 0x387   : > { %v2718_v36 = vmul.f32 %v3373_v62, %v6608_v60  ;;  %v3375_v58 = vclamps-f32 %v2741_v27, 100000.0  ;;  %v2754_v28 = vadd.f32 %v2753_v61, %v2752_v30 }
 0x388   : > { %v2731_v53 = vmul.f32 %v3374_v54, %v6608_v60 }
 0x389   : > { %v2719_v59 = vadd.f32 %v2718_v36, %v2666_v23  ;;  %v2744_v56 = vmul.f32 %v3375_v58, %v6608_v60  ;;  %v3376_v25 = vclamps-f32 %v2754_v28, 100000.0  ;;  %v2806_v58 = vmul.f32 %v6748_v44, %v4832_v21 }
 0x38a   : > { %v2732_v31 = vadd.f32 %v2731_v53, %v2679_v50 }
 0x38b   : > { %v2745_v41 = vadd.f32 %v2744_v56, %v2692_v11  ;;  %v2757_v45 = vmul.f32 %v3376_v25, %v6608_v60  ;;  %v2760_v51 = vmul.f32 %v2719_v59, %v4791_v0  ;;  %v2773_v23 = vmul.f32 %v2719_v59, %v4799_v4 }
 0x38c   : > { %v2761_v46 = vmul.f32 %v2732_v31, %v4793_v1  ;;  %v2774_v50 = vmul.f32 %v2732_v31, %v4801_v5  ;;  %v2786_v52 = vmul.f32 %v2719_v59, %v4807_v8  ;;  %v2787_v38 = vmul.f32 %v2732_v31, %v4809_v9 }
 0x38d   : > { %v2758_v55 = vadd.f32 %v2757_v45, %v2705_v37  ;;  %v2763_v63 = vmul.f32 %v2745_v41, %v4795_v2  ;;  %v2776_v49 = vmul.f32 %v2745_v41, %v4803_v6  ;;  %v2789_v11 = vmul.f32 %v2745_v41, %v4811_v10 }
 0x38e   : > { %v2762_v29 = vadd.f32 %v2761_v46, %v2760_v51  ;;  %v2775_v24 = vadd.f32 %v2774_v50, %v2773_v23  ;;  %v2788_v57 = vadd.f32 %v2787_v38, %v2786_v52  ;;  %v2799_v40 = vmul.f32 %v2719_v59, %v4815_v13 }
 0x38f   : > { %v2765_v33 = vmul.f32 %v2758_v55, %v4797_v3  ;;  %v2778_v26 = vmul.f32 %v2758_v55, %v4805_v7  ;;  %v2791_v39 = vmul.f32 %v2758_v55, %v4813_v12  ;;  %v2800_v47 = vmul.f32 %v2732_v31, %v4817_v14 }
 0x390   : > { %v2764_v37 = vadd.f32 %v2763_v63, %v2762_v29  ;;  %v2777_v22 = vadd.f32 %v2776_v49, %v2775_v24  ;;  %v2790_v42 = vadd.f32 %v2789_v11, %v2788_v57  ;;  %v2802_v61 = vmul.f32 %v2745_v41, %v4819_v15 }
 0x391   : > { %v2801_v34 = vadd.f32 %v2800_v47, %v2799_v40  ;;  %v2804_v62 = vmul.f32 %v2758_v55, %v4823_v17 }
 0x392   : > { %v2766_v27 = vadd.f32 %v2765_v33, %v2764_v37  ;;  %v2779_v30 = vadd.f32 %v2778_v26, %v2777_v22  ;;  %v2792_v54 = vadd.f32 %v2791_v39, %v2790_v42 }
 0x393   : > { %v2803_v36 = vadd.f32 %v2802_v61, %v2801_v34 }
 0x394   : > { %v2768_v28 = vadd.f32 %v2767_v32, %v2766_v27  ;;  %v2781_v53 = vadd.f32 %v2780_v35, %v2779_v30  ;;  %v2794_v56 = vadd.f32 %v2793_v48, %v2792_v54  ;;  %v7058_v54 = vmov %v6770_v43 }
 0x395   : > { %v2805_v25 = vadd.f32 %v2804_v62, %v2803_v36 }
 0x396   : > { %v3377_v45 = vclamps-f32 %v2768_v28, 100000.0  ;;  %v3378_v51 = vclamps-f32 %v2781_v53, 100000.0  ;;  %v3379_v23 = vclamps-f32 %v2794_v56, 100000.0 }
 0x397   : > { %v2807_v46 = vadd.f32 %v2806_v58, %v2805_v25 }
 0x398   : > { %v2771_v50 = vmul.f32 %v3377_v45, %v6608_v60  ;;  %v2784_v52 = vmul.f32 %v3378_v51, %v6608_v60  ;;  %v2797_v38 = vmul.f32 %v3379_v23, %v6608_v60  ;;  %v7063_v45 = vmov (%p2592_p7), %v6770_v43 }
 0x399   : > { %v3380_v63 = vclamps-f32 %v2807_v46, 100000.0 }
 0x39a   : > { %v2772_v49 = vadd.f32 %v2771_v50, %v2719_v59   ;;  %v2785_v11 = vadd.f32 %v2784_v52, %v2732_v31   ;;  %v2798_v29 = vadd.f32 %v2797_v38, %v2745_v41  }
 0x39b   : > { %v2810_v44 = vmul.f32 %v3380_v63, %v6608_v60  ;;  %2595 = sbr.rel (!%p2592_p7) target bundleno = 858 (0x35a), region = 183 }
 0x39c   : > { %v7060_v34 = vmov %v2798_v29  ;;  %v7061_v22 = vmov %v2785_v11  ;;  %v7062_v26 = vmov %v2772_v49  ;;  %v7065_v52 = vmov (%p2592_p7), %v2798_v29 }
 0x39d   : > { %v2811_v24 = vadd.f32 %v2810_v44, %v2758_v55   ;;  %v7066_v43 = vmov (%p2592_p7), %v2785_v11  ;;  %v7067_v27 = vmov (%p2592_p7), %v2772_v49 }
 0x39f   : > { %v7059_v32 = vmov %v2811_v24  ;;  %v7064_v51 = vmov (%p2592_p7), %v2811_v24 }
 0x3a0 PF:  { %s3381_s1 = sshll.u32 %s6615_s13, 2  ;;  %v2818_v60 = vmul.f32 %v4729_v27, %v4791_v0  ;;  %v2819_v59 = vmul.f32 %v4725_v43, %v4793_v1  ;;  %v2821_v31 = vmul.f32 %v4721_v52, %v4795_v2  ;;  %v2831_v32 = vmul.f32 %v4729_v27, %v4799_v4  ;;  %s4737_s18 = smov [#allocation13]   ;;  %v4729_v27 = vphi %v7057_v27, %v7067_v27   ;;  %v4725_v43 = vphi %v7056_v43, %v7066_v43   ;;  %v4721_v52 = vphi %v7055_v52, %v7065_v52   ;;  %v4717_v51 = vphi %v7054_v51, %v7064_v51   ;;  %v4713_v45 = vphi %v7053_v45, %v7063_v45  }
 0x3a1   :  { %s6871_s16 = ssub.s32 %s7091_s8, %s3381_s1  ;;  %v2832_v35 = vmul.f32 %v4725_v43, %v4801_v5  ;;  %v2834_v48 = vmul.f32 %v4721_v52, %v4803_v6  ;;  %v2823_v55 = vmul.f32 %v4717_v51, %v4797_v3  ;;  %v2825_v57 = vmul.f32 %v4713_v45, %v4825_v18  ;;  %s2993_s19 = sshll.u32 %s4737_s18, 4  ;;  %s2994_s19 = int_to_ptr.vmem [resolvable:$true] %s2993_s19 }
 0x3a2   :  { %p2815_p8 = scmp.gt.s32.totalorder %s6871_s16, 0  ;;  %v2820_v41 = vadd.f32 %v2819_v59, %v2818_v60  ;;  %v2844_v40 = vmul.f32 %v4729_v27, %v4807_v8  ;;  %v2836_v26 = vmul.f32 %v4717_v51, %v4805_v7  ;;  %v2845_v39 = vmul.f32 %v4725_v43, %v4809_v9  ;;  %p2871_p9 = scmp.gt.s32.totalorder %s6871_s16, 1 }
 0x3a3   :  { %v2833_v33 = vadd.f32 %v2832_v35, %v2831_v32  ;;  %v2847_v47 = vmul.f32 %v4721_v52, %v4811_v10  ;;  %v2838_v22 = vmul.f32 %v4713_v45, %v4827_v19  ;;  %v2857_v42 = vmul.f32 %v4729_v27, %v4815_v13  ;;  %p2927_p10 = scmp.gt.s32.totalorder %s6871_s16, 2  ;;  %s4085_s3 = scalar_lea.vmem %s2994_s19, 128 }
 0x3a4   :  { %v2822_v37 = vadd.f32 %v2821_v31, %v2820_v41  ;;  %v2858_v61 = vmul.f32 %v4725_v43, %v4817_v14  ;;  %s2816_s17 = scalar_select %p2815_p8, %s6578_s10, 0.0  ;;  %v2846_v62 = vadd.f32 %v2845_v39, %v2844_v40  ;;  %v2849_v30 = vmul.f32 %v4717_v51, %v4813_v12 }
 0x3a5   :  { %v2835_v34 = vadd.f32 %v2834_v48, %v2833_v33  ;;  %v2860_v54 = vmul.f32 %v4721_v52, %v4819_v15  ;;  %v2862_v28 = vmul.f32 %v4717_v51, %v4823_v17  ;;  %v2851_v25 = vmul.f32 %v4713_v45, %v4829_v20  ;;  %s2872_s0 = scalar_select %p2871_p9, %s6578_s10, 0.0 }
 0x3a6   :  { %v2824_v36 = vadd.f32 %v2823_v55, %v2822_v37  ;;  %v2859_v58 = vadd.f32 %v2858_v61, %v2857_v42  ;;  %v2848_v56 = vadd.f32 %v2847_v47, %v2846_v62  ;;  %v2864_v50 = vmul.f32 %v4713_v45, %v4832_v21  ;;  %s7095_s10 = smov (!%p2927_p10, %s6578_s10), 0.0  ;;  %p4086_p11 = scmp.ne.s32.totalorder %s2994_s19, %s4085_s3 }
 0x3a7   :  { %v2837_v53 = vadd.f32 %v2836_v26, %v2835_v34  ;;  %v2817_v38 = vstv %s2816_s17  ;;  %p4090_p12 = scmp.lt.s32.totalorder %s2994_s19, %s2994_s19  ;;  %p4091_p13 = scmp.lt.s32.totalorder %s4085_s3, %s4085_s3 }
 0x3a8   :  { %v2826_v23 = vadd.f32 %v2825_v57, %v2824_v36  ;;  %v2861_v46 = vadd.f32 %v2860_v54, %v2859_v58  ;;  %v2850_v49 = vadd.f32 %v2849_v30, %v2848_v56  ;;  %v2870_v60 = vadd.f32 %v4713_v45, %v2817_v38 }
 0x3a9   :  { %v2839_v63 = vadd.f32 %v2838_v22, %v2837_v53  ;;  %p4092_p0 = por %p4091_p13, %p4090_p12 }
 0x3aa   :  { %v3382_v11 = vclamps-f32 %v2826_v23, 100000.0  ;;  %v2863_v29 = vadd.f32 %v2862_v28, %v2861_v46  ;;  %v2852_v24 = vadd.f32 %v2851_v25, %v2850_v49  ;;  %v2881_v40 = vmul.f32 %v2870_v60, %v4825_v18 }
 0x3ab   :  { %v3383_v44 = vclamps-f32 %v2839_v63, 100000.0  ;;  %p4093_p1 = pnand %p4092_p0, %p4086_p11 }
 0x3ac   :  { %v2829_v59 = vmul.f32 %v3382_v11, %v2817_v38  ;;  %v2865_v31 = vadd.f32 %v2864_v50, %v2863_v29  ;;  %v3384_v35 = vclamps-f32 %v2852_v24, 100000.0  ;;  %v2907_v50 = vmul.f32 %v2870_v60, %v4829_v20 }
 0x3ad   :  { %v2842_v32 = vmul.f32 %v3383_v44, %v2817_v38  ;;  %v2920_v24 = vmul.f32 %v2870_v60, %v4832_v21 }
 0x3ae   :  { %v2830_v48 = vadd.f32 %v4729_v27, %v2829_v59  ;;  %v3385_v41 = vclamps-f32 %v2865_v31, 100000.0  ;;  %v2855_v57 = vmul.f32 %v3384_v35, %v2817_v38 }
 0x3af   :  { %v2843_v55 = vadd.f32 %v4725_v43, %v2842_v32  ;;  %v2894_v43 = vmul.f32 %v2870_v60, %v4827_v19  ;;  %v2873_v32 = vstv %s2872_s0 }
 0x3b0   :  { %v2868_v33 = vmul.f32 %v3385_v41, %v2817_v38  ;;  %v2874_v26 = vmul.f32 %v2830_v48, %v4791_v0  ;;  %v2887_v39 = vmul.f32 %v2830_v48, %v4799_v4  ;;  %v2900_v47 = vmul.f32 %v2830_v48, %v4807_v8 }
 0x3b1   :  { %v2856_v37 = vadd.f32 %v4721_v52, %v2855_v57  ;;  %v2875_v45 = vmul.f32 %v2843_v55, %v4793_v1  ;;  %v2888_v22 = vmul.f32 %v2843_v55, %v4801_v5  ;;  %v2901_v42 = vmul.f32 %v2843_v55, %v4809_v9 }
 0x3b2   :  { %v2869_v27 = vadd.f32 %v4717_v51, %v2868_v33  ;;  %v2913_v61 = vmul.f32 %v2830_v48, %v4815_v13  ;;  %v2914_v34 = vmul.f32 %v2843_v55, %v4817_v14 }
 0x3b3   :  { %v2876_v62 = vadd.f32 %v2875_v45, %v2874_v26  ;;  %v2877_v52 = vmul.f32 %v2856_v37, %v4795_v2  ;;  %v2889_v30 = vadd.f32 %v2888_v22, %v2887_v39  ;;  %v2890_v54 = vmul.f32 %v2856_v37, %v4803_v6 }
 0x3b4   :  { %v2879_v36 = vmul.f32 %v2869_v27, %v4797_v3  ;;  %v2892_v58 = vmul.f32 %v2869_v27, %v4805_v7  ;;  %v2902_v51 = vadd.f32 %v2901_v42, %v2900_v47  ;;  %v2903_v28 = vmul.f32 %v2856_v37, %v4811_v10 }
 0x3b5   :  { %v2878_v53 = vadd.f32 %v2877_v52, %v2876_v62  ;;  %v2891_v56 = vadd.f32 %v2890_v54, %v2889_v30  ;;  %v2905_v25 = vmul.f32 %v2869_v27, %v4813_v12  ;;  %v2915_v23 = vadd.f32 %v2914_v34, %v2913_v61 }
 0x3b6   :  { %v2904_v46 = vadd.f32 %v2903_v28, %v2902_v51  ;;  %v2916_v38 = vmul.f32 %v2856_v37, %v4819_v15  ;;  %v2918_v63 = vmul.f32 %v2869_v27, %v4823_v17  ;;  %v2926_v47 = vadd.f32 %v2873_v32, %v2870_v60 }
 0x3b7   :  { %v2880_v49 = vadd.f32 %v2879_v36, %v2878_v53  ;;  %v2893_v11 = vadd.f32 %v2892_v58, %v2891_v56 }
 0x3b8   :  { %v2906_v29 = vadd.f32 %v2905_v25, %v2904_v46  ;;  %v2917_v44 = vadd.f32 %v2916_v38, %v2915_v23 }
 0x3b9   :  { %v2882_v59 = vadd.f32 %v2881_v40, %v2880_v49  ;;  %v2895_v31 = vadd.f32 %v2894_v43, %v2893_v11  ;;  %v2937_v40 = vmul.f32 %v2926_v47, %v4825_v18  ;;  %v2950_v43 = vmul.f32 %v2926_v47, %v4827_v19 }
 0x3ba   :  { %v2908_v35 = vadd.f32 %v2907_v50, %v2906_v29  ;;  %v2919_v41 = vadd.f32 %v2918_v63, %v2917_v44  ;;  %v2929_v63 = vstv %s7095_s10 }
 0x3bb   :  { %v3386_v57 = vclamps-f32 %v2882_v59, 100000.0  ;;  %v3387_v33 = vclamps-f32 %v2895_v31, 100000.0 }
 0x3bc   :  { %v3388_v26 = vclamps-f32 %v2908_v35, 100000.0  ;;  %v2921_v39 = vadd.f32 %v2920_v24, %v2919_v41 }
 0x3bd   :  { %v2885_v45 = vmul.f32 %v3386_v57, %v2873_v32  ;;  %v2898_v22 = vmul.f32 %v3387_v33, %v2873_v32 }
 0x3be   :  { %v2911_v42 = vmul.f32 %v3388_v26, %v2873_v32  ;;  %v3389_v61 = vclamps-f32 %v2921_v39, 100000.0 }
 0x3bf   :  { %v2886_v34 = vadd.f32 %v2885_v45, %v2830_v48  ;;  %v2899_v62 = vadd.f32 %v2898_v22, %v2843_v55 }
 0x3c0   :  { %v2912_v52 = vadd.f32 %v2911_v42, %v2856_v37  ;;  %v2924_v30 = vmul.f32 %v3389_v61, %v2873_v32 }
 0x3c1   :  { %v2930_v54 = vmul.f32 %v2886_v34, %v4791_v0  ;;  %v2931_v36 = vmul.f32 %v2899_v62, %v4793_v1  ;;  %v2943_v58 = vmul.f32 %v2886_v34, %v4799_v4  ;;  %v2944_v60 = vmul.f32 %v2899_v62, %v4801_v5 }
 0x3c2   :  { %v2925_v51 = vadd.f32 %v2924_v30, %v2869_v27  ;;  %v2933_v48 = vmul.f32 %v2912_v52, %v4795_v2  ;;  %v2946_v55 = vmul.f32 %v2912_v52, %v4803_v6  ;;  %v2956_v18 = vmul.f32 %v2886_v34, %v4807_v8 }
 0x3c3   :  { %v2932_v37 = vadd.f32 %v2931_v36, %v2930_v54  ;;  %v2945_v19 = vadd.f32 %v2944_v60, %v2943_v58  ;;  %v2957_v0 = vmul.f32 %v2899_v62, %v4809_v9  ;;  %v2959_v1 = vmul.f32 %v2912_v52, %v4811_v10 }
 0x3c4   :  { %v2935_v4 = vmul.f32 %v2925_v51, %v4797_v3  ;;  %v2948_v5 = vmul.f32 %v2925_v51, %v4805_v7  ;;  %v2961_v27 = vmul.f32 %v2925_v51, %v4813_v12  ;;  %v2969_v28 = vmul.f32 %v2886_v34, %v4815_v13 }
 0x3c5   :  { %v2934_v53 = vadd.f32 %v2933_v48, %v2932_v37  ;;  %v2947_v2 = vadd.f32 %v2946_v55, %v2945_v19  ;;  %v2958_v56 = vadd.f32 %v2957_v0, %v2956_v18  ;;  %v2970_v6 = vmul.f32 %v2899_v62, %v4817_v14 }
 0x3c6   :  { %v2963_v8 = vmul.f32 %v2926_v47, %v4829_v20  ;;  %v2972_v9 = vmul.f32 %v2912_v52, %v4819_v15  ;;  %v2974_v10 = vmul.f32 %v2925_v51, %v4823_v17  ;;  %v2976_v12 = vmul.f32 %v2926_v47, %v4832_v21 }
 0x3c7   :  { %v2936_v3 = vadd.f32 %v2935_v4, %v2934_v53  ;;  %v2949_v25 = vadd.f32 %v2948_v5, %v2947_v2  ;;  %v2960_v7 = vadd.f32 %v2959_v1, %v2958_v56  ;;  %v2971_v23 = vadd.f32 %v2970_v6, %v2969_v28 }
 0x3c9   :  { %v2938_v13 = vadd.f32 %v2937_v40, %v2936_v3  ;;  %v2951_v46 = vadd.f32 %v2950_v43, %v2949_v25  ;;  %v2962_v50 = vadd.f32 %v2961_v27, %v2960_v7  ;;  %v2973_v38 = vadd.f32 %v2972_v9, %v2971_v23 }
 0x3cb   :  { %v3390_v14 = vclamps-f32 %v2938_v13, 100000.0  ;;  %v3391_v49 = vclamps-f32 %v2951_v46, 100000.0  ;;  %v2964_v11 = vadd.f32 %v2963_v8, %v2962_v50  ;;  %v2975_v29 = vadd.f32 %v2974_v10, %v2973_v38 }
 0x3cd   :  { %v2941_v20 = vmul.f32 %v3390_v14, %v2929_v63  ;;  %v2954_v44 = vmul.f32 %v3391_v49, %v2929_v63  ;;  %v3392_v15 = vclamps-f32 %v2964_v11, 100000.0  ;;  %v2977_v24 = vadd.f32 %v2976_v12, %v2975_v29 }
 0x3cf   :  { %v2942_v17 = vadd.f32 %v2941_v20, %v2886_v34  ;;  %v2955_v59 = vadd.f32 %v2954_v44, %v2899_v62  ;;  %v2967_v31 = vmul.f32 %v3392_v15, %v2929_v63  ;;  %v3393_v32 = vclamps-f32 %v2977_v24, 100000.0 }
 0x3d1   :  { %v2968_v35 = vadd.f32 %v2967_v31, %v2912_v52  ;;  %v2980_v41 = vmul.f32 %v3393_v32, %v2929_v63  ;;  %v2982_v21 = vsel %vm135_vm0, %v2942_v17, 0.0 }
 0x3d2   :  { %v2983_v57 = vsel %vm136_vm1, %v2955_v59, %v2982_v21 }
 0x3d3   :  { %v2981_v33 = vadd.f32 %v2980_v41, %v2925_v51  ;;  %v2984_v26 = vsel %vm137_vm2, %v2968_v35, %v2983_v57 }
 0x3d5   :  { %v2985_v39 = vsel %vm138_vm3, %v2981_v33, %v2984_v26 }
 0x3d6   :  { %2986 = vst [vmem:[#allocation13 + $0x7] sm:$0x1] %v2985_v39 }
 0x3d7   :  { %4096 = shalt.err (!%p4093_p1)
}
 0x3d8   :  { %2996 = dma.vmem_to_hbm [thread:$0]  %s2994_s19, 128, %s6962_s6, [#allocation3]  }
 0x3d9   :  { %4421 = dma.done.wait [#allocation3], 128  }
 0x3da   :  { %4422 = vsyncadd [#allocation3], 4294967168 }
 0x3db   :  { %3000 = vsyncpa [#allocation3], 1 }
 0x3dc   :  { %3001 = vsyncpa [#allocation4], 1 }
 0x3dd   :  { %3002 = vsyncpa [#allocation5], 1 }
 0x3de   :  { %3003 = vsyncpa [#allocation8], 1 }
 0x3df   :  { %3004 = vsyncpa [#allocation11], 1 }

</bundles_post_ra>
